<compile_context>
chip_gen: v5e
topology: v5e:2x2
jax: 0.10.0
libtpu: 0.0.40
codegen_flags: <defaults>
</compile_context>

<pallas_src>
import math

import jax
import jax.numpy as jnp
from jax.experimental import pallas as pl
from jax.experimental.pallas import tpu as pltpu

CP = 128          # channel count padded 96 -> 128 so every lane slice is vreg-aligned
H1, W1 = 17, 5    # conv1 output spatial (== input spatial: k=3, pad=1)
H2, W2 = 15, 3    # conv2 output spatial (k=5, pad=1)
H3, W3 = 13, 1    # conv3 output spatial (k=3, pad=0)
K2 = 5 * 5 * CP   # conv2 contraction depth (kh*kw*Cp) = 3200
K3 = 3 * 3 * CP   # conv3 contraction depth               = 1152
KF = H3 * CP      # fc1 contraction depth (h*Cp)          = 1664


# ----------------------------- fused Pallas kernel ---------------------------------

def _fused_net_kernel(p1_ref, w1_ref, b1_ref, b2_ref, b3_ref, bf1_ref, wf2_ref, bf2_ref,
                      w2_hbm, w3_hbm, wf1_hbm,
                      pad1, o_c2, o_c3, o_fc1, o_out,
                      w2_v, w3_v, wf1_v, sem, c1_stage, lhs2_buf, lhs3_buf, c3_stage):
    f32, bf16 = jnp.float32, jnp.bfloat16
    n_batch = o_c2.shape[0]

    # --- start later-layer weight DMAs so they overlap conv1/conv2 compute ---------
    cp_w2 = pltpu.make_async_copy(w2_hbm, w2_v, sem.at[0]); cp_w2.start()
    cp_w3 = pltpu.make_async_copy(w3_hbm, w3_v, sem.at[1]); cp_w3.start()
    cp_wf = pltpu.make_async_copy(wf1_hbm, wf1_v, sem.at[2]); cp_wf.start()

    # --- pad1 doubles as conv1 output (bf16); zero only the conv2 halo -------------
    zrow = jnp.zeros((n_batch, 1, (W1 + 2) * CP), bf16)
    pad1[:, 0:1, :] = zrow
    pad1[:, H1 + 1:H1 + 2, :] = zrow
    zcol = jnp.zeros((n_batch, H1 + 2, CP), bf16)
    pad1[:, :, 0:CP] = zcol
    pad1[:, :, (W1 + 1) * CP:(W1 + 2) * CP] = zcol

    # --- conv1 (1->96, k3, p1) + ReLU : ONE [N*W1*H1, 9] x [9, 128] matmul ----------
    act1 = jnp.maximum(
        jnp.dot(p1_ref[...], w1_ref[...], preferred_element_type=f32) + b1_ref[...], 0.0)
    c1_stage[...] = act1.astype(bf16)                                       # [170, 128]
    for n in range(n_batch):
        for ow in range(W1):
            r0 = (n * W1 + ow) * H1
            # interior of the zero-padded buffer: padded row = oh+1, padded col = ow+1
            pad1[n, 1:1 + H1, CP * (ow + 1):CP * (ow + 2)] = c1_stage[r0:r0 + H1, :]

    # --- conv2 (96->96, k5, p1) + ReLU : im2col staging + ONE [96, 3200] matmul -----
    # lhs row = 16*(n*W2+ow) + oh  (16-row stride keeps stores sublane-aligned;
    # the unwritten filler rows are never read back).
    for n in range(n_batch):
        for ow in range(W2):
            r0 = 16 * (n * W2 + ow)
            for kh in range(5):
                lhs2_buf[r0:r0 + H2, kh * 5 * CP:(kh + 1) * 5 * CP] = \
                    pad1[n, kh:kh + H2, CP * ow:CP * (ow + 5)]
    cp_w2.wait()
    act2 = jnp.maximum(
        jnp.dot(lhs2_buf[...], w2_v[...], preferred_element_type=f32) + b2_ref[...], 0.0
    ).astype(bf16)                                                          # [16*N*W2, 128]
    for n in range(n_batch):
        for ow in range(W2):
            r0 = 16 * (n * W2 + ow)
            o_c2[n, :, CP * ow:CP * (ow + 1)] = act2[r0:r0 + H2, :]

    # --- conv3 (96->96, k3, no pad) + ReLU : im2col staging + ONE [32, 1152] matmul -
    for n in range(n_batch):
        for kh in range(3):
            lhs3_buf[16 * n:16 * n + H3, kh * 3 * CP:(kh + 1) * 3 * CP] = \
                o_c2[n, kh:kh + H3, :]
    cp_w3.wait()
    act3 = jnp.maximum(
        jnp.dot(lhs3_buf[...], w3_v[...], preferred_element_type=f32) + b3_ref[...], 0.0
    ).astype(bf16)                                                          # [16*N, 128]
    c3_stage[...] = act3
    # flatten (h, c) -> lanes of the conv3 output (lane = h*128 + c); this layout is
    # matched by the fc1 weight prep, reproducing torch's view(-1, 96*13*1) ordering.
    for n in range(n_batch):
        for h in range(H3):
            o_c3[n:n + 1, h * CP:(h + 1) * CP] = c3_stage[16 * n + h:16 * n + h + 1, :]

    # --- fc1 (1248->192) + ReLU : ONE [N, 1664] x [1664, 192] matmul; fc2 on VPU ----
    cp_wf.wait()
    f1 = jnp.maximum(
        jnp.dot(o_c3[...], wf1_v[...], preferred_element_type=f32) + bf1_ref[...], 0.0)
    o_fc1[...] = f1
    # fc2 output width is 1: cross-lane reduce on the VPU/XLU in f32.
    o_out[...] = jnp.sum(f1 * wf2_ref[...], axis=-1, keepdims=True) + bf2_ref[...]


# ----------------------------- parameters ------------------------------------------

def init_params(key):
    keys = jax.random.split(key, 10)

    def u(k, shape, scale):
        return jax.random.uniform(k, shape, jnp.float32, -1.0, 1.0) * scale

    return {
        "conv1_w": u(keys[0], (96, 1, 3, 3), 0.30),
        "conv1_b": u(keys[1], (96,), 0.10),
        "conv2_w": u(keys[2], (96, 96, 5, 5), 0.04),
        "conv2_b": u(keys[3], (96,), 0.10),
        "conv3_w": u(keys[4], (96, 96, 3, 3), 0.05),
        "conv3_b": u(keys[5], (96,), 0.10),
        "fc1_w": u(keys[6], (192, 96 * 13 * 1), 0.03),
        "fc1_b": u(keys[7], (192,), 0.10),
        "fc2_w": u(keys[8], (1, 192), 0.05),
        "fc2_b": u(keys[9], (1,), 0.10),
    }


def prepare_params(params):
    """One-time weight rearrangement into the kernel's channel-padded bf16 layout."""
    bf16, f32 = jnp.bfloat16, jnp.float32
    pc = CP - 96

    # conv1: [OC,1,KH,KW] -> [KH*KW, OCp]    (tap index t = kh*3 + kw)
    w1 = jnp.transpose(params["conv1_w"][:, 0], (1, 2, 0)).reshape(9, 96)
    w1 = jnp.pad(w1, ((0, 0), (0, pc))).astype(bf16)                       # [9, 128]
    b1 = jnp.pad(params["conv1_b"], (0, pc)).reshape(1, CP).astype(f32)

    # conv2: [OC,IC,5,5] -> [KH*KW*ICp, OCp]  (K index = kh*640 + kw*128 + ic)
    w2 = jnp.transpose(params["conv2_w"], (2, 3, 1, 0))                    # [5,5,ic,oc]
    w2 = jnp.pad(w2, ((0, 0), (0, 0), (0, pc), (0, pc)))
    w2 = w2.reshape(K2, CP).astype(bf16)                                   # [3200, 128]
    b2 = jnp.pad(params["conv2_b"], (0, pc)).reshape(1, CP).astype(f32)

    # conv3: [OC,IC,3,3] -> [KH*KW*ICp, OCp]  (K index = kh*384 + kw*128 + ic)
    w3 = jnp.transpose(params["conv3_w"], (2, 3, 1, 0))
    w3 = jnp.pad(w3, ((0, 0), (0, 0), (0, pc), (0, pc)))
    w3 = w3.reshape(K3, CP).astype(bf16)                                   # [1152, 128]
    b3 = jnp.pad(params["conv3_b"], (0, pc)).reshape(1, CP).astype(f32)

    # fc1: torch flattening of conv3 output is (c, h) with W3 == 1
    #      [192, 1248] -> [H3*Cp, 192]  (K index = h*128 + c)
    wf1 = params["fc1_w"].reshape(192, 96, H3).transpose(2, 1, 0)          # [13,96,192]
    wf1 = jnp.pad(wf1, ((0, 0), (0, pc), (0, 0)))
    wf1 = wf1.reshape(KF, 192).astype(bf16)                                # [1664, 192]
    bf1 = params["fc1_b"].reshape(1, 192).astype(f32)

    wf2 = params["fc2_w"].reshape(1, 192).astype(f32)
    bf2 = params["fc2_b"].reshape(1, 1).astype(f32)

    return dict(w1=w1, b1=b1, w2=w2, b2=b2, w3=w3, b3=b3,
                wf1=wf1, bf1=bf1, wf2=wf2, bf2=bf2)


# ----------------------------- forward ---------------------------------------------

def _conv1_patches(x):
    """x: [N,1,17,5] -> [N, W1(ow), H1(oh), 9(kh*3+kw)] im2col patches for conv1."""
    xp = jnp.pad(x[:, 0], ((0, 0), (1, 1), (1, 1)))                        # [N, 19, 7]
    cols = [xp[:, kh:kh + H1, kw:kw + W1] for kh in range(3) for kw in range(3)]
    p = jnp.stack(cols, axis=-1)                                           # [N,17,5,9]
    return p.transpose(0, 2, 1, 3)                                         # [N,5,17,9]


def _full_spec(shape):
    nd = len(shape)

    def index_map(i):
        return (0,) * nd

    return pl.BlockSpec(shape, index_map)


@jax.jit
def net_forward(prep, x):
    """Mirrors Net.forward (classification=False). Returns (x_out, pre_out)."""
    n = x.shape[0]
    p1 = _conv1_patches(x.astype(jnp.float32))
    p1 = p1.reshape(n * W1 * H1, 9).astype(jnp.bfloat16)                   # [170, 9]

    vmem_inputs = (p1, prep["w1"], prep["b1"], prep["b2"], prep["b3"],
                   prep["bf1"], prep["wf2"], prep["bf2"])
    hbm_inputs = (prep["w2"], prep["w3"], prep["wf1"])     # DMA'd manually in-kernel
    inputs = vmem_inputs + hbm_inputs

    out_shape = (
        jax.ShapeDtypeStruct((n, H1 + 2, (W1 + 2) * CP), jnp.bfloat16),  # conv1 (padded)
        jax.ShapeDtypeStruct((n, H2, W2 * CP), jnp.bfloat16),            # conv2
        jax.ShapeDtypeStruct((n, H3 * CP), jnp.bfloat16),                # conv3 (flattened)
        jax.ShapeDtypeStruct((n, 192), jnp.float32),                     # fc1
        jax.ShapeDtypeStruct((n, 1), jnp.float32),                       # fc2
    )

    m2 = 16 * n * W2          # conv2 im2col rows (16-row stride per (n, ow) block)
    m3 = 16 * n               # conv3 im2col rows (16-row stride per batch)

    flops = 2 * (n * W1 * H1 * 9 * CP + m2 * K2 * CP + m3 * K3 * CP
                 + n * KF * 192 + n * 192)
    bytes_accessed = (sum(int(a.size) * a.dtype.itemsize for a in inputs)
                      + sum(math.prod(s.shape) * s.dtype.itemsize for s in out_shape))

    in_specs = ([_full_spec(a.shape) for a in vmem_inputs]
                + [pl.BlockSpec(memory_space=pl.ANY) for _ in hbm_inputs])

    c1p, c2, c3f, f1, out = pl.pallas_call(
        _fused_net_kernel,
        out_shape=out_shape,
        grid=(1,),
        in_specs=in_specs,
        out_specs=tuple(_full_spec(s.shape) for s in out_shape),
        scratch_shapes=[
            pltpu.VMEM((K2, CP), jnp.bfloat16),            # w2 resident copy
            pltpu.VMEM((K3, CP), jnp.bfloat16),            # w3 resident copy
            pltpu.VMEM((KF, 192), jnp.bfloat16),           # fc1 weight resident copy
            pltpu.SemaphoreType.DMA((3,)),                 # weight DMA semaphores
            pltpu.VMEM((n * W1 * H1, CP), jnp.bfloat16),   # conv1 activation staging
            pltpu.VMEM((m2, K2), jnp.bfloat16),            # conv2 im2col lhs
            pltpu.VMEM((m3, K3), jnp.bfloat16),            # conv3 im2col lhs
            pltpu.VMEM((m3, CP), jnp.bfloat16),            # conv3 activation staging
        ],
        compiler_params=pltpu.CompilerParams(
            dimension_semantics=("arbitrary",),
            vmem_limit_bytes=32 * 1024 * 1024),
        cost_estimate=pl.CostEstimate(flops=flops, transcendentals=0,
                                      bytes_accessed=bytes_accessed),
    )(*inputs)

    # Convert the kernel's channel-padded channels-last outputs to PyTorch NCHW
    # (tiny, one-shot layout ops outside the kernel; nothing feeds back in).
    x_conv1 = c1p[:, 1:1 + H1, CP:CP * (W1 + 1)].astype(jnp.float32)
    x_conv1 = x_conv1.reshape(n, H1, W1, CP)[..., :96].transpose(0, 3, 1, 2)   # [N,96,17,5]
    x_conv2 = c2.astype(jnp.float32).reshape(n, H2, W2, CP)[..., :96]
    x_conv2 = x_conv2.transpose(0, 3, 1, 2)                                    # [N,96,15,3]
    x_conv3 = c3f.astype(jnp.float32).reshape(n, H3, CP)[..., :96]
    x_conv3 = x_conv3.transpose(0, 2, 1).reshape(n, 96, H3, W3)                # [N,96,13,1]
    x_dim1 = x_conv3.reshape(n, 96 * H3 * W3)                                  # torch .view
    # TODO(synk): classification=True branch (Dropout + LogSoftmax) not implemented;
    # the default constructor uses classification=False, which is what we reproduce.
    pre_out = [x_conv1, x_conv2, x_conv3, x_dim1, f1, f1, out]
    return out, pre_out


# ----------------------------- pure-JAX reference ----------------------------------

def _rq(x):
    # The kernel feeds the MXU bf16 operands with f32 accumulation; mirror that.
    return x.astype(jnp.bfloat16).astype(jnp.float32)


def _im2col(x, kh, kw, pad):
    n, c, h, w = x.shape
    xp = jnp.pad(x, ((0, 0), (0, 0), (pad, pad), (pad, pad)))
    oh = h + 2 * pad - kh + 1
    ow = w + 2 * pad - kw + 1
    cols = []
    for i in range(kh):
        for j in range(kw):
            cols.append(xp[:, :, i:i + oh, j:j + ow])
    patches = jnp.stack(cols, axis=2).reshape(n, c * kh * kw, oh, ow)
    patches = patches.transpose(0, 2, 3, 1).reshape(n * oh * ow, c * kh * kw)
    return patches, oh, ow


def ref_forward(params, x):
    hi = jax.lax.Precision.HIGHEST

    def conv(inp, w, b, pad):
        oc = w.shape[0]
        nb = inp.shape[0]
        patches, oh, ow = _im2col(inp, w.shape[2], w.shape[3], pad)
        y = jnp.dot(_rq(patches), _rq(w.reshape(oc, -1).T), precision=hi) + b[None, :]
        y = jnp.maximum(y, 0.0)
        return y.reshape(nb, oh, ow, oc).transpose(0, 3, 1, 2)

    pre = []
    a1 = conv(x, params["conv1_w"], params["conv1_b"], 1); pre.append(a1)
    a2 = conv(a1, params["conv2_w"], params["conv2_b"], 1); pre.append(a2)
    a3 = conv(a2, params["conv3_w"], params["conv3_b"], 0); pre.append(a3)
    d1 = a3.reshape(-1, 96 * H3 * W3); pre.append(d1)
    f1 = jnp.maximum(jnp.dot(_rq(d1), _rq(params["fc1_w"].T), precision=hi)
                     + params["fc1_b"][None, :], 0.0)
    pre.append(f1); pre.append(f1)
    out = jnp.dot(f1, params["fc2_w"].T, precision=hi) + params["fc2_b"][None, :]
    pre.append(out)
    return out, pre


# ----------------------------- main -------------------------------------------------

if __name__ == "__main__":
    key = jax.random.PRNGKey(0)
    pkey, xkey = jax.random.split(key)
    params = init_params(pkey)
    prep = prepare_params(params)            # weight layout prep, hoisted out of forward

    x = jax.random.normal(xkey, (2, 1, 17, 5), jnp.float32)   # NCHW, batch=2

    x_out, pre_out = net_forward(prep, x)
    jax.block_until_ready(x_out)

    # Shape checks against the PyTorch module's semantics.
    assert pre_out[0].shape == (2, 96, 17, 5)
    assert pre_out[1].shape == (2, 96, 15, 3)
    assert pre_out[2].shape == (2, 96, 13, 1)
    assert pre_out[3].shape == (2, 96 * 13 * 1)
    assert pre_out[4].shape == (2, 192)
    assert pre_out[5].shape == (2, 192)
    assert x_out.shape == (2, 1)

    # Numerical check against a pure-JAX reference that uses the same
    # bf16-operand / f32-accumulate matmul contract as the fused kernel.
    x_out_ref, pre_out_ref = ref_forward(params, x)
    assert jnp.allclose(x_out, x_out_ref, rtol=5e-3, atol=5e-3), "output mismatch"
    for a, b in zip(pre_out, pre_out_ref):
        assert jnp.allclose(a, b, rtol=5e-3, atol=5e-3), "intermediate mismatch"

    print("KERNEL_OK")
</pallas_src>

<mosaic_0001>
module attributes {stable_mosaic.version = 11 : i64} {
  func.func @_fused_net_kernel(%arg0: i32, %arg1: memref<170x9xbf16, #tpu.memory_space<vmem>>, %arg2: memref<9x128xbf16, #tpu.memory_space<vmem>>, %arg3: memref<1x128xf32, #tpu.memory_space<vmem>>, %arg4: memref<1x128xf32, #tpu.memory_space<vmem>>, %arg5: memref<1x128xf32, #tpu.memory_space<vmem>>, %arg6: memref<1x192xf32, #tpu.memory_space<vmem>>, %arg7: memref<1x192xf32, #tpu.memory_space<vmem>>, %arg8: memref<1x1xf32, #tpu.memory_space<vmem>>, %arg9: memref<3200x128xbf16, #tpu.memory_space<any>>, %arg10: memref<1152x128xbf16, #tpu.memory_space<any>>, %arg11: memref<1664x192xbf16, #tpu.memory_space<any>>, %arg12: memref<2x19x896xbf16, #tpu.memory_space<vmem>>, %arg13: memref<2x15x384xbf16, #tpu.memory_space<vmem>>, %arg14: memref<2x1664xbf16, #tpu.memory_space<vmem>>, %arg15: memref<2x192xf32, #tpu.memory_space<vmem>>, %arg16: memref<2x1xf32, #tpu.memory_space<vmem>>, %arg17: memref<3200x128xbf16, #tpu.memory_space<vmem>>, %arg18: memref<1152x128xbf16, #tpu.memory_space<vmem>>, %arg19: memref<1664x192xbf16, #tpu.memory_space<vmem>>, %arg20: memref<3x!tpu.dma_semaphore, #tpu.memory_space<semaphore_mem>>, %arg21: memref<170x128xbf16, #tpu.memory_space<vmem>>, %arg22: memref<96x3200xbf16, #tpu.memory_space<vmem>>, %arg23: memref<32x1152xbf16, #tpu.memory_space<vmem>>, %arg24: memref<32x128xbf16, #tpu.memory_space<vmem>>) attributes {dimension_semantics = [#tpu.dimension_semantics<arbitrary>], iteration_bounds = array<i64: 1>, scalar_prefetch = 0 : i64, scratch_operands = 8 : i64, tpu.core_type = #tpu.core_type<tc>, window_params = [{pipeline_mode = #tpu.pipeline_mode<synchronous>, transform_indices = @transform_0, window_bounds = array<i64: 170, 9>}, {pipeline_mode = #tpu.pipeline_mode<synchronous>, transform_indices = @transform_1, window_bounds = array<i64: 9, 128>}, {pipeline_mode = #tpu.pipeline_mode<synchronous>, transform_indices = @transform_2, window_bounds = array<i64: 1, 128>}, {pipeline_mode = #tpu.pipeline_mode<synchronous>, transform_indices = @transform_3, window_bounds = array<i64: 1, 128>}, {pipeline_mode = #tpu.pipeline_mode<synchronous>, transform_indices = @transform_4, window_bounds = array<i64: 1, 128>}, {pipeline_mode = #tpu.pipeline_mode<synchronous>, transform_indices = @transform_5, window_bounds = array<i64: 1, 192>}, {pipeline_mode = #tpu.pipeline_mode<synchronous>, transform_indices = @transform_6, window_bounds = array<i64: 1, 192>}, {pipeline_mode = #tpu.pipeline_mode<synchronous>, transform_indices = @transform_7, window_bounds = array<i64: 1, 1>}, {}, {}, {}, {pipeline_mode = #tpu.pipeline_mode<synchronous>, transform_indices = @transform_11, window_bounds = array<i64: 2, 19, 896>}, {pipeline_mode = #tpu.pipeline_mode<synchronous>, transform_indices = @transform_12, window_bounds = array<i64: 2, 15, 384>}, {pipeline_mode = #tpu.pipeline_mode<synchronous>, transform_indices = @transform_13, window_bounds = array<i64: 2, 1664>}, {pipeline_mode = #tpu.pipeline_mode<synchronous>, transform_indices = @transform_14, window_bounds = array<i64: 2, 192>}, {pipeline_mode = #tpu.pipeline_mode<synchronous>, transform_indices = @transform_15, window_bounds = array<i64: 2, 1>}]} {
    %c0_i32 = arith.constant 0 : i32
    %0 = tpu.memref_slice %arg20[%c0_i32] : memref<3x!tpu.dma_semaphore, #tpu.memory_space<semaphore_mem>> -> memref<1x!tpu.dma_semaphore, #tpu.memory_space<semaphore_mem>>
    %1 = tpu.memref_squeeze %0 : memref<1x!tpu.dma_semaphore, #tpu.memory_space<semaphore_mem>> -> memref<!tpu.dma_semaphore, #tpu.memory_space<semaphore_mem>>
    tpu.enqueue_dma source(%arg9 : memref<3200x128xbf16, #tpu.memory_space<any>>) target(%arg17 : memref<3200x128xbf16, #tpu.memory_space<vmem>>) target_semaphore(%1 : memref<!tpu.dma_semaphore, #tpu.memory_space<semaphore_mem>>)
    %c1_i32 = arith.constant 1 : i32
    %2 = tpu.memref_slice %arg20[%c1_i32] : memref<3x!tpu.dma_semaphore, #tpu.memory_space<semaphore_mem>> -> memref<1x!tpu.dma_semaphore, #tpu.memory_space<semaphore_mem>>
    %3 = tpu.memref_squeeze %2 : memref<1x!tpu.dma_semaphore, #tpu.memory_space<semaphore_mem>> -> memref<!tpu.dma_semaphore, #tpu.memory_space<semaphore_mem>>
    tpu.enqueue_dma source(%arg10 : memref<1152x128xbf16, #tpu.memory_space<any>>) target(%arg18 : memref<1152x128xbf16, #tpu.memory_space<vmem>>) target_semaphore(%3 : memref<!tpu.dma_semaphore, #tpu.memory_space<semaphore_mem>>)
    %c2_i32 = arith.constant 2 : i32
    %4 = tpu.memref_slice %arg20[%c2_i32] : memref<3x!tpu.dma_semaphore, #tpu.memory_space<semaphore_mem>> -> memref<1x!tpu.dma_semaphore, #tpu.memory_space<semaphore_mem>>
    %5 = tpu.memref_squeeze %4 : memref<1x!tpu.dma_semaphore, #tpu.memory_space<semaphore_mem>> -> memref<!tpu.dma_semaphore, #tpu.memory_space<semaphore_mem>>
    tpu.enqueue_dma source(%arg11 : memref<1664x192xbf16, #tpu.memory_space<any>>) target(%arg19 : memref<1664x192xbf16, #tpu.memory_space<vmem>>) target_semaphore(%5 : memref<!tpu.dma_semaphore, #tpu.memory_space<semaphore_mem>>)
    %cst = arith.constant 0.000000e+00 : bf16
    %6 = vector.broadcast %cst : bf16 to vector<2x1x896xbf16>
    %c0 = arith.constant 0 : index
    %c0_0 = arith.constant 0 : index
    %c0_1 = arith.constant 0 : index
    %7 = vector.load %arg12[%c0, %c0_0, %c0_1] : memref<2x19x896xbf16, #tpu.memory_space<vmem>>, vector<2x1x896xbf16>
    tpu.vector_store %arg12[%c0, %c0_0, %c0_1], %6 {strides = array<i32>} : memref<2x19x896xbf16, #tpu.memory_space<vmem>>, vector<2x1x896xbf16>,
    %c0_2 = arith.constant 0 : index
    %c18 = arith.constant 18 : index
    %c0_3 = arith.constant 0 : index
    %8 = vector.load %arg12[%c0_2, %c18, %c0_3] : memref<2x19x896xbf16, #tpu.memory_space<vmem>>, vector<2x1x896xbf16>
    tpu.vector_store %arg12[%c0_2, %c18, %c0_3], %6 {strides = array<i32>} : memref<2x19x896xbf16, #tpu.memory_space<vmem>>, vector<2x1x896xbf16>,
    %cst_4 = arith.constant 0.000000e+00 : bf16
    %9 = vector.broadcast %cst_4 : bf16 to vector<2x19x128xbf16>
    %c0_5 = arith.constant 0 : index
    %c0_6 = arith.constant 0 : index
    %c0_7 = arith.constant 0 : index
    %10 = vector.load %arg12[%c0_5, %c0_6, %c0_7] : memref<2x19x896xbf16, #tpu.memory_space<vmem>>, vector<2x19x128xbf16>
    tpu.vector_store %arg12[%c0_5, %c0_6, %c0_7], %9 {strides = array<i32>} : memref<2x19x896xbf16, #tpu.memory_space<vmem>>, vector<2x19x128xbf16>,
    %c0_8 = arith.constant 0 : index
    %c0_9 = arith.constant 0 : index
    %c768 = arith.constant 768 : index
    %11 = vector.load %arg12[%c0_8, %c0_9, %c768] : memref<2x19x896xbf16, #tpu.memory_space<vmem>>, vector<2x19x128xbf16>
    tpu.vector_store %arg12[%c0_8, %c0_9, %c768], %9 {strides = array<i32>} : memref<2x19x896xbf16, #tpu.memory_space<vmem>>, vector<2x19x128xbf16>,
    %c0_10 = arith.constant 0 : index
    %c0_11 = arith.constant 0 : index
    %12 = vector.load %arg1[%c0_10, %c0_11] : memref<170x9xbf16, #tpu.memory_space<vmem>>, vector<170x9xbf16>
    %c0_12 = arith.constant 0 : index
    %c0_13 = arith.constant 0 : index
    %13 = vector.load %arg2[%c0_12, %c0_13] : memref<9x128xbf16, #tpu.memory_space<vmem>>, vector<9x128xbf16>
    %cst_14 = arith.constant dense<0.000000e+00> : vector<170x128xf32>
    %14 = tpu.matmul %12, %13, %cst_14 {dimension_numbers = #tpu.dot_dimension_numbers<[1], [0], [0], [1], [0, 0, 1, 1], [], []>} : vector<170x9xbf16>, vector<9x128xbf16>, vector<170x128xf32> -> vector<170x128xf32>
    %c0_15 = arith.constant 0 : index
    %c0_16 = arith.constant 0 : index
    %15 = vector.load %arg3[%c0_15, %c0_16] : memref<1x128xf32, #tpu.memory_space<vmem>>, vector<1x128xf32>
    %16 = vector.broadcast %15 : vector<1x128xf32> to vector<170x128xf32>
    %17 = arith.addf %14, %16 : vector<170x128xf32>
    %cst_17 = arith.constant 0.000000e+00 : f32
    %18 = vector.broadcast %cst_17 : f32 to vector<170x128xf32>
    %19 = arith.maximumf %17, %18 : vector<170x128xf32>
    %20 = arith.truncf %19 : vector<170x128xf32> to vector<170x128xbf16>
    %c0_18 = arith.constant 0 : index
    %c0_19 = arith.constant 0 : index
    %21 = vector.load %arg21[%c0_18, %c0_19] : memref<170x128xbf16, #tpu.memory_space<vmem>>, vector<170x128xbf16>
    tpu.vector_store %arg21[%c0_18, %c0_19], %20 {strides = array<i32>} : memref<170x128xbf16, #tpu.memory_space<vmem>>, vector<170x128xbf16>,
    %c0_20 = arith.constant 0 : index
    %c0_21 = arith.constant 0 : index
    %22 = vector.load %arg21[%c0_20, %c0_21] : memref<170x128xbf16, #tpu.memory_space<vmem>>, vector<17x128xbf16>
    %c0_22 = arith.constant 0 : index
    %c1 = arith.constant 1 : index
    %c128 = arith.constant 128 : index
    %23 = vector.load %arg12[%c0_22, %c1, %c128] : memref<2x19x896xbf16, #tpu.memory_space<vmem>>, vector<1x17x128xbf16>
    %24 = vector.shape_cast %23 : vector<1x17x128xbf16> to vector<17x128xbf16>
    %25 = vector.shape_cast %22 : vector<17x128xbf16> to vector<1x17x128xbf16>
    tpu.vector_store %arg12[%c0_22, %c1, %c128], %25 {strides = array<i32>} : memref<2x19x896xbf16, #tpu.memory_space<vmem>>, vector<1x17x128xbf16>,
    %c17 = arith.constant 17 : index
    %c0_23 = arith.constant 0 : index
    %26 = vector.load %arg21[%c17, %c0_23] : memref<170x128xbf16, #tpu.memory_space<vmem>>, vector<17x128xbf16>
    %c0_24 = arith.constant 0 : index
    %c1_25 = arith.constant 1 : index
    %c256 = arith.constant 256 : index
    %27 = vector.load %arg12[%c0_24, %c1_25, %c256] : memref<2x19x896xbf16, #tpu.memory_space<vmem>>, vector<1x17x128xbf16>
    %28 = vector.shape_cast %27 : vector<1x17x128xbf16> to vector<17x128xbf16>
    %29 = vector.shape_cast %26 : vector<17x128xbf16> to vector<1x17x128xbf16>
    tpu.vector_store %arg12[%c0_24, %c1_25, %c256], %29 {strides = array<i32>} : memref<2x19x896xbf16, #tpu.memory_space<vmem>>, vector<1x17x128xbf16>,
    %c34 = arith.constant 34 : index
    %c0_26 = arith.constant 0 : index
    %30 = vector.load %arg21[%c34, %c0_26] : memref<170x128xbf16, #tpu.memory_space<vmem>>, vector<17x128xbf16>
    %c0_27 = arith.constant 0 : index
    %c1_28 = arith.constant 1 : index
    %c384 = arith.constant 384 : index
    %31 = vector.load %arg12[%c0_27, %c1_28, %c384] : memref<2x19x896xbf16, #tpu.memory_space<vmem>>, vector<1x17x128xbf16>
    %32 = vector.shape_cast %31 : vector<1x17x128xbf16> to vector<17x128xbf16>
    %33 = vector.shape_cast %30 : vector<17x128xbf16> to vector<1x17x128xbf16>
    tpu.vector_store %arg12[%c0_27, %c1_28, %c384], %33 {strides = array<i32>} : memref<2x19x896xbf16, #tpu.memory_space<vmem>>, vector<1x17x128xbf16>,
    %c51 = arith.constant 51 : index
    %c0_29 = arith.constant 0 : index
    %34 = vector.load %arg21[%c51, %c0_29] : memref<170x128xbf16, #tpu.memory_space<vmem>>, vector<17x128xbf16>
    %c0_30 = arith.constant 0 : index
    %c1_31 = arith.constant 1 : index
    %c512 = arith.constant 512 : index
    %35 = vector.load %arg12[%c0_30, %c1_31, %c512] : memref<2x19x896xbf16, #tpu.memory_space<vmem>>, vector<1x17x128xbf16>
    %36 = vector.shape_cast %35 : vector<1x17x128xbf16> to vector<17x128xbf16>
    %37 = vector.shape_cast %34 : vector<17x128xbf16> to vector<1x17x128xbf16>
    tpu.vector_store %arg12[%c0_30, %c1_31, %c512], %37 {strides = array<i32>} : memref<2x19x896xbf16, #tpu.memory_space<vmem>>, vector<1x17x128xbf16>,
    %c68 = arith.constant 68 : index
    %c0_32 = arith.constant 0 : index
    %38 = vector.load %arg21[%c68, %c0_32] : memref<170x128xbf16, #tpu.memory_space<vmem>>, vector<17x128xbf16>
    %c0_33 = arith.constant 0 : index
    %c1_34 = arith.constant 1 : index
    %c640 = arith.constant 640 : index
    %39 = vector.load %arg12[%c0_33, %c1_34, %c640] : memref<2x19x896xbf16, #tpu.memory_space<vmem>>, vector<1x17x128xbf16>
    %40 = vector.shape_cast %39 : vector<1x17x128xbf16> to vector<17x128xbf16>
    %41 = vector.shape_cast %38 : vector<17x128xbf16> to vector<1x17x128xbf16>
    tpu.vector_store %arg12[%c0_33, %c1_34, %c640], %41 {strides = array<i32>} : memref<2x19x896xbf16, #tpu.memory_space<vmem>>, vector<1x17x128xbf16>,
    %c85 = arith.constant 85 : index
    %c0_35 = arith.constant 0 : index
    %42 = vector.load %arg21[%c85, %c0_35] : memref<170x128xbf16, #tpu.memory_space<vmem>>, vector<17x128xbf16>
    %c1_36 = arith.constant 1 : index
    %c1_37 = arith.constant 1 : index
    %c128_38 = arith.constant 128 : index
    %43 = vector.load %arg12[%c1_36, %c1_37, %c128_38] : memref<2x19x896xbf16, #tpu.memory_space<vmem>>, vector<1x17x128xbf16>
    %44 = vector.shape_cast %43 : vector<1x17x128xbf16> to vector<17x128xbf16>
    %45 = vector.shape_cast %42 : vector<17x128xbf16> to vector<1x17x128xbf16>
    tpu.vector_store %arg12[%c1_36, %c1_37, %c128_38], %45 {strides = array<i32>} : memref<2x19x896xbf16, #tpu.memory_space<vmem>>, vector<1x17x128xbf16>,
    %c102 = arith.constant 102 : index
    %c0_39 = arith.constant 0 : index
    %46 = vector.load %arg21[%c102, %c0_39] : memref<170x128xbf16, #tpu.memory_space<vmem>>, vector<17x128xbf16>
    %c1_40 = arith.constant 1 : index
    %c1_41 = arith.constant 1 : index
    %c256_42 = arith.constant 256 : index
    %47 = vector.load %arg12[%c1_40, %c1_41, %c256_42] : memref<2x19x896xbf16, #tpu.memory_space<vmem>>, vector<1x17x128xbf16>
    %48 = vector.shape_cast %47 : vector<1x17x128xbf16> to vector<17x128xbf16>
    %49 = vector.shape_cast %46 : vector<17x128xbf16> to vector<1x17x128xbf16>
    tpu.vector_store %arg12[%c1_40, %c1_41, %c256_42], %49 {strides = array<i32>} : memref<2x19x896xbf16, #tpu.memory_space<vmem>>, vector<1x17x128xbf16>,
    %c119 = arith.constant 119 : index
    %c0_43 = arith.constant 0 : index
    %50 = vector.load %arg21[%c119, %c0_43] : memref<170x128xbf16, #tpu.memory_space<vmem>>, vector<17x128xbf16>
    %c1_44 = arith.constant 1 : index
    %c1_45 = arith.constant 1 : index
    %c384_46 = arith.constant 384 : index
    %51 = vector.load %arg12[%c1_44, %c1_45, %c384_46] : memref<2x19x896xbf16, #tpu.memory_space<vmem>>, vector<1x17x128xbf16>
    %52 = vector.shape_cast %51 : vector<1x17x128xbf16> to vector<17x128xbf16>
    %53 = vector.shape_cast %50 : vector<17x128xbf16> to vector<1x17x128xbf16>
    tpu.vector_store %arg12[%c1_44, %c1_45, %c384_46], %53 {strides = array<i32>} : memref<2x19x896xbf16, #tpu.memory_space<vmem>>, vector<1x17x128xbf16>,
    %c136 = arith.constant 136 : index
    %c0_47 = arith.constant 0 : index
    %54 = vector.load %arg21[%c136, %c0_47] : memref<170x128xbf16, #tpu.memory_space<vmem>>, vector<17x128xbf16>
    %c1_48 = arith.constant 1 : index
    %c1_49 = arith.constant 1 : index
    %c512_50 = arith.constant 512 : index
    %55 = vector.load %arg12[%c1_48, %c1_49, %c512_50] : memref<2x19x896xbf16, #tpu.memory_space<vmem>>, vector<1x17x128xbf16>
    %56 = vector.shape_cast %55 : vector<1x17x128xbf16> to vector<17x128xbf16>
    %57 = vector.shape_cast %54 : vector<17x128xbf16> to vector<1x17x128xbf16>
    tpu.vector_store %arg12[%c1_48, %c1_49, %c512_50], %57 {strides = array<i32>} : memref<2x19x896xbf16, #tpu.memory_space<vmem>>, vector<1x17x128xbf16>,
    %c153 = arith.constant 153 : index
    %c0_51 = arith.constant 0 : index
    %58 = vector.load %arg21[%c153, %c0_51] : memref<170x128xbf16, #tpu.memory_space<vmem>>, vector<17x128xbf16>
    %c1_52 = arith.constant 1 : index
    %c1_53 = arith.constant 1 : index
    %c640_54 = arith.constant 640 : index
    %59 = vector.load %arg12[%c1_52, %c1_53, %c640_54] : memref<2x19x896xbf16, #tpu.memory_space<vmem>>, vector<1x17x128xbf16>
    %60 = vector.shape_cast %59 : vector<1x17x128xbf16> to vector<17x128xbf16>
    %61 = vector.shape_cast %58 : vector<17x128xbf16> to vector<1x17x128xbf16>
    tpu.vector_store %arg12[%c1_52, %c1_53, %c640_54], %61 {strides = array<i32>} : memref<2x19x896xbf16, #tpu.memory_space<vmem>>, vector<1x17x128xbf16>,
    %c0_55 = arith.constant 0 : index
    %c0_56 = arith.constant 0 : index
    %c0_57 = arith.constant 0 : index
    %62 = vector.load %arg12[%c0_55, %c0_56, %c0_57] : memref<2x19x896xbf16, #tpu.memory_space<vmem>>, vector<1x15x640xbf16>
    %63 = vector.shape_cast %62 : vector<1x15x640xbf16> to vector<15x640xbf16>
    %c0_58 = arith.constant 0 : index
    %c0_59 = arith.constant 0 : index
    %64 = vector.load %arg22[%c0_58, %c0_59] : memref<96x3200xbf16, #tpu.memory_space<vmem>>, vector<15x640xbf16>
    tpu.vector_store %arg22[%c0_58, %c0_59], %63 {strides = array<i32>} : memref<96x3200xbf16, #tpu.memory_space<vmem>>, vector<15x640xbf16>,
    %c0_60 = arith.constant 0 : index
    %c1_61 = arith.constant 1 : index
    %c0_62 = arith.constant 0 : index
    %65 = vector.load %arg12[%c0_60, %c1_61, %c0_62] : memref<2x19x896xbf16, #tpu.memory_space<vmem>>, vector<1x15x640xbf16>
    %66 = vector.shape_cast %65 : vector<1x15x640xbf16> to vector<15x640xbf16>
    %c0_63 = arith.constant 0 : index
    %c640_64 = arith.constant 640 : index
    %67 = vector.load %arg22[%c0_63, %c640_64] : memref<96x3200xbf16, #tpu.memory_space<vmem>>, vector<15x640xbf16>
    tpu.vector_store %arg22[%c0_63, %c640_64], %66 {strides = array<i32>} : memref<96x3200xbf16, #tpu.memory_space<vmem>>, vector<15x640xbf16>,
    %c0_65 = arith.constant 0 : index
    %c2 = arith.constant 2 : index
    %c0_66 = arith.constant 0 : index
    %68 = vector.load %arg12[%c0_65, %c2, %c0_66] : memref<2x19x896xbf16, #tpu.memory_space<vmem>>, vector<1x15x640xbf16>
    %69 = vector.shape_cast %68 : vector<1x15x640xbf16> to vector<15x640xbf16>
    %c0_67 = arith.constant 0 : index
    %c1280 = arith.constant 1280 : index
    %70 = vector.load %arg22[%c0_67, %c1280] : memref<96x3200xbf16, #tpu.memory_space<vmem>>, vector<15x640xbf16>
    tpu.vector_store %arg22[%c0_67, %c1280], %69 {strides = array<i32>} : memref<96x3200xbf16, #tpu.memory_space<vmem>>, vector<15x640xbf16>,
    %c0_68 = arith.constant 0 : index
    %c3 = arith.constant 3 : index
    %c0_69 = arith.constant 0 : index
    %71 = vector.load %arg12[%c0_68, %c3, %c0_69] : memref<2x19x896xbf16, #tpu.memory_space<vmem>>, vector<1x15x640xbf16>
    %72 = vector.shape_cast %71 : vector<1x15x640xbf16> to vector<15x640xbf16>
    %c0_70 = arith.constant 0 : index
    %c1920 = arith.constant 1920 : index
    %73 = vector.load %arg22[%c0_70, %c1920] : memref<96x3200xbf16, #tpu.memory_space<vmem>>, vector<15x640xbf16>
    tpu.vector_store %arg22[%c0_70, %c1920], %72 {strides = array<i32>} : memref<96x3200xbf16, #tpu.memory_space<vmem>>, vector<15x640xbf16>,
    %c0_71 = arith.constant 0 : index
    %c4 = arith.constant 4 : index
    %c0_72 = arith.constant 0 : index
    %74 = vector.load %arg12[%c0_71, %c4, %c0_72] : memref<2x19x896xbf16, #tpu.memory_space<vmem>>, vector<1x15x640xbf16>
    %75 = vector.shape_cast %74 : vector<1x15x640xbf16> to vector<15x640xbf16>
    %c0_73 = arith.constant 0 : index
    %c2560 = arith.constant 2560 : index
    %76 = vector.load %arg22[%c0_73, %c2560] : memref<96x3200xbf16, #tpu.memory_space<vmem>>, vector<15x640xbf16>
    tpu.vector_store %arg22[%c0_73, %c2560], %75 {strides = array<i32>} : memref<96x3200xbf16, #tpu.memory_space<vmem>>, vector<15x640xbf16>,
    %c0_74 = arith.constant 0 : index
    %c0_75 = arith.constant 0 : index
    %c128_76 = arith.constant 128 : index
    %77 = vector.load %arg12[%c0_74, %c0_75, %c128_76] : memref<2x19x896xbf16, #tpu.memory_space<vmem>>, vector<1x15x640xbf16>
    %78 = vector.shape_cast %77 : vector<1x15x640xbf16> to vector<15x640xbf16>
    %c16 = arith.constant 16 : index
    %c0_77 = arith.constant 0 : index
    %79 = vector.load %arg22[%c16, %c0_77] : memref<96x3200xbf16, #tpu.memory_space<vmem>>, vector<15x640xbf16>
    tpu.vector_store %arg22[%c16, %c0_77], %78 {strides = array<i32>} : memref<96x3200xbf16, #tpu.memory_space<vmem>>, vector<15x640xbf16>,
    %c0_78 = arith.constant 0 : index
    %c1_79 = arith.constant 1 : index
    %c128_80 = arith.constant 128 : index
    %80 = vector.load %arg12[%c0_78, %c1_79, %c128_80] : memref<2x19x896xbf16, #tpu.memory_space<vmem>>, vector<1x15x640xbf16>
    %81 = vector.shape_cast %80 : vector<1x15x640xbf16> to vector<15x640xbf16>
    %c16_81 = arith.constant 16 : index
    %c640_82 = arith.constant 640 : index
    %82 = vector.load %arg22[%c16_81, %c640_82] : memref<96x3200xbf16, #tpu.memory_space<vmem>>, vector<15x640xbf16>
    tpu.vector_store %arg22[%c16_81, %c640_82], %81 {strides = array<i32>} : memref<96x3200xbf16, #tpu.memory_space<vmem>>, vector<15x640xbf16>,
    %c0_83 = arith.constant 0 : index
    %c2_84 = arith.constant 2 : index
    %c128_85 = arith.constant 128 : index
    %83 = vector.load %arg12[%c0_83, %c2_84, %c128_85] : memref<2x19x896xbf16, #tpu.memory_space<vmem>>, vector<1x15x640xbf16>
    %84 = vector.shape_cast %83 : vector<1x15x640xbf16> to vector<15x640xbf16>
    %c16_86 = arith.constant 16 : index
    %c1280_87 = arith.constant 1280 : index
    %85 = vector.load %arg22[%c16_86, %c1280_87] : memref<96x3200xbf16, #tpu.memory_space<vmem>>, vector<15x640xbf16>
    tpu.vector_store %arg22[%c16_86, %c1280_87], %84 {strides = array<i32>} : memref<96x3200xbf16, #tpu.memory_space<vmem>>, vector<15x640xbf16>,
    %c0_88 = arith.constant 0 : index
    %c3_89 = arith.constant 3 : index
    %c128_90 = arith.constant 128 : index
    %86 = vector.load %arg12[%c0_88, %c3_89, %c128_90] : memref<2x19x896xbf16, #tpu.memory_space<vmem>>, vector<1x15x640xbf16>
    %87 = vector.shape_cast %86 : vector<1x15x640xbf16> to vector<15x640xbf16>
    %c16_91 = arith.constant 16 : index
    %c1920_92 = arith.constant 1920 : index
    %88 = vector.load %arg22[%c16_91, %c1920_92] : memref<96x3200xbf16, #tpu.memory_space<vmem>>, vector<15x640xbf16>
    tpu.vector_store %arg22[%c16_91, %c1920_92], %87 {strides = array<i32>} : memref<96x3200xbf16, #tpu.memory_space<vmem>>, vector<15x640xbf16>,
    %c0_93 = arith.constant 0 : index
    %c4_94 = arith.constant 4 : index
    %c128_95 = arith.constant 128 : index
    %89 = vector.load %arg12[%c0_93, %c4_94, %c128_95] : memref<2x19x896xbf16, #tpu.memory_space<vmem>>, vector<1x15x640xbf16>
    %90 = vector.shape_cast %89 : vector<1x15x640xbf16> to vector<15x640xbf16>
    %c16_96 = arith.constant 16 : index
    %c2560_97 = arith.constant 2560 : index
    %91 = vector.load %arg22[%c16_96, %c2560_97] : memref<96x3200xbf16, #tpu.memory_space<vmem>>, vector<15x640xbf16>
    tpu.vector_store %arg22[%c16_96, %c2560_97], %90 {strides = array<i32>} : memref<96x3200xbf16, #tpu.memory_space<vmem>>, vector<15x640xbf16>,
    %c0_98 = arith.constant 0 : index
    %c0_99 = arith.constant 0 : index
    %c256_100 = arith.constant 256 : index
    %92 = vector.load %arg12[%c0_98, %c0_99, %c256_100] : memref<2x19x896xbf16, #tpu.memory_space<vmem>>, vector<1x15x640xbf16>
    %93 = vector.shape_cast %92 : vector<1x15x640xbf16> to vector<15x640xbf16>
    %c32 = arith.constant 32 : index
    %c0_101 = arith.constant 0 : index
    %94 = vector.load %arg22[%c32, %c0_101] : memref<96x3200xbf16, #tpu.memory_space<vmem>>, vector<15x640xbf16>
    tpu.vector_store %arg22[%c32, %c0_101], %93 {strides = array<i32>} : memref<96x3200xbf16, #tpu.memory_space<vmem>>, vector<15x640xbf16>,
    %c0_102 = arith.constant 0 : index
    %c1_103 = arith.constant 1 : index
    %c256_104 = arith.constant 256 : index
    %95 = vector.load %arg12[%c0_102, %c1_103, %c256_104] : memref<2x19x896xbf16, #tpu.memory_space<vmem>>, vector<1x15x640xbf16>
    %96 = vector.shape_cast %95 : vector<1x15x640xbf16> to vector<15x640xbf16>
    %c32_105 = arith.constant 32 : index
    %c640_106 = arith.constant 640 : index
    %97 = vector.load %arg22[%c32_105, %c640_106] : memref<96x3200xbf16, #tpu.memory_space<vmem>>, vector<15x640xbf16>
    tpu.vector_store %arg22[%c32_105, %c640_106], %96 {strides = array<i32>} : memref<96x3200xbf16, #tpu.memory_space<vmem>>, vector<15x640xbf16>,
    %c0_107 = arith.constant 0 : index
    %c2_108 = arith.constant 2 : index
    %c256_109 = arith.constant 256 : index
    %98 = vector.load %arg12[%c0_107, %c2_108, %c256_109] : memref<2x19x896xbf16, #tpu.memory_space<vmem>>, vector<1x15x640xbf16>
    %99 = vector.shape_cast %98 : vector<1x15x640xbf16> to vector<15x640xbf16>
    %c32_110 = arith.constant 32 : index
    %c1280_111 = arith.constant 1280 : index
    %100 = vector.load %arg22[%c32_110, %c1280_111] : memref<96x3200xbf16, #tpu.memory_space<vmem>>, vector<15x640xbf16>
    tpu.vector_store %arg22[%c32_110, %c1280_111], %99 {strides = array<i32>} : memref<96x3200xbf16, #tpu.memory_space<vmem>>, vector<15x640xbf16>,
    %c0_112 = arith.constant 0 : index
    %c3_113 = arith.constant 3 : index
    %c256_114 = arith.constant 256 : index
    %101 = vector.load %arg12[%c0_112, %c3_113, %c256_114] : memref<2x19x896xbf16, #tpu.memory_space<vmem>>, vector<1x15x640xbf16>
    %102 = vector.shape_cast %101 : vector<1x15x640xbf16> to vector<15x640xbf16>
    %c32_115 = arith.constant 32 : index
    %c1920_116 = arith.constant 1920 : index
    %103 = vector.load %arg22[%c32_115, %c1920_116] : memref<96x3200xbf16, #tpu.memory_space<vmem>>, vector<15x640xbf16>
    tpu.vector_store %arg22[%c32_115, %c1920_116], %102 {strides = array<i32>} : memref<96x3200xbf16, #tpu.memory_space<vmem>>, vector<15x640xbf16>,
    %c0_117 = arith.constant 0 : index
    %c4_118 = arith.constant 4 : index
    %c256_119 = arith.constant 256 : index
    %104 = vector.load %arg12[%c0_117, %c4_118, %c256_119] : memref<2x19x896xbf16, #tpu.memory_space<vmem>>, vector<1x15x640xbf16>
    %105 = vector.shape_cast %104 : vector<1x15x640xbf16> to vector<15x640xbf16>
    %c32_120 = arith.constant 32 : index
    %c2560_121 = arith.constant 2560 : index
    %106 = vector.load %arg22[%c32_120, %c2560_121] : memref<96x3200xbf16, #tpu.memory_space<vmem>>, vector<15x640xbf16>
    tpu.vector_store %arg22[%c32_120, %c2560_121], %105 {strides = array<i32>} : memref<96x3200xbf16, #tpu.memory_space<vmem>>, vector<15x640xbf16>,
    %c1_122 = arith.constant 1 : index
    %c0_123 = arith.constant 0 : index
    %c0_124 = arith.constant 0 : index
    %107 = vector.load %arg12[%c1_122, %c0_123, %c0_124] : memref<2x19x896xbf16, #tpu.memory_space<vmem>>, vector<1x15x640xbf16>
    %108 = vector.shape_cast %107 : vector<1x15x640xbf16> to vector<15x640xbf16>
    %c48 = arith.constant 48 : index
    %c0_125 = arith.constant 0 : index
    %109 = vector.load %arg22[%c48, %c0_125] : memref<96x3200xbf16, #tpu.memory_space<vmem>>, vector<15x640xbf16>
    tpu.vector_store %arg22[%c48, %c0_125], %108 {strides = array<i32>} : memref<96x3200xbf16, #tpu.memory_space<vmem>>, vector<15x640xbf16>,
    %c1_126 = arith.constant 1 : index
    %c1_127 = arith.constant 1 : index
    %c0_128 = arith.constant 0 : index
    %110 = vector.load %arg12[%c1_126, %c1_127, %c0_128] : memref<2x19x896xbf16, #tpu.memory_space<vmem>>, vector<1x15x640xbf16>
    %111 = vector.shape_cast %110 : vector<1x15x640xbf16> to vector<15x640xbf16>
    %c48_129 = arith.constant 48 : index
    %c640_130 = arith.constant 640 : index
    %112 = vector.load %arg22[%c48_129, %c640_130] : memref<96x3200xbf16, #tpu.memory_space<vmem>>, vector<15x640xbf16>
    tpu.vector_store %arg22[%c48_129, %c640_130], %111 {strides = array<i32>} : memref<96x3200xbf16, #tpu.memory_space<vmem>>, vector<15x640xbf16>,
    %c1_131 = arith.constant 1 : index
    %c2_132 = arith.constant 2 : index
    %c0_133 = arith.constant 0 : index
    %113 = vector.load %arg12[%c1_131, %c2_132, %c0_133] : memref<2x19x896xbf16, #tpu.memory_space<vmem>>, vector<1x15x640xbf16>
    %114 = vector.shape_cast %113 : vector<1x15x640xbf16> to vector<15x640xbf16>
    %c48_134 = arith.constant 48 : index
    %c1280_135 = arith.constant 1280 : index
    %115 = vector.load %arg22[%c48_134, %c1280_135] : memref<96x3200xbf16, #tpu.memory_space<vmem>>, vector<15x640xbf16>
    tpu.vector_store %arg22[%c48_134, %c1280_135], %114 {strides = array<i32>} : memref<96x3200xbf16, #tpu.memory_space<vmem>>, vector<15x640xbf16>,
    %c1_136 = arith.constant 1 : index
    %c3_137 = arith.constant 3 : index
    %c0_138 = arith.constant 0 : index
    %116 = vector.load %arg12[%c1_136, %c3_137, %c0_138] : memref<2x19x896xbf16, #tpu.memory_space<vmem>>, vector<1x15x640xbf16>
    %117 = vector.shape_cast %116 : vector<1x15x640xbf16> to vector<15x640xbf16>
    %c48_139 = arith.constant 48 : index
    %c1920_140 = arith.constant 1920 : index
    %118 = vector.load %arg22[%c48_139, %c1920_140] : memref<96x3200xbf16, #tpu.memory_space<vmem>>, vector<15x640xbf16>
    tpu.vector_store %arg22[%c48_139, %c1920_140], %117 {strides = array<i32>} : memref<96x3200xbf16, #tpu.memory_space<vmem>>, vector<15x640xbf16>,
    %c1_141 = arith.constant 1 : index
    %c4_142 = arith.constant 4 : index
    %c0_143 = arith.constant 0 : index
    %119 = vector.load %arg12[%c1_141, %c4_142, %c0_143] : memref<2x19x896xbf16, #tpu.memory_space<vmem>>, vector<1x15x640xbf16>
    %120 = vector.shape_cast %119 : vector<1x15x640xbf16> to vector<15x640xbf16>
    %c48_144 = arith.constant 48 : index
    %c2560_145 = arith.constant 2560 : index
    %121 = vector.load %arg22[%c48_144, %c2560_145] : memref<96x3200xbf16, #tpu.memory_space<vmem>>, vector<15x640xbf16>
    tpu.vector_store %arg22[%c48_144, %c2560_145], %120 {strides = array<i32>} : memref<96x3200xbf16, #tpu.memory_space<vmem>>, vector<15x640xbf16>,
    %c1_146 = arith.constant 1 : index
    %c0_147 = arith.constant 0 : index
    %c128_148 = arith.constant 128 : index
    %122 = vector.load %arg12[%c1_146, %c0_147, %c128_148] : memref<2x19x896xbf16, #tpu.memory_space<vmem>>, vector<1x15x640xbf16>
    %123 = vector.shape_cast %122 : vector<1x15x640xbf16> to vector<15x640xbf16>
    %c64 = arith.constant 64 : index
    %c0_149 = arith.constant 0 : index
    %124 = vector.load %arg22[%c64, %c0_149] : memref<96x3200xbf16, #tpu.memory_space<vmem>>, vector<15x640xbf16>
    tpu.vector_store %arg22[%c64, %c0_149], %123 {strides = array<i32>} : memref<96x3200xbf16, #tpu.memory_space<vmem>>, vector<15x640xbf16>,
    %c1_150 = arith.constant 1 : index
    %c1_151 = arith.constant 1 : index
    %c128_152 = arith.constant 128 : index
    %125 = vector.load %arg12[%c1_150, %c1_151, %c128_152] : memref<2x19x896xbf16, #tpu.memory_space<vmem>>, vector<1x15x640xbf16>
    %126 = vector.shape_cast %125 : vector<1x15x640xbf16> to vector<15x640xbf16>
    %c64_153 = arith.constant 64 : index
    %c640_154 = arith.constant 640 : index
    %127 = vector.load %arg22[%c64_153, %c640_154] : memref<96x3200xbf16, #tpu.memory_space<vmem>>, vector<15x640xbf16>
    tpu.vector_store %arg22[%c64_153, %c640_154], %126 {strides = array<i32>} : memref<96x3200xbf16, #tpu.memory_space<vmem>>, vector<15x640xbf16>,
    %c1_155 = arith.constant 1 : index
    %c2_156 = arith.constant 2 : index
    %c128_157 = arith.constant 128 : index
    %128 = vector.load %arg12[%c1_155, %c2_156, %c128_157] : memref<2x19x896xbf16, #tpu.memory_space<vmem>>, vector<1x15x640xbf16>
    %129 = vector.shape_cast %128 : vector<1x15x640xbf16> to vector<15x640xbf16>
    %c64_158 = arith.constant 64 : index
    %c1280_159 = arith.constant 1280 : index
    %130 = vector.load %arg22[%c64_158, %c1280_159] : memref<96x3200xbf16, #tpu.memory_space<vmem>>, vector<15x640xbf16>
    tpu.vector_store %arg22[%c64_158, %c1280_159], %129 {strides = array<i32>} : memref<96x3200xbf16, #tpu.memory_space<vmem>>, vector<15x640xbf16>,
    %c1_160 = arith.constant 1 : index
    %c3_161 = arith.constant 3 : index
    %c128_162 = arith.constant 128 : index
    %131 = vector.load %arg12[%c1_160, %c3_161, %c128_162] : memref<2x19x896xbf16, #tpu.memory_space<vmem>>, vector<1x15x640xbf16>
    %132 = vector.shape_cast %131 : vector<1x15x640xbf16> to vector<15x640xbf16>
    %c64_163 = arith.constant 64 : index
    %c1920_164 = arith.constant 1920 : index
    %133 = vector.load %arg22[%c64_163, %c1920_164] : memref<96x3200xbf16, #tpu.memory_space<vmem>>, vector<15x640xbf16>
    tpu.vector_store %arg22[%c64_163, %c1920_164], %132 {strides = array<i32>} : memref<96x3200xbf16, #tpu.memory_space<vmem>>, vector<15x640xbf16>,
    %c1_165 = arith.constant 1 : index
    %c4_166 = arith.constant 4 : index
    %c128_167 = arith.constant 128 : index
    %134 = vector.load %arg12[%c1_165, %c4_166, %c128_167] : memref<2x19x896xbf16, #tpu.memory_space<vmem>>, vector<1x15x640xbf16>
    %135 = vector.shape_cast %134 : vector<1x15x640xbf16> to vector<15x640xbf16>
    %c64_168 = arith.constant 64 : index
    %c2560_169 = arith.constant 2560 : index
    %136 = vector.load %arg22[%c64_168, %c2560_169] : memref<96x3200xbf16, #tpu.memory_space<vmem>>, vector<15x640xbf16>
    tpu.vector_store %arg22[%c64_168, %c2560_169], %135 {strides = array<i32>} : memref<96x3200xbf16, #tpu.memory_space<vmem>>, vector<15x640xbf16>,
    %c1_170 = arith.constant 1 : index
    %c0_171 = arith.constant 0 : index
    %c256_172 = arith.constant 256 : index
    %137 = vector.load %arg12[%c1_170, %c0_171, %c256_172] : memref<2x19x896xbf16, #tpu.memory_space<vmem>>, vector<1x15x640xbf16>
    %138 = vector.shape_cast %137 : vector<1x15x640xbf16> to vector<15x640xbf16>
    %c80 = arith.constant 80 : index
    %c0_173 = arith.constant 0 : index
    %139 = vector.load %arg22[%c80, %c0_173] : memref<96x3200xbf16, #tpu.memory_space<vmem>>, vector<15x640xbf16>
    tpu.vector_store %arg22[%c80, %c0_173], %138 {strides = array<i32>} : memref<96x3200xbf16, #tpu.memory_space<vmem>>, vector<15x640xbf16>,
    %c1_174 = arith.constant 1 : index
    %c1_175 = arith.constant 1 : index
    %c256_176 = arith.constant 256 : index
    %140 = vector.load %arg12[%c1_174, %c1_175, %c256_176] : memref<2x19x896xbf16, #tpu.memory_space<vmem>>, vector<1x15x640xbf16>
    %141 = vector.shape_cast %140 : vector<1x15x640xbf16> to vector<15x640xbf16>
    %c80_177 = arith.constant 80 : index
    %c640_178 = arith.constant 640 : index
    %142 = vector.load %arg22[%c80_177, %c640_178] : memref<96x3200xbf16, #tpu.memory_space<vmem>>, vector<15x640xbf16>
    tpu.vector_store %arg22[%c80_177, %c640_178], %141 {strides = array<i32>} : memref<96x3200xbf16, #tpu.memory_space<vmem>>, vector<15x640xbf16>,
    %c1_179 = arith.constant 1 : index
    %c2_180 = arith.constant 2 : index
    %c256_181 = arith.constant 256 : index
    %143 = vector.load %arg12[%c1_179, %c2_180, %c256_181] : memref<2x19x896xbf16, #tpu.memory_space<vmem>>, vector<1x15x640xbf16>
    %144 = vector.shape_cast %143 : vector<1x15x640xbf16> to vector<15x640xbf16>
    %c80_182 = arith.constant 80 : index
    %c1280_183 = arith.constant 1280 : index
    %145 = vector.load %arg22[%c80_182, %c1280_183] : memref<96x3200xbf16, #tpu.memory_space<vmem>>, vector<15x640xbf16>
    tpu.vector_store %arg22[%c80_182, %c1280_183], %144 {strides = array<i32>} : memref<96x3200xbf16, #tpu.memory_space<vmem>>, vector<15x640xbf16>,
    %c1_184 = arith.constant 1 : index
    %c3_185 = arith.constant 3 : index
    %c256_186 = arith.constant 256 : index
    %146 = vector.load %arg12[%c1_184, %c3_185, %c256_186] : memref<2x19x896xbf16, #tpu.memory_space<vmem>>, vector<1x15x640xbf16>
    %147 = vector.shape_cast %146 : vector<1x15x640xbf16> to vector<15x640xbf16>
    %c80_187 = arith.constant 80 : index
    %c1920_188 = arith.constant 1920 : index
    %148 = vector.load %arg22[%c80_187, %c1920_188] : memref<96x3200xbf16, #tpu.memory_space<vmem>>, vector<15x640xbf16>
    tpu.vector_store %arg22[%c80_187, %c1920_188], %147 {strides = array<i32>} : memref<96x3200xbf16, #tpu.memory_space<vmem>>, vector<15x640xbf16>,
    %c1_189 = arith.constant 1 : index
    %c4_190 = arith.constant 4 : index
    %c256_191 = arith.constant 256 : index
    %149 = vector.load %arg12[%c1_189, %c4_190, %c256_191] : memref<2x19x896xbf16, #tpu.memory_space<vmem>>, vector<1x15x640xbf16>
    %150 = vector.shape_cast %149 : vector<1x15x640xbf16> to vector<15x640xbf16>
    %c80_192 = arith.constant 80 : index
    %c2560_193 = arith.constant 2560 : index
    %151 = vector.load %arg22[%c80_192, %c2560_193] : memref<96x3200xbf16, #tpu.memory_space<vmem>>, vector<15x640xbf16>
    tpu.vector_store %arg22[%c80_192, %c2560_193], %150 {strides = array<i32>} : memref<96x3200xbf16, #tpu.memory_space<vmem>>, vector<15x640xbf16>,
    %c0_i32_194 = arith.constant 0 : i32
    %152 = tpu.memref_slice %arg20[%c0_i32_194] : memref<3x!tpu.dma_semaphore, #tpu.memory_space<semaphore_mem>> -> memref<1x!tpu.dma_semaphore, #tpu.memory_space<semaphore_mem>>
    %153 = tpu.memref_squeeze %152 : memref<1x!tpu.dma_semaphore, #tpu.memory_space<semaphore_mem>> -> memref<!tpu.dma_semaphore, #tpu.memory_space<semaphore_mem>>
    tpu.wait_dma2 semaphore(%153 : memref<!tpu.dma_semaphore, #tpu.memory_space<semaphore_mem>>) src(%arg9 : memref<3200x128xbf16, #tpu.memory_space<any>>) dst(%arg17 : memref<3200x128xbf16, #tpu.memory_space<vmem>>)
    %c0_195 = arith.constant 0 : index
    %c0_196 = arith.constant 0 : index
    %154 = vector.load %arg22[%c0_195, %c0_196] : memref<96x3200xbf16, #tpu.memory_space<vmem>>, vector<96x3200xbf16>
    %c0_197 = arith.constant 0 : index
    %c0_198 = arith.constant 0 : index
    %155 = vector.load %arg17[%c0_197, %c0_198] : memref<3200x128xbf16, #tpu.memory_space<vmem>>, vector<3200x128xbf16>
    %cst_199 = arith.constant dense<0.000000e+00> : vector<96x128xf32>
    %156 = tpu.matmul %154, %155, %cst_199 {dimension_numbers = #tpu.dot_dimension_numbers<[1], [0], [0], [1], [0, 0, 1, 1], [], []>} : vector<96x3200xbf16>, vector<3200x128xbf16>, vector<96x128xf32> -> vector<96x128xf32>
    %c0_200 = arith.constant 0 : index
    %c0_201 = arith.constant 0 : index
    %157 = vector.load %arg4[%c0_200, %c0_201] : memref<1x128xf32, #tpu.memory_space<vmem>>, vector<1x128xf32>
    %158 = vector.broadcast %157 : vector<1x128xf32> to vector<96x128xf32>
    %159 = arith.addf %156, %158 : vector<96x128xf32>
    %cst_202 = arith.constant 0.000000e+00 : f32
    %160 = vector.broadcast %cst_202 : f32 to vector<96x128xf32>
    %161 = arith.maximumf %159, %160 : vector<96x128xf32>
    %162 = arith.truncf %161 : vector<96x128xf32> to vector<96x128xbf16>
    %163 = vector.extract_strided_slice %162 {offsets = [0, 0], sizes = [15, 128], strides = [1, 1]} : vector<96x128xbf16> to vector<15x128xbf16>
    %c0_203 = arith.constant 0 : index
    %c0_204 = arith.constant 0 : index
    %c0_205 = arith.constant 0 : index
    %164 = vector.load %arg13[%c0_203, %c0_204, %c0_205] : memref<2x15x384xbf16, #tpu.memory_space<vmem>>, vector<1x15x128xbf16>
    %165 = vector.shape_cast %164 : vector<1x15x128xbf16> to vector<15x128xbf16>
    %166 = vector.shape_cast %163 : vector<15x128xbf16> to vector<1x15x128xbf16>
    tpu.vector_store %arg13[%c0_203, %c0_204, %c0_205], %166 {strides = array<i32>} : memref<2x15x384xbf16, #tpu.memory_space<vmem>>, vector<1x15x128xbf16>,
    %167 = vector.extract_strided_slice %162 {offsets = [16, 0], sizes = [15, 128], strides = [1, 1]} : vector<96x128xbf16> to vector<15x128xbf16>
    %c0_206 = arith.constant 0 : index
    %c0_207 = arith.constant 0 : index
    %c128_208 = arith.constant 128 : index
    %168 = vector.load %arg13[%c0_206, %c0_207, %c128_208] : memref<2x15x384xbf16, #tpu.memory_space<vmem>>, vector<1x15x128xbf16>
    %169 = vector.shape_cast %168 : vector<1x15x128xbf16> to vector<15x128xbf16>
    %170 = vector.shape_cast %167 : vector<15x128xbf16> to vector<1x15x128xbf16>
    tpu.vector_store %arg13[%c0_206, %c0_207, %c128_208], %170 {strides = array<i32>} : memref<2x15x384xbf16, #tpu.memory_space<vmem>>, vector<1x15x128xbf16>,
    %171 = vector.extract_strided_slice %162 {offsets = [32, 0], sizes = [15, 128], strides = [1, 1]} : vector<96x128xbf16> to vector<15x128xbf16>
    %c0_209 = arith.constant 0 : index
    %c0_210 = arith.constant 0 : index
    %c256_211 = arith.constant 256 : index
    %172 = vector.load %arg13[%c0_209, %c0_210, %c256_211] : memref<2x15x384xbf16, #tpu.memory_space<vmem>>, vector<1x15x128xbf16>
    %173 = vector.shape_cast %172 : vector<1x15x128xbf16> to vector<15x128xbf16>
    %174 = vector.shape_cast %171 : vector<15x128xbf16> to vector<1x15x128xbf16>
    tpu.vector_store %arg13[%c0_209, %c0_210, %c256_211], %174 {strides = array<i32>} : memref<2x15x384xbf16, #tpu.memory_space<vmem>>, vector<1x15x128xbf16>,
    %175 = vector.extract_strided_slice %162 {offsets = [48, 0], sizes = [15, 128], strides = [1, 1]} : vector<96x128xbf16> to vector<15x128xbf16>
    %c1_212 = arith.constant 1 : index
    %c0_213 = arith.constant 0 : index
    %c0_214 = arith.constant 0 : index
    %176 = vector.load %arg13[%c1_212, %c0_213, %c0_214] : memref<2x15x384xbf16, #tpu.memory_space<vmem>>, vector<1x15x128xbf16>
    %177 = vector.shape_cast %176 : vector<1x15x128xbf16> to vector<15x128xbf16>
    %178 = vector.shape_cast %175 : vector<15x128xbf16> to vector<1x15x128xbf16>
    tpu.vector_store %arg13[%c1_212, %c0_213, %c0_214], %178 {strides = array<i32>} : memref<2x15x384xbf16, #tpu.memory_space<vmem>>, vector<1x15x128xbf16>,
    %179 = vector.extract_strided_slice %162 {offsets = [64, 0], sizes = [15, 128], strides = [1, 1]} : vector<96x128xbf16> to vector<15x128xbf16>
    %c1_215 = arith.constant 1 : index
    %c0_216 = arith.constant 0 : index
    %c128_217 = arith.constant 128 : index
    %180 = vector.load %arg13[%c1_215, %c0_216, %c128_217] : memref<2x15x384xbf16, #tpu.memory_space<vmem>>, vector<1x15x128xbf16>
    %181 = vector.shape_cast %180 : vector<1x15x128xbf16> to vector<15x128xbf16>
    %182 = vector.shape_cast %179 : vector<15x128xbf16> to vector<1x15x128xbf16>
    tpu.vector_store %arg13[%c1_215, %c0_216, %c128_217], %182 {strides = array<i32>} : memref<2x15x384xbf16, #tpu.memory_space<vmem>>, vector<1x15x128xbf16>,
    %183 = vector.extract_strided_slice %162 {offsets = [80, 0], sizes = [15, 128], strides = [1, 1]} : vector<96x128xbf16> to vector<15x128xbf16>
    %c1_218 = arith.constant 1 : index
    %c0_219 = arith.constant 0 : index
    %c256_220 = arith.constant 256 : index
    %184 = vector.load %arg13[%c1_218, %c0_219, %c256_220] : memref<2x15x384xbf16, #tpu.memory_space<vmem>>, vector<1x15x128xbf16>
    %185 = vector.shape_cast %184 : vector<1x15x128xbf16> to vector<15x128xbf16>
    %186 = vector.shape_cast %183 : vector<15x128xbf16> to vector<1x15x128xbf16>
    tpu.vector_store %arg13[%c1_218, %c0_219, %c256_220], %186 {strides = array<i32>} : memref<2x15x384xbf16, #tpu.memory_space<vmem>>, vector<1x15x128xbf16>,
    %c0_221 = arith.constant 0 : index
    %c0_222 = arith.constant 0 : index
    %c0_223 = arith.constant 0 : index
    %187 = vector.load %arg13[%c0_221, %c0_222, %c0_223] : memref<2x15x384xbf16, #tpu.memory_space<vmem>>, vector<1x13x384xbf16>
    %188 = vector.shape_cast %187 : vector<1x13x384xbf16> to vector<13x384xbf16>
    %c0_224 = arith.constant 0 : index
    %c0_225 = arith.constant 0 : index
    %189 = vector.load %arg23[%c0_224, %c0_225] : memref<32x1152xbf16, #tpu.memory_space<vmem>>, vector<13x384xbf16>
    tpu.vector_store %arg23[%c0_224, %c0_225], %188 {strides = array<i32>} : memref<32x1152xbf16, #tpu.memory_space<vmem>>, vector<13x384xbf16>,
    %c0_226 = arith.constant 0 : index
    %c1_227 = arith.constant 1 : index
    %c0_228 = arith.constant 0 : index
    %190 = vector.load %arg13[%c0_226, %c1_227, %c0_228] : memref<2x15x384xbf16, #tpu.memory_space<vmem>>, vector<1x13x384xbf16>
    %191 = vector.shape_cast %190 : vector<1x13x384xbf16> to vector<13x384xbf16>
    %c0_229 = arith.constant 0 : index
    %c384_230 = arith.constant 384 : index
    %192 = vector.load %arg23[%c0_229, %c384_230] : memref<32x1152xbf16, #tpu.memory_space<vmem>>, vector<13x384xbf16>
    tpu.vector_store %arg23[%c0_229, %c384_230], %191 {strides = array<i32>} : memref<32x1152xbf16, #tpu.memory_space<vmem>>, vector<13x384xbf16>,
    %c0_231 = arith.constant 0 : index
    %c2_232 = arith.constant 2 : index
    %c0_233 = arith.constant 0 : index
    %193 = vector.load %arg13[%c0_231, %c2_232, %c0_233] : memref<2x15x384xbf16, #tpu.memory_space<vmem>>, vector<1x13x384xbf16>
    %194 = vector.shape_cast %193 : vector<1x13x384xbf16> to vector<13x384xbf16>
    %c0_234 = arith.constant 0 : index
    %c768_235 = arith.constant 768 : index
    %195 = vector.load %arg23[%c0_234, %c768_235] : memref<32x1152xbf16, #tpu.memory_space<vmem>>, vector<13x384xbf16>
    tpu.vector_store %arg23[%c0_234, %c768_235], %194 {strides = array<i32>} : memref<32x1152xbf16, #tpu.memory_space<vmem>>, vector<13x384xbf16>,
    %c1_236 = arith.constant 1 : index
    %c0_237 = arith.constant 0 : index
    %c0_238 = arith.constant 0 : index
    %196 = vector.load %arg13[%c1_236, %c0_237, %c0_238] : memref<2x15x384xbf16, #tpu.memory_space<vmem>>, vector<1x13x384xbf16>
    %197 = vector.shape_cast %196 : vector<1x13x384xbf16> to vector<13x384xbf16>
    %c16_239 = arith.constant 16 : index
    %c0_240 = arith.constant 0 : index
    %198 = vector.load %arg23[%c16_239, %c0_240] : memref<32x1152xbf16, #tpu.memory_space<vmem>>, vector<13x384xbf16>
    tpu.vector_store %arg23[%c16_239, %c0_240], %197 {strides = array<i32>} : memref<32x1152xbf16, #tpu.memory_space<vmem>>, vector<13x384xbf16>,
    %c1_241 = arith.constant 1 : index
    %c1_242 = arith.constant 1 : index
    %c0_243 = arith.constant 0 : index
    %199 = vector.load %arg13[%c1_241, %c1_242, %c0_243] : memref<2x15x384xbf16, #tpu.memory_space<vmem>>, vector<1x13x384xbf16>
    %200 = vector.shape_cast %199 : vector<1x13x384xbf16> to vector<13x384xbf16>
    %c16_244 = arith.constant 16 : index
    %c384_245 = arith.constant 384 : index
    %201 = vector.load %arg23[%c16_244, %c384_245] : memref<32x1152xbf16, #tpu.memory_space<vmem>>, vector<13x384xbf16>
    tpu.vector_store %arg23[%c16_244, %c384_245], %200 {strides = array<i32>} : memref<32x1152xbf16, #tpu.memory_space<vmem>>, vector<13x384xbf16>,
    %c1_246 = arith.constant 1 : index
    %c2_247 = arith.constant 2 : index
    %c0_248 = arith.constant 0 : index
    %202 = vector.load %arg13[%c1_246, %c2_247, %c0_248] : memref<2x15x384xbf16, #tpu.memory_space<vmem>>, vector<1x13x384xbf16>
    %203 = vector.shape_cast %202 : vector<1x13x384xbf16> to vector<13x384xbf16>
    %c16_249 = arith.constant 16 : index
    %c768_250 = arith.constant 768 : index
    %204 = vector.load %arg23[%c16_249, %c768_250] : memref<32x1152xbf16, #tpu.memory_space<vmem>>, vector<13x384xbf16>
    tpu.vector_store %arg23[%c16_249, %c768_250], %203 {strides = array<i32>} : memref<32x1152xbf16, #tpu.memory_space<vmem>>, vector<13x384xbf16>,
    %c1_i32_251 = arith.constant 1 : i32
    %205 = tpu.memref_slice %arg20[%c1_i32_251] : memref<3x!tpu.dma_semaphore, #tpu.memory_space<semaphore_mem>> -> memref<1x!tpu.dma_semaphore, #tpu.memory_space<semaphore_mem>>
    %206 = tpu.memref_squeeze %205 : memref<1x!tpu.dma_semaphore, #tpu.memory_space<semaphore_mem>> -> memref<!tpu.dma_semaphore, #tpu.memory_space<semaphore_mem>>
    tpu.wait_dma2 semaphore(%206 : memref<!tpu.dma_semaphore, #tpu.memory_space<semaphore_mem>>) src(%arg10 : memref<1152x128xbf16, #tpu.memory_space<any>>) dst(%arg18 : memref<1152x128xbf16, #tpu.memory_space<vmem>>)
    %c0_252 = arith.constant 0 : index
    %c0_253 = arith.constant 0 : index
    %207 = vector.load %arg23[%c0_252, %c0_253] : memref<32x1152xbf16, #tpu.memory_space<vmem>>, vector<32x1152xbf16>
    %c0_254 = arith.constant 0 : index
    %c0_255 = arith.constant 0 : index
    %208 = vector.load %arg18[%c0_254, %c0_255] : memref<1152x128xbf16, #tpu.memory_space<vmem>>, vector<1152x128xbf16>
    %cst_256 = arith.constant dense<0.000000e+00> : vector<32x128xf32>
    %209 = tpu.matmul %207, %208, %cst_256 {dimension_numbers = #tpu.dot_dimension_numbers<[1], [0], [0], [1], [0, 0, 1, 1], [], []>} : vector<32x1152xbf16>, vector<1152x128xbf16>, vector<32x128xf32> -> vector<32x128xf32>
    %c0_257 = arith.constant 0 : index
    %c0_258 = arith.constant 0 : index
    %210 = vector.load %arg5[%c0_257, %c0_258] : memref<1x128xf32, #tpu.memory_space<vmem>>, vector<1x128xf32>
    %211 = vector.broadcast %210 : vector<1x128xf32> to vector<32x128xf32>
    %212 = arith.addf %209, %211 : vector<32x128xf32>
    %cst_259 = arith.constant 0.000000e+00 : f32
    %213 = vector.broadcast %cst_259 : f32 to vector<32x128xf32>
    %214 = arith.maximumf %212, %213 : vector<32x128xf32>
    %215 = arith.truncf %214 : vector<32x128xf32> to vector<32x128xbf16>
    %c0_260 = arith.constant 0 : index
    %c0_261 = arith.constant 0 : index
    %216 = vector.load %arg24[%c0_260, %c0_261] : memref<32x128xbf16, #tpu.memory_space<vmem>>, vector<32x128xbf16>
    tpu.vector_store %arg24[%c0_260, %c0_261], %215 {strides = array<i32>} : memref<32x128xbf16, #tpu.memory_space<vmem>>, vector<32x128xbf16>,
    %c0_262 = arith.constant 0 : index
    %c0_263 = arith.constant 0 : index
    %217 = vector.load %arg24[%c0_262, %c0_263] : memref<32x128xbf16, #tpu.memory_space<vmem>>, vector<1x128xbf16>
    %c0_264 = arith.constant 0 : index
    %c0_265 = arith.constant 0 : index
    %218 = vector.load %arg14[%c0_264, %c0_265] : memref<2x1664xbf16, #tpu.memory_space<vmem>>, vector<1x128xbf16>
    tpu.vector_store %arg14[%c0_264, %c0_265], %217 {strides = array<i32>} : memref<2x1664xbf16, #tpu.memory_space<vmem>>, vector<1x128xbf16>,
    %c1_266 = arith.constant 1 : index
    %c0_267 = arith.constant 0 : index
    %219 = vector.load %arg24[%c1_266, %c0_267] : memref<32x128xbf16, #tpu.memory_space<vmem>>, vector<1x128xbf16>
    %c0_268 = arith.constant 0 : index
    %c128_269 = arith.constant 128 : index
    %220 = vector.load %arg14[%c0_268, %c128_269] : memref<2x1664xbf16, #tpu.memory_space<vmem>>, vector<1x128xbf16>
    tpu.vector_store %arg14[%c0_268, %c128_269], %219 {strides = array<i32>} : memref<2x1664xbf16, #tpu.memory_space<vmem>>, vector<1x128xbf16>,
    %c2_270 = arith.constant 2 : index
    %c0_271 = arith.constant 0 : index
    %221 = vector.load %arg24[%c2_270, %c0_271] : memref<32x128xbf16, #tpu.memory_space<vmem>>, vector<1x128xbf16>
    %c0_272 = arith.constant 0 : index
    %c256_273 = arith.constant 256 : index
    %222 = vector.load %arg14[%c0_272, %c256_273] : memref<2x1664xbf16, #tpu.memory_space<vmem>>, vector<1x128xbf16>
    tpu.vector_store %arg14[%c0_272, %c256_273], %221 {strides = array<i32>} : memref<2x1664xbf16, #tpu.memory_space<vmem>>, vector<1x128xbf16>,
    %c3_274 = arith.constant 3 : index
    %c0_275 = arith.constant 0 : index
    %223 = vector.load %arg24[%c3_274, %c0_275] : memref<32x128xbf16, #tpu.memory_space<vmem>>, vector<1x128xbf16>
    %c0_276 = arith.constant 0 : index
    %c384_277 = arith.constant 384 : index
    %224 = vector.load %arg14[%c0_276, %c384_277] : memref<2x1664xbf16, #tpu.memory_space<vmem>>, vector<1x128xbf16>
    tpu.vector_store %arg14[%c0_276, %c384_277], %223 {strides = array<i32>} : memref<2x1664xbf16, #tpu.memory_space<vmem>>, vector<1x128xbf16>,
    %c4_278 = arith.constant 4 : index
    %c0_279 = arith.constant 0 : index
    %225 = vector.load %arg24[%c4_278, %c0_279] : memref<32x128xbf16, #tpu.memory_space<vmem>>, vector<1x128xbf16>
    %c0_280 = arith.constant 0 : index
    %c512_281 = arith.constant 512 : index
    %226 = vector.load %arg14[%c0_280, %c512_281] : memref<2x1664xbf16, #tpu.memory_space<vmem>>, vector<1x128xbf16>
    tpu.vector_store %arg14[%c0_280, %c512_281], %225 {strides = array<i32>} : memref<2x1664xbf16, #tpu.memory_space<vmem>>, vector<1x128xbf16>,
    %c5 = arith.constant 5 : index
    %c0_282 = arith.constant 0 : index
    %227 = vector.load %arg24[%c5, %c0_282] : memref<32x128xbf16, #tpu.memory_space<vmem>>, vector<1x128xbf16>
    %c0_283 = arith.constant 0 : index
    %c640_284 = arith.constant 640 : index
    %228 = vector.load %arg14[%c0_283, %c640_284] : memref<2x1664xbf16, #tpu.memory_space<vmem>>, vector<1x128xbf16>
    tpu.vector_store %arg14[%c0_283, %c640_284], %227 {strides = array<i32>} : memref<2x1664xbf16, #tpu.memory_space<vmem>>, vector<1x128xbf16>,
    %c6 = arith.constant 6 : index
    %c0_285 = arith.constant 0 : index
    %229 = vector.load %arg24[%c6, %c0_285] : memref<32x128xbf16, #tpu.memory_space<vmem>>, vector<1x128xbf16>
    %c0_286 = arith.constant 0 : index
    %c768_287 = arith.constant 768 : index
    %230 = vector.load %arg14[%c0_286, %c768_287] : memref<2x1664xbf16, #tpu.memory_space<vmem>>, vector<1x128xbf16>
    tpu.vector_store %arg14[%c0_286, %c768_287], %229 {strides = array<i32>} : memref<2x1664xbf16, #tpu.memory_space<vmem>>, vector<1x128xbf16>,
    %c7 = arith.constant 7 : index
    %c0_288 = arith.constant 0 : index
    %231 = vector.load %arg24[%c7, %c0_288] : memref<32x128xbf16, #tpu.memory_space<vmem>>, vector<1x128xbf16>
    %c0_289 = arith.constant 0 : index
    %c896 = arith.constant 896 : index
    %232 = vector.load %arg14[%c0_289, %c896] : memref<2x1664xbf16, #tpu.memory_space<vmem>>, vector<1x128xbf16>
    tpu.vector_store %arg14[%c0_289, %c896], %231 {strides = array<i32>} : memref<2x1664xbf16, #tpu.memory_space<vmem>>, vector<1x128xbf16>,
    %c8 = arith.constant 8 : index
    %c0_290 = arith.constant 0 : index
    %233 = vector.load %arg24[%c8, %c0_290] : memref<32x128xbf16, #tpu.memory_space<vmem>>, vector<1x128xbf16>
    %c0_291 = arith.constant 0 : index
    %c1024 = arith.constant 1024 : index
    %234 = vector.load %arg14[%c0_291, %c1024] : memref<2x1664xbf16, #tpu.memory_space<vmem>>, vector<1x128xbf16>
    tpu.vector_store %arg14[%c0_291, %c1024], %233 {strides = array<i32>} : memref<2x1664xbf16, #tpu.memory_space<vmem>>, vector<1x128xbf16>,
    %c9 = arith.constant 9 : index
    %c0_292 = arith.constant 0 : index
    %235 = vector.load %arg24[%c9, %c0_292] : memref<32x128xbf16, #tpu.memory_space<vmem>>, vector<1x128xbf16>
    %c0_293 = arith.constant 0 : index
    %c1152 = arith.constant 1152 : index
    %236 = vector.load %arg14[%c0_293, %c1152] : memref<2x1664xbf16, #tpu.memory_space<vmem>>, vector<1x128xbf16>
    tpu.vector_store %arg14[%c0_293, %c1152], %235 {strides = array<i32>} : memref<2x1664xbf16, #tpu.memory_space<vmem>>, vector<1x128xbf16>,
    %c10 = arith.constant 10 : index
    %c0_294 = arith.constant 0 : index
    %237 = vector.load %arg24[%c10, %c0_294] : memref<32x128xbf16, #tpu.memory_space<vmem>>, vector<1x128xbf16>
    %c0_295 = arith.constant 0 : index
    %c1280_296 = arith.constant 1280 : index
    %238 = vector.load %arg14[%c0_295, %c1280_296] : memref<2x1664xbf16, #tpu.memory_space<vmem>>, vector<1x128xbf16>
    tpu.vector_store %arg14[%c0_295, %c1280_296], %237 {strides = array<i32>} : memref<2x1664xbf16, #tpu.memory_space<vmem>>, vector<1x128xbf16>,
    %c11 = arith.constant 11 : index
    %c0_297 = arith.constant 0 : index
    %239 = vector.load %arg24[%c11, %c0_297] : memref<32x128xbf16, #tpu.memory_space<vmem>>, vector<1x128xbf16>
    %c0_298 = arith.constant 0 : index
    %c1408 = arith.constant 1408 : index
    %240 = vector.load %arg14[%c0_298, %c1408] : memref<2x1664xbf16, #tpu.memory_space<vmem>>, vector<1x128xbf16>
    tpu.vector_store %arg14[%c0_298, %c1408], %239 {strides = array<i32>} : memref<2x1664xbf16, #tpu.memory_space<vmem>>, vector<1x128xbf16>,
    %c12 = arith.constant 12 : index
    %c0_299 = arith.constant 0 : index
    %241 = vector.load %arg24[%c12, %c0_299] : memref<32x128xbf16, #tpu.memory_space<vmem>>, vector<1x128xbf16>
    %c0_300 = arith.constant 0 : index
    %c1536 = arith.constant 1536 : index
    %242 = vector.load %arg14[%c0_300, %c1536] : memref<2x1664xbf16, #tpu.memory_space<vmem>>, vector<1x128xbf16>
    tpu.vector_store %arg14[%c0_300, %c1536], %241 {strides = array<i32>} : memref<2x1664xbf16, #tpu.memory_space<vmem>>, vector<1x128xbf16>,
    %c16_301 = arith.constant 16 : index
    %c0_302 = arith.constant 0 : index
    %243 = vector.load %arg24[%c16_301, %c0_302] : memref<32x128xbf16, #tpu.memory_space<vmem>>, vector<1x128xbf16>
    %c1_303 = arith.constant 1 : index
    %c0_304 = arith.constant 0 : index
    %244 = vector.load %arg14[%c1_303, %c0_304] : memref<2x1664xbf16, #tpu.memory_space<vmem>>, vector<1x128xbf16>
    tpu.vector_store %arg14[%c1_303, %c0_304], %243 {strides = array<i32>} : memref<2x1664xbf16, #tpu.memory_space<vmem>>, vector<1x128xbf16>,
    %c17_305 = arith.constant 17 : index
    %c0_306 = arith.constant 0 : index
    %245 = vector.load %arg24[%c17_305, %c0_306] : memref<32x128xbf16, #tpu.memory_space<vmem>>, vector<1x128xbf16>
    %c1_307 = arith.constant 1 : index
    %c128_308 = arith.constant 128 : index
    %246 = vector.load %arg14[%c1_307, %c128_308] : memref<2x1664xbf16, #tpu.memory_space<vmem>>, vector<1x128xbf16>
    tpu.vector_store %arg14[%c1_307, %c128_308], %245 {strides = array<i32>} : memref<2x1664xbf16, #tpu.memory_space<vmem>>, vector<1x128xbf16>,
    %c18_309 = arith.constant 18 : index
    %c0_310 = arith.constant 0 : index
    %247 = vector.load %arg24[%c18_309, %c0_310] : memref<32x128xbf16, #tpu.memory_space<vmem>>, vector<1x128xbf16>
    %c1_311 = arith.constant 1 : index
    %c256_312 = arith.constant 256 : index
    %248 = vector.load %arg14[%c1_311, %c256_312] : memref<2x1664xbf16, #tpu.memory_space<vmem>>, vector<1x128xbf16>
    tpu.vector_store %arg14[%c1_311, %c256_312], %247 {strides = array<i32>} : memref<2x1664xbf16, #tpu.memory_space<vmem>>, vector<1x128xbf16>,
    %c19 = arith.constant 19 : index
    %c0_313 = arith.constant 0 : index
    %249 = vector.load %arg24[%c19, %c0_313] : memref<32x128xbf16, #tpu.memory_space<vmem>>, vector<1x128xbf16>
    %c1_314 = arith.constant 1 : index
    %c384_315 = arith.constant 384 : index
    %250 = vector.load %arg14[%c1_314, %c384_315] : memref<2x1664xbf16, #tpu.memory_space<vmem>>, vector<1x128xbf16>
    tpu.vector_store %arg14[%c1_314, %c384_315], %249 {strides = array<i32>} : memref<2x1664xbf16, #tpu.memory_space<vmem>>, vector<1x128xbf16>,
    %c20 = arith.constant 20 : index
    %c0_316 = arith.constant 0 : index
    %251 = vector.load %arg24[%c20, %c0_316] : memref<32x128xbf16, #tpu.memory_space<vmem>>, vector<1x128xbf16>
    %c1_317 = arith.constant 1 : index
    %c512_318 = arith.constant 512 : index
    %252 = vector.load %arg14[%c1_317, %c512_318] : memref<2x1664xbf16, #tpu.memory_space<vmem>>, vector<1x128xbf16>
    tpu.vector_store %arg14[%c1_317, %c512_318], %251 {strides = array<i32>} : memref<2x1664xbf16, #tpu.memory_space<vmem>>, vector<1x128xbf16>,
    %c21 = arith.constant 21 : index
    %c0_319 = arith.constant 0 : index
    %253 = vector.load %arg24[%c21, %c0_319] : memref<32x128xbf16, #tpu.memory_space<vmem>>, vector<1x128xbf16>
    %c1_320 = arith.constant 1 : index
    %c640_321 = arith.constant 640 : index
    %254 = vector.load %arg14[%c1_320, %c640_321] : memref<2x1664xbf16, #tpu.memory_space<vmem>>, vector<1x128xbf16>
    tpu.vector_store %arg14[%c1_320, %c640_321], %253 {strides = array<i32>} : memref<2x1664xbf16, #tpu.memory_space<vmem>>, vector<1x128xbf16>,
    %c22 = arith.constant 22 : index
    %c0_322 = arith.constant 0 : index
    %255 = vector.load %arg24[%c22, %c0_322] : memref<32x128xbf16, #tpu.memory_space<vmem>>, vector<1x128xbf16>
    %c1_323 = arith.constant 1 : index
    %c768_324 = arith.constant 768 : index
    %256 = vector.load %arg14[%c1_323, %c768_324] : memref<2x1664xbf16, #tpu.memory_space<vmem>>, vector<1x128xbf16>
    tpu.vector_store %arg14[%c1_323, %c768_324], %255 {strides = array<i32>} : memref<2x1664xbf16, #tpu.memory_space<vmem>>, vector<1x128xbf16>,
    %c23 = arith.constant 23 : index
    %c0_325 = arith.constant 0 : index
    %257 = vector.load %arg24[%c23, %c0_325] : memref<32x128xbf16, #tpu.memory_space<vmem>>, vector<1x128xbf16>
    %c1_326 = arith.constant 1 : index
    %c896_327 = arith.constant 896 : index
    %258 = vector.load %arg14[%c1_326, %c896_327] : memref<2x1664xbf16, #tpu.memory_space<vmem>>, vector<1x128xbf16>
    tpu.vector_store %arg14[%c1_326, %c896_327], %257 {strides = array<i32>} : memref<2x1664xbf16, #tpu.memory_space<vmem>>, vector<1x128xbf16>,
    %c24 = arith.constant 24 : index
    %c0_328 = arith.constant 0 : index
    %259 = vector.load %arg24[%c24, %c0_328] : memref<32x128xbf16, #tpu.memory_space<vmem>>, vector<1x128xbf16>
    %c1_329 = arith.constant 1 : index
    %c1024_330 = arith.constant 1024 : index
    %260 = vector.load %arg14[%c1_329, %c1024_330] : memref<2x1664xbf16, #tpu.memory_space<vmem>>, vector<1x128xbf16>
    tpu.vector_store %arg14[%c1_329, %c1024_330], %259 {strides = array<i32>} : memref<2x1664xbf16, #tpu.memory_space<vmem>>, vector<1x128xbf16>,
    %c25 = arith.constant 25 : index
    %c0_331 = arith.constant 0 : index
    %261 = vector.load %arg24[%c25, %c0_331] : memref<32x128xbf16, #tpu.memory_space<vmem>>, vector<1x128xbf16>
    %c1_332 = arith.constant 1 : index
    %c1152_333 = arith.constant 1152 : index
    %262 = vector.load %arg14[%c1_332, %c1152_333] : memref<2x1664xbf16, #tpu.memory_space<vmem>>, vector<1x128xbf16>
    tpu.vector_store %arg14[%c1_332, %c1152_333], %261 {strides = array<i32>} : memref<2x1664xbf16, #tpu.memory_space<vmem>>, vector<1x128xbf16>,
    %c26 = arith.constant 26 : index
    %c0_334 = arith.constant 0 : index
    %263 = vector.load %arg24[%c26, %c0_334] : memref<32x128xbf16, #tpu.memory_space<vmem>>, vector<1x128xbf16>
    %c1_335 = arith.constant 1 : index
    %c1280_336 = arith.constant 1280 : index
    %264 = vector.load %arg14[%c1_335, %c1280_336] : memref<2x1664xbf16, #tpu.memory_space<vmem>>, vector<1x128xbf16>
    tpu.vector_store %arg14[%c1_335, %c1280_336], %263 {strides = array<i32>} : memref<2x1664xbf16, #tpu.memory_space<vmem>>, vector<1x128xbf16>,
    %c27 = arith.constant 27 : index
    %c0_337 = arith.constant 0 : index
    %265 = vector.load %arg24[%c27, %c0_337] : memref<32x128xbf16, #tpu.memory_space<vmem>>, vector<1x128xbf16>
    %c1_338 = arith.constant 1 : index
    %c1408_339 = arith.constant 1408 : index
    %266 = vector.load %arg14[%c1_338, %c1408_339] : memref<2x1664xbf16, #tpu.memory_space<vmem>>, vector<1x128xbf16>
    tpu.vector_store %arg14[%c1_338, %c1408_339], %265 {strides = array<i32>} : memref<2x1664xbf16, #tpu.memory_space<vmem>>, vector<1x128xbf16>,
    %c28 = arith.constant 28 : index
    %c0_340 = arith.constant 0 : index
    %267 = vector.load %arg24[%c28, %c0_340] : memref<32x128xbf16, #tpu.memory_space<vmem>>, vector<1x128xbf16>
    %c1_341 = arith.constant 1 : index
    %c1536_342 = arith.constant 1536 : index
    %268 = vector.load %arg14[%c1_341, %c1536_342] : memref<2x1664xbf16, #tpu.memory_space<vmem>>, vector<1x128xbf16>
    tpu.vector_store %arg14[%c1_341, %c1536_342], %267 {strides = array<i32>} : memref<2x1664xbf16, #tpu.memory_space<vmem>>, vector<1x128xbf16>,
    %c2_i32_343 = arith.constant 2 : i32
    %269 = tpu.memref_slice %arg20[%c2_i32_343] : memref<3x!tpu.dma_semaphore, #tpu.memory_space<semaphore_mem>> -> memref<1x!tpu.dma_semaphore, #tpu.memory_space<semaphore_mem>>
    %270 = tpu.memref_squeeze %269 : memref<1x!tpu.dma_semaphore, #tpu.memory_space<semaphore_mem>> -> memref<!tpu.dma_semaphore, #tpu.memory_space<semaphore_mem>>
    tpu.wait_dma2 semaphore(%270 : memref<!tpu.dma_semaphore, #tpu.memory_space<semaphore_mem>>) src(%arg11 : memref<1664x192xbf16, #tpu.memory_space<any>>) dst(%arg19 : memref<1664x192xbf16, #tpu.memory_space<vmem>>)
    %c0_344 = arith.constant 0 : index
    %c0_345 = arith.constant 0 : index
    %271 = vector.load %arg14[%c0_344, %c0_345] : memref<2x1664xbf16, #tpu.memory_space<vmem>>, vector<2x1664xbf16>
    %c0_346 = arith.constant 0 : index
    %c0_347 = arith.constant 0 : index
    %272 = vector.load %arg19[%c0_346, %c0_347] : memref<1664x192xbf16, #tpu.memory_space<vmem>>, vector<1664x192xbf16>
    %cst_348 = arith.constant dense<0.000000e+00> : vector<2x192xf32>
    %273 = tpu.matmul %271, %272, %cst_348 {dimension_numbers = #tpu.dot_dimension_numbers<[1], [0], [0], [1], [0, 0, 1, 1], [], []>} : vector<2x1664xbf16>, vector<1664x192xbf16>, vector<2x192xf32> -> vector<2x192xf32>
    %c0_349 = arith.constant 0 : index
    %c0_350 = arith.constant 0 : index
    %274 = vector.load %arg6[%c0_349, %c0_350] : memref<1x192xf32, #tpu.memory_space<vmem>>, vector<1x192xf32>
    %275 = vector.broadcast %274 : vector<1x192xf32> to vector<2x192xf32>
    %276 = arith.addf %273, %275 : vector<2x192xf32>
    %cst_351 = arith.constant 0.000000e+00 : f32
    %277 = vector.broadcast %cst_351 : f32 to vector<2x192xf32>
    %278 = arith.maximumf %276, %277 : vector<2x192xf32>
    %c0_352 = arith.constant 0 : index
    %c0_353 = arith.constant 0 : index
    %279 = vector.load %arg15[%c0_352, %c0_353] : memref<2x192xf32, #tpu.memory_space<vmem>>, vector<2x192xf32>
    tpu.vector_store %arg15[%c0_352, %c0_353], %278 {strides = array<i32>} : memref<2x192xf32, #tpu.memory_space<vmem>>, vector<2x192xf32>,
    %c0_354 = arith.constant 0 : index
    %c0_355 = arith.constant 0 : index
    %280 = vector.load %arg7[%c0_354, %c0_355] : memref<1x192xf32, #tpu.memory_space<vmem>>, vector<1x192xf32>
    %281 = vector.broadcast %280 : vector<1x192xf32> to vector<2x192xf32>
    %282 = arith.mulf %278, %281 : vector<2x192xf32>
    %cst_356 = arith.constant dense<0.000000e+00> : vector<2xf32>
    %283 = vector.multi_reduction <add>, %282, %cst_356 [1] : vector<2x192xf32> to vector<2xf32>
    %284 = vector.shape_cast %283 : vector<2xf32> to vector<2x1xf32>
    %c0_357 = arith.constant 0 : index
    %c0_358 = arith.constant 0 : index
    %285 = vector.load %arg8[%c0_357, %c0_358] : memref<1x1xf32, #tpu.memory_space<vmem>>, vector<1x1xf32>
    %286 = vector.broadcast %285 : vector<1x1xf32> to vector<2x1xf32>
    %287 = arith.addf %284, %286 : vector<2x1xf32>
    %c0_359 = arith.constant 0 : index
    %c0_360 = arith.constant 0 : index
    %288 = vector.load %arg16[%c0_359, %c0_360] : memref<2x1xf32, #tpu.memory_space<vmem>>, vector<2x1xf32>
    tpu.vector_store %arg16[%c0_359, %c0_360], %287 {strides = array<i32>} : memref<2x1xf32, #tpu.memory_space<vmem>>, vector<2x1xf32>,
    return
  }
  func.func @transform_0(%arg0: i32) -> (i32, i32) {
    %c0_i32 = arith.constant 0 : i32
    %c0_i32_0 = arith.constant 0 : i32
    %c0_i32_1 = arith.constant 0 : i32
    return %c0_i32, %c0_i32_0 : i32, i32
  }
  func.func @transform_1(%arg0: i32) -> (i32, i32) {
    %c0_i32 = arith.constant 0 : i32
    %c0_i32_0 = arith.constant 0 : i32
    %c0_i32_1 = arith.constant 0 : i32
    return %c0_i32, %c0_i32_0 : i32, i32
  }
  func.func @transform_2(%arg0: i32) -> (i32, i32) {
    %c0_i32 = arith.constant 0 : i32
    %c0_i32_0 = arith.constant 0 : i32
    %c0_i32_1 = arith.constant 0 : i32
    return %c0_i32, %c0_i32_0 : i32, i32
  }
  func.func @transform_3(%arg0: i32) -> (i32, i32) {
    %c0_i32 = arith.constant 0 : i32
    %c0_i32_0 = arith.constant 0 : i32
    %c0_i32_1 = arith.constant 0 : i32
    return %c0_i32, %c0_i32_0 : i32, i32
  }
  func.func @transform_4(%arg0: i32) -> (i32, i32) {
    %c0_i32 = arith.constant 0 : i32
    %c0_i32_0 = arith.constant 0 : i32
    %c0_i32_1 = arith.constant 0 : i32
    return %c0_i32, %c0_i32_0 : i32, i32
  }
  func.func @transform_5(%arg0: i32) -> (i32, i32) {
    %c0_i32 = arith.constant 0 : i32
    %c0_i32_0 = arith.constant 0 : i32
    %c0_i32_1 = arith.constant 0 : i32
    return %c0_i32, %c0_i32_0 : i32, i32
  }
  func.func @transform_6(%arg0: i32) -> (i32, i32) {
    %c0_i32 = arith.constant 0 : i32
    %c0_i32_0 = arith.constant 0 : i32
    %c0_i32_1 = arith.constant 0 : i32
    return %c0_i32, %c0_i32_0 : i32, i32
  }
  func.func @transform_7(%arg0: i32) -> (i32, i32) {
    %c0_i32 = arith.constant 0 : i32
    %c0_i32_0 = arith.constant 0 : i32
    %c0_i32_1 = arith.constant 0 : i32
    return %c0_i32, %c0_i32_0 : i32, i32
  }
  func.func @transform_11(%arg0: i32) -> (i32, i32, i32) {
    %c0_i32 = arith.constant 0 : i32
    %c0_i32_0 = arith.constant 0 : i32
    %c0_i32_1 = arith.constant 0 : i32
    %c0_i32_2 = arith.constant 0 : i32
    return %c0_i32, %c0_i32_0, %c0_i32_1 : i32, i32, i32
  }
  func.func @transform_12(%arg0: i32) -> (i32, i32, i32) {
    %c0_i32 = arith.constant 0 : i32
    %c0_i32_0 = arith.constant 0 : i32
    %c0_i32_1 = arith.constant 0 : i32
    %c0_i32_2 = arith.constant 0 : i32
    return %c0_i32, %c0_i32_0, %c0_i32_1 : i32, i32, i32
  }
  func.func @transform_13(%arg0: i32) -> (i32, i32) {
    %c0_i32 = arith.constant 0 : i32
    %c0_i32_0 = arith.constant 0 : i32
    %c0_i32_1 = arith.constant 0 : i32
    return %c0_i32, %c0_i32_0 : i32, i32
  }
  func.func @transform_14(%arg0: i32) -> (i32, i32) {
    %c0_i32 = arith.constant 0 : i32
    %c0_i32_0 = arith.constant 0 : i32
    %c0_i32_1 = arith.constant 0 : i32
    return %c0_i32, %c0_i32_0 : i32, i32
  }
  func.func @transform_15(%arg0: i32) -> (i32, i32) {
    %c0_i32 = arith.constant 0 : i32
    %c0_i32_0 = arith.constant 0 : i32
    %c0_i32_1 = arith.constant 0 : i32
    return %c0_i32, %c0_i32_0 : i32, i32
  }
}

</mosaic_0001>

<bundles_post_ra>
// kernel: net_forward.1
= control target key start
LH: loop header
LB: loop body
LE: loop exit
PB: predicated region body
PF: predicated region fallthrough
CT: control target
= control target key end

     0   :  { %s18152_s0 = inlined_call_operand.vmem [shape: bf16[170,9], index: 0, kind: input, shape index: {}]   ;;  %s18153_s1 = inlined_call_operand.vmem [shape: bf16[9,128], index: 1, kind: input, shape index: {}]   ;;  %s18154_s2 = inlined_call_operand.vmem [shape: f32[1,128], index: 2, kind: input, shape index: {}]   ;;  %s18155_s3 = inlined_call_operand.vmem [shape: f32[1,128], index: 3, kind: input, shape index: {}]   ;;  %s18156_s4 = inlined_call_operand.vmem [shape: f32[1,128], index: 4, kind: input, shape index: {}]   ;;  %s18157_s5 = inlined_call_operand.vmem [shape: f32[1,192], index: 5, kind: input, shape index: {}]   ;;  %s18158_s6 = inlined_call_operand.vmem [shape: f32[1,192], index: 6, kind: input, shape index: {}]   ;;  %s18159_s7 = inlined_call_operand.<no memory space> [shape: f32[1,1], index: 7, kind: input, shape index: {}]   ;;  %s18160_s9 = inlined_call_operand.vmem [shape: bf16[1152,128], index: 9, kind: input, shape index: {}]   ;;  %s18161_s10 = inlined_call_operand.vmem [shape: bf16[1664,192], index: 10, kind: input, shape index: {}]   ;;  %s18162_s11 = inlined_call_operand.vmem [shape: bf16[2,19,896], index: 11, kind: output, shape index: {0}]   ;;  %s18163_s12 = inlined_call_operand.vmem [shape: bf16[2,15,384], index: 12, kind: output, shape index: {1}]   ;;  %s18164_s13 = inlined_call_operand.vmem [shape: bf16[2,1664], index: 13, kind: output, shape index: {2}]   ;;  %s18165_s14 = inlined_call_operand.vmem [shape: f32[2,192], index: 14, kind: output, shape index: {3}]   ;;  %s18166_s15 = inlined_call_operand.vmem [shape: f32[2,1], index: 15, kind: output, shape index: {4}]   ;;  %s18167_s8 = inlined_call_operand.vmem [shape: bf16[3200,128], index: 8, kind: input, shape index: {}]  }
   0x1   :  { %v21_v0 = vstv %s18159_s7  ;;  %v50_v1 = vld [vmem:[%s18167_s8] sm:$0xff]  ;;  %v52_v2 = vld [vmem:[%s18167_s8 + $0x8] sm:$0xff]  ;;  %v54_v3 = vld [vmem:[%s18167_s8 + $0x10] sm:$0xff] }
   0x2   :  { %22 = vst [vmem:[#allocation10] sm:$0x1] %v21_v0  ;;  %v56_v4 = vld [vmem:[%s18167_s8 + $0x18] sm:$0xff]  ;;  %v58_v5 = vld [vmem:[%s18167_s8 + $0x20] sm:$0xff]  ;;  %v60_v6 = vld [vmem:[%s18167_s8 + $0x28] sm:$0xff] }
   0x3   :  { %51 = vst [vmem:[#allocation2 + $0x2b0] sm:$0xff] %v50_v1  ;;  %v62_v7 = vld [vmem:[%s18167_s8 + $0x30] sm:$0xff]  ;;  %v64_v8 = vld [vmem:[%s18167_s8 + $0x38] sm:$0xff]  ;;  %v66_v9 = vld [vmem:[%s18167_s8 + $0x40] sm:$0xff] }
   0x4   :  { %53 = vst [vmem:[#allocation2 + $0x3b0] sm:$0xff] %v52_v2  ;;  %v68_v10 = vld [vmem:[%s18167_s8 + $0x48] sm:$0xff]  ;;  %v70_v11 = vld [vmem:[%s18167_s8 + $0x50] sm:$0xff]  ;;  %v72_v12 = vld [vmem:[%s18167_s8 + $0x58] sm:$0xff] }
   0x5   :  { %55 = vst [vmem:[#allocation2 + $0x4d8] sm:$0xff] %v54_v3  ;;  %v74_v13 = vld [vmem:[%s18167_s8 + $0x60] sm:$0xff]  ;;  %v76_v14 = vld [vmem:[%s18167_s8 + $0x68] sm:$0xff]  ;;  %v78_v15 = vld [vmem:[%s18167_s8 + $0x70] sm:$0xff] }
   0x6   :  { %57 = vst [vmem:[#allocation2 + $0x18] sm:$0xff] %v56_v4  ;;  %v80_v16 = vld [vmem:[%s18167_s8 + $0x78] sm:$0xff]  ;;  %v82_v17 = vld [vmem:[%s18167_s8 + $0x80] sm:$0xff]  ;;  %v84_v18 = vld [vmem:[%s18167_s8 + $0x88] sm:$0xff] }
   0x7   :  { %59 = vst [vmem:[#allocation2 + $0x450] sm:$0xff] %v58_v5  ;;  %v86_v19 = vld [vmem:[%s18167_s8 + $0x90] sm:$0xff]  ;;  %v88_v20 = vld [vmem:[%s18167_s8 + $0x98] sm:$0xff]  ;;  %v90_v21 = vld [vmem:[%s18167_s8 + $0xa0] sm:$0xff] }
   0x8   :  { %61 = vst [vmem:[#allocation2 + $0x328] sm:$0xff] %v60_v6  ;;  %v92_v22 = vld [vmem:[%s18167_s8 + $0xa8] sm:$0xff]  ;;  %v94_v23 = vld [vmem:[%s18167_s8 + $0xb0] sm:$0xff]  ;;  %v96_v24 = vld [vmem:[%s18167_s8 + $0xb8] sm:$0xff] }
   0x9   :  { %63 = vst [vmem:[#allocation2 + $0x440] sm:$0xff] %v62_v7  ;;  %v98_v25 = vld [vmem:[%s18167_s8 + $0xc0] sm:$0xff]  ;;  %v100_v26 = vld [vmem:[%s18167_s8 + $0xc8] sm:$0xff]  ;;  %v102_v27 = vld [vmem:[%s18167_s8 + $0xd0] sm:$0xff] }
   0xa   :  { %65 = vst [vmem:[#allocation2 + $0x378] sm:$0xff] %v64_v8  ;;  %v104_v28 = vld [vmem:[%s18167_s8 + $0xd8] sm:$0xff]  ;;  %v106_v29 = vld [vmem:[%s18167_s8 + $0xe0] sm:$0xff]  ;;  %v108_v30 = vld [vmem:[%s18167_s8 + $0xe8] sm:$0xff] }
   0xb   :  { %67 = vst [vmem:[#allocation2 + $0x108] sm:$0xff] %v66_v9  ;;  %v110_v31 = vld [vmem:[%s18167_s8 + $0xf0] sm:$0xff]  ;;  %v112_v32 = vld [vmem:[%s18167_s8 + $0xf8] sm:$0xff]  ;;  %v114_v33 = vld [vmem:[%s18167_s8 + $0x100] sm:$0xff] }
   0xc   :  { %69 = vst [vmem:[#allocation2 + $0x510] sm:$0xff] %v68_v10  ;;  %v116_v34 = vld [vmem:[%s18167_s8 + $0x108] sm:$0xff]  ;;  %v118_v35 = vld [vmem:[%s18167_s8 + $0x110] sm:$0xff]  ;;  %v120_v36 = vld [vmem:[%s18167_s8 + $0x118] sm:$0xff] }
   0xd   :  { %71 = vst [vmem:[#allocation2 + $0x490] sm:$0xff] %v70_v11  ;;  %v122_v37 = vld [vmem:[%s18167_s8 + $0x120] sm:$0xff]  ;;  %v124_v38 = vld [vmem:[%s18167_s8 + $0x128] sm:$0xff]  ;;  %v126_v39 = vld [vmem:[%s18167_s8 + $0x130] sm:$0xff] }
   0xe   :  { %73 = vst [vmem:[#allocation2 + $0x318] sm:$0xff] %v72_v12  ;;  %v128_v40 = vld [vmem:[%s18167_s8 + $0x138] sm:$0xff]  ;;  %v130_v41 = vld [vmem:[%s18167_s8 + $0x140] sm:$0xff]  ;;  %v132_v42 = vld [vmem:[%s18167_s8 + $0x148] sm:$0xff] }
   0xf   :  { %75 = vst [vmem:[#allocation2 + $0x548] sm:$0xff] %v74_v13  ;;  %v134_v43 = vld [vmem:[%s18167_s8 + $0x150] sm:$0xff]  ;;  %v136_v44 = vld [vmem:[%s18167_s8 + $0x158] sm:$0xff]  ;;  %v138_v45 = vld [vmem:[%s18167_s8 + $0x160] sm:$0xff] }
  0x10   :  { %77 = vst [vmem:[#allocation2 + $0x500] sm:$0xff] %v76_v14  ;;  %v140_v46 = vld [vmem:[%s18167_s8 + $0x168] sm:$0xff]  ;;  %v142_v47 = vld [vmem:[%s18167_s8 + $0x170] sm:$0xff]  ;;  %v144_v48 = vld [vmem:[%s18167_s8 + $0x178] sm:$0xff] }
  0x11   :  { %79 = vst [vmem:[#allocation2 + $0x58] sm:$0xff] %v78_v15  ;;  %v146_v49 = vld [vmem:[%s18167_s8 + $0x180] sm:$0xff]  ;;  %v148_v50 = vld [vmem:[%s18167_s8 + $0x188] sm:$0xff]  ;;  %v150_v51 = vld [vmem:[%s18167_s8 + $0x190] sm:$0xff] }
  0x12   :  { %81 = vst [vmem:[#allocation2 + $0x2b8] sm:$0xff] %v80_v16  ;;  %v152_v52 = vld [vmem:[%s18167_s8 + $0x198] sm:$0xff]  ;;  %v154_v53 = vld [vmem:[%s18167_s8 + $0x1a0] sm:$0xff]  ;;  %v156_v54 = vld [vmem:[%s18167_s8 + $0x1a8] sm:$0xff] }
  0x13   :  { %83 = vst [vmem:[#allocation2 + $0x580] sm:$0xff] %v82_v17  ;;  %v158_v55 = vld [vmem:[%s18167_s8 + $0x1b0] sm:$0xff]  ;;  %v160_v56 = vld [vmem:[%s18167_s8 + $0x1b8] sm:$0xff]  ;;  %v162_v57 = vld [vmem:[%s18167_s8 + $0x1c0] sm:$0xff] }
  0x14   :  { %85 = vst [vmem:[#allocation2 + $0x590] sm:$0xff] %v84_v18  ;;  %v164_v58 = vld [vmem:[%s18167_s8 + $0x1c8] sm:$0xff]  ;;  %v166_v59 = vld [vmem:[%s18167_s8 + $0x1d0] sm:$0xff]  ;;  %v168_v60 = vld [vmem:[%s18167_s8 + $0x1d8] sm:$0xff] }
  0x15   :  { %87 = vst [vmem:[#allocation2 + $0x540] sm:$0xff] %v86_v19  ;;  %v170_v61 = vld [vmem:[%s18167_s8 + $0x1e0] sm:$0xff]  ;;  %v172_v62 = vld [vmem:[%s18167_s8 + $0x1e8] sm:$0xff]  ;;  %v174_v63 = vld [vmem:[%s18167_s8 + $0x1f0] sm:$0xff] }
  0x16   :  { %89 = vst [vmem:[#allocation2 + $0x3c0] sm:$0xff] %v88_v20  ;;  %v176_v0 = vld [vmem:[%s18167_s8 + $0x1f8] sm:$0xff]  ;;  %v178_v1 = vld [vmem:[%s18167_s8 + $0x200] sm:$0xff]  ;;  %v180_v2 = vld [vmem:[%s18167_s8 + $0x208] sm:$0xff] }
  0x17   :  { %91 = vst [vmem:[#allocation2 + $0x330] sm:$0xff] %v90_v21  ;;  %v182_v3 = vld [vmem:[%s18167_s8 + $0x210] sm:$0xff]  ;;  %v184_v4 = vld [vmem:[%s18167_s8 + $0x218] sm:$0xff]  ;;  %v186_v5 = vld [vmem:[%s18167_s8 + $0x220] sm:$0xff] }
  0x18   :  { %93 = vst [vmem:[#allocation2 + $0x100] sm:$0xff] %v92_v22  ;;  %v188_v6 = vld [vmem:[%s18167_s8 + $0x228] sm:$0xff]  ;;  %v190_v7 = vld [vmem:[%s18167_s8 + $0x230] sm:$0xff]  ;;  %v192_v8 = vld [vmem:[%s18167_s8 + $0x238] sm:$0xff] }
  0x19   :  { %95 = vst [vmem:[#allocation2 + $0x8] sm:$0xff] %v94_v23  ;;  %v194_v9 = vld [vmem:[%s18167_s8 + $0x240] sm:$0xff]  ;;  %v196_v10 = vld [vmem:[%s18167_s8 + $0x248] sm:$0xff]  ;;  %v198_v11 = vld [vmem:[%s18167_s8 + $0x250] sm:$0xff] }
  0x1a   :  { %97 = vst [vmem:[#allocation2 + $0x188] sm:$0xff] %v96_v24  ;;  %v200_v12 = vld [vmem:[%s18167_s8 + $0x258] sm:$0xff]  ;;  %v202_v13 = vld [vmem:[%s18167_s8 + $0x260] sm:$0xff]  ;;  %v204_v14 = vld [vmem:[%s18167_s8 + $0x268] sm:$0xff] }
  0x1b   :  { %99 = vst [vmem:[#allocation2 + $0x248] sm:$0xff] %v98_v25  ;;  %v206_v15 = vld [vmem:[%s18167_s8 + $0x270] sm:$0xff]  ;;  %v208_v16 = vld [vmem:[%s18167_s8 + $0x278] sm:$0xff]  ;;  %v210_v17 = vld [vmem:[%s18167_s8 + $0x280] sm:$0xff] }
  0x1c   :  { %101 = vst [vmem:[#allocation2 + $0xc8] sm:$0xff] %v100_v26  ;;  %v212_v18 = vld [vmem:[%s18167_s8 + $0x288] sm:$0xff]  ;;  %v214_v19 = vld [vmem:[%s18167_s8 + $0x290] sm:$0xff]  ;;  %v216_v20 = vld [vmem:[%s18167_s8 + $0x298] sm:$0xff] }
  0x1d   :  { %103 = vst [vmem:[#allocation2 + $0x388] sm:$0xff] %v102_v27  ;;  %v218_v21 = vld [vmem:[%s18167_s8 + $0x2a0] sm:$0xff]  ;;  %v220_v22 = vld [vmem:[%s18167_s8 + $0x2a8] sm:$0xff]  ;;  %v222_v23 = vld [vmem:[%s18167_s8 + $0x2b0] sm:$0xff] }
  0x1e   :  { %105 = vst [vmem:[#allocation2 + $0x520] sm:$0xff] %v104_v28  ;;  %v224_v24 = vld [vmem:[%s18167_s8 + $0x2b8] sm:$0xff]  ;;  %v226_v25 = vld [vmem:[%s18167_s8 + $0x2c0] sm:$0xff]  ;;  %v228_v26 = vld [vmem:[%s18167_s8 + $0x2c8] sm:$0xff] }
  0x1f   :  { %107 = vst [vmem:[#allocation2 + $0x3a8] sm:$0xff] %v106_v29  ;;  %v230_v27 = vld [vmem:[%s18167_s8 + $0x2d0] sm:$0xff]  ;;  %v232_v28 = vld [vmem:[%s18167_s8 + $0x2d8] sm:$0xff]  ;;  %v234_v29 = vld [vmem:[%s18167_s8 + $0x2e0] sm:$0xff] }
  0x20   :  { %109 = vst [vmem:[#allocation2 + $0x5e0] sm:$0xff] %v108_v30  ;;  %v236_v30 = vld [vmem:[%s18167_s8 + $0x2e8] sm:$0xff] }
  0x21   :  { %111 = vst [vmem:[#allocation2 + $0x488] sm:$0xff] %v110_v31  ;;  %v238_v31 = vld [vmem:[%s18167_s8 + $0x2f0] sm:$0xff] }
  0x22   :  { %113 = vst [vmem:[#allocation2 + $0x4d0] sm:$0xff] %v112_v32  ;;  %v240_v32 = vld [vmem:[%s18167_s8 + $0x2f8] sm:$0xff] }
  0x23   :  { %115 = vst [vmem:[#allocation2 + $0x98] sm:$0xff] %v114_v33  ;;  %v242_v33 = vld [vmem:[%s18167_s8 + $0x300] sm:$0xff] }
  0x24   :  { %117 = vst [vmem:[#allocation2 + $0xb0] sm:$0xff] %v116_v34  ;;  %v244_v34 = vld [vmem:[%s18167_s8 + $0x308] sm:$0xff] }
  0x25   :  { %119 = vst [vmem:[#allocation2 + $0x2a0] sm:$0xff] %v118_v35  ;;  %v246_v35 = vld [vmem:[%s18167_s8 + $0x310] sm:$0xff] }
  0x26   :  { %121 = vst [vmem:[#allocation2 + $0x570] sm:$0xff] %v120_v36  ;;  %v248_v36 = vld [vmem:[%s18167_s8 + $0x318] sm:$0xff] }
  0x27   :  { %123 = vst [vmem:[#allocation2 + $0x598] sm:$0xff] %v122_v37  ;;  %v250_v37 = vld [vmem:[%s18167_s8 + $0x320] sm:$0xff] }
  0x28   :  { %125 = vst [vmem:[#allocation2 + $0x5a8] sm:$0xff] %v124_v38  ;;  %v252_v38 = vld [vmem:[%s18167_s8 + $0x328] sm:$0xff] }
  0x29   :  { %127 = vst [vmem:[#allocation2 + $0x4c8] sm:$0xff] %v126_v39  ;;  %v254_v39 = vld [vmem:[%s18167_s8 + $0x330] sm:$0xff] }
  0x2a   :  { %129 = vst [vmem:[#allocation2 + $0x5e8] sm:$0xff] %v128_v40  ;;  %v256_v40 = vld [vmem:[%s18167_s8 + $0x338] sm:$0xff] }
  0x2b   :  { %131 = vst [vmem:[#allocation2 + $0x1f8] sm:$0xff] %v130_v41  ;;  %v258_v41 = vld [vmem:[%s18167_s8 + $0x340] sm:$0xff] }
  0x2c   :  { %133 = vst [vmem:[#allocation2 + $0x2f0] sm:$0xff] %v132_v42  ;;  %v260_v42 = vld [vmem:[%s18167_s8 + $0x348] sm:$0xff] }
  0x2d   :  { %135 = vst [vmem:[#allocation2 + $0x3c8] sm:$0xff] %v134_v43  ;;  %v262_v43 = vld [vmem:[%s18167_s8 + $0x350] sm:$0xff] }
  0x2e   :  { %137 = vst [vmem:[#allocation2 + $0x5c0] sm:$0xff] %v136_v44  ;;  %v264_v44 = vld [vmem:[%s18167_s8 + $0x358] sm:$0xff] }
  0x2f   :  { %139 = vst [vmem:[#allocation2 + $0x338] sm:$0xff] %v138_v45  ;;  %v266_v45 = vld [vmem:[%s18167_s8 + $0x360] sm:$0xff] }
  0x30   :  { %141 = vst [vmem:[#allocation2 + $0x480] sm:$0xff] %v140_v46  ;;  %v268_v46 = vld [vmem:[%s18167_s8 + $0x368] sm:$0xff] }
  0x31   :  { %143 = vst [vmem:[#allocation2 + $0x2a8] sm:$0xff] %v142_v47  ;;  %v270_v47 = vld [vmem:[%s18167_s8 + $0x370] sm:$0xff] }
  0x32   :  { %145 = vst [vmem:[#allocation2 + $0x3e0] sm:$0xff] %v144_v48  ;;  %v272_v48 = vld [vmem:[%s18167_s8 + $0x378] sm:$0xff] }
  0x33   :  { %147 = vst [vmem:[#allocation2 + $0x3d8] sm:$0xff] %v146_v49  ;;  %v274_v49 = vld [vmem:[%s18167_s8 + $0x380] sm:$0xff] }
  0x34   :  { %149 = vst [vmem:[#allocation2 + $0x4b0] sm:$0xff] %v148_v50  ;;  %v276_v50 = vld [vmem:[%s18167_s8 + $0x388] sm:$0xff] }
  0x35   :  { %151 = vst [vmem:[#allocation2 + $0x28] sm:$0xff] %v150_v51  ;;  %v278_v51 = vld [vmem:[%s18167_s8 + $0x390] sm:$0xff] }
  0x36   :  { %153 = vst [vmem:[#allocation2 + $0xf8] sm:$0xff] %v152_v52  ;;  %v280_v52 = vld [vmem:[%s18167_s8 + $0x398] sm:$0xff] }
  0x37   :  { %155 = vst [vmem:[#allocation2 + $0x608] sm:$0xff] %v154_v53  ;;  %v282_v53 = vld [vmem:[%s18167_s8 + $0x3a0] sm:$0xff] }
  0x38   :  { %157 = vst [vmem:[#allocation2 + $0x4f0] sm:$0xff] %v156_v54  ;;  %v284_v54 = vld [vmem:[%s18167_s8 + $0x3a8] sm:$0xff] }
  0x39   :  { %159 = vst [vmem:[#allocation2 + $0x5a0] sm:$0xff] %v158_v55  ;;  %v286_v55 = vld [vmem:[%s18167_s8 + $0x3b0] sm:$0xff] }
  0x3a   :  { %161 = vst [vmem:[#allocation2 + $0x618] sm:$0xff] %v160_v56  ;;  %v288_v56 = vld [vmem:[%s18167_s8 + $0x3b8] sm:$0xff] }
  0x3b   :  { %163 = vst [vmem:[#allocation2 + $0x308] sm:$0xff] %v162_v57  ;;  %v290_v57 = vld [vmem:[%s18167_s8 + $0x3c0] sm:$0xff] }
  0x3c   :  { %165 = vst [vmem:[#allocation2 + $0x278] sm:$0xff] %v164_v58  ;;  %v292_v58 = vld [vmem:[%s18167_s8 + $0x3c8] sm:$0xff] }
  0x3d   :  { %167 = vst [vmem:[#allocation2 + $0x118] sm:$0xff] %v166_v59  ;;  %v294_v59 = vld [vmem:[%s18167_s8 + $0x3d0] sm:$0xff] }
  0x3e   :  { %169 = vst [vmem:[#allocation2 + $0x508] sm:$0xff] %v168_v60  ;;  %v296_v60 = vld [vmem:[%s18167_s8 + $0x3d8] sm:$0xff] }
  0x3f   :  { %171 = vst [vmem:[#allocation2 + $0x2f8] sm:$0xff] %v170_v61  ;;  %v298_v61 = vld [vmem:[%s18167_s8 + $0x3e0] sm:$0xff] }
  0x40   :  { %173 = vst [vmem:[#allocation2 + $0x380] sm:$0xff] %v172_v62  ;;  %v300_v62 = vld [vmem:[%s18167_s8 + $0x3e8] sm:$0xff] }
  0x41   :  { %175 = vst [vmem:[#allocation2 + $0x5f8] sm:$0xff] %v174_v63  ;;  %v302_v63 = vld [vmem:[%s18167_s8 + $0x3f0] sm:$0xff] }
  0x42   :  { %177 = vst [vmem:[#allocation2 + $0x70] sm:$0xff] %v176_v0  ;;  %v304_v0 = vld [vmem:[%s18167_s8 + $0x3f8] sm:$0xff] }
  0x43   :  { %179 = vst [vmem:[#allocation2 + $0x538] sm:$0xff] %v178_v1  ;;  %v306_v1 = vld [vmem:[%s18167_s8 + $0x400] sm:$0xff] }
  0x44   :  { %181 = vst [vmem:[#allocation2 + $0x1d0] sm:$0xff] %v180_v2  ;;  %v308_v2 = vld [vmem:[%s18167_s8 + $0x408] sm:$0xff] }
  0x45   :  { %183 = vst [vmem:[#allocation2 + $0xe8] sm:$0xff] %v182_v3  ;;  %v310_v3 = vld [vmem:[%s18167_s8 + $0x410] sm:$0xff] }
  0x46   :  { %185 = vst [vmem:[#allocation2 + $0x270] sm:$0xff] %v184_v4  ;;  %v312_v4 = vld [vmem:[%s18167_s8 + $0x418] sm:$0xff] }
  0x47   :  { %187 = vst [vmem:[#allocation2 + $0x588] sm:$0xff] %v186_v5  ;;  %v314_v5 = vld [vmem:[%s18167_s8 + $0x420] sm:$0xff] }
  0x48   :  { %189 = vst [vmem:[#allocation2 + $0x148] sm:$0xff] %v188_v6  ;;  %v316_v6 = vld [vmem:[%s18167_s8 + $0x428] sm:$0xff] }
  0x49   :  { %191 = vst [vmem:[#allocation2 + $0x2e8] sm:$0xff] %v190_v7  ;;  %v318_v7 = vld [vmem:[%s18167_s8 + $0x430] sm:$0xff] }
  0x4a   :  { %193 = vst [vmem:[#allocation2 + $0x638] sm:$0xff] %v192_v8  ;;  %v320_v8 = vld [vmem:[%s18167_s8 + $0x438] sm:$0xff] }
  0x4b   :  { %195 = vst [vmem:[#allocation2 + $0x390] sm:$0xff] %v194_v9  ;;  %v322_v9 = vld [vmem:[%s18167_s8 + $0x440] sm:$0xff] }
  0x4c   :  { %197 = vst [vmem:[#allocation2 + $0x4c0] sm:$0xff] %v196_v10  ;;  %v324_v10 = vld [vmem:[%s18167_s8 + $0x448] sm:$0xff] }
  0x4d   :  { %199 = vst [vmem:[#allocation2 + $0xb8] sm:$0xff] %v198_v11  ;;  %v326_v11 = vld [vmem:[%s18167_s8 + $0x450] sm:$0xff] }
  0x4e   :  { %201 = vst [vmem:[#allocation2 + $0x530] sm:$0xff] %v200_v12  ;;  %v328_v12 = vld [vmem:[%s18167_s8 + $0x458] sm:$0xff] }
  0x4f   :  { %203 = vst [vmem:[#allocation2 + $0x3f8] sm:$0xff] %v202_v13  ;;  %v330_v13 = vld [vmem:[%s18167_s8 + $0x460] sm:$0xff] }
  0x50   :  { %205 = vst [vmem:[#allocation2 + $0x128] sm:$0xff] %v204_v14  ;;  %v332_v14 = vld [vmem:[%s18167_s8 + $0x468] sm:$0xff] }
  0x51   :  { %207 = vst [vmem:[#allocation2 + $0x320] sm:$0xff] %v206_v15  ;;  %v334_v15 = vld [vmem:[%s18167_s8 + $0x470] sm:$0xff] }
  0x52   :  { %209 = vst [vmem:[#allocation2 + $0x340] sm:$0xff] %v208_v16  ;;  %v336_v16 = vld [vmem:[%s18167_s8 + $0x478] sm:$0xff] }
  0x53   :  { %211 = vst [vmem:[#allocation2 + $0x398] sm:$0xff] %v210_v17  ;;  %v338_v17 = vld [vmem:[%s18167_s8 + $0x480] sm:$0xff] }
  0x54   :  { %213 = vst [vmem:[#allocation2 + $0x138] sm:$0xff] %v212_v18  ;;  %v340_v18 = vld [vmem:[%s18167_s8 + $0x488] sm:$0xff] }
  0x55   :  { %215 = vst [vmem:[#allocation2 + $0x518] sm:$0xff] %v214_v19  ;;  %v342_v19 = vld [vmem:[%s18167_s8 + $0x490] sm:$0xff] }
  0x56   :  { %217 = vst [vmem:[#allocation2 + $0x48] sm:$0xff] %v216_v20  ;;  %v344_v20 = vld [vmem:[%s18167_s8 + $0x498] sm:$0xff] }
  0x57   :  { %219 = vst [vmem:[#allocation2 + $0xd0] sm:$0xff] %v218_v21  ;;  %v346_v21 = vld [vmem:[%s18167_s8 + $0x4a0] sm:$0xff] }
  0x58   :  { %221 = vst [vmem:[#allocation2 + $0x238] sm:$0xff] %v220_v22  ;;  %v348_v22 = vld [vmem:[%s18167_s8 + $0x4a8] sm:$0xff] }
  0x59   :  { %223 = vst [vmem:[#allocation2 + $0x20] sm:$0xff] %v222_v23  ;;  %v350_v23 = vld [vmem:[%s18167_s8 + $0x4b0] sm:$0xff] }
  0x5a   :  { %225 = vst [vmem:[#allocation2 + $0x78] sm:$0xff] %v224_v24  ;;  %v352_v24 = vld [vmem:[%s18167_s8 + $0x4b8] sm:$0xff] }
  0x5b   :  { %227 = vst [vmem:[#allocation2 + $0x2d8] sm:$0xff] %v226_v25  ;;  %v354_v25 = vld [vmem:[%s18167_s8 + $0x4c0] sm:$0xff] }
  0x5c   :  { %229 = vst [vmem:[#allocation2 + $0x4e0] sm:$0xff] %v228_v26  ;;  %v356_v26 = vld [vmem:[%s18167_s8 + $0x4c8] sm:$0xff] }
  0x5d   :  { %231 = vst [vmem:[#allocation2 + $0x168] sm:$0xff] %v230_v27  ;;  %v358_v27 = vld [vmem:[%s18167_s8 + $0x4d0] sm:$0xff] }
  0x5e   :  { %233 = vst [vmem:[#allocation2 + $0x50] sm:$0xff] %v232_v28  ;;  %v360_v28 = vld [vmem:[%s18167_s8 + $0x4d8] sm:$0xff] }
  0x5f   :  { %235 = vst [vmem:[#allocation2 + $0x610] sm:$0xff] %v234_v29  ;;  %v362_v29 = vld [vmem:[%s18167_s8 + $0x4e0] sm:$0xff] }
  0x60   :  { %237 = vst [vmem:[#allocation2 + $0x460] sm:$0xff] %v236_v30  ;;  %v364_v30 = vld [vmem:[%s18167_s8 + $0x4e8] sm:$0xff] }
  0x61   :  { %239 = vst [vmem:[#allocation2 + $0x60] sm:$0xff] %v238_v31  ;;  %v366_v31 = vld [vmem:[%s18167_s8 + $0x4f0] sm:$0xff] }
  0x62   :  { %241 = vst [vmem:[#allocation2 + $0x1a0] sm:$0xff] %v240_v32  ;;  %v368_v32 = vld [vmem:[%s18167_s8 + $0x4f8] sm:$0xff] }
  0x63   :  { %243 = vst [vmem:[#allocation2 + $0x458] sm:$0xff] %v242_v33  ;;  %v370_v33 = vld [vmem:[%s18167_s8 + $0x500] sm:$0xff] }
  0x64   :  { %245 = vst [vmem:[#allocation2 + $0x498] sm:$0xff] %v244_v34  ;;  %v372_v34 = vld [vmem:[%s18167_s8 + $0x508] sm:$0xff] }
  0x65   :  { %247 = vst [vmem:[#allocation2 + $0x400] sm:$0xff] %v246_v35  ;;  %v374_v35 = vld [vmem:[%s18167_s8 + $0x510] sm:$0xff] }
  0x66   :  { %249 = vst [vmem:[#allocation2 + $0x5d8] sm:$0xff] %v248_v36  ;;  %v376_v36 = vld [vmem:[%s18167_s8 + $0x518] sm:$0xff] }
  0x67   :  { %251 = vst [vmem:[#allocation2 + $0x210] sm:$0xff] %v250_v37  ;;  %v378_v37 = vld [vmem:[%s18167_s8 + $0x520] sm:$0xff] }
  0x68   :  { %253 = vst [vmem:[#allocation2 + $0x160] sm:$0xff] %v252_v38  ;;  %v380_v38 = vld [vmem:[%s18167_s8 + $0x528] sm:$0xff] }
  0x69   :  { %255 = vst [vmem:[#allocation2 + $0x178] sm:$0xff] %v254_v39  ;;  %v382_v39 = vld [vmem:[%s18167_s8 + $0x530] sm:$0xff] }
  0x6a   :  { %257 = vst [vmem:[#allocation2 + $0x200] sm:$0xff] %v256_v40  ;;  %v384_v40 = vld [vmem:[%s18167_s8 + $0x538] sm:$0xff] }
  0x6b   :  { %259 = vst [vmem:[#allocation2 + $0x288] sm:$0xff] %v258_v41  ;;  %v386_v41 = vld [vmem:[%s18167_s8 + $0x540] sm:$0xff] }
  0x6c   :  { %261 = vst [vmem:[#allocation2 + $0x240] sm:$0xff] %v260_v42  ;;  %v388_v42 = vld [vmem:[%s18167_s8 + $0x548] sm:$0xff] }
  0x6d   :  { %263 = vst [vmem:[#allocation2 + $0x230] sm:$0xff] %v262_v43  ;;  %v390_v43 = vld [vmem:[%s18167_s8 + $0x550] sm:$0xff] }
  0x6e   :  { %265 = vst [vmem:[#allocation2 + $0x5d0] sm:$0xff] %v264_v44  ;;  %v392_v44 = vld [vmem:[%s18167_s8 + $0x558] sm:$0xff] }
  0x6f   :  { %267 = vst [vmem:[#allocation2 + $0x5b0] sm:$0xff] %v266_v45  ;;  %v394_v45 = vld [vmem:[%s18167_s8 + $0x560] sm:$0xff] }
  0x70   :  { %269 = vst [vmem:[#allocation2 + $0x310] sm:$0xff] %v268_v46  ;;  %v396_v46 = vld [vmem:[%s18167_s8 + $0x568] sm:$0xff] }
  0x71   :  { %271 = vst [vmem:[#allocation2 + $0x630] sm:$0xff] %v270_v47  ;;  %v398_v47 = vld [vmem:[%s18167_s8 + $0x570] sm:$0xff] }
  0x72   :  { %273 = vst [vmem:[#allocation2 + $0x628] sm:$0xff] %v272_v48  ;;  %v400_v48 = vld [vmem:[%s18167_s8 + $0x578] sm:$0xff] }
  0x73   :  { %275 = vst [vmem:[#allocation2 + $0x370] sm:$0xff] %v274_v49  ;;  %v402_v49 = vld [vmem:[%s18167_s8 + $0x580] sm:$0xff] }
  0x74   :  { %277 = vst [vmem:[#allocation2 + $0x190] sm:$0xff] %v276_v50  ;;  %v404_v50 = vld [vmem:[%s18167_s8 + $0x588] sm:$0xff] }
  0x75   :  { %279 = vst [vmem:[#allocation2 + $0x30] sm:$0xff] %v278_v51  ;;  %v406_v51 = vld [vmem:[%s18167_s8 + $0x590] sm:$0xff] }
  0x76   :  { %281 = vst [vmem:[#allocation2 + $0x300] sm:$0xff] %v280_v52  ;;  %v408_v52 = vld [vmem:[%s18167_s8 + $0x598] sm:$0xff] }
  0x77   :  { %283 = vst [vmem:[#allocation2 + $0x428] sm:$0xff] %v282_v53  ;;  %v410_v53 = vld [vmem:[%s18167_s8 + $0x5a0] sm:$0xff] }
  0x78   :  { %285 = vst [vmem:[#allocation2 + $0x150] sm:$0xff] %v284_v54  ;;  %v412_v54 = vld [vmem:[%s18167_s8 + $0x5a8] sm:$0xff] }
  0x79   :  { %287 = vst [vmem:[#allocation2 + $0xc0] sm:$0xff] %v286_v55  ;;  %v414_v55 = vld [vmem:[%s18167_s8 + $0x5b0] sm:$0xff] }
  0x7a   :  { %289 = vst [vmem:[#allocation2 + $0x358] sm:$0xff] %v288_v56  ;;  %v416_v56 = vld [vmem:[%s18167_s8 + $0x5b8] sm:$0xff] }
  0x7b   :  { %291 = vst [vmem:[#allocation2 + $0x4a0] sm:$0xff] %v290_v57  ;;  %v418_v57 = vld [vmem:[%s18167_s8 + $0x5c0] sm:$0xff] }
  0x7c   :  { %293 = vst [vmem:[#allocation2 + $0x418] sm:$0xff] %v292_v58  ;;  %v420_v58 = vld [vmem:[%s18167_s8 + $0x5c8] sm:$0xff] }
  0x7d   :  { %295 = vst [vmem:[#allocation2 + $0x5c8] sm:$0xff] %v294_v59  ;;  %v422_v59 = vld [vmem:[%s18167_s8 + $0x5d0] sm:$0xff] }
  0x7e   :  { %297 = vst [vmem:[#allocation2 + $0x438] sm:$0xff] %v296_v60  ;;  %v424_v60 = vld [vmem:[%s18167_s8 + $0x5d8] sm:$0xff] }
  0x7f   :  { %299 = vst [vmem:[#allocation2 + $0x268] sm:$0xff] %v298_v61  ;;  %v426_v61 = vld [vmem:[%s18167_s8 + $0x5e0] sm:$0xff] }
  0x80   :  { %301 = vst [vmem:[#allocation2 + $0x2c8] sm:$0xff] %v300_v62  ;;  %v428_v62 = vld [vmem:[%s18167_s8 + $0x5e8] sm:$0xff] }
  0x81   :  { %303 = vst [vmem:[#allocation2 + $0x1e0] sm:$0xff] %v302_v63  ;;  %v430_v63 = vld [vmem:[%s18167_s8 + $0x5f0] sm:$0xff] }
  0x82   :  { %305 = vst [vmem:[#allocation2 + $0x120] sm:$0xff] %v304_v0  ;;  %v432_v0 = vld [vmem:[%s18167_s8 + $0x5f8] sm:$0xff] }
  0x83   :  { %307 = vst [vmem:[#allocation2 + $0x4a8] sm:$0xff] %v306_v1  ;;  %v434_v1 = vld [vmem:[%s18167_s8 + $0x600] sm:$0xff] }
  0x84   :  { %309 = vst [vmem:[#allocation2 + $0x3d0] sm:$0xff] %v308_v2  ;;  %v436_v2 = vld [vmem:[%s18167_s8 + $0x608] sm:$0xff] }
  0x85   :  { %311 = vst [vmem:[#allocation2 + $0x180] sm:$0xff] %v310_v3  ;;  %v438_v3 = vld [vmem:[%s18167_s8 + $0x610] sm:$0xff] }
  0x86   :  { %313 = vst [vmem:[#allocation2 + $0x550] sm:$0xff] %v312_v4  ;;  %v440_v4 = vld [vmem:[%s18167_s8 + $0x618] sm:$0xff] }
  0x87   :  { %315 = vst [vmem:[#allocation2 + $0x478] sm:$0xff] %v314_v5  ;;  %v442_v5 = vld [vmem:[%s18167_s8 + $0x620] sm:$0xff] }
  0x88   :  { %317 = vst [vmem:[#allocation2 + $0x368] sm:$0xff] %v316_v6  ;;  %v444_v6 = vld [vmem:[%s18167_s8 + $0x628] sm:$0xff] }
  0x89   :  { %319 = vst [vmem:[#allocation2 + $0x3a0] sm:$0xff] %v318_v7  ;;  %v446_v7 = vld [vmem:[%s18167_s8 + $0x630] sm:$0xff] }
  0x8a   :  { %321 = vst [vmem:[#allocation2 + $0x38] sm:$0xff] %v320_v8  ;;  %v448_v8 = vld [vmem:[%s18167_s8 + $0x638] sm:$0xff] }
  0x8b   :  { %323 = vst [vmem:[#allocation2 + $0x280] sm:$0xff] %v322_v9 }
  0x8c   :  { %325 = vst [vmem:[#allocation2 + $0x5f0] sm:$0xff] %v324_v10 }
  0x8d   :  { %327 = vst [vmem:[#allocation2 + $0x68] sm:$0xff] %v326_v11 }
  0x8e   :  { %329 = vst [vmem:[#allocation2 + $0x40] sm:$0xff] %v328_v12 }
  0x8f   :  { %331 = vst [vmem:[#allocation2 + $0x4f8] sm:$0xff] %v330_v13 }
  0x90   :  { %333 = vst [vmem:[#allocation2 + $0x408] sm:$0xff] %v332_v14 }
  0x91   :  { %335 = vst [vmem:[#allocation2 + $0x3b8] sm:$0xff] %v334_v15 }
  0x92   :  { %337 = vst [vmem:[#allocation2 + $0x430] sm:$0xff] %v336_v16 }
  0x93   :  { %339 = vst [vmem:[#allocation2 + $0x198] sm:$0xff] %v338_v17 }
  0x94   :  { %341 = vst [vmem:[#allocation2 + $0x350] sm:$0xff] %v340_v18 }
  0x95   :  { %343 = vst [vmem:[#allocation2 + $0x360] sm:$0xff] %v342_v19 }
  0x96   :  { %345 = vst [vmem:[#allocation2 + $0x250] sm:$0xff] %v344_v20 }
  0x97   :  { %347 = vst [vmem:[#allocation2 + $0xe0] sm:$0xff] %v346_v21 }
  0x98   :  { %349 = vst [vmem:[#allocation2 + $0x80] sm:$0xff] %v348_v22 }
  0x99   :  { %351 = vst [vmem:[#allocation2 + $0x1d8] sm:$0xff] %v350_v23 }
  0x9a   :  { %353 = vst [vmem:[#allocation2 + $0x568] sm:$0xff] %v352_v24 }
  0x9b   :  { %355 = vst [vmem:[#allocation2 + $0x170] sm:$0xff] %v354_v25 }
  0x9c   :  { %357 = vst [vmem:[#allocation2 + $0x3f0] sm:$0xff] %v356_v26 }
  0x9d   :  { %359 = vst [vmem:[#allocation2 + $0x218] sm:$0xff] %v358_v27 }
  0x9e   :  { %361 = vst [vmem:[#allocation2 + $0x3e8] sm:$0xff] %v360_v28 }
  0x9f   :  { %363 = vst [vmem:[#allocation2 + $0x140] sm:$0xff] %v362_v29 }
  0xa0   :  { %365 = vst [vmem:[#allocation2 + $0x420] sm:$0xff] %v364_v30 }
  0xa1   :  { %367 = vst [vmem:[#allocation2 + $0x110] sm:$0xff] %v366_v31 }
  0xa2   :  { %369 = vst [vmem:[#allocation2 + $0x1a8] sm:$0xff] %v368_v32 }
  0xa3   :  { %371 = vst [vmem:[#allocation2 + $0x470] sm:$0xff] %v370_v33 }
  0xa4   :  { %373 = vst [vmem:[#allocation2 + $0x4b8] sm:$0xff] %v372_v34 }
  0xa5   :  { %375 = vst [vmem:[#allocation2 + $0x298] sm:$0xff] %v374_v35 }
  0xa6   :  { %377 = vst [vmem:[#allocation2 + $0x1e8] sm:$0xff] %v376_v36 }
  0xa7   :  { %379 = vst [vmem:[#allocation2 + $0x1c8] sm:$0xff] %v378_v37 }
  0xa8   :  { %381 = vst [vmem:[#allocation2 + $0x1b8] sm:$0xff] %v380_v38 }
  0xa9   :  { %383 = vst [vmem:[#allocation2 + $0x258] sm:$0xff] %v382_v39 }
  0xaa   :  { %385 = vst [vmem:[#allocation2 + $0x208] sm:$0xff] %v384_v40 }
  0xab   :  { %387 = vst [vmem:[#allocation2 + $0x348] sm:$0xff] %v386_v41 }
  0xac   :  { %389 = vst [vmem:[#allocation2 + $0x88] sm:$0xff] %v388_v42 }
  0xad   :  { %391 = vst [vmem:[#allocation2 + $0x90] sm:$0xff] %v390_v43 }
  0xae   :  { %393 = vst [vmem:[#allocation2 + $0x1f0] sm:$0xff] %v392_v44 }
  0xaf   :  { %395 = vst [vmem:[#allocation2] sm:$0xff] %v394_v45 }
  0xb0   :  { %397 = vst [vmem:[#allocation2 + $0x5b8] sm:$0xff] %v396_v46 }
  0xb1   :  { %399 = vst [vmem:[#allocation2 + $0x600] sm:$0xff] %v398_v47 }
  0xb2   :  { %401 = vst [vmem:[#allocation2 + $0xa8] sm:$0xff] %v400_v48 }
  0xb3   :  { %403 = vst [vmem:[#allocation2 + $0x260] sm:$0xff] %v402_v49 }
  0xb4   :  { %405 = vst [vmem:[#allocation2 + $0x220] sm:$0xff] %v404_v50 }
  0xb5   :  { %407 = vst [vmem:[#allocation2 + $0x620] sm:$0xff] %v406_v51 }
  0xb6   :  { %409 = vst [vmem:[#allocation2 + $0x410] sm:$0xff] %v408_v52 }
  0xb7   :  { %411 = vst [vmem:[#allocation2 + $0x1b0] sm:$0xff] %v410_v53 }
  0xb8   :  { %413 = vst [vmem:[#allocation2 + $0x2d0] sm:$0xff] %v412_v54 }
  0xb9   :  { %415 = vst [vmem:[#allocation2 + $0x2e0] sm:$0xff] %v414_v55 }
  0xba   :  { %417 = vst [vmem:[#allocation2 + $0x528] sm:$0xff] %v416_v56 }
  0xbb   :  { %419 = vst [vmem:[#allocation2 + $0x130] sm:$0xff] %v418_v57 }
  0xbc   :  { %421 = vst [vmem:[#allocation2 + $0x2c0] sm:$0xff] %v420_v58 }
  0xbd   :  { %423 = vst [vmem:[#allocation2 + $0x158] sm:$0xff] %v422_v59 }
  0xbe   :  { %425 = vst [vmem:[#allocation2 + $0x578] sm:$0xff] %v424_v60 }
  0xbf   :  { %427 = vst [vmem:[#allocation2 + $0x468] sm:$0xff] %v426_v61 }
  0xc0   :  { %429 = vst [vmem:[#allocation2 + $0x228] sm:$0xff] %v428_v62 }
  0xc1   :  { %431 = vst [vmem:[#allocation2 + $0x558] sm:$0xff] %v430_v63 }
  0xc2   :  { %433 = vst [vmem:[#allocation2 + $0x1c0] sm:$0xff] %v432_v0 }
  0xc3   :  { %435 = vst [vmem:[#allocation2 + $0xd8] sm:$0xff] %v434_v1 }
  0xc4   :  { %437 = vst [vmem:[#allocation2 + $0x10] sm:$0xff] %v436_v2 }
  0xc5   :  { %439 = vst [vmem:[#allocation2 + $0x448] sm:$0xff] %v438_v3 }
  0xc6   :  { %441 = vst [vmem:[#allocation2 + $0xf0] sm:$0xff] %v440_v4 }
  0xc7   :  { %443 = vst [vmem:[#allocation2 + $0x560] sm:$0xff] %v442_v5 }
  0xc8   :  { %445 = vst [vmem:[#allocation2 + $0xa0] sm:$0xff] %v444_v6 }
  0xc9   :  { %447 = vst [vmem:[#allocation2 + $0x4e8] sm:$0xff] %v446_v7 }
  0xca   :  { %449 = vst [vmem:[#allocation2 + $0x290] sm:$0xff] %v448_v8 }
  0xcb   :  { %455 = vsyncadd [#allocation5], 25600  ;;  %v467_v9 = vld [vmem:[%s18160_s9] sm:$0xff]  ;;  %v469_v10 = vld [vmem:[%s18160_s9 + $0x8] sm:$0xff] }
  0xcc   :  { %468 = vst [vmem:[#allocation3 + $0x68] sm:$0xff] %v467_v9  ;;  %v471_v11 = vld [vmem:[%s18160_s9 + $0x10] sm:$0xff]  ;;  %v473_v12 = vld [vmem:[%s18160_s9 + $0x18] sm:$0xff]  ;;  %v475_v13 = vld [vmem:[%s18160_s9 + $0x20] sm:$0xff] }
  0xcd   :  { %470 = vst [vmem:[#allocation3 + $0x188] sm:$0xff] %v469_v10  ;;  %v477_v14 = vld [vmem:[%s18160_s9 + $0x28] sm:$0xff]  ;;  %v479_v15 = vld [vmem:[%s18160_s9 + $0x30] sm:$0xff]  ;;  %v481_v16 = vld [vmem:[%s18160_s9 + $0x38] sm:$0xff] }
  0xce   :  { %472 = vst [vmem:[#allocation3 + $0x1c0] sm:$0xff] %v471_v11  ;;  %v483_v17 = vld [vmem:[%s18160_s9 + $0x40] sm:$0xff]  ;;  %v485_v18 = vld [vmem:[%s18160_s9 + $0x48] sm:$0xff]  ;;  %v487_v19 = vld [vmem:[%s18160_s9 + $0x50] sm:$0xff] }
  0xcf   :  { %474 = vst [vmem:[#allocation3 + $0x1e0] sm:$0xff] %v473_v12  ;;  %v489_v20 = vld [vmem:[%s18160_s9 + $0x58] sm:$0xff]  ;;  %v491_v21 = vld [vmem:[%s18160_s9 + $0x60] sm:$0xff]  ;;  %v493_v22 = vld [vmem:[%s18160_s9 + $0x68] sm:$0xff] }
  0xd0   :  { %476 = vst [vmem:[#allocation3 + $0x130] sm:$0xff] %v475_v13  ;;  %v495_v23 = vld [vmem:[%s18160_s9 + $0x70] sm:$0xff]  ;;  %v497_v24 = vld [vmem:[%s18160_s9 + $0x78] sm:$0xff]  ;;  %v499_v25 = vld [vmem:[%s18160_s9 + $0x80] sm:$0xff] }
  0xd1   :  { %478 = vst [vmem:[#allocation3 + $0x178] sm:$0xff] %v477_v14  ;;  %v501_v26 = vld [vmem:[%s18160_s9 + $0x88] sm:$0xff]  ;;  %v503_v27 = vld [vmem:[%s18160_s9 + $0x90] sm:$0xff]  ;;  %v505_v28 = vld [vmem:[%s18160_s9 + $0x98] sm:$0xff] }
  0xd2   :  { %480 = vst [vmem:[#allocation3 + $0x38] sm:$0xff] %v479_v15  ;;  %v507_v29 = vld [vmem:[%s18160_s9 + $0xa0] sm:$0xff]  ;;  %v509_v30 = vld [vmem:[%s18160_s9 + $0xa8] sm:$0xff]  ;;  %v511_v31 = vld [vmem:[%s18160_s9 + $0xb0] sm:$0xff] }
  0xd3   :  { %482 = vst [vmem:[#allocation3 + $0x1b0] sm:$0xff] %v481_v16  ;;  %v513_v32 = vld [vmem:[%s18160_s9 + $0xb8] sm:$0xff]  ;;  %v515_v33 = vld [vmem:[%s18160_s9 + $0xc0] sm:$0xff]  ;;  %v517_v34 = vld [vmem:[%s18160_s9 + $0xc8] sm:$0xff] }
  0xd4   :  { %484 = vst [vmem:[#allocation3 + $0x110] sm:$0xff] %v483_v17  ;;  %v519_v35 = vld [vmem:[%s18160_s9 + $0xd0] sm:$0xff]  ;;  %v521_v36 = vld [vmem:[%s18160_s9 + $0xd8] sm:$0xff]  ;;  %v523_v37 = vld [vmem:[%s18160_s9 + $0xe0] sm:$0xff] }
  0xd5   :  { %486 = vst [vmem:[#allocation3 + $0x210] sm:$0xff] %v485_v18  ;;  %v525_v38 = vld [vmem:[%s18160_s9 + $0xe8] sm:$0xff]  ;;  %v527_v39 = vld [vmem:[%s18160_s9 + $0xf0] sm:$0xff]  ;;  %v529_v40 = vld [vmem:[%s18160_s9 + $0xf8] sm:$0xff] }
  0xd6   :  { %488 = vst [vmem:[#allocation3 + $0x1a0] sm:$0xff] %v487_v19  ;;  %v531_v41 = vld [vmem:[%s18160_s9 + $0x100] sm:$0xff]  ;;  %v533_v42 = vld [vmem:[%s18160_s9 + $0x108] sm:$0xff]  ;;  %v535_v43 = vld [vmem:[%s18160_s9 + $0x110] sm:$0xff] }
  0xd7   :  { %490 = vst [vmem:[#allocation3 + $0x40] sm:$0xff] %v489_v20  ;;  %v537_v44 = vld [vmem:[%s18160_s9 + $0x118] sm:$0xff]  ;;  %v539_v45 = vld [vmem:[%s18160_s9 + $0x120] sm:$0xff]  ;;  %v541_v46 = vld [vmem:[%s18160_s9 + $0x128] sm:$0xff] }
  0xd8   :  { %492 = vst [vmem:[#allocation3 + $0x58] sm:$0xff] %v491_v21  ;;  %v543_v47 = vld [vmem:[%s18160_s9 + $0x130] sm:$0xff]  ;;  %v545_v48 = vld [vmem:[%s18160_s9 + $0x138] sm:$0xff]  ;;  %v547_v49 = vld [vmem:[%s18160_s9 + $0x140] sm:$0xff] }
  0xd9   :  { %494 = vst [vmem:[#allocation3 + $0x98] sm:$0xff] %v493_v22  ;;  %v549_v50 = vld [vmem:[%s18160_s9 + $0x148] sm:$0xff]  ;;  %v551_v51 = vld [vmem:[%s18160_s9 + $0x150] sm:$0xff]  ;;  %v553_v52 = vld [vmem:[%s18160_s9 + $0x158] sm:$0xff] }
  0xda   :  { %496 = vst [vmem:[#allocation3 + $0x198] sm:$0xff] %v495_v23  ;;  %v555_v53 = vld [vmem:[%s18160_s9 + $0x160] sm:$0xff]  ;;  %v557_v54 = vld [vmem:[%s18160_s9 + $0x168] sm:$0xff]  ;;  %v559_v55 = vld [vmem:[%s18160_s9 + $0x170] sm:$0xff] }
  0xdb   :  { %498 = vst [vmem:[#allocation3 + $0x190] sm:$0xff] %v497_v24  ;;  %v561_v56 = vld [vmem:[%s18160_s9 + $0x178] sm:$0xff]  ;;  %v563_v57 = vld [vmem:[%s18160_s9 + $0x180] sm:$0xff]  ;;  %v565_v58 = vld [vmem:[%s18160_s9 + $0x188] sm:$0xff] }
  0xdc   :  { %500 = vst [vmem:[#allocation3 + $0x60] sm:$0xff] %v499_v25  ;;  %v567_v59 = vld [vmem:[%s18160_s9 + $0x190] sm:$0xff]  ;;  %v569_v60 = vld [vmem:[%s18160_s9 + $0x198] sm:$0xff]  ;;  %v571_v61 = vld [vmem:[%s18160_s9 + $0x1a0] sm:$0xff] }
  0xdd   :  { %502 = vst [vmem:[#allocation3 + $0xa8] sm:$0xff] %v501_v26  ;;  %v573_v62 = vld [vmem:[%s18160_s9 + $0x1a8] sm:$0xff]  ;;  %v575_v63 = vld [vmem:[%s18160_s9 + $0x1b0] sm:$0xff]  ;;  %v577_v0 = vld [vmem:[%s18160_s9 + $0x1b8] sm:$0xff] }
  0xde   :  { %504 = vst [vmem:[#allocation3 + $0x138] sm:$0xff] %v503_v27  ;;  %v579_v1 = vld [vmem:[%s18160_s9 + $0x1c0] sm:$0xff]  ;;  %v581_v2 = vld [vmem:[%s18160_s9 + $0x1c8] sm:$0xff]  ;;  %v583_v3 = vld [vmem:[%s18160_s9 + $0x1d0] sm:$0xff] }
  0xdf   :  { %506 = vst [vmem:[#allocation3 + $0x150] sm:$0xff] %v505_v28  ;;  %v585_v4 = vld [vmem:[%s18160_s9 + $0x1d8] sm:$0xff]  ;;  %v587_v5 = vld [vmem:[%s18160_s9 + $0x1e0] sm:$0xff]  ;;  %v589_v6 = vld [vmem:[%s18160_s9 + $0x1e8] sm:$0xff] }
  0xe0   :  { %508 = vst [vmem:[#allocation3 + $0x30] sm:$0xff] %v507_v29  ;;  %v591_v7 = vld [vmem:[%s18160_s9 + $0x1f0] sm:$0xff]  ;;  %v593_v8 = vld [vmem:[%s18160_s9 + $0x1f8] sm:$0xff]  ;;  %v595_v9 = vld [vmem:[%s18160_s9 + $0x200] sm:$0xff] }
  0xe1   :  { %510 = vst [vmem:[#allocation3 + $0xf8] sm:$0xff] %v509_v30  ;;  %v597_v10 = vld [vmem:[%s18160_s9 + $0x208] sm:$0xff]  ;;  %v599_v11 = vld [vmem:[%s18160_s9 + $0x210] sm:$0xff]  ;;  %v601_v12 = vld [vmem:[%s18160_s9 + $0x218] sm:$0xff] }
  0xe2   :  { %512 = vst [vmem:[#allocation3 + $0x50] sm:$0xff] %v511_v31  ;;  %v603_v13 = vld [vmem:[%s18160_s9 + $0x220] sm:$0xff]  ;;  %v605_v14 = vld [vmem:[%s18160_s9 + $0x228] sm:$0xff]  ;;  %v607_v15 = vld [vmem:[%s18160_s9 + $0x230] sm:$0xff] }
  0xe3   :  { %514 = vst [vmem:[#allocation3 + $0x108] sm:$0xff] %v513_v32  ;;  %v609_v16 = vld [vmem:[%s18160_s9 + $0x238] sm:$0xff] }
  0xe4   :  { %516 = vst [vmem:[#allocation3 + $0x1e8] sm:$0xff] %v515_v33 }
  0xe5   :  { %518 = vst [vmem:[#allocation3 + $0x160] sm:$0xff] %v517_v34 }
  0xe6   :  { %520 = vst [vmem:[#allocation3 + $0x88] sm:$0xff] %v519_v35 }
  0xe7   :  { %522 = vst [vmem:[#allocation3 + $0x1d0] sm:$0xff] %v521_v36 }
  0xe8   :  { %524 = vst [vmem:[#allocation3 + $0x120] sm:$0xff] %v523_v37 }
  0xe9   :  { %526 = vst [vmem:[#allocation3 + $0x1f8] sm:$0xff] %v525_v38 }
  0xea   :  { %528 = vst [vmem:[#allocation3 + $0x48] sm:$0xff] %v527_v39 }
  0xeb   :  { %530 = vst [vmem:[#allocation3 + $0xc0] sm:$0xff] %v529_v40 }
  0xec   :  { %532 = vst [vmem:[#allocation3 + $0x148] sm:$0xff] %v531_v41 }
  0xed   :  { %534 = vst [vmem:[#allocation3 + $0x18] sm:$0xff] %v533_v42 }
  0xee   :  { %536 = vst [vmem:[#allocation3 + $0xe8] sm:$0xff] %v535_v43 }
  0xef   :  { %538 = vst [vmem:[#allocation3 + $0x220] sm:$0xff] %v537_v44 }
  0xf0   :  { %540 = vst [vmem:[#allocation3 + $0x8] sm:$0xff] %v539_v45 }
  0xf1   :  { %542 = vst [vmem:[#allocation3 + $0x90] sm:$0xff] %v541_v46 }
  0xf2   :  { %544 = vst [vmem:[#allocation3 + $0xb0] sm:$0xff] %v543_v47 }
  0xf3   :  { %546 = vst [vmem:[#allocation3 + $0xd0] sm:$0xff] %v545_v48 }
  0xf4   :  { %548 = vst [vmem:[#allocation3 + $0x1c8] sm:$0xff] %v547_v49 }
  0xf5   :  { %550 = vst [vmem:[#allocation3 + $0xd8] sm:$0xff] %v549_v50 }
  0xf6   :  { %552 = vst [vmem:[#allocation3 + $0x228] sm:$0xff] %v551_v51 }
  0xf7   :  { %554 = vst [vmem:[#allocation3 + $0x1b8] sm:$0xff] %v553_v52 }
  0xf8   :  { %556 = vst [vmem:[#allocation3 + $0x180] sm:$0xff] %v555_v53 }
  0xf9   :  { %558 = vst [vmem:[#allocation3 + $0x100] sm:$0xff] %v557_v54 }
  0xfa   :  { %560 = vst [vmem:[#allocation3 + $0x20] sm:$0xff] %v559_v55 }
  0xfb   :  { %562 = vst [vmem:[#allocation3 + $0x168] sm:$0xff] %v561_v56 }
  0xfc   :  { %564 = vst [vmem:[#allocation3 + $0x200] sm:$0xff] %v563_v57 }
  0xfd   :  { %566 = vst [vmem:[#allocation3 + $0xa0] sm:$0xff] %v565_v58 }
  0xfe   :  { %568 = vst [vmem:[#allocation3 + $0x230] sm:$0xff] %v567_v59 }
  0xff   :  { %570 = vst [vmem:[#allocation3 + $0x118] sm:$0xff] %v569_v60 }
 0x100   :  { %572 = vst [vmem:[#allocation3 + $0x28] sm:$0xff] %v571_v61 }
 0x101   :  { %574 = vst [vmem:[#allocation3 + $0x78] sm:$0xff] %v573_v62 }
 0x102   :  { %576 = vst [vmem:[#allocation3] sm:$0xff] %v575_v63 }
 0x103   :  { %578 = vst [vmem:[#allocation3 + $0xb8] sm:$0xff] %v577_v0 }
 0x104   :  { %580 = vst [vmem:[#allocation3 + $0x1f0] sm:$0xff] %v579_v1 }
 0x105   :  { %582 = vst [vmem:[#allocation3 + $0x238] sm:$0xff] %v581_v2 }
 0x106   :  { %584 = vst [vmem:[#allocation3 + $0xe0] sm:$0xff] %v583_v3 }
 0x107   :  { %586 = vst [vmem:[#allocation3 + $0x218] sm:$0xff] %v585_v4 }
 0x108   :  { %588 = vst [vmem:[#allocation3 + $0x70] sm:$0xff] %v587_v5 }
 0x109   :  { %590 = vst [vmem:[#allocation3 + $0x158] sm:$0xff] %v589_v6 }
 0x10a   :  { %592 = vst [vmem:[#allocation3 + $0x208] sm:$0xff] %v591_v7 }
 0x10b   :  { %594 = vst [vmem:[#allocation3 + $0x140] sm:$0xff] %v593_v8 }
 0x10c   :  { %596 = vst [vmem:[#allocation3 + $0xc8] sm:$0xff] %v595_v9 }
 0x10d   :  { %598 = vst [vmem:[#allocation3 + $0x1d8] sm:$0xff] %v597_v10 }
 0x10e   :  { %600 = vst [vmem:[#allocation3 + $0x80] sm:$0xff] %v599_v11 }
 0x10f   :  { %602 = vst [vmem:[#allocation3 + $0x170] sm:$0xff] %v601_v12 }
 0x110   :  { %604 = vst [vmem:[#allocation3 + $0xf0] sm:$0xff] %v603_v13 }
 0x111   :  { %606 = vst [vmem:[#allocation3 + $0x1a8] sm:$0xff] %v605_v14 }
 0x112   :  { %608 = vst [vmem:[#allocation3 + $0x128] sm:$0xff] %v607_v15 }
 0x113   :  { %610 = vst [vmem:[#allocation3 + $0x10] sm:$0xff] %v609_v16 }
 0x114   :  { %616 = vsyncadd [#allocation5 + $0x1], 9216  ;;  %v628_v17 = vld [vmem:[%s18161_s10] sm:$0xff]  ;;  %v630_v18 = vld [vmem:[%s18161_s10 + $0x8] sm:$0xff] }
 0x115   :  { %629 = vst [vmem:[#allocation4] sm:$0xff] %v628_v17  ;;  %v632_v19 = vld [vmem:[%s18161_s10 + $0x10] sm:$0xff]  ;;  %v634_v20 = vld [vmem:[%s18161_s10 + $0x18] sm:$0xff]  ;;  %v636_v21 = vld [vmem:[%s18161_s10 + $0x20] sm:$0xff] }
 0x116   :  { %631 = vst [vmem:[#allocation4 + $0x8] sm:$0xff] %v630_v18  ;;  %v638_v22 = vld [vmem:[%s18161_s10 + $0x28] sm:$0xff]  ;;  %v640_v23 = vld [vmem:[%s18161_s10 + $0x30] sm:$0xff]  ;;  %v642_v24 = vld [vmem:[%s18161_s10 + $0x38] sm:$0xff] }
 0x117   :  { %633 = vst [vmem:[#allocation4 + $0x10] sm:$0xff] %v632_v19  ;;  %v644_v25 = vld [vmem:[%s18161_s10 + $0x40] sm:$0xff]  ;;  %v646_v26 = vld [vmem:[%s18161_s10 + $0x48] sm:$0xff]  ;;  %v648_v27 = vld [vmem:[%s18161_s10 + $0x50] sm:$0xff] }
 0x118   :  { %635 = vst [vmem:[#allocation4 + $0x18] sm:$0xff] %v634_v20  ;;  %v650_v28 = vld [vmem:[%s18161_s10 + $0x58] sm:$0xff]  ;;  %v652_v29 = vld [vmem:[%s18161_s10 + $0x60] sm:$0xff]  ;;  %v654_v30 = vld [vmem:[%s18161_s10 + $0x68] sm:$0xff] }
 0x119   :  { %637 = vst [vmem:[#allocation4 + $0x20] sm:$0xff] %v636_v21  ;;  %v656_v31 = vld [vmem:[%s18161_s10 + $0x70] sm:$0xff]  ;;  %v658_v32 = vld [vmem:[%s18161_s10 + $0x78] sm:$0xff]  ;;  %v660_v33 = vld [vmem:[%s18161_s10 + $0x80] sm:$0xff] }
 0x11a   :  { %639 = vst [vmem:[#allocation4 + $0x28] sm:$0xff] %v638_v22  ;;  %v662_v34 = vld [vmem:[%s18161_s10 + $0x88] sm:$0xff]  ;;  %v664_v35 = vld [vmem:[%s18161_s10 + $0x90] sm:$0xff]  ;;  %v666_v36 = vld [vmem:[%s18161_s10 + $0x98] sm:$0xff] }
 0x11b   :  { %641 = vst [vmem:[#allocation4 + $0x30] sm:$0xff] %v640_v23  ;;  %v668_v37 = vld [vmem:[%s18161_s10 + $0xa0] sm:$0xff]  ;;  %v670_v38 = vld [vmem:[%s18161_s10 + $0xa8] sm:$0xff]  ;;  %v672_v39 = vld [vmem:[%s18161_s10 + $0xb0] sm:$0xff] }
 0x11c   :  { %643 = vst [vmem:[#allocation4 + $0x38] sm:$0xff] %v642_v24  ;;  %v674_v40 = vld [vmem:[%s18161_s10 + $0xb8] sm:$0xff]  ;;  %v676_v41 = vld [vmem:[%s18161_s10 + $0xc0] sm:$0xff]  ;;  %v678_v42 = vld [vmem:[%s18161_s10 + $0xc8] sm:$0xff] }
 0x11d   :  { %645 = vst [vmem:[#allocation4 + $0x40] sm:$0xff] %v644_v25  ;;  %v680_v43 = vld [vmem:[%s18161_s10 + $0xd0] sm:$0xff]  ;;  %v682_v44 = vld [vmem:[%s18161_s10 + $0xd8] sm:$0xff]  ;;  %v684_v45 = vld [vmem:[%s18161_s10 + $0xe0] sm:$0xff] }
 0x11e   :  { %647 = vst [vmem:[#allocation4 + $0x48] sm:$0xff] %v646_v26  ;;  %v686_v46 = vld [vmem:[%s18161_s10 + $0xe8] sm:$0xff]  ;;  %v688_v47 = vld [vmem:[%s18161_s10 + $0xf0] sm:$0xff]  ;;  %v690_v48 = vld [vmem:[%s18161_s10 + $0xf8] sm:$0xff] }
 0x11f   :  { %649 = vst [vmem:[#allocation4 + $0x50] sm:$0xff] %v648_v27  ;;  %v692_v49 = vld [vmem:[%s18161_s10 + $0x100] sm:$0xff]  ;;  %v694_v50 = vld [vmem:[%s18161_s10 + $0x108] sm:$0xff]  ;;  %v696_v51 = vld [vmem:[%s18161_s10 + $0x110] sm:$0xff] }
 0x120   :  { %651 = vst [vmem:[#allocation4 + $0x58] sm:$0xff] %v650_v28  ;;  %v698_v52 = vld [vmem:[%s18161_s10 + $0x118] sm:$0xff]  ;;  %v700_v53 = vld [vmem:[%s18161_s10 + $0x120] sm:$0xff]  ;;  %v702_v54 = vld [vmem:[%s18161_s10 + $0x128] sm:$0xff] }
 0x121   :  { %653 = vst [vmem:[#allocation4 + $0x60] sm:$0xff] %v652_v29  ;;  %v704_v55 = vld [vmem:[%s18161_s10 + $0x130] sm:$0xff]  ;;  %v706_v56 = vld [vmem:[%s18161_s10 + $0x138] sm:$0xff]  ;;  %v708_v57 = vld [vmem:[%s18161_s10 + $0x140] sm:$0xff] }
 0x122   :  { %655 = vst [vmem:[#allocation4 + $0x68] sm:$0xff] %v654_v30  ;;  %v710_v58 = vld [vmem:[%s18161_s10 + $0x148] sm:$0xff]  ;;  %v712_v59 = vld [vmem:[%s18161_s10 + $0x150] sm:$0xff]  ;;  %v714_v60 = vld [vmem:[%s18161_s10 + $0x158] sm:$0xff] }
 0x123   :  { %657 = vst [vmem:[#allocation4 + $0x70] sm:$0xff] %v656_v31  ;;  %v716_v61 = vld [vmem:[%s18161_s10 + $0x160] sm:$0xff]  ;;  %v718_v62 = vld [vmem:[%s18161_s10 + $0x168] sm:$0xff]  ;;  %v720_v63 = vld [vmem:[%s18161_s10 + $0x170] sm:$0xff] }
 0x124   :  { %659 = vst [vmem:[#allocation4 + $0x78] sm:$0xff] %v658_v32  ;;  %v722_v0 = vld [vmem:[%s18161_s10 + $0x178] sm:$0xff]  ;;  %v724_v1 = vld [vmem:[%s18161_s10 + $0x180] sm:$0xff]  ;;  %v726_v2 = vld [vmem:[%s18161_s10 + $0x188] sm:$0xff] }
 0x125   :  { %661 = vst [vmem:[#allocation4 + $0x80] sm:$0xff] %v660_v33  ;;  %v728_v3 = vld [vmem:[%s18161_s10 + $0x190] sm:$0xff]  ;;  %v730_v4 = vld [vmem:[%s18161_s10 + $0x198] sm:$0xff]  ;;  %v732_v5 = vld [vmem:[%s18161_s10 + $0x1a0] sm:$0xff] }
 0x126   :  { %663 = vst [vmem:[#allocation4 + $0x88] sm:$0xff] %v662_v34  ;;  %v734_v6 = vld [vmem:[%s18161_s10 + $0x1a8] sm:$0xff]  ;;  %v736_v7 = vld [vmem:[%s18161_s10 + $0x1b0] sm:$0xff]  ;;  %v738_v8 = vld [vmem:[%s18161_s10 + $0x1b8] sm:$0xff] }
 0x127   :  { %665 = vst [vmem:[#allocation4 + $0x90] sm:$0xff] %v664_v35  ;;  %v740_v9 = vld [vmem:[%s18161_s10 + $0x1c0] sm:$0xff]  ;;  %v742_v10 = vld [vmem:[%s18161_s10 + $0x1c8] sm:$0xff]  ;;  %v744_v11 = vld [vmem:[%s18161_s10 + $0x1d0] sm:$0xff] }
 0x128   :  { %667 = vst [vmem:[#allocation4 + $0x98] sm:$0xff] %v666_v36  ;;  %v746_v12 = vld [vmem:[%s18161_s10 + $0x1d8] sm:$0xff]  ;;  %v748_v13 = vld [vmem:[%s18161_s10 + $0x1e0] sm:$0xff]  ;;  %v750_v14 = vld [vmem:[%s18161_s10 + $0x1e8] sm:$0xff] }
 0x129   :  { %669 = vst [vmem:[#allocation4 + $0xa0] sm:$0xff] %v668_v37  ;;  %v752_v15 = vld [vmem:[%s18161_s10 + $0x1f0] sm:$0xff]  ;;  %v754_v16 = vld [vmem:[%s18161_s10 + $0x1f8] sm:$0xff]  ;;  %v756_v17 = vld [vmem:[%s18161_s10 + $0x200] sm:$0xff] }
 0x12a   :  { %671 = vst [vmem:[#allocation4 + $0xa8] sm:$0xff] %v670_v38  ;;  %v758_v18 = vld [vmem:[%s18161_s10 + $0x208] sm:$0xff]  ;;  %v760_v19 = vld [vmem:[%s18161_s10 + $0x210] sm:$0xff]  ;;  %v762_v20 = vld [vmem:[%s18161_s10 + $0x218] sm:$0xff] }
 0x12b   :  { %673 = vst [vmem:[#allocation4 + $0xb0] sm:$0xff] %v672_v39  ;;  %v764_v21 = vld [vmem:[%s18161_s10 + $0x220] sm:$0xff]  ;;  %v766_v22 = vld [vmem:[%s18161_s10 + $0x228] sm:$0xff]  ;;  %v768_v23 = vld [vmem:[%s18161_s10 + $0x230] sm:$0xff] }
 0x12c   :  { %675 = vst [vmem:[#allocation4 + $0xb8] sm:$0xff] %v674_v40  ;;  %v770_v24 = vld [vmem:[%s18161_s10 + $0x238] sm:$0xff]  ;;  %v772_v25 = vld [vmem:[%s18161_s10 + $0x240] sm:$0xff]  ;;  %v774_v26 = vld [vmem:[%s18161_s10 + $0x248] sm:$0xff] }
 0x12d   :  { %677 = vst [vmem:[#allocation4 + $0xc0] sm:$0xff] %v676_v41  ;;  %v776_v27 = vld [vmem:[%s18161_s10 + $0x250] sm:$0xff]  ;;  %v778_v28 = vld [vmem:[%s18161_s10 + $0x258] sm:$0xff]  ;;  %v780_v29 = vld [vmem:[%s18161_s10 + $0x260] sm:$0xff] }
 0x12e   :  { %679 = vst [vmem:[#allocation4 + $0xc8] sm:$0xff] %v678_v42  ;;  %v782_v30 = vld [vmem:[%s18161_s10 + $0x268] sm:$0xff]  ;;  %v784_v31 = vld [vmem:[%s18161_s10 + $0x270] sm:$0xff]  ;;  %v786_v32 = vld [vmem:[%s18161_s10 + $0x278] sm:$0xff] }
 0x12f   :  { %681 = vst [vmem:[#allocation4 + $0xd0] sm:$0xff] %v680_v43  ;;  %v788_v33 = vld [vmem:[%s18161_s10 + $0x280] sm:$0xff]  ;;  %v790_v34 = vld [vmem:[%s18161_s10 + $0x288] sm:$0xff]  ;;  %v792_v35 = vld [vmem:[%s18161_s10 + $0x290] sm:$0xff] }
 0x130   :  { %683 = vst [vmem:[#allocation4 + $0xd8] sm:$0xff] %v682_v44  ;;  %v794_v36 = vld [vmem:[%s18161_s10 + $0x298] sm:$0xff]  ;;  %v796_v37 = vld [vmem:[%s18161_s10 + $0x2a0] sm:$0xff]  ;;  %v798_v38 = vld [vmem:[%s18161_s10 + $0x2a8] sm:$0xff] }
 0x131   :  { %685 = vst [vmem:[#allocation4 + $0xe0] sm:$0xff] %v684_v45  ;;  %v800_v39 = vld [vmem:[%s18161_s10 + $0x2b0] sm:$0xff]  ;;  %v802_v40 = vld [vmem:[%s18161_s10 + $0x2b8] sm:$0xff]  ;;  %v804_v41 = vld [vmem:[%s18161_s10 + $0x2c0] sm:$0xff] }
 0x132   :  { %687 = vst [vmem:[#allocation4 + $0xe8] sm:$0xff] %v686_v46  ;;  %v806_v42 = vld [vmem:[%s18161_s10 + $0x2c8] sm:$0xff]  ;;  %v808_v43 = vld [vmem:[%s18161_s10 + $0x2d0] sm:$0xff]  ;;  %v810_v44 = vld [vmem:[%s18161_s10 + $0x2d8] sm:$0xff] }
 0x133   :  { %689 = vst [vmem:[#allocation4 + $0xf0] sm:$0xff] %v688_v47  ;;  %v812_v45 = vld [vmem:[%s18161_s10 + $0x2e0] sm:$0xff]  ;;  %v814_v46 = vld [vmem:[%s18161_s10 + $0x2e8] sm:$0xff]  ;;  %v816_v47 = vld [vmem:[%s18161_s10 + $0x2f0] sm:$0xff] }
 0x134   :  { %691 = vst [vmem:[#allocation4 + $0xf8] sm:$0xff] %v690_v48  ;;  %v818_v48 = vld [vmem:[%s18161_s10 + $0x2f8] sm:$0xff] }
 0x135   :  { %693 = vst [vmem:[#allocation4 + $0x100] sm:$0xff] %v692_v49  ;;  %v820_v49 = vld [vmem:[%s18161_s10 + $0x300] sm:$0xff] }
 0x136   :  { %695 = vst [vmem:[#allocation4 + $0x108] sm:$0xff] %v694_v50  ;;  %v822_v50 = vld [vmem:[%s18161_s10 + $0x308] sm:$0xff] }
 0x137   :  { %697 = vst [vmem:[#allocation4 + $0x110] sm:$0xff] %v696_v51  ;;  %v824_v51 = vld [vmem:[%s18161_s10 + $0x310] sm:$0xff] }
 0x138   :  { %699 = vst [vmem:[#allocation4 + $0x118] sm:$0xff] %v698_v52  ;;  %v826_v52 = vld [vmem:[%s18161_s10 + $0x318] sm:$0xff] }
 0x139   :  { %701 = vst [vmem:[#allocation4 + $0x120] sm:$0xff] %v700_v53  ;;  %v828_v53 = vld [vmem:[%s18161_s10 + $0x320] sm:$0xff] }
 0x13a   :  { %703 = vst [vmem:[#allocation4 + $0x128] sm:$0xff] %v702_v54  ;;  %v830_v54 = vld [vmem:[%s18161_s10 + $0x328] sm:$0xff] }
 0x13b   :  { %705 = vst [vmem:[#allocation4 + $0x130] sm:$0xff] %v704_v55  ;;  %v832_v55 = vld [vmem:[%s18161_s10 + $0x330] sm:$0xff] }
 0x13c   :  { %707 = vst [vmem:[#allocation4 + $0x138] sm:$0xff] %v706_v56  ;;  %v834_v56 = vld [vmem:[%s18161_s10 + $0x338] sm:$0xff] }
 0x13d   :  { %709 = vst [vmem:[#allocation4 + $0x140] sm:$0xff] %v708_v57  ;;  %v836_v57 = vld [vmem:[%s18161_s10 + $0x340] sm:$0xff] }
 0x13e   :  { %711 = vst [vmem:[#allocation4 + $0x148] sm:$0xff] %v710_v58  ;;  %v838_v58 = vld [vmem:[%s18161_s10 + $0x348] sm:$0xff] }
 0x13f   :  { %713 = vst [vmem:[#allocation4 + $0x150] sm:$0xff] %v712_v59  ;;  %v840_v59 = vld [vmem:[%s18161_s10 + $0x350] sm:$0xff] }
 0x140   :  { %715 = vst [vmem:[#allocation4 + $0x158] sm:$0xff] %v714_v60  ;;  %v842_v60 = vld [vmem:[%s18161_s10 + $0x358] sm:$0xff] }
 0x141   :  { %717 = vst [vmem:[#allocation4 + $0x160] sm:$0xff] %v716_v61  ;;  %v844_v61 = vld [vmem:[%s18161_s10 + $0x360] sm:$0xff] }
 0x142   :  { %719 = vst [vmem:[#allocation4 + $0x168] sm:$0xff] %v718_v62  ;;  %v846_v62 = vld [vmem:[%s18161_s10 + $0x368] sm:$0xff] }
 0x143   :  { %721 = vst [vmem:[#allocation4 + $0x170] sm:$0xff] %v720_v63  ;;  %v848_v63 = vld [vmem:[%s18161_s10 + $0x370] sm:$0xff] }
 0x144   :  { %723 = vst [vmem:[#allocation4 + $0x178] sm:$0xff] %v722_v0  ;;  %v850_v0 = vld [vmem:[%s18161_s10 + $0x378] sm:$0xff] }
 0x145   :  { %725 = vst [vmem:[#allocation4 + $0x180] sm:$0xff] %v724_v1  ;;  %v852_v1 = vld [vmem:[%s18161_s10 + $0x380] sm:$0xff] }
 0x146   :  { %727 = vst [vmem:[#allocation4 + $0x188] sm:$0xff] %v726_v2  ;;  %v854_v2 = vld [vmem:[%s18161_s10 + $0x388] sm:$0xff] }
 0x147   :  { %729 = vst [vmem:[#allocation4 + $0x190] sm:$0xff] %v728_v3  ;;  %v856_v3 = vld [vmem:[%s18161_s10 + $0x390] sm:$0xff] }
 0x148   :  { %731 = vst [vmem:[#allocation4 + $0x198] sm:$0xff] %v730_v4  ;;  %v858_v4 = vld [vmem:[%s18161_s10 + $0x398] sm:$0xff] }
 0x149   :  { %733 = vst [vmem:[#allocation4 + $0x1a0] sm:$0xff] %v732_v5  ;;  %v860_v5 = vld [vmem:[%s18161_s10 + $0x3a0] sm:$0xff] }
 0x14a   :  { %735 = vst [vmem:[#allocation4 + $0x1a8] sm:$0xff] %v734_v6  ;;  %v862_v6 = vld [vmem:[%s18161_s10 + $0x3a8] sm:$0xff] }
 0x14b   :  { %737 = vst [vmem:[#allocation4 + $0x1b0] sm:$0xff] %v736_v7  ;;  %v864_v7 = vld [vmem:[%s18161_s10 + $0x3b0] sm:$0xff] }
 0x14c   :  { %739 = vst [vmem:[#allocation4 + $0x1b8] sm:$0xff] %v738_v8  ;;  %v866_v8 = vld [vmem:[%s18161_s10 + $0x3b8] sm:$0xff] }
 0x14d   :  { %741 = vst [vmem:[#allocation4 + $0x1c0] sm:$0xff] %v740_v9  ;;  %v868_v9 = vld [vmem:[%s18161_s10 + $0x3c0] sm:$0xff] }
 0x14e   :  { %743 = vst [vmem:[#allocation4 + $0x1c8] sm:$0xff] %v742_v10  ;;  %v870_v10 = vld [vmem:[%s18161_s10 + $0x3c8] sm:$0xff] }
 0x14f   :  { %745 = vst [vmem:[#allocation4 + $0x1d0] sm:$0xff] %v744_v11  ;;  %v872_v11 = vld [vmem:[%s18161_s10 + $0x3d0] sm:$0xff] }
 0x150   :  { %747 = vst [vmem:[#allocation4 + $0x1d8] sm:$0xff] %v746_v12  ;;  %v874_v12 = vld [vmem:[%s18161_s10 + $0x3d8] sm:$0xff] }
 0x151   :  { %749 = vst [vmem:[#allocation4 + $0x1e0] sm:$0xff] %v748_v13  ;;  %v876_v13 = vld [vmem:[%s18161_s10 + $0x3e0] sm:$0xff] }
 0x152   :  { %751 = vst [vmem:[#allocation4 + $0x1e8] sm:$0xff] %v750_v14  ;;  %v878_v14 = vld [vmem:[%s18161_s10 + $0x3e8] sm:$0xff] }
 0x153   :  { %753 = vst [vmem:[#allocation4 + $0x1f0] sm:$0xff] %v752_v15  ;;  %v880_v15 = vld [vmem:[%s18161_s10 + $0x3f0] sm:$0xff] }
 0x154   :  { %755 = vst [vmem:[#allocation4 + $0x1f8] sm:$0xff] %v754_v16  ;;  %v882_v16 = vld [vmem:[%s18161_s10 + $0x3f8] sm:$0xff] }
 0x155   :  { %757 = vst [vmem:[#allocation4 + $0x200] sm:$0xff] %v756_v17  ;;  %v884_v17 = vld [vmem:[%s18161_s10 + $0x400] sm:$0xff] }
 0x156   :  { %759 = vst [vmem:[#allocation4 + $0x208] sm:$0xff] %v758_v18  ;;  %v886_v18 = vld [vmem:[%s18161_s10 + $0x408] sm:$0xff] }
 0x157   :  { %761 = vst [vmem:[#allocation4 + $0x210] sm:$0xff] %v760_v19  ;;  %v888_v19 = vld [vmem:[%s18161_s10 + $0x410] sm:$0xff] }
 0x158   :  { %763 = vst [vmem:[#allocation4 + $0x218] sm:$0xff] %v762_v20  ;;  %v890_v20 = vld [vmem:[%s18161_s10 + $0x418] sm:$0xff] }
 0x159   :  { %765 = vst [vmem:[#allocation4 + $0x220] sm:$0xff] %v764_v21  ;;  %v892_v21 = vld [vmem:[%s18161_s10 + $0x420] sm:$0xff] }
 0x15a   :  { %767 = vst [vmem:[#allocation4 + $0x228] sm:$0xff] %v766_v22  ;;  %v894_v22 = vld [vmem:[%s18161_s10 + $0x428] sm:$0xff] }
 0x15b   :  { %769 = vst [vmem:[#allocation4 + $0x230] sm:$0xff] %v768_v23  ;;  %v896_v23 = vld [vmem:[%s18161_s10 + $0x430] sm:$0xff] }
 0x15c   :  { %771 = vst [vmem:[#allocation4 + $0x238] sm:$0xff] %v770_v24  ;;  %v898_v24 = vld [vmem:[%s18161_s10 + $0x438] sm:$0xff] }
 0x15d   :  { %773 = vst [vmem:[#allocation4 + $0x240] sm:$0xff] %v772_v25  ;;  %v900_v25 = vld [vmem:[%s18161_s10 + $0x440] sm:$0xff] }
 0x15e   :  { %775 = vst [vmem:[#allocation4 + $0x248] sm:$0xff] %v774_v26  ;;  %v902_v26 = vld [vmem:[%s18161_s10 + $0x448] sm:$0xff] }
 0x15f   :  { %777 = vst [vmem:[#allocation4 + $0x250] sm:$0xff] %v776_v27  ;;  %v904_v27 = vld [vmem:[%s18161_s10 + $0x450] sm:$0xff] }
 0x160   :  { %779 = vst [vmem:[#allocation4 + $0x258] sm:$0xff] %v778_v28  ;;  %v906_v28 = vld [vmem:[%s18161_s10 + $0x458] sm:$0xff] }
 0x161   :  { %781 = vst [vmem:[#allocation4 + $0x260] sm:$0xff] %v780_v29  ;;  %v908_v29 = vld [vmem:[%s18161_s10 + $0x460] sm:$0xff] }
 0x162   :  { %783 = vst [vmem:[#allocation4 + $0x268] sm:$0xff] %v782_v30  ;;  %v910_v30 = vld [vmem:[%s18161_s10 + $0x468] sm:$0xff] }
 0x163   :  { %785 = vst [vmem:[#allocation4 + $0x270] sm:$0xff] %v784_v31  ;;  %v912_v31 = vld [vmem:[%s18161_s10 + $0x470] sm:$0xff] }
 0x164   :  { %787 = vst [vmem:[#allocation4 + $0x278] sm:$0xff] %v786_v32  ;;  %v914_v32 = vld [vmem:[%s18161_s10 + $0x478] sm:$0xff] }
 0x165   :  { %789 = vst [vmem:[#allocation4 + $0x280] sm:$0xff] %v788_v33  ;;  %v916_v33 = vld [vmem:[%s18161_s10 + $0x480] sm:$0xff] }
 0x166   :  { %791 = vst [vmem:[#allocation4 + $0x288] sm:$0xff] %v790_v34  ;;  %v918_v34 = vld [vmem:[%s18161_s10 + $0x488] sm:$0xff] }
 0x167   :  { %793 = vst [vmem:[#allocation4 + $0x290] sm:$0xff] %v792_v35  ;;  %v920_v35 = vld [vmem:[%s18161_s10 + $0x490] sm:$0xff] }
 0x168   :  { %795 = vst [vmem:[#allocation4 + $0x298] sm:$0xff] %v794_v36  ;;  %v922_v36 = vld [vmem:[%s18161_s10 + $0x498] sm:$0xff] }
 0x169   :  { %797 = vst [vmem:[#allocation4 + $0x2a0] sm:$0xff] %v796_v37  ;;  %v924_v37 = vld [vmem:[%s18161_s10 + $0x4a0] sm:$0xff] }
 0x16a   :  { %799 = vst [vmem:[#allocation4 + $0x2a8] sm:$0xff] %v798_v38  ;;  %v926_v38 = vld [vmem:[%s18161_s10 + $0x4a8] sm:$0xff] }
 0x16b   :  { %801 = vst [vmem:[#allocation4 + $0x2b0] sm:$0xff] %v800_v39  ;;  %v928_v39 = vld [vmem:[%s18161_s10 + $0x4b0] sm:$0xff] }
 0x16c   :  { %803 = vst [vmem:[#allocation4 + $0x2b8] sm:$0xff] %v802_v40  ;;  %v930_v40 = vld [vmem:[%s18161_s10 + $0x4b8] sm:$0xff] }
 0x16d   :  { %805 = vst [vmem:[#allocation4 + $0x2c0] sm:$0xff] %v804_v41  ;;  %v932_v41 = vld [vmem:[%s18161_s10 + $0x4c0] sm:$0xff] }
 0x16e   :  { %807 = vst [vmem:[#allocation4 + $0x2c8] sm:$0xff] %v806_v42  ;;  %v934_v42 = vld [vmem:[%s18161_s10 + $0x4c8] sm:$0xff] }
 0x16f   :  { %809 = vst [vmem:[#allocation4 + $0x2d0] sm:$0xff] %v808_v43  ;;  %v936_v43 = vld [vmem:[%s18161_s10 + $0x4d0] sm:$0xff] }
 0x170   :  { %811 = vst [vmem:[#allocation4 + $0x2d8] sm:$0xff] %v810_v44  ;;  %v938_v44 = vld [vmem:[%s18161_s10 + $0x4d8] sm:$0xff] }
 0x171   :  { %813 = vst [vmem:[#allocation4 + $0x2e0] sm:$0xff] %v812_v45  ;;  %v940_v45 = vld [vmem:[%s18161_s10 + $0x4e0] sm:$0xff] }
 0x172   :  { %815 = vst [vmem:[#allocation4 + $0x2e8] sm:$0xff] %v814_v46  ;;  %v942_v46 = vld [vmem:[%s18161_s10 + $0x4e8] sm:$0xff] }
 0x173   :  { %817 = vst [vmem:[#allocation4 + $0x2f0] sm:$0xff] %v816_v47  ;;  %v944_v47 = vld [vmem:[%s18161_s10 + $0x4f0] sm:$0xff] }
 0x174   :  { %819 = vst [vmem:[#allocation4 + $0x2f8] sm:$0xff] %v818_v48  ;;  %v946_v48 = vld [vmem:[%s18161_s10 + $0x4f8] sm:$0xff] }
 0x175   :  { %821 = vst [vmem:[#allocation4 + $0x300] sm:$0xff] %v820_v49  ;;  %v948_v49 = vld [vmem:[%s18161_s10 + $0x500] sm:$0xff] }
 0x176   :  { %823 = vst [vmem:[#allocation4 + $0x308] sm:$0xff] %v822_v50  ;;  %v950_v50 = vld [vmem:[%s18161_s10 + $0x508] sm:$0xff] }
 0x177   :  { %825 = vst [vmem:[#allocation4 + $0x310] sm:$0xff] %v824_v51  ;;  %v952_v51 = vld [vmem:[%s18161_s10 + $0x510] sm:$0xff] }
 0x178   :  { %827 = vst [vmem:[#allocation4 + $0x318] sm:$0xff] %v826_v52  ;;  %v954_v52 = vld [vmem:[%s18161_s10 + $0x518] sm:$0xff] }
 0x179   :  { %829 = vst [vmem:[#allocation4 + $0x320] sm:$0xff] %v828_v53  ;;  %v956_v53 = vld [vmem:[%s18161_s10 + $0x520] sm:$0xff] }
 0x17a   :  { %831 = vst [vmem:[#allocation4 + $0x328] sm:$0xff] %v830_v54  ;;  %v958_v54 = vld [vmem:[%s18161_s10 + $0x528] sm:$0xff] }
 0x17b   :  { %833 = vst [vmem:[#allocation4 + $0x330] sm:$0xff] %v832_v55  ;;  %v960_v55 = vld [vmem:[%s18161_s10 + $0x530] sm:$0xff] }
 0x17c   :  { %835 = vst [vmem:[#allocation4 + $0x338] sm:$0xff] %v834_v56  ;;  %v962_v56 = vld [vmem:[%s18161_s10 + $0x538] sm:$0xff] }
 0x17d   :  { %837 = vst [vmem:[#allocation4 + $0x340] sm:$0xff] %v836_v57  ;;  %v964_v57 = vld [vmem:[%s18161_s10 + $0x540] sm:$0xff] }
 0x17e   :  { %839 = vst [vmem:[#allocation4 + $0x348] sm:$0xff] %v838_v58  ;;  %v966_v58 = vld [vmem:[%s18161_s10 + $0x548] sm:$0xff] }
 0x17f   :  { %841 = vst [vmem:[#allocation4 + $0x350] sm:$0xff] %v840_v59  ;;  %v968_v59 = vld [vmem:[%s18161_s10 + $0x550] sm:$0xff] }
 0x180   :  { %843 = vst [vmem:[#allocation4 + $0x358] sm:$0xff] %v842_v60  ;;  %v970_v60 = vld [vmem:[%s18161_s10 + $0x558] sm:$0xff] }
 0x181   :  { %845 = vst [vmem:[#allocation4 + $0x360] sm:$0xff] %v844_v61  ;;  %v972_v61 = vld [vmem:[%s18161_s10 + $0x560] sm:$0xff] }
 0x182   :  { %847 = vst [vmem:[#allocation4 + $0x368] sm:$0xff] %v846_v62  ;;  %v974_v62 = vld [vmem:[%s18161_s10 + $0x568] sm:$0xff] }
 0x183   :  { %849 = vst [vmem:[#allocation4 + $0x370] sm:$0xff] %v848_v63  ;;  %v976_v63 = vld [vmem:[%s18161_s10 + $0x570] sm:$0xff] }
 0x184   :  { %851 = vst [vmem:[#allocation4 + $0x378] sm:$0xff] %v850_v0  ;;  %v978_v0 = vld [vmem:[%s18161_s10 + $0x578] sm:$0xff] }
 0x185   :  { %853 = vst [vmem:[#allocation4 + $0x380] sm:$0xff] %v852_v1  ;;  %v980_v1 = vld [vmem:[%s18161_s10 + $0x580] sm:$0xff] }
 0x186   :  { %855 = vst [vmem:[#allocation4 + $0x388] sm:$0xff] %v854_v2  ;;  %v982_v2 = vld [vmem:[%s18161_s10 + $0x588] sm:$0xff] }
 0x187   :  { %857 = vst [vmem:[#allocation4 + $0x390] sm:$0xff] %v856_v3  ;;  %v984_v3 = vld [vmem:[%s18161_s10 + $0x590] sm:$0xff] }
 0x188   :  { %859 = vst [vmem:[#allocation4 + $0x398] sm:$0xff] %v858_v4  ;;  %v986_v4 = vld [vmem:[%s18161_s10 + $0x598] sm:$0xff] }
 0x189   :  { %861 = vst [vmem:[#allocation4 + $0x3a0] sm:$0xff] %v860_v5  ;;  %v988_v5 = vld [vmem:[%s18161_s10 + $0x5a0] sm:$0xff] }
 0x18a   :  { %863 = vst [vmem:[#allocation4 + $0x3a8] sm:$0xff] %v862_v6  ;;  %v990_v6 = vld [vmem:[%s18161_s10 + $0x5a8] sm:$0xff] }
 0x18b   :  { %865 = vst [vmem:[#allocation4 + $0x3b0] sm:$0xff] %v864_v7  ;;  %v992_v7 = vld [vmem:[%s18161_s10 + $0x5b0] sm:$0xff] }
 0x18c   :  { %867 = vst [vmem:[#allocation4 + $0x3b8] sm:$0xff] %v866_v8  ;;  %v994_v8 = vld [vmem:[%s18161_s10 + $0x5b8] sm:$0xff] }
 0x18d   :  { %869 = vst [vmem:[#allocation4 + $0x3c0] sm:$0xff] %v868_v9  ;;  %v996_v9 = vld [vmem:[%s18161_s10 + $0x5c0] sm:$0xff] }
 0x18e   :  { %871 = vst [vmem:[#allocation4 + $0x3c8] sm:$0xff] %v870_v10  ;;  %v998_v10 = vld [vmem:[%s18161_s10 + $0x5c8] sm:$0xff] }
 0x18f   :  { %873 = vst [vmem:[#allocation4 + $0x3d0] sm:$0xff] %v872_v11  ;;  %v1000_v11 = vld [vmem:[%s18161_s10 + $0x5d0] sm:$0xff] }
 0x190   :  { %875 = vst [vmem:[#allocation4 + $0x3d8] sm:$0xff] %v874_v12  ;;  %v1002_v12 = vld [vmem:[%s18161_s10 + $0x5d8] sm:$0xff] }
 0x191   :  { %877 = vst [vmem:[#allocation4 + $0x3e0] sm:$0xff] %v876_v13  ;;  %v1004_v13 = vld [vmem:[%s18161_s10 + $0x5e0] sm:$0xff] }
 0x192   :  { %879 = vst [vmem:[#allocation4 + $0x3e8] sm:$0xff] %v878_v14  ;;  %v1006_v14 = vld [vmem:[%s18161_s10 + $0x5e8] sm:$0xff] }
 0x193   :  { %881 = vst [vmem:[#allocation4 + $0x3f0] sm:$0xff] %v880_v15  ;;  %v1008_v15 = vld [vmem:[%s18161_s10 + $0x5f0] sm:$0xff] }
 0x194   :  { %883 = vst [vmem:[#allocation4 + $0x3f8] sm:$0xff] %v882_v16  ;;  %v1010_v16 = vld [vmem:[%s18161_s10 + $0x5f8] sm:$0xff] }
 0x195   :  { %885 = vst [vmem:[#allocation4 + $0x400] sm:$0xff] %v884_v17  ;;  %v1012_v17 = vld [vmem:[%s18161_s10 + $0x600] sm:$0xff] }
 0x196   :  { %887 = vst [vmem:[#allocation4 + $0x408] sm:$0xff] %v886_v18  ;;  %v1014_v18 = vld [vmem:[%s18161_s10 + $0x608] sm:$0xff] }
 0x197   :  { %889 = vst [vmem:[#allocation4 + $0x410] sm:$0xff] %v888_v19  ;;  %v1016_v19 = vld [vmem:[%s18161_s10 + $0x610] sm:$0xff] }
 0x198   :  { %891 = vst [vmem:[#allocation4 + $0x418] sm:$0xff] %v890_v20  ;;  %v1018_v20 = vld [vmem:[%s18161_s10 + $0x618] sm:$0xff] }
 0x199   :  { %893 = vst [vmem:[#allocation4 + $0x420] sm:$0xff] %v892_v21  ;;  %v1020_v21 = vld [vmem:[%s18161_s10 + $0x620] sm:$0xff] }
 0x19a   :  { %895 = vst [vmem:[#allocation4 + $0x428] sm:$0xff] %v894_v22  ;;  %v1022_v22 = vld [vmem:[%s18161_s10 + $0x628] sm:$0xff] }
 0x19b   :  { %897 = vst [vmem:[#allocation4 + $0x430] sm:$0xff] %v896_v23  ;;  %v1024_v23 = vld [vmem:[%s18161_s10 + $0x630] sm:$0xff] }
 0x19c   :  { %899 = vst [vmem:[#allocation4 + $0x438] sm:$0xff] %v898_v24  ;;  %v1026_v24 = vld [vmem:[%s18161_s10 + $0x638] sm:$0xff] }
 0x19d   :  { %901 = vst [vmem:[#allocation4 + $0x440] sm:$0xff] %v900_v25  ;;  %v1028_v25 = vld [vmem:[%s18161_s10 + $0x640] sm:$0xff] }
 0x19e   :  { %903 = vst [vmem:[#allocation4 + $0x448] sm:$0xff] %v902_v26  ;;  %v1030_v26 = vld [vmem:[%s18161_s10 + $0x648] sm:$0xff] }
 0x19f   :  { %905 = vst [vmem:[#allocation4 + $0x450] sm:$0xff] %v904_v27  ;;  %v1032_v27 = vld [vmem:[%s18161_s10 + $0x650] sm:$0xff] }
 0x1a0   :  { %907 = vst [vmem:[#allocation4 + $0x458] sm:$0xff] %v906_v28  ;;  %v1034_v28 = vld [vmem:[%s18161_s10 + $0x658] sm:$0xff] }
 0x1a1   :  { %909 = vst [vmem:[#allocation4 + $0x460] sm:$0xff] %v908_v29  ;;  %v1036_v29 = vld [vmem:[%s18161_s10 + $0x660] sm:$0xff] }
 0x1a2   :  { %911 = vst [vmem:[#allocation4 + $0x468] sm:$0xff] %v910_v30  ;;  %v1038_v30 = vld [vmem:[%s18161_s10 + $0x668] sm:$0xff] }
 0x1a3   :  { %913 = vst [vmem:[#allocation4 + $0x470] sm:$0xff] %v912_v31  ;;  %v1040_v31 = vld [vmem:[%s18161_s10 + $0x670] sm:$0xff] }
 0x1a4   :  { %915 = vst [vmem:[#allocation4 + $0x478] sm:$0xff] %v914_v32  ;;  %v1042_v32 = vld [vmem:[%s18161_s10 + $0x678] sm:$0xff] }
 0x1a5   :  { %917 = vst [vmem:[#allocation4 + $0x480] sm:$0xff] %v916_v33 }
 0x1a6   :  { %919 = vst [vmem:[#allocation4 + $0x488] sm:$0xff] %v918_v34 }
 0x1a7   :  { %921 = vst [vmem:[#allocation4 + $0x490] sm:$0xff] %v920_v35 }
 0x1a8   :  { %923 = vst [vmem:[#allocation4 + $0x498] sm:$0xff] %v922_v36 }
 0x1a9   :  { %925 = vst [vmem:[#allocation4 + $0x4a0] sm:$0xff] %v924_v37 }
 0x1aa   :  { %927 = vst [vmem:[#allocation4 + $0x4a8] sm:$0xff] %v926_v38 }
 0x1ab   :  { %929 = vst [vmem:[#allocation4 + $0x4b0] sm:$0xff] %v928_v39 }
 0x1ac   :  { %931 = vst [vmem:[#allocation4 + $0x4b8] sm:$0xff] %v930_v40 }
 0x1ad   :  { %933 = vst [vmem:[#allocation4 + $0x4c0] sm:$0xff] %v932_v41 }
 0x1ae   :  { %935 = vst [vmem:[#allocation4 + $0x4c8] sm:$0xff] %v934_v42 }
 0x1af   :  { %937 = vst [vmem:[#allocation4 + $0x4d0] sm:$0xff] %v936_v43 }
 0x1b0   :  { %939 = vst [vmem:[#allocation4 + $0x4d8] sm:$0xff] %v938_v44 }
 0x1b1   :  { %941 = vst [vmem:[#allocation4 + $0x4e0] sm:$0xff] %v940_v45 }
 0x1b2   :  { %943 = vst [vmem:[#allocation4 + $0x4e8] sm:$0xff] %v942_v46 }
 0x1b3   :  { %945 = vst [vmem:[#allocation4 + $0x4f0] sm:$0xff] %v944_v47 }
 0x1b4   :  { %947 = vst [vmem:[#allocation4 + $0x4f8] sm:$0xff] %v946_v48 }
 0x1b5   :  { %949 = vst [vmem:[#allocation4 + $0x500] sm:$0xff] %v948_v49 }
 0x1b6   :  { %951 = vst [vmem:[#allocation4 + $0x508] sm:$0xff] %v950_v50 }
 0x1b7   :  { %953 = vst [vmem:[#allocation4 + $0x510] sm:$0xff] %v952_v51 }
 0x1b8   :  { %955 = vst [vmem:[#allocation4 + $0x518] sm:$0xff] %v954_v52 }
 0x1b9   :  { %957 = vst [vmem:[#allocation4 + $0x520] sm:$0xff] %v956_v53 }
 0x1ba   :  { %959 = vst [vmem:[#allocation4 + $0x528] sm:$0xff] %v958_v54 }
 0x1bb   :  { %961 = vst [vmem:[#allocation4 + $0x530] sm:$0xff] %v960_v55 }
 0x1bc   :  { %963 = vst [vmem:[#allocation4 + $0x538] sm:$0xff] %v962_v56 }
 0x1bd   :  { %965 = vst [vmem:[#allocation4 + $0x540] sm:$0xff] %v964_v57 }
 0x1be   :  { %967 = vst [vmem:[#allocation4 + $0x548] sm:$0xff] %v966_v58 }
 0x1bf   :  { %969 = vst [vmem:[#allocation4 + $0x550] sm:$0xff] %v968_v59 }
 0x1c0   :  { %971 = vst [vmem:[#allocation4 + $0x558] sm:$0xff] %v970_v60 }
 0x1c1   :  { %973 = vst [vmem:[#allocation4 + $0x560] sm:$0xff] %v972_v61 }
 0x1c2   :  { %975 = vst [vmem:[#allocation4 + $0x568] sm:$0xff] %v974_v62 }
 0x1c3   :  { %977 = vst [vmem:[#allocation4 + $0x570] sm:$0xff] %v976_v63 }
 0x1c4   :  { %979 = vst [vmem:[#allocation4 + $0x578] sm:$0xff] %v978_v0 }
 0x1c5   :  { %981 = vst [vmem:[#allocation4 + $0x580] sm:$0xff] %v980_v1 }
 0x1c6   :  { %983 = vst [vmem:[#allocation4 + $0x588] sm:$0xff] %v982_v2 }
 0x1c7   :  { %985 = vst [vmem:[#allocation4 + $0x590] sm:$0xff] %v984_v3 }
 0x1c8   :  { %987 = vst [vmem:[#allocation4 + $0x598] sm:$0xff] %v986_v4 }
 0x1c9   :  { %989 = vst [vmem:[#allocation4 + $0x5a0] sm:$0xff] %v988_v5 }
 0x1ca   :  { %991 = vst [vmem:[#allocation4 + $0x5a8] sm:$0xff] %v990_v6 }
 0x1cb   :  { %993 = vst [vmem:[#allocation4 + $0x5b0] sm:$0xff] %v992_v7 }
 0x1cc   :  { %995 = vst [vmem:[#allocation4 + $0x5b8] sm:$0xff] %v994_v8 }
 0x1cd   :  { %997 = vst [vmem:[#allocation4 + $0x5c0] sm:$0xff] %v996_v9 }
 0x1ce   :  { %999 = vst [vmem:[#allocation4 + $0x5c8] sm:$0xff] %v998_v10 }
 0x1cf   :  { %1001 = vst [vmem:[#allocation4 + $0x5d0] sm:$0xff] %v1000_v11 }
 0x1d0   :  { %1003 = vst [vmem:[#allocation4 + $0x5d8] sm:$0xff] %v1002_v12 }
 0x1d1   :  { %1005 = vst [vmem:[#allocation4 + $0x5e0] sm:$0xff] %v1004_v13 }
 0x1d2   :  { %1007 = vst [vmem:[#allocation4 + $0x5e8] sm:$0xff] %v1006_v14 }
 0x1d3   :  { %1009 = vst [vmem:[#allocation4 + $0x5f0] sm:$0xff] %v1008_v15 }
 0x1d4   :  { %1011 = vst [vmem:[#allocation4 + $0x5f8] sm:$0xff] %v1010_v16 }
 0x1d5   :  { %1013 = vst [vmem:[#allocation4 + $0x600] sm:$0xff] %v1012_v17 }
 0x1d6   :  { %1015 = vst [vmem:[#allocation4 + $0x608] sm:$0xff] %v1014_v18 }
 0x1d7   :  { %1017 = vst [vmem:[#allocation4 + $0x610] sm:$0xff] %v1016_v19 }
 0x1d8   :  { %1019 = vst [vmem:[#allocation4 + $0x618] sm:$0xff] %v1018_v20 }
 0x1d9   :  { %1021 = vst [vmem:[#allocation4 + $0x620] sm:$0xff] %v1020_v21 }
 0x1da   :  { %1023 = vst [vmem:[#allocation4 + $0x628] sm:$0xff] %v1022_v22 }
 0x1db   :  { %1025 = vst [vmem:[#allocation4 + $0x630] sm:$0xff] %v1024_v23 }
 0x1dc   :  { %1027 = vst [vmem:[#allocation4 + $0x638] sm:$0xff] %v1026_v24 }
 0x1dd   :  { %1029 = vst [vmem:[#allocation4 + $0x640] sm:$0xff] %v1028_v25 }
 0x1de   :  { %1031 = vst [vmem:[#allocation4 + $0x648] sm:$0xff] %v1030_v26 }
 0x1df   :  { %1033 = vst [vmem:[#allocation4 + $0x650] sm:$0xff] %v1032_v27 }
 0x1e0   :  { %1035 = vst [vmem:[#allocation4 + $0x658] sm:$0xff] %v1034_v28 }
 0x1e1   :  { %1037 = vst [vmem:[#allocation4 + $0x660] sm:$0xff] %v1036_v29 }
 0x1e2   :  { %1039 = vst [vmem:[#allocation4 + $0x668] sm:$0xff] %v1038_v30 }
 0x1e3   :  { %1041 = vst [vmem:[#allocation4 + $0x670] sm:$0xff] %v1040_v31 }
 0x1e4   :  { %1043 = vst [vmem:[#allocation4 + $0x678] sm:$0xff] %v1042_v32 }
 0x1e5   :  { %1049 = vsyncadd [#allocation5 + $0x2], 26624  ;;  %v10263_v33 = vld [vmem:[%s18153_s1] sm:$0xf]  ;;  %v13089_v34 = vld [vmem:[%s18153_s1] sm:$0x10] }
 0x1e6   :  { %v10264_v35 = vor.u32 %v13089_v34, %v10263_v33  ;;  %vm1256_vm0 = vcmask 1043456   ;;  %vm1257_vm1 = vcmask 1044480   ;;  %v13833_v36 = vmov 65535   ;;  %v13078_v40 = vld [vmem:[%s18152_s0] sm:$0xff]  ;;  %v13079_v41 = vld [vmem:[%s18152_s0 + $0x8] sm:$0xff]  ;;  %v13080_v42 = vld [vmem:[%s18152_s0 + $0x10] sm:$0xff] }
 0x1e7   :  { %v1258_v37 = vsel %vm1256_vm0, 4294967295, %v13833_v36  ;;  %vm18170_vm2 = vcmask 72704   ;;  %v13081_v43 = vld [vmem:[%s18152_s0 + $0x18] sm:$0xff]  ;;  %v13082_v44 = vld [vmem:[%s18152_s0 + $0x20] sm:$0xff]  ;;  %v13083_v45 = vld [vmem:[%s18152_s0 + $0x28] sm:$0xff]  ;;  %vm18168_vm3 = vcmask 1040384  }
 0x1e8   :  { %v1259_v38 = vsel %vm1257_vm1, %v1258_v37, 0  ;;  %v13084_v46 = vld [vmem:[%s18152_s0 + $0x30] sm:$0xff]  ;;  %vm1051_vm4 = vsmask.f32 256  ;;  %vm18169_vm5 = vcmask 1044484   ;;  %v13834_v57 = vmov 0  }
 0x1e9   :  { %v1261_v39 = vand.u32 %v10264_v35, %v1259_v38  ;;  %vm1054_vm6 = vsmask.f32 4352  ;;  %vm15395_vm7 = vmand %vm18168_vm3, %vm1051_vm4  ;;  %v1057_v48 = vld [vmem:[%s18162_s11] sm:$0x11]  ;;  %v1066_v49 = vld [vmem:[%s18162_s11 + $0x18] sm:$0x1] }
 0x1ea   :  { %vm1055_vm8 = vmand %vm18169_vm5, %vm1054_vm6  ;;  %v1067_v50 = vsel %vm15395_vm7, 0, %v1066_v49  ;;  %v1075_v51 = vld [vmem:[%s18162_s11 + $0x64] sm:$0x11]  ;;  %v1078_v52 = vld [vmem:[%s18162_s11 + $0x6c] sm:$0x1]  ;;  %vm18173_vm15 = vcmask 1042432  }
 0x1eb   :  { %1270 = vmatpush.bf16.msra.mxu0 %v1261_v39  ;;  %vm15416_vm9 = vmor %vm1055_vm8, %vm15395_vm7  ;;  %1068 = vst [vmem:[%s18162_s11 + $0x18] sm:$0x1] %v1067_v50  ;;  %v1079_v54 = vsel %vm15395_vm7, 0, %v1078_v52  ;;  %v13085_v58 = vld [vmem:[%s18152_s0 + $0x38] sm:$0xff]  ;;  %v13086_v59 = vld [vmem:[%s18152_s0 + $0x40] sm:$0xff]  ;;  %vm18171_vm1 = vcmask 1046532  }
 0x1ec   :  { %v1058_v55 = vsel %vm15416_vm9, 0, %v1057_v48  ;;  %v1076_v56 = vsel %vm15416_vm9, 0, %v1075_v51  ;;  %1080 = vst [vmem:[%s18162_s11 + $0x6c] sm:$0x1] %v1079_v54  ;;  %v15476_v61 = vld [vmem:[%s18154_s2] ss:$0 sm:$0xff]  ;;  %vm15529_vm6 = vmor %vm18173_vm15, %vm18171_vm1 }
 0x1ed   :  { %1059 = vst [vmem:[%s18162_s11] sm:$0x11] %v1058_v55  ;;  %v1060_v3 = vld [vmem:[%s18162_s11 + $0x8] sm:$0x11]  ;;  %vm1441_vm10 = vsmask.f32 3328 }
 0x1ee   :  { %10265 = vmatmul.msk.bf16.vlgmr.msra.gmra.mxu0 %vm18170_vm2, %v13078_v40  ;;  %1077 = vst [vmem:[%s18162_s11 + $0x64] sm:$0x11] %v1076_v56  ;;  %v1061_v5 = vsel %vm15416_vm9, 0, %v1060_v3  ;;  %v13087_v6 = vld [vmem:[%s18152_s0 + $0x48] sm:$0xff]  ;;  %vm18172_vm11 = vsmask.f32 7938  ;;  %vm15494_vm13 = vmand %vm1256_vm0, %vm1441_vm10 }
 0x1ef   :  { %1112 = vst [vmem:[%s18162_s11] sm:$0xf] %v13834_v57  ;;  %vm1442_vm12 = vsmask.f32 7440  ;;  %vm1396_vm14 = vsmask.f32 4368  ;;  %vm15547_vm1 = vmand %vm1256_vm0, %vm18172_vm11 }
 0x1f0   :  { %1113 = vst [vmem:[%s18162_s11 + $0x1c] sm:$0xf] %v13834_v57  ;;  %v2347_v11 = vld [vmem:[#allocation7 + $0x204] sm:$0xf]  ;;  %vm1690_vm8 = vsmask.f32 7424  ;;  %vm15563_vm0 = vmor %vm1051_vm4, %vm1396_vm14 }
 0x1f1   :  { %1120 = vst [vmem:[%s18162_s11 + $0x70] sm:$0xf] %v13834_v57  ;;  %vm18174_vm3 = vsmask.f32 2304  ;;  %vm1510_vm5 = vsmask.f32 6416  ;;  %vm15572_vm11 = vmor %vm1441_vm10, %vm1442_vm12 }
 0x1f2   :  { %1124 = vst [vmem:[%s18162_s11 + $0x18] sm:$0xf] %v13834_v57  ;;  %v2428_v39 = vld [vmem:[#allocation7 + $0x218] sm:$0xf]  ;;  %vm1555_vm4 = vcmask 1045508   ;;  %vm18194_vm12 = vcmask 1047556  }
 0x1f3   :  { %1125 = vst [vmem:[%s18162_s11 + $0x34] sm:$0xf] %v13834_v57  ;;  %vm15615_vm14 = vmand %vm18194_vm12, %vm1690_vm8  ;;  %vm18201_vm8 = vcmask 72704   ;;  %vm1081_vm12 = vcmask 1041409   ;;  %vm1085_vm15 = vsmask.f32 5376 }
 0x1f4   :  { %1129 = vst [vmem:[%s18162_s11 + $0x6c] sm:$0xf] %v13834_v57  ;;  %v1425_v36 = vld [vmem:[%s18162_s11 + $0x4] sm:$0xf] }
 0x1f5   :  { %1130 = vst [vmem:[%s18162_s11 + $0x88] sm:$0xf] %v13834_v57 }
 0x1f6   :  { %1062 = vst [vmem:[%s18162_s11 + $0x8] sm:$0x11] %v1061_v5 }
 0x1f9   :  { %v2334_v9 = vld [vmem:[%s18162_s11 + $0x18] sm:$0xf] }
 0x1fa   :  { %v2337_v10 = vld [vmem:[%s18162_s11 + $0x34] sm:$0xf]  ;;  %2340 = vst [vmem:[#allocation7 + $0x1a0] sm:$0xf] %v2334_v9  ;;  %v2352_v13 = vld [vmem:[%s18162_s11 + $0x18] sm:$0xf] }
 0x1fb   :  { %v2348_v12 = vsel %vm15494_vm13, %v2337_v10, %v2347_v11  ;;  %v2355_v14 = vld [vmem:[%s18162_s11 + $0x34] sm:$0xf]  ;;  %v2385_v15 = vshrl.u32 %v2352_v13, 16  ;;  %v2388_v16 = vshll.u32 %v2352_v13, 16  ;;  %v2433_v19 = vld [vmem:[%s18162_s11 + $0x18] sm:$0xe] }
 0x1fc   :  { %2349 = vst [vmem:[#allocation7 + $0x204] sm:$0xf] %v2348_v12  ;;  %v2394_v17 = vshll.u32 %v2355_v14, 16  ;;  %v2408_v18 = vshrl.u32 %v2355_v14, 16  ;;  %v15521_v20 = vld [vmem:[%s18162_s11 + $0x34] sm:$0xf] }
 0x1fd   :  { %v2387_v21 = vrot.slane %v2385_v15, 4  ;;  %v2390_v22 = vrot.slane %v2388_v16, 5  ;;  %v2490_v25 = vld [vmem:[%s18162_s11 + $0x18] sm:$0xe]  ;;  %v10313_v28 = vrot.slane %v2433_v19, 9  ;;  %v2459_v29 = vrot.slane %v15521_v20, 5 }
 0x1fe   :  { %10266 = vmatmul.msk.bf16.gmra.mxu0 %vm18170_vm2, %v13079_v41  ;;  %v2396_v23 = vrot.slane %v2394_v17, 5  ;;  %v2410_v24 = vrot.slane %v2408_v18, 4  ;;  %v2493_v34 = vld [vmem:[%s18162_s11 + $0x34] sm:$0xf]  ;;  %v2601_v48 = vld [vmem:[%s18162_s11 + $0x18] sm:$0xc] }
 0x1ff   :  { %v2391_v37 = vor.u32 %v2390_v22, %v2387_v21  ;;  %v2460_v40 = vsel %vm15529_vm6, %v10313_v28, %v2459_v29  ;;  %v15559_v49 = vld [vmem:[%s18162_s11 + $0x34] sm:$0xf]  ;;  %v2543_v54 = vshrl.u32 %v2493_v34, 16  ;;  %v2546_v55 = vshll.u32 %v2493_v34, 16  ;;  %v10409_v56 = vld [vmem:[%s18162_s11 + $0x6c] sm:$0xf] }
 0x200   :  { %v2411_v38 = vor.u32 %v2410_v24, %v2396_v23  ;;  %2478 = vst [vmem:[#allocation7 + $0x1c8] sm:$0xf] %v2460_v40  ;;  %v10415_v5 = vld [vmem:[%s18162_s11 + $0x6c] sm:$0xf]  ;;  %v10418_v12 = vld [vmem:[%s18162_s11 + $0x88] sm:$0xf] }
 0x201   :  { %v2392_v51 = vrot.slane %v2391_v37, 4  ;;  %3312 = vst [vmem:[#allocation7 + $0x3f8] sm:$0xf] %v10409_v56  ;;  %v2545_v10 = vrot.slane %v2543_v54, 5  ;;  %v2548_v11 = vrot.slane %v2546_v55, 6  ;;  %v10316_v14 = vrot.slane %v2601_v48, 10 }
 0x202   :  { %v2412_v52 = vrot.slane %v2411_v38, 4  ;;  %v2627_v15 = vrot.slane %v15559_v49, 6  ;;  %v3357_v19 = vshrl.u32 %v10415_v5, 16  ;;  %v3360_v21 = vshll.u32 %v10415_v5, 16  ;;  %v15652_v40 = vld [vmem:[%s18162_s11 + $0x88] sm:$0xf] }
 0x203   :  { %v3366_v22 = vshll.u32 %v10418_v12, 16  ;;  %v15619_v24 = vor.u32 %v2548_v11, %v2545_v10 }
 0x20e   :  { %10267 = vmatmul.msk.bf16.gmra.mxu0 %vm18170_vm2, %v13080_v42 }
 0x21e   :  { %10268 = vmatmul.msk.bf16.gmra.mxu0 %vm18170_vm2, %v13081_v43 }
 0x22e   :  { %10269 = vmatmul.msk.bf16.gmra.mxu0 %vm18170_vm2, %v13082_v44 }
 0x23e   :  { %10270 = vmatmul.msk.bf16.gmra.mxu0 %vm18170_vm2, %v13083_v45  ;;  %v2534_v45 = vshrl.u32 %v2490_v25, 16 }
 0x24e   :  { %10271 = vmatmul.msk.bf16.gmra.mxu0 %vm18170_vm2, %v13084_v46  ;;  %v2537_v46 = vshll.u32 %v2490_v25, 16 }
 0x250   :  { %v2539_v3 = vrot.slane %v2537_v46, 6 }
 0x25e   :  { %10272 = vmatmul.msk.bf16.gmra.mxu0 %vm18170_vm2, %v13085_v58 }
 0x26b   :  { %v1272_v60 = vpop.f32.mrf.mxu0 }
 0x26c   :  { %v1273_v62 = vadd.f32 %v15476_v61, %v1272_v60 }
 0x26e   :  { %10273 = vmatmul.msk.bf16.gmra.mxu0 %vm18170_vm2, %v13086_v59  ;;  %v1327_v1 = vmax.f32 %v1273_v62, 0.0 }
 0x273   :  { %v1274_v63 = vpop.f32.mrf.mxu0 }
 0x274   :  { %v1275_v0 = vadd.f32 %v15476_v61, %v1274_v63  ;;  %v10412_v63 = vld [vmem:[%s18162_s11 + $0x88] sm:$0xf] }
 0x276   :  { %v1328_v2 = vmax.f32 %v1275_v0, 0.0  ;;  %v2397_v0 = vsel %vm15572_vm11, %v2392_v51, %v2396_v23 }
 0x277   :  { %2421 = vst [vmem:[#allocation7 + $0x1b4] sm:$0xf] %v2397_v0 }
 0x278   :  { %v13741_v4 = vpack.c.bf16 %v1328_v2, %v1327_v1  ;;  %v2429_v1 = vsel %vm15494_vm13, %v2412_v52, %v2428_v39  ;;  %v2536_v2 = vrot.slane %v2534_v45, 5  ;;  %v1693_v39 = vld [vmem:[#allocation7 + $0x64] sm:$0xff] }
 0x279   :  { %2430 = vst [vmem:[#allocation7 + $0x218] sm:$0xf] %v2429_v1 }
 0x27a   :  { %13742 = vst [vmem:[#allocation6] sm:$0xff] %v13741_v4   ;;  %v3319_v4 = vld [vmem:[#allocation7 + $0x45c] sm:$0xf]  ;;  %v2540_v13 = vor.u32 %v2539_v3, %v2536_v2 }
 0x27b   :  { %v15498_v8 = vpop.f32.mrf.mxu0  ;;  %v3320_v18 = vsel %vm15494_vm13, %v10412_v63, %v3319_v4 }
 0x27c   :  { %v15600_v16 = vadd.f32 %v15476_v61, %v15498_v8  ;;  %v2541_v23 = vrot.slane %v2540_v13, 4  ;;  %3321 = vst [vmem:[#allocation7 + $0x45c] sm:$0xf] %v3320_v18 }
 0x27e   :  { %10274 = vmatmul.msk.bf16.gmra.mxu0 %vm18170_vm2, %v13087_v6  ;;  %vm18175_vm2 = vcmask 1041408   ;;  %v1329_v45 = vmax.f32 %v15600_v16, 0.0 }
 0x27f   :  { %vm15607_vm10 = vmor %vm18175_vm2, %vm1555_vm4 }
 0x280   :  { %v2628_v25 = vsel %vm15607_vm10, %v10316_v14, %v2627_v15  ;;  %vm15629_vm4 = vmor %vm18174_vm3, %vm1510_vm5  ;;  %v18177_v14 = vrot.slane %v15652_v40, 5 }
 0x281   :  { %v1393_v26 = vld [vmem:[#allocation6] sm:$0xf]  ;;  %v1394_v27 = vld [vmem:[#allocation6 + $0x4] sm:$0xf]  ;;  %2646 = vst [vmem:[#allocation7 + $0x1f0] sm:$0xf] %v2628_v25  ;;  %v2550_v34 = vsel %vm15629_vm4, %v2541_v23, %v15619_v24  ;;  %vm15645_vm5 = vmor %vm15615_vm14, %vm15494_vm13 }
 0x282   :  { %v1399_v30 = vshrl.u32 %v1393_v26, 16  ;;  %v1402_v31 = vshll.u32 %v1393_v26, 16  ;;  %v1407_v32 = vshrl.u32 %v1394_v27, 16  ;;  %v1410_v35 = vshll.u32 %v1394_v27, 16  ;;  %2589 = vst [vmem:[#allocation7 + $0x1dc] sm:$0xf] %v2550_v34 }
 0x283   :  { %v15543_v41 = vpop.f32.mrf.mxu0  ;;  %v3380_v26 = vshrl.u32 %v10418_v12, 16  ;;  %v1774_v23 = vld [vmem:[#allocation7 + $0x78] sm:$0xff]  ;;  %vm1082_vm14 = vsmask.f32 1280 }
 0x284   :  { %v1401_v43 = vrot.slane %v1399_v30, 7  ;;  %v15551_v44 = vrot.slane %v1407_v32, 7  ;;  %v3359_v30 = vrot.slane %v3357_v19, 4  ;;  %v3368_v32 = vrot.slane %v3366_v22, 5  ;;  %vm15756_vm3 = vmand %vm1081_vm12, %vm1082_vm14 }
 0x285   :  { %v15667_v55 = vadd.f32 %v15476_v61, %v15543_v41 }
 0x286   :  { %v1404_v59 = vor.u32 %v1402_v31, %v1401_v43  ;;  %v1405_v60 = vrot.slane %v1401_v43, 4  ;;  %v1412_v62 = vor.u32 %v1410_v35, %v15551_v44  ;;  %v3362_v31 = vrot.slane %v3360_v21, 5 }
 0x287   :  { %v3382_v35 = vrot.slane %v3380_v26, 4 }
 0x288   :  { %v1413_v6 = vsel %vm15563_vm0, %v1405_v60, %v1412_v62  ;;  %v1426_v9 = vsel %vm15547_vm1, %v1404_v59, %v1425_v36  ;;  %v15639_v36 = vld [vmem:[%s18162_s11 + $0x6c] sm:$0xe]  ;;  %v3363_v37 = vor.u32 %v3362_v31, %v3359_v30  ;;  %v3400_v31 = vld [vmem:[#allocation7 + $0x470] sm:$0xf] }
 0x289   :  { %1427 = vst [vmem:[%s18162_s11 + $0x4] sm:$0xf] %v1426_v9  ;;  %v10430_v43 = vrot.slane %v15639_v36, 9  ;;  %v3383_v54 = vor.u32 %v3382_v35, %v3368_v32 }
 0x28a   :  { %1428 = vst [vmem:[%s18162_s11 + $0x20] sm:$0xf] %v1413_v6  ;;  %v3364_v52 = vrot.slane %v3363_v37, 4  ;;  %v10433_v37 = vld [vmem:[%s18162_s11 + $0x6c] sm:$0xe] }
 0x28b   :  { %v15625_v27 = vpop.f32.mrf.mxu0  ;;  %v3384_v36 = vrot.slane %v3383_v54, 4 }
 0x28c   :  { %v3369_v30 = vsel %vm15572_vm11, %v3364_v52, %v3368_v32  ;;  %v10442_v32 = vld [vmem:[%s18162_s11 + $0x6c] sm:$0xc]  ;;  %v1283_v52 = vadd.f32 %v15476_v61, %v15625_v27  ;;  %v10259_v27 = vld [vmem:[%s18152_s0 + $0x50] sm:$0xf] }
 0x28d   :  { %3393 = vst [vmem:[#allocation7 + $0x40c] sm:$0xf] %v3369_v30 }
 0x28e   :  { %v1331_v16 = vmax.f32 %v1283_v52, 0.0 }
 0x290   :  { %v1679_v46 = vld [vmem:[%s18162_s11] sm:$0xff] }
 0x291   :  { %v1783_v48 = vld [vmem:[%s18162_s11] sm:$0xee]  ;;  %1685 = vst [vmem:[#allocation7] sm:$0xff] %v1679_v46  ;;  %v1709_v59 = vshrl.u32 %v1679_v46, 16  ;;  %v1712_v60 = vshll.u32 %v1679_v46, 16 }
 0x292   :  { %v1840_v51 = vld [vmem:[%s18162_s11] sm:$0xee]  ;;  %v10299_v62 = vrot.slane %v1783_v48, 9  ;;  %v10436_v48 = vld [vmem:[%s18162_s11 + $0x88] sm:$0xf] }
 0x293   :  { %v15672_v56 = vld [vmem:[%s18162_s11 + $0x1c] sm:$0xff]  ;;  %v1850_v63 = vshrl.u32 %v1840_v51, 16  ;;  %v1711_v4 = vrot.slane %v1709_v59, 4  ;;  %v1714_v5 = vrot.slane %v1712_v60, 5  ;;  %v1853_v9 = vshll.u32 %v1840_v51, 16  ;;  %v1284_v10 = vpop.f32.mrf.mxu0 }
 0x294   :  { %v1694_v0 = vsel %vm15645_vm5, %v15672_v56, %v1693_v39  ;;  %v1718_v1 = vshll.u32 %v15672_v56, 16  ;;  %v1750_v2 = vshrl.u32 %v15672_v56, 16  ;;  %v1803_v41 = vrot.slane %v15672_v56, 5  ;;  %v1951_v3 = vld [vmem:[%s18162_s11] sm:$0xcc] }
 0x295   :  { %1695 = vst [vmem:[#allocation7 + $0x64] sm:$0xff] %v1694_v0  ;;  %v1852_v6 = vrot.slane %v1850_v63, 5  ;;  %v1715_v18 = vor.u32 %v1714_v5, %v1711_v4  ;;  %v1855_v19 = vrot.slane %v1853_v9, 6  ;;  %v10302_v25 = vrot.slane %v1951_v3, 10  ;;  %v15718_v63 = vld [vmem:[%s18162_s11 + $0x88] sm:$0xf] }
 0x296   :  { %v1720_v11 = vrot.slane %v1718_v1, 5  ;;  %v1752_v12 = vrot.slane %v1750_v2, 4  ;;  %v1804_v13 = vsel %vm15529_vm6, %v10299_v62, %v1803_v41  ;;  %v1861_v21 = vrot.slane %v1750_v2, 5 }
 0x297   :  { %1828 = vst [vmem:[#allocation7 + $0x28] sm:$0xff] %v1804_v13  ;;  %v1864_v22 = vrot.slane %v1718_v1, 6  ;;  %v1971_v26 = vrot.slane %v15672_v56, 6  ;;  %v1716_v34 = vrot.slane %v1715_v18, 4  ;;  %v1856_v35 = vor.u32 %v1855_v19, %v1852_v6 }
 0x298   :  { %v1753_v8 = vor.u32 %v1752_v12, %v1720_v11  ;;  %v1330_v51 = vmax.f32 %v15667_v55, 0.0  ;;  %v3432_v62 = vsel %vm15529_vm6, %v10430_v43, %v18177_v14  ;;  %v3401_v0 = vsel %vm15494_vm13, %v3384_v36, %v3400_v31  ;;  %v13088_v43 = vld [vmem:[%s18152_s0 + $0x50] sm:$0x10] }
 0x299   :  { %v1972_v46 = vsel %vm15607_vm10, %v10302_v25, %v1971_v26  ;;  %v1721_v54 = vsel %vm15572_vm11, %v1716_v34, %v1720_v11  ;;  %v1857_v59 = vrot.slane %v1856_v35, 4  ;;  %v15709_v60 = vor.u32 %v1864_v22, %v1861_v21  ;;  %3402 = vst [vmem:[#allocation7 + $0x470] sm:$0xf] %v3401_v0 }
 0x29a   :  { %v1754_v39 = vrot.slane %v1753_v8, 4  ;;  %1996 = vst [vmem:[#allocation7 + $0x50] sm:$0xff] %v1972_v46  ;;  %v3506_v1 = vshrl.u32 %v10433_v37, 16  ;;  %v3509_v2 = vshll.u32 %v10433_v37, 16  ;;  %v3515_v4 = vshrl.u32 %v10436_v48, 16 }
 0x29b   :  { %1771 = vst [vmem:[#allocation7 + $0x14] sm:$0xff] %v1721_v54  ;;  %v1866_v3 = vsel %vm15629_vm4, %v1857_v59, %v15709_v60  ;;  %v3518_v5 = vshll.u32 %v10436_v48, 16  ;;  %v10451_v6 = vrot.slane %v10442_v32, 10  ;;  %v1287_v9 = vpop.f32.mrf.mxu0  ;;  %v18176_v13 = vrot.slane %v15718_v63, 6  ;;  %v1063_v48 = vld [vmem:[%s18162_s11 + $0x10] sm:$0x11] }
 0x29c   :  { %v1775_v55 = vsel %vm15645_vm5, %v1754_v39, %v1774_v23  ;;  %1939 = vst [vmem:[#allocation7 + $0x3c] sm:$0xff] %v1866_v3  ;;  %v3508_v11 = vrot.slane %v3506_v1, 5  ;;  %v3511_v12 = vrot.slane %v3509_v2, 6  ;;  %v13746_v18 = vpack.c.bf16 %v1330_v51, %v1329_v45  ;;  %v1088_v2 = vld [vmem:[%s18162_s11 + $0x38] sm:$0x22] }
 0x29d   :  { %1776 = vst [vmem:[#allocation7 + $0x78] sm:$0xff] %v1775_v55  ;;  %v3517_v19 = vrot.slane %v3515_v4, 5  ;;  %v3520_v21 = vrot.slane %v3518_v5, 6  ;;  %v10260_v22 = vor.u32 %v13088_v43, %v10259_v27  ;;  %v3600_v23 = vsel %vm15607_vm10, %v10451_v6, %v18176_v13 }
 0x29e   :  { %3450 = vst [vmem:[#allocation7 + $0x420] sm:$0xf] %v3432_v62  ;;  %v3512_v8 = vor.u32 %v3511_v12, %v3508_v11  ;;  %v1285_v25 = vadd.f32 %v15476_v61, %v1284_v10  ;;  %v1288_v36 = vadd.f32 %v15476_v61, %v1287_v9  ;;  %v1433_v10 = vld [vmem:[%s18162_s11 + $0x8] sm:$0xf]  ;;  %v1414_v62 = vrot.slane %v15551_v44, 4  ;;  %v2017_v12 = vld [vmem:[#allocation7 + $0x12c] sm:$0xff] }
 0x29f   :  { %3618 = vst [vmem:[#allocation7 + $0x448] sm:$0xf] %v3600_v23  ;;  %10275 = vmatmul.msk.bf16.gmra.mxu0 %vm18201_vm8, %v10260_v22  ;;  %v15742_v31 = vor.u32 %v3520_v21, %v3517_v19  ;;  %vm1084_vm8 = vcmask 1045509   ;;  %v1064_v0 = vsel %vm15416_vm9, 0, %v1063_v48  ;;  %v15902_v20 = vrot.slane %v1971_v26, 4 }
 0x2a0   :  { %v3513_v30 = vrot.slane %v3512_v8, 4  ;;  %13808 = vst [vmem:[#allocation6 + $0x8] sm:$0xff] %v13746_v18   ;;  %v1332_v45 = vmax.f32 %v1285_v25, 0.0  ;;  %v1333_v46 = vmax.f32 %v1288_v36, 0.0  ;;  %vm1086_vm12 = vmand %vm1084_vm8, %vm1085_vm15  ;;  %v1903_v56 = vrot.slane %v15709_v60, 4 }
 0x2a1   :  { %vm15773_vm2 = vmor %vm1086_vm12, %vm15756_vm3  ;;  %1065 = vst [vmem:[%s18162_s11 + $0x10] sm:$0x11] %v1064_v0  ;;  %vm18206_vm15 = vcmask 1041408   ;;  %v16397_v44 = vld [vmem:[%s18162_s11 + $0xa4] sm:$0x2] }
 0x2a2   :  { %v3522_v34 = vsel %vm15629_vm4, %v3513_v30, %v15742_v31  ;;  %v13751_v35 = vpack.c.bf16 %v1332_v45, %v1331_v16  ;;  %v1089_v3 = vsel %vm15773_vm2, 0, %v1088_v2  ;;  %vm16010_vm8 = vmand %vm18206_vm15, %vm1082_vm14 }
 0x2a3   :  { %3561 = vst [vmem:[#allocation7 + $0x434] sm:$0xf] %v3522_v34  ;;  %v1289_v37 = vpop.f32.mrf.mxu0 }
 0x2a4   :  { %13809 = vst [vmem:[#allocation6 + $0x10] sm:$0xff] %v13751_v35   ;;  %v1290_v39 = vadd.f32 %v15476_v61, %v1289_v37 }
 0x2a5   :  { %1090 = vst [vmem:[%s18162_s11 + $0x38] sm:$0x22] %v1089_v3 }
 0x2a6   :  { %v1334_v32 = vmax.f32 %v1290_v39, 0.0 }
 0x2a7   :  { %v1395_v52 = vld [vmem:[#allocation6 + $0x8] sm:$0x1]  ;;  %v1431_v59 = vld [vmem:[#allocation6 + $0xc] sm:$0xf] }
 0x2a8   :  { %v1430_v54 = vld [vmem:[#allocation6 + $0x8] sm:$0xf]  ;;  %v1416_v27 = vshll.u32 %v1395_v52, 16  ;;  %1436 = vst [vmem:[%s18162_s11 + $0x24] sm:$0xf] %v1431_v59  ;;  %v13756_v1 = vpack.c.bf16 %v1334_v32, %v1333_v46 }
 0x2a9   :  { %v1434_v55 = vsel %vm15547_vm1, %v1430_v54, %v1433_v10 }
 0x2aa   :  { %1435 = vst [vmem:[%s18162_s11 + $0x8] sm:$0xf] %v1434_v55  ;;  %v1418_v43 = vsel %vm15563_vm0, %v1414_v62, %v1416_v27 }
 0x2ab   :  { %1429 = vst [vmem:[%s18162_s11 + $0x3c] sm:$0x1] %v1418_v43  ;;  %v1432_v4 = vld [vmem:[#allocation6 + $0x10] sm:$0x1]  ;;  %v1438_v5 = vld [vmem:[#allocation6 + $0x10] sm:$0xe] }
 0x2ac   :  { %1437 = vst [vmem:[%s18162_s11 + $0x40] sm:$0x1] %v1432_v4  ;;  %v1439_v6 = vld [vmem:[#allocation6 + $0x14] sm:$0xf]  ;;  %v1445_v9 = vshrl.u32 %v1438_v5, 16  ;;  %v1448_v11 = vshll.u32 %v1438_v5, 16 }
 0x2ad   :  { %v1454_v18 = vshll.u32 %v1439_v6, 16  ;;  %v1458_v19 = vshrl.u32 %v1439_v6, 16  ;;  %13810 = vst [vmem:[#allocation6 + $0x18] sm:$0xff] %v13756_v1   ;;  %v15821_v1 = vpop.f32.mrf.mxu0  ;;  %v2098_v6 = vld [vmem:[#allocation7 + $0x140] sm:$0xff] }
 0x2ae   :  { %v1447_v21 = vrot.slane %v1445_v9, 4  ;;  %v1450_v22 = vrot.slane %v1448_v11, 5 }
 0x2af   :  { %v15799_v8 = vld [vmem:[%s18162_s11 + $0x20] sm:$0xff]  ;;  %v1456_v23 = vrot.slane %v1454_v18, 5  ;;  %v1460_v25 = vrot.slane %v1458_v19, 4 }
 0x2b0   :  { %v2018_v16 = vsel %vm15645_vm5, %v15799_v8, %v2017_v12  ;;  %v2042_v45 = vshll.u32 %v15799_v8, 16  ;;  %v2074_v34 = vshrl.u32 %v15799_v8, 16  ;;  %v2127_v36 = vrot.slane %v15799_v8, 5 }
 0x2b1   :  { %v2008_v30 = vld [vmem:[%s18162_s11 + $0x4] sm:$0xff]  ;;  %2019 = vst [vmem:[#allocation7 + $0x12c] sm:$0xff] %v2018_v16  ;;  %v1451_v54 = vor.u32 %v1450_v22, %v1447_v21  ;;  %v2295_v12 = vrot.slane %v15799_v8, 6  ;;  %v1461_v21 = vor.u32 %v1460_v25, %v1456_v23  ;;  %v1476_v22 = vld [vmem:[%s18162_s11 + $0xc] sm:$0xf] }
 0x2b2   :  { %v2107_v35 = vld [vmem:[%s18162_s11 + $0x4] sm:$0xee]  ;;  %2014 = vst [vmem:[#allocation7 + $0xc8] sm:$0xff] %v2008_v30  ;;  %v2033_v37 = vshrl.u32 %v2008_v30, 16  ;;  %v2036_v10 = vshll.u32 %v2008_v30, 16  ;;  %v2044_v48 = vrot.slane %v2042_v45, 5 }
 0x2b3   :  { %v10305_v39 = vrot.slane %v2107_v35, 9  ;;  %v2164_v46 = vld [vmem:[%s18162_s11 + $0x4] sm:$0xee]  ;;  %v2076_v32 = vrot.slane %v2074_v34, 4  ;;  %v2185_v3 = vrot.slane %v2074_v34, 5  ;;  %v2188_v4 = vrot.slane %v2042_v45, 6 }
 0x2b4   :  { %v2174_v52 = vshrl.u32 %v2164_v46, 16  ;;  %v2035_v59 = vrot.slane %v2033_v37, 4  ;;  %v2038_v62 = vrot.slane %v2036_v10, 5  ;;  %v2177_v55 = vshll.u32 %v2164_v46, 16  ;;  %v2275_v0 = vld [vmem:[%s18162_s11 + $0x4] sm:$0xcc] }
 0x2b5   :  { %v2128_v27 = vsel %vm15529_vm6, %v10305_v39, %v2127_v36  ;;  %v2077_v2 = vor.u32 %v2076_v32, %v2044_v48  ;;  %v10308_v11 = vrot.slane %v2275_v0, 10  ;;  %v1452_v19 = vrot.slane %v1451_v54, 4  ;;  %v2113_v30 = vld [vmem:[%s18162_s11 + $0x3c] sm:$0x11]  ;;  %v1481_v32 = vld [vmem:[#allocation6 + $0x18] sm:$0xe] }
 0x2b6   :  { %2152 = vst [vmem:[#allocation7 + $0xf0] sm:$0xff] %v2128_v27  ;;  %v2176_v43 = vrot.slane %v2174_v52, 5  ;;  %v2039_v5 = vor.u32 %v2038_v62, %v2035_v59  ;;  %v2179_v9 = vrot.slane %v2177_v55, 6  ;;  %v2137_v34 = vrot.slane %v2127_v36, 4  ;;  %v2170_v25 = vld [vmem:[%s18162_s11 + $0x3c] sm:$0x11] }
 0x2b7   :  { %v2078_v18 = vrot.slane %v2077_v2, 4  ;;  %v2296_v35 = vsel %vm15607_vm10, %v10308_v11, %v2295_v12  ;;  %v1440_v37 = vld [vmem:[#allocation6 + $0x18] sm:$0x3]  ;;  %v2189_v39 = vor.u32 %v2188_v4, %v2185_v3  ;;  %v1457_v46 = vsel %vm15572_vm11, %v1452_v19, %v1456_v23  ;;  %v15841_v52 = vld [vmem:[#allocation6 + $0x1c] sm:$0xf]  ;;  %v2155_v55 = vld [vmem:[#allocation7 + $0x154] sm:$0xff] }
 0x2b8   :  { %v2040_v16 = vrot.slane %v2039_v5, 4  ;;  %v2180_v45 = vor.u32 %v2179_v9, %v2176_v43  ;;  %2320 = vst [vmem:[#allocation7 + $0x118] sm:$0xff] %v2296_v35  ;;  %v1462_v36 = vrot.slane %v1461_v21, 4  ;;  %v1477_v62 = vsel %vm15547_vm1, %v1457_v46, %v1476_v22  ;;  %v2266_v35 = vld [vmem:[#allocation7 + $0x168] sm:$0xff] }
 0x2b9   :  { %v2099_v10 = vsel %vm15645_vm5, %v2078_v18, %v2098_v6  ;;  %v2138_v27 = vrot.slane %v2113_v30, 5  ;;  %v2229_v0 = vshrl.u32 %v2170_v25, 16  ;;  %v2232_v2 = vshll.u32 %v2170_v25, 16  ;;  %1478 = vst [vmem:[%s18162_s11 + $0xc] sm:$0xf] %v1477_v62 }
 0x2ba   :  { %v2045_v54 = vsel %vm15572_vm11, %v2040_v16, %v2044_v48  ;;  %2100 = vst [vmem:[#allocation7 + $0x140] sm:$0xff] %v2099_v10  ;;  %v2181_v59 = vrot.slane %v2180_v45, 4  ;;  %v1464_v43 = vshll.u32 %v1440_v37, 16  ;;  %v1468_v3 = vshrl.u32 %v1440_v37, 16  ;;  %v1501_v6 = vld [vmem:[%s18162_s11 + $0x10] sm:$0xf]  ;;  %v1294_v16 = vpop.f32.mrf.mxu0 }
 0x2bb   :  { %2095 = vst [vmem:[#allocation7 + $0xdc] sm:$0xff] %v2045_v54  ;;  %v2139_v48 = vsel %vm15529_vm6, %v2137_v34, %v2138_v27  ;;  %v10276_v4 = vrot.slane %v1481_v32, 9  ;;  %v1492_v5 = vrot.slane %v15841_v52, 5  ;;  %v2231_v11 = vrot.slane %v2229_v0, 5  ;;  %v1091_v34 = vld [vmem:[%s18162_s11 + $0x40] sm:$0x22] }
 0x2bc   :  { %v2190_v23 = vsel %vm15629_vm4, %v2181_v59, %v2189_v39  ;;  %v2156_v9 = vsel %vm15645_vm5, %v2139_v48, %v2155_v55  ;;  %v2234_v18 = vrot.slane %v2232_v2, 6  ;;  %v1466_v19 = vrot.slane %v1464_v43, 5 }
 0x2bd   :  { %2263 = vst [vmem:[#allocation7 + $0x104] sm:$0xff] %v2190_v23  ;;  %v2227_v21 = vrot.slane %v2189_v39, 4  ;;  %v1470_v22 = vrot.slane %v1468_v3, 4  ;;  %v1493_v30 = vsel %vm15529_vm6, %v10276_v4, %v1492_v5  ;;  %v1092_v10 = vsel %vm15773_vm2, 0, %v1091_v34 }
 0x2be   :  { %2157 = vst [vmem:[#allocation7 + $0x154] sm:$0xff] %v2156_v9  ;;  %v2235_v45 = vor.u32 %v2234_v18, %v2231_v11  ;;  %v1467_v25 = vsel %vm15572_vm11, %v1462_v36, %v1466_v19  ;;  %v1502_v37 = vsel %vm15547_vm1, %v1493_v30, %v1501_v6  ;;  %v1295_v36 = vadd.f32 %v15476_v61, %v1294_v16  ;;  %v1696_v6 = vld [vmem:[#allocation7 + $0x6c] sm:$0xff] }
 0x2bf   :  { %v1471_v39 = vor.u32 %v1470_v22, %v1466_v19  ;;  %1479 = vst [vmem:[%s18162_s11 + $0x28] sm:$0xf] %v1467_v25  ;;  %v15884_v32 = vrot.slane %v2459_v29, 4  ;;  %v15889_v59 = vrot.slane %v2627_v15, 4  ;;  %v15898_v27 = vrot.slane %v1803_v41, 4 }
 0x2c0   :  { %v2236_v46 = vsel %vm15629_vm4, %v2227_v21, %v2235_v45  ;;  %1503 = vst [vmem:[%s18162_s11 + $0x10] sm:$0xf] %v1502_v37  ;;  %v1680_v29 = vld [vmem:[%s18162_s11 + $0x8] sm:$0xff]  ;;  %v1293_v15 = vadd.f32 %v15476_v61, %v15821_v1  ;;  %v1336_v3 = vmax.f32 %v1295_v36, 0.0 }
 0x2c1   :  { %v2267_v62 = vsel %vm15645_vm5, %v2236_v46, %v2266_v35  ;;  %1093 = vst [vmem:[%s18162_s11 + $0x40] sm:$0x22] %v1092_v10  ;;  %v1841_v49 = vld [vmem:[%s18162_s11 + $0x8] sm:$0xee]  ;;  %v1723_v55 = vshrl.u32 %v1680_v29, 16  ;;  %v1726_v41 = vshll.u32 %v1680_v29, 16 }
 0x2c2   :  { %2268 = vst [vmem:[#allocation7 + $0x168] sm:$0xff] %v2267_v62  ;;  %v1868_v0 = vshrl.u32 %v1841_v49, 16  ;;  %v1472_v2 = vrot.slane %v1471_v39, 4  ;;  %v1784_v26 = vld [vmem:[%s18162_s11 + $0x8] sm:$0xee]  ;;  %v1871_v43 = vshll.u32 %v1841_v49, 16 }
 0x2c3   :  { %1686 = vst [vmem:[#allocation7 + $0x8] sm:$0xff] %v1680_v29  ;;  %v1725_v23 = vrot.slane %v1723_v55, 4  ;;  %v1728_v48 = vrot.slane %v1726_v41, 5  ;;  %v2488_v1 = vld [vmem:[%s18162_s11 + $0x8] sm:$0xee]  ;;  %v1335_v19 = vmax.f32 %v1293_v15, 0.0 }
 0x2c4   :  { %2338 = vst [vmem:[#allocation7 + $0x190] sm:$0xff] %v1680_v29  ;;  %v1870_v4 = vrot.slane %v1868_v0, 5  ;;  %v1873_v9 = vrot.slane %v1871_v43, 6  ;;  %v2498_v11 = vshrl.u32 %v2488_v1, 16  ;;  %v2501_v18 = vshll.u32 %v2488_v1, 16 }
 0x2c5   :  { %v1729_v21 = vor.u32 %v1728_v48, %v1725_v23  ;;  %v10300_v22 = vrot.slane %v1784_v26, 9  ;;  %1480 = vst [vmem:[%s18162_s11 + $0x44] sm:$0x1] %v1472_v2  ;;  %v2431_v34 = vld [vmem:[%s18162_s11 + $0x8] sm:$0xee]  ;;  %v13761_v25 = vpack.c.bf16 %v1336_v3, %v1335_v19  ;;  %v2341_v26 = vld [vmem:[#allocation7 + $0x1f4] sm:$0xff] }
 0x2c6   :  { %v15928_v16 = vld [vmem:[%s18162_s11 + $0x24] sm:$0xff]  ;;  %v1874_v37 = vor.u32 %v1873_v9, %v1870_v4  ;;  %v15945_v62 = vrot.slane %v2498_v11, 5  ;;  %v15947_v29 = vrot.slane %v2501_v18, 6  ;;  %v15960_v43 = vrot.slane %v2295_v12, 4 }
 0x2c7   :  { %v1681_v30 = vld [vmem:[%s18162_s11 + $0x10] sm:$0xf]  ;;  %v1697_v45 = vsel %vm15645_vm5, %v15928_v16, %v1696_v6  ;;  %v1732_v10 = vshll.u32 %v15928_v16, 16  ;;  %v1755_v49 = vshrl.u32 %v15928_v16, 16  ;;  %v15951_v15 = vrot.slane %v15928_v16, 5  ;;  %13811 = vst [vmem:[#allocation6 + $0x20] sm:$0xff] %v13761_v25  }
 0x2c8   :  { %1687 = vst [vmem:[#allocation7 + $0x10] sm:$0xf] %v1681_v30  ;;  %v1704_v35 = vld [vmem:[%s18162_s11 + $0x10] sm:$0xf]  ;;  %v1730_v55 = vrot.slane %v1729_v21, 4  ;;  %v10311_v3 = vrot.slane %v2431_v34, 9  ;;  %v2504_v18 = vor.u32 %v15947_v29, %v15945_v62  ;;  %v2342_v30 = vsel %vm15645_vm5, %v15928_v16, %v2341_v26 }
 0x2c9   :  { %1698 = vst [vmem:[#allocation7 + $0x6c] sm:$0xff] %v1697_v45  ;;  %v1737_v39 = vshrl.u32 %v1704_v35, 16  ;;  %v1740_v46 = vshll.u32 %v1704_v35, 16  ;;  %v15943_v36 = vld [vmem:[%s18162_s11 + $0xc] sm:$0xff]  ;;  %v1734_v41 = vrot.slane %v1732_v10, 5  ;;  %v1757_v23 = vrot.slane %v1755_v49, 4 }
 0x2ca   :  { %2015 = vst [vmem:[#allocation7 + $0xd0] sm:$0xff] %v15943_v36  ;;  %v1808_v48 = vsel %vm15529_vm6, %v10300_v22, %v15951_v15  ;;  %v1842_v4 = vld [vmem:[%s18162_s11 + $0x10] sm:$0xe]  ;;  %v1777_v6 = vld [vmem:[#allocation7 + $0x80] sm:$0xff]  ;;  %v1816_v9 = vrot.slane %v15951_v15, 4  ;;  %v1879_v8 = vrot.slane %v1755_v49, 5  ;;  %v2452_v49 = vsel %vm15529_vm6, %v10311_v3, %v15951_v15 }
 0x2cb   :  { %v15954_v0 = vrot.slane %v1737_v39, 4  ;;  %v15956_v2 = vrot.slane %v1740_v46, 5  ;;  %v1735_v1 = vsel %vm15572_vm11, %v1730_v55, %v1734_v41  ;;  %1829 = vst [vmem:[#allocation7 + $0x30] sm:$0xff] %v1808_v48  ;;  %v1882_v12 = vrot.slane %v1732_v10, 6  ;;  %v1834_v35 = vld [vmem:[#allocation7 + $0x94] sm:$0xff] }
 0x2cc   :  { %v1875_v11 = vrot.slane %v1874_v37, 4  ;;  %v1758_v19 = vor.u32 %v1757_v23, %v1734_v41  ;;  %1772 = vst [vmem:[#allocation7 + $0x1c] sm:$0xff] %v1735_v1  ;;  %v1790_v21 = vld [vmem:[%s18162_s11 + $0x40] sm:$0x11]  ;;  %v1886_v37 = vshrl.u32 %v1842_v4, 16 }
 0x2cd   :  { %v1847_v22 = vld [vmem:[%s18162_s11 + $0x40] sm:$0x11]  ;;  %v1743_v34 = vor.u32 %v15956_v2, %v15954_v0  ;;  %v1817_v45 = vrot.slane %v1790_v21, 5  ;;  %v15984_v25 = vor.u32 %v1882_v12, %v1879_v8  ;;  %2343 = vst [vmem:[#allocation7 + $0x1f4] sm:$0xff] %v2342_v30  ;;  %v15989_v10 = vld [vmem:[%s18162_s11 + $0x38] sm:$0x3] }
 0x2ce   :  { %v1952_v39 = vld [vmem:[%s18162_s11 + $0x8] sm:$0xcc]  ;;  %v1759_v46 = vrot.slane %v1758_v19, 4  ;;  %v1915_v62 = vshrl.u32 %v1847_v22, 16  ;;  %v1918_v29 = vshll.u32 %v1847_v22, 16  ;;  %v1889_v2 = vshll.u32 %v1842_v4, 16 }
 0x2cf   :  { %v2599_v55 = vld [vmem:[%s18162_s11 + $0x8] sm:$0xcc]  ;;  %v1818_v41 = vsel %vm15529_vm6, %v1816_v9, %v1817_v45  ;;  %v1884_v0 = vsel %vm15629_vm4, %v1875_v11, %v15984_v25  ;;  %v1913_v26 = vrot.slane %v15984_v25, 4  ;;  %2419 = vst [vmem:[#allocation7 + $0x1a4] sm:$0xff] %v1735_v1  ;;  %v16019_v48 = vld [vmem:[%s18162_s11 + $0x10] sm:$0xe]  ;;  %v1297_v1 = vpop.f32.mrf.mxu0 }
 0x2d0   :  { %v1778_v23 = vsel %vm15645_vm5, %v1759_v46, %v1777_v6  ;;  %v1835_v4 = vsel %vm15645_vm5, %v1818_v41, %v1834_v35  ;;  %v1917_v8 = vrot.slane %v1915_v62, 5  ;;  %v1920_v12 = vrot.slane %v1918_v29, 6  ;;  %1940 = vst [vmem:[#allocation7 + $0x44] sm:$0xff] %v1884_v0  ;;  %v1945_v21 = vld [vmem:[#allocation7 + $0xa8] sm:$0xff]  ;;  %v16031_v45 = vld [vmem:[%s18162_s11 + $0x10] sm:$0xc] }
 0x2d1   :  { %v10303_v11 = vrot.slane %v1952_v39, 10  ;;  %v1494_v19 = vrot.slane %v1492_v5, 4  ;;  %1779 = vst [vmem:[#allocation7 + $0x80] sm:$0xff] %v1778_v23  ;;  %v16026_v6 = vrot.slane %v15928_v16, 6  ;;  %v2422_v22 = vld [vmem:[#allocation7 + $0x208] sm:$0xff]  ;;  %v1117_v52 = vsel %vm16010_vm8, 0, %v15989_v10 }
 0x2d2   :  { %1836 = vst [vmem:[#allocation7 + $0x94] sm:$0xff] %v1835_v4  ;;  %v1921_v30 = vor.u32 %v1920_v12, %v1917_v8  ;;  %v2437_v35 = vld [vmem:[%s18162_s11 + $0x40] sm:$0x11]  ;;  %v2505_v5 = vrot.slane %v2504_v18, 4  ;;  %v10314_v39 = vrot.slane %v2599_v55, 10  ;;  %v10301_v16 = vrot.slane %v16019_v48, 9 }
 0x2d3   :  { %v1976_v62 = vsel %vm15607_vm10, %v10303_v11, %v16026_v6  ;;  %2476 = vst [vmem:[#allocation7 + $0x1b8] sm:$0xff] %v2452_v49  ;;  %v2479_v29 = vld [vmem:[#allocation7 + $0x21c] sm:$0xff]  ;;  %v16043_v41 = vrot.slane %v1743_v34, 4  ;;  %v1888_v0 = vrot.slane %v1886_v37, 5  ;;  %v1891_v23 = vrot.slane %v1889_v2, 6 }
 0x2d4   :  { %v1922_v4 = vsel %vm15629_vm4, %v1913_v26, %v1921_v30  ;;  %1997 = vst [vmem:[#allocation7 + $0x58] sm:$0xff] %v1976_v62  ;;  %v2494_v18 = vld [vmem:[%s18162_s11 + $0x40] sm:$0x11]  ;;  %v10304_v49 = vrot.slane %v16031_v45, 10  ;;  %v16058_v34 = vld [vmem:[%s18162_s11 + $0xc] sm:$0xee]  ;;  %v2423_v37 = vsel %vm15645_vm5, %v1759_v46, %v2422_v22  ;;  %v16064_v11 = vadd.f32 %v15476_v61, %v1297_v1 }
 0x2d5   :  { %v1946_v10 = vsel %vm15645_vm5, %v1922_v4, %v1945_v21  ;;  %v2462_v55 = vrot.slane %v2437_v35, 5  ;;  %v1483_v2 = vld [vmem:[#allocation6 + $0x20] sm:$0x3]  ;;  %v2047_v8 = vshrl.u32 %v15943_v36, 16  ;;  %v1506_v12 = vld [vmem:[#allocation6 + $0x20] sm:$0xc]  ;;  %v2620_v35 = vsel %vm15607_vm10, %v10314_v39, %v16026_v6 }
 0x2d6   :  { %1947 = vst [vmem:[#allocation7 + $0xa8] sm:$0xff] %v1946_v10  ;;  %v2165_v21 = vld [vmem:[%s18162_s11 + $0xc] sm:$0xee]  ;;  %v2553_v46 = vshrl.u32 %v2494_v18, 16  ;;  %v2556_v22 = vshll.u32 %v2494_v18, 16  ;;  %v2050_v62 = vshll.u32 %v15943_v36, 16  ;;  %v2514_v18 = vsel %vm15629_vm4, %v2505_v5, %v15984_v25 }
 0x2d7   :  { %2424 = vst [vmem:[#allocation7 + $0x208] sm:$0xff] %v2423_v37  ;;  %v2463_v30 = vsel %vm15529_vm6, %v1816_v9, %v2462_v55  ;;  %v10306_v61 = vrot.slane %v16058_v34, 9  ;;  %v1507_v4 = vld [vmem:[#allocation6 + $0x24] sm:$0xf]  ;;  %v1495_v37 = vrot.slane %v1483_v2, 5  ;;  %v1513_v9 = vshrl.u32 %v1506_v12, 16  ;;  %v1299_v13 = vpop.f32.mrf.mxu0 }
 0x2d8   :  { %v2480_v1 = vsel %vm15645_vm5, %v2463_v30, %v2479_v29  ;;  %2644 = vst [vmem:[#allocation7 + $0x1e0] sm:$0xff] %v2620_v35  ;;  %v2555_v15 = vrot.slane %v2553_v46, 5  ;;  %v2558_v10 = vrot.slane %v2556_v22, 6  ;;  %v1892_v55 = vor.u32 %v1891_v23, %v1888_v0  ;;  %v1069_v36 = vld [vmem:[%s18162_s11 + $0x54] sm:$0x11] }
 0x2d9   :  { %2481 = vst [vmem:[#allocation7 + $0x21c] sm:$0xff] %v2480_v1  ;;  %v1516_v39 = vshll.u32 %v1506_v12, 16  ;;  %v2590_v30 = vld [vmem:[#allocation7 + $0x230] sm:$0xff]  ;;  %v1496_v0 = vsel %vm15529_vm6, %v1494_v19, %v1495_v37  ;;  %v1497_v23 = vrot.slane %v1495_v37, 4  ;;  %v1515_v2 = vrot.slane %v1513_v9, 5 }
 0x2da   :  { %1118 = vst [vmem:[%s18162_s11 + $0x38] sm:$0x3] %v1117_v52  ;;  %v2559_v29 = vor.u32 %v2558_v10, %v2555_v15  ;;  %v2192_v46 = vshrl.u32 %v2165_v21, 16  ;;  %v1522_v12 = vshrl.u32 %v1507_v4, 16  ;;  %v1525_v22 = vshll.u32 %v1507_v4, 16 }
 0x2db   :  { %2587 = vst [vmem:[#allocation7 + $0x1cc] sm:$0xff] %v2514_v18  ;;  %v1518_v5 = vrot.slane %v1516_v39, 6  ;;  %v2195_v35 = vshll.u32 %v2165_v21, 16  ;;  %v1070_v19 = vsel %vm15416_vm9, 0, %v1069_v36  ;;  %v16106_v1 = vld [vmem:[%s18154_s2] ss:$0 sm:$0xff] }
 0x2dc   :  { %1504 = vst [vmem:[%s18162_s11 + $0x2c] sm:$0xf] %v1496_v0  ;;  %v2560_v52 = vsel %vm15629_vm4, %v1913_v26, %v2559_v29  ;;  %v1300_v4 = vadd.f32 %v16106_v1, %v1299_v13  ;;  %v1524_v15 = vrot.slane %v1522_v12, 5  ;;  %v1527_v26 = vrot.slane %v1525_v22, 6  ;;  %v1094_v13 = vld [vmem:[%s18162_s11 + $0x48] sm:$0x22] }
 0x2dd   :  { %1505 = vst [vmem:[%s18162_s11 + $0x48] sm:$0x1] %v1497_v23  ;;  %v2591_v25 = vsel %vm15645_vm5, %v2560_v52, %v2590_v30  ;;  %v1519_v21 = vor.u32 %v1518_v5, %v1515_v2  ;;  %v16114_v10 = vrot.slane %v1892_v55, 4  ;;  %v1984_v37 = vrot.slane %v16026_v6, 4  ;;  %v1544_v36 = vld [vmem:[%s18162_s11 + $0x14] sm:$0xf] }
 0x2de   :  { %1071 = vst [vmem:[%s18162_s11 + $0x54] sm:$0x11] %v1070_v19  ;;  %v16117_v9 = vrot.slane %v2047_v8, 4  ;;  %v16122_v39 = vor.u32 %v1527_v26, %v1524_v15  ;;  %v1095_v8 = vsel %vm15773_vm2, 0, %v1094_v13  ;;  %v16133_v55 = vrot.slane %v2050_v62, 5 }
 0x2df   :  { %2592 = vst [vmem:[#allocation7 + $0x230] sm:$0xff] %v2591_v25  ;;  %v1520_v18 = vrot.slane %v1519_v21, 4  ;;  %v1699_v29 = vld [vmem:[#allocation7 + $0x74] sm:$0xf]  ;;  %v1338_v30 = vmax.f32 %v1300_v4, 0.0  ;;  %v16138_v0 = vrot.slane %v2192_v46, 5 }
 0x2e0   :  { %1119 = vst [vmem:[%s18162_s11 + $0x54] sm:$0xf] %v13834_v57  ;;  %v16140_v23 = vrot.slane %v2195_v35, 6  ;;  %v1337_v57 = vmax.f32 %v16064_v11, 0.0  ;;  %v2053_v19 = vor.u32 %v16133_v55, %v16117_v9  ;;  %v1837_v21 = vld [vmem:[#allocation7 + $0x9c] sm:$0xf] }
 0x2e1   :  { %1096 = vst [vmem:[%s18162_s11 + $0x48] sm:$0x22] %v1095_v8  ;;  %v1529_v2 = vsel %vm15629_vm4, %v1520_v18, %v16122_v39 }
 0x2e2   :  { %v1545_v62 = vsel %vm15547_vm1, %v1529_v2, %v1544_v36  ;;  %v13766_v26 = vpack.c.bf16 %v1338_v30, %v1337_v57  ;;  %v1780_v2 = vld [vmem:[#allocation7 + $0x88] sm:$0xf]  ;;  %v16185_v57 = vld [vmem:[%s18162_s11 + $0xc] sm:$0xcc] }
 0x2e3   :  { %v1684_v5 = vld [vmem:[%s18162_s11 + $0x2c] sm:$0xf]  ;;  %1546 = vst [vmem:[%s18162_s11 + $0x14] sm:$0xf] %v1545_v62 }
 0x2e4   :  { %v1707_v46 = vld [vmem:[%s18162_s11 + $0x2c] sm:$0xf]  ;;  %v1700_v11 = vsel %vm15494_vm13, %v1684_v5, %v1699_v29  ;;  %v1791_v52 = vld [vmem:[%s18162_s11 + $0x48] sm:$0x1]  ;;  %13812 = vst [vmem:[#allocation6 + $0x28] sm:$0xff] %v13766_v26  }
 0x2e5   :  { %v1788_v12 = vld [vmem:[%s18162_s11 + $0x2c] sm:$0xf]  ;;  %v1746_v22 = vshll.u32 %v1707_v46, 16  ;;  %v1760_v35 = vshrl.u32 %v1707_v46, 16  ;;  %1701 = vst [vmem:[#allocation7 + $0x74] sm:$0xf] %v1700_v11 }
 0x2e6   :  { %v1811_v4 = vrot.slane %v1788_v12, 5  ;;  %v1820_v25 = vrot.slane %v1791_v52, 5  ;;  %v1845_v15 = vld [vmem:[%s18162_s11 + $0x2c] sm:$0xf]  ;;  %v1848_v36 = vld [vmem:[%s18162_s11 + $0x48] sm:$0x1] }
 0x2e7   :  { %v1748_v13 = vrot.slane %v1746_v22, 5  ;;  %v1762_v18 = vrot.slane %v1760_v35, 4  ;;  %v1895_v8 = vshrl.u32 %v1845_v15, 16  ;;  %v1898_v29 = vshll.u32 %v1845_v15, 16  ;;  %v16180_v30 = vld [vmem:[%s18162_s11 + $0x2c] sm:$0xf] }
 0x2e8   :  { %v1812_v9 = vsel %vm15529_vm6, %v10301_v16, %v1811_v4  ;;  %v1819_v55 = vrot.slane %v1811_v4, 4  ;;  %v1925_v62 = vshrl.u32 %v1848_v36, 16  ;;  %v1928_v5 = vshll.u32 %v1848_v36, 16  ;;  %v16193_v11 = vld [vmem:[%s18162_s11 + $0x28] sm:$0xff]  ;;  %v1789_v36 = vld [vmem:[%s18162_s11 + $0x38] sm:$0x11] }
 0x2e9   :  { %v1749_v48 = vsel %vm15572_vm11, %v16043_v41, %v1748_v13  ;;  %v1763_v46 = vor.u32 %v1762_v18, %v1748_v13  ;;  %1830 = vst [vmem:[#allocation7 + $0x38] sm:$0xf] %v1812_v9  ;;  %v1897_v16 = vrot.slane %v1895_v8, 5  ;;  %v1900_v12 = vrot.slane %v1898_v29, 6  ;;  %v1948_v18 = vld [vmem:[#allocation7 + $0xb0] sm:$0xf] }
 0x2ea   :  { %1773 = vst [vmem:[#allocation7 + $0x24] sm:$0xf] %v1749_v48  ;;  %v1821_v22 = vsel %vm15529_vm6, %v1819_v55, %v1820_v25  ;;  %v1927_v35 = vrot.slane %v1925_v62, 5  ;;  %v1930_v52 = vrot.slane %v1928_v5, 6  ;;  %v1979_v4 = vrot.slane %v16180_v30, 6 }
 0x2eb   :  { %v1764_v15 = vrot.slane %v1763_v46, 4  ;;  %v1838_v41 = vsel %vm15494_vm13, %v1821_v22, %v1837_v21  ;;  %v1901_v13 = vor.u32 %v1900_v12, %v1897_v16  ;;  %v2198_v8 = vor.u32 %v16140_v23, %v16138_v0  ;;  %v2020_v21 = vld [vmem:[#allocation7 + $0x134] sm:$0xff]  ;;  %v2114_v26 = vld [vmem:[%s18162_s11 + $0x44] sm:$0x11] }
 0x2ec   :  { %1839 = vst [vmem:[#allocation7 + $0x9c] sm:$0xf] %v1838_v41  ;;  %v1931_v25 = vor.u32 %v1930_v52, %v1927_v35  ;;  %v1980_v29 = vsel %vm15607_vm10, %v10304_v49, %v1979_v4  ;;  %v2056_v9 = vshll.u32 %v16193_v11, 16  ;;  %v2010_v45 = vld [vmem:[%s18162_s11 + $0x14] sm:$0xf]  ;;  %v2079_v49 = vshrl.u32 %v16193_v11, 16  ;;  %v1302_v41 = vpop.f32.mrf.mxu0 }
 0x2ed   :  { %v1781_v55 = vsel %vm15494_vm13, %v1764_v15, %v1780_v2  ;;  %v1902_v0 = vsel %vm15629_vm4, %v16114_v10, %v1901_v13  ;;  %v1923_v23 = vrot.slane %v1901_v13, 4  ;;  %1998 = vst [vmem:[#allocation7 + $0x60] sm:$0xf] %v1980_v29  ;;  %v2054_v62 = vrot.slane %v2053_v19, 4  ;;  %v2028_v16 = vld [vmem:[%s18162_s11 + $0x14] sm:$0xf] }
 0x2ee   :  { %v10309_v5 = vrot.slane %v16185_v57, 10  ;;  %1782 = vst [vmem:[#allocation7 + $0x88] sm:$0xf] %v1781_v55  ;;  %v2058_v48 = vrot.slane %v2056_v9, 5  ;;  %v2131_v46 = vrot.slane %v16193_v11, 5  ;;  %v2021_v10 = vsel %vm15645_vm5, %v16193_v11, %v2020_v21  ;;  %v2158_v52 = vld [vmem:[#allocation7 + $0x15c] sm:$0xff] }
 0x2ef   :  { %v1932_v2 = vsel %vm15629_vm4, %v1923_v23, %v1931_v25  ;;  %1941 = vst [vmem:[#allocation7 + $0x4c] sm:$0xf] %v1902_v0  ;;  %v2081_v12 = vrot.slane %v2079_v49, 4  ;;  %v2141_v19 = vrot.slane %v2114_v26, 5  ;;  %v2171_v15 = vld [vmem:[%s18162_s11 + $0x44] sm:$0x11] }
 0x2f0   :  { %v1949_v22 = vsel %vm15494_vm13, %v1932_v2, %v1948_v18  ;;  %2016 = vst [vmem:[#allocation7 + $0xd8] sm:$0xf] %v2010_v45  ;;  %v2059_v35 = vsel %vm15572_vm11, %v2054_v62, %v2058_v48  ;;  %v1814_v13 = vrot.slane %v1789_v36, 5  ;;  %v2199_v25 = vrot.slane %v2198_v8, 4  ;;  %v16248_v26 = vld [vmem:[%s18162_s11 + $0x38] sm:$0x11] }
 0x2f1   :  { %1950 = vst [vmem:[#allocation7 + $0xb0] sm:$0xf] %v1949_v22  ;;  %v2082_v29 = vor.u32 %v2081_v12, %v2058_v48  ;;  %v2132_v21 = vsel %vm15529_vm6, %v10306_v61, %v2131_v46  ;;  %v2140_v18 = vrot.slane %v2131_v46, 4  ;;  %v2061_v55 = vshrl.u32 %v2028_v16, 16  ;;  %v2101_v23 = vld [vmem:[#allocation7 + $0x148] sm:$0xff] }
 0x2f2   :  { %2022 = vst [vmem:[#allocation7 + $0x134] sm:$0xff] %v2021_v10  ;;  %v2064_v0 = vshll.u32 %v2028_v16, 16  ;;  %v2203_v45 = vrot.slane %v2079_v49, 5  ;;  %v2206_v36 = vrot.slane %v2056_v9, 6  ;;  %v1530_v8 = vrot.slane %v16122_v39, 4  ;;  %v1831_v49 = vld [vmem:[#allocation7 + $0x8c] sm:$0xff] }
 0x2f3   :  { %v2083_v62 = vrot.slane %v2082_v29, 4  ;;  %2096 = vst [vmem:[#allocation7 + $0xe4] sm:$0xff] %v2059_v35  ;;  %v2142_v34 = vsel %vm15529_vm6, %v2140_v18, %v2141_v19  ;;  %v2239_v61 = vshrl.u32 %v2171_v15, 16  ;;  %v2166_v46 = vld [vmem:[%s18162_s11 + $0x14] sm:$0xe]  ;;  %v1815_v9 = vsel %vm15529_vm6, %v15898_v27, %v1814_v13 }
 0x2f4   :  { %2153 = vst [vmem:[#allocation7 + $0xf8] sm:$0xff] %v2132_v21  ;;  %v2159_v48 = vsel %vm15645_vm5, %v2142_v34, %v2158_v52  ;;  %v2207_v2 = vor.u32 %v2206_v36, %v2203_v45  ;;  %v1905_v10 = vshrl.u32 %v16248_v26, 16  ;;  %v16267_v12 = vld [vmem:[%s18162_s11 + $0x14] sm:$0xe]  ;;  %v2242_v22 = vshll.u32 %v2171_v15, 16 }
 0x2f5   :  { %v2102_v16 = vsel %vm15645_vm5, %v2083_v62, %v2101_v23  ;;  %2160 = vst [vmem:[#allocation7 + $0x15c] sm:$0xff] %v2159_v48  ;;  %v2241_v19 = vrot.slane %v2239_v61, 5  ;;  %v2333_v35 = vld [vmem:[%s18162_s11 + $0x10] sm:$0xff]  ;;  %v16272_v52 = vrot.slane %v2061_v55, 4  ;;  %v16274_v27 = vrot.slane %v2064_v0, 5 }
 0x2f6   :  { %2103 = vst [vmem:[#allocation7 + $0x148] sm:$0xff] %v2102_v16  ;;  %v2208_v13 = vsel %vm15629_vm4, %v2199_v25, %v2207_v2  ;;  %v2299_v29 = vrot.slane %v16193_v11, 6  ;;  %v2489_v21 = vld [vmem:[%s18162_s11 + $0x10] sm:$0xee]  ;;  %v2210_v18 = vshrl.u32 %v2166_v46, 16  ;;  %v2237_v15 = vrot.slane %v2207_v2, 4 }
 0x2f7   :  { %v2244_v23 = vrot.slane %v2242_v22, 6  ;;  %2264 = vst [vmem:[#allocation7 + $0x10c] sm:$0xff] %v2208_v13  ;;  %v1508_v45 = vld [vmem:[#allocation6 + $0x28] sm:$0x7]  ;;  %v1832_v55 = vsel %vm15645_vm5, %v1815_v9, %v1831_v49  ;;  %v16286_v0 = vrot.slane %v1979_v4, 4  ;;  %v2213_v36 = vshll.u32 %v2166_v46, 16  ;;  %v1304_v22 = vpop.f32.mrf.mxu0 }
 0x2f8   :  { %v2269_v25 = vld [vmem:[#allocation7 + $0x170] sm:$0xff]  ;;  %v2300_v62 = vsel %vm15607_vm10, %v10309_v5, %v2299_v29  ;;  %2339 = vst [vmem:[#allocation7 + $0x198] sm:$0xff] %v2333_v35  ;;  %v1303_v61 = vadd.f32 %v16106_v1, %v1302_v41  ;;  %v10307_v48 = vrot.slane %v16267_v12, 9  ;;  %v2371_v30 = vshrl.u32 %v2333_v35, 16  ;;  %v1106_v39 = vld [vmem:[%s18162_s11 + $0x9c] sm:$0x22] }
 0x2f9   :  { %v1549_v34 = vld [vmem:[#allocation6 + $0x28] sm:$0xc]  ;;  %v2245_v2 = vor.u32 %v2244_v23, %v2241_v19  ;;  %2321 = vst [vmem:[#allocation7 + $0x120] sm:$0xff] %v2300_v62  ;;  %v2374_v4 = vshll.u32 %v2333_v35, 16  ;;  %v16296_v9 = vld [vmem:[#allocation6 + $0x2c] sm:$0xf]  ;;  %v2067_v46 = vor.u32 %v16274_v27, %v16272_v52 }
 0x2fa   :  { %v2516_v49 = vshrl.u32 %v2489_v21, 16  ;;  %v2519_v57 = vshll.u32 %v2489_v21, 16  ;;  %v1532_v16 = vshrl.u32 %v1508_v45, 16  ;;  %v2212_v5 = vrot.slane %v2210_v18, 5  ;;  %v10278_v52 = vld [vmem:[%s18162_s11 + $0x58] sm:$0xf] }
 0x2fb   :  { %v2246_v13 = vsel %vm15629_vm4, %v2237_v15, %v2245_v2  ;;  %v1535_v41 = vshll.u32 %v1508_v45, 16  ;;  %v10277_v14 = vrot.slane %v1549_v34, 10  ;;  %v2215_v54 = vrot.slane %v2213_v36, 6  ;;  %v1072_v15 = vld [vmem:[%s18162_s11 + $0x5c] sm:$0x11]  ;;  %1833 = vst [vmem:[#allocation7 + $0x8c] sm:$0xff] %v1832_v55 }
 0x2fc   :  { %v2270_v19 = vsel %vm15645_vm5, %v2246_v13, %v2269_v25  ;;  %v1534_v35 = vrot.slane %v1532_v16, 5  ;;  %v1559_v23 = vrot.slane %v16296_v9, 6  ;;  %v2373_v27 = vrot.slane %v2371_v30, 4  ;;  %v1100_v2 = vld [vmem:[%s18162_s11 + $0x8c] sm:$0x22] }
 0x2fd   :  { %2271 = vst [vmem:[#allocation7 + $0x170] sm:$0xff] %v2270_v19  ;;  %v2376_v21 = vrot.slane %v2374_v4, 5  ;;  %v1537_v18 = vrot.slane %v1535_v41, 6  ;;  %v1305_v45 = vadd.f32 %v16106_v1, %v1304_v22  ;;  %v2518_v36 = vrot.slane %v2516_v49, 5  ;;  %v16322_v30 = vld [vmem:[%s18162_s11 + $0x14] sm:$0xc] }
 0x2fe   :  { %v2521_v62 = vrot.slane %v2519_v57, 6  ;;  %v1560_v25 = vsel %vm15607_vm10, %v10277_v14, %v1559_v23  ;;  %v1073_v34 = vsel %vm15416_vm9, 0, %v1072_v15  ;;  %v16327_v4 = vld [vmem:[%s18162_s11 + $0x10] sm:$0xee]  ;;  %v1101_v14 = vsel %vm15773_vm2, 0, %v1100_v2  ;;  %v1942_v2 = vld [vmem:[#allocation7 + $0xa0] sm:$0xff] }
 0x2ff   :  { %v1538_v9 = vor.u32 %v1537_v18, %v1534_v35  ;;  %v1570_v53 = vsel %vm15547_vm1, %v1560_v25, %v10278_v52  ;;  %1074 = vst [vmem:[%s18162_s11 + $0x5c] sm:$0x11] %v1073_v34  ;;  %v1340_v55 = vmax.f32 %v1305_v45, 0.0  ;;  %v1339_v49 = vmax.f32 %v1303_v61, 0.0  ;;  %v1097_v57 = vld [vmem:[%s18162_s11 + $0x50] sm:$0x2] }
 0x300   :  { %10279 = vst [vmem:[%s18162_s11 + $0x58] sm:$0xf] %v1570_v53  ;;  %v1907_v16 = vrot.slane %v1905_v10, 5  ;;  %v1957_v22 = vld [vmem:[%s18162_s11 + $0x38] sm:$0x33]  ;;  %v2216_v13 = vor.u32 %v2215_v54, %v2212_v5  ;;  %v1098_v61 = vsel %vm15756_vm3, 0, %v1097_v57  ;;  %v2377_v35 = vor.u32 %v2376_v21, %v2373_v27 }
 0x301   :  { %v1539_v41 = vsel %vm15629_vm4, %v1530_v8, %v1538_v9  ;;  %v1540_v19 = vrot.slane %v1538_v9, 4  ;;  %1102 = vst [vmem:[%s18162_s11 + $0x8c] sm:$0x22] %v1101_v14  ;;  %v1103_v10 = vld [vmem:[%s18162_s11 + $0x94] sm:$0x22]  ;;  %v1908_v8 = vshll.u32 %v16248_v26, 16  ;;  %v2522_v52 = vor.u32 %v2521_v62, %v2518_v36 }
 0x302   :  { %1547 = vst [vmem:[%s18162_s11 + $0x30] sm:$0xf] %v1539_v41  ;;  %v1104_v54 = vsel %vm15773_vm2, 0, %v1103_v10  ;;  %v16368_v5 = vrot.slane %v2067_v46, 4  ;;  %v16373_v27 = vld [vmem:[%s18162_s11 + $0x10] sm:$0xcc]  ;;  %v13771_v18 = vpack.c.bf16 %v1340_v55, %v1339_v49 }
 0x303   :  { %1548 = vst [vmem:[%s18162_s11 + $0x4c] sm:$0x1] %v1540_v19  ;;  %v1107_v21 = vsel %vm15773_vm2, 0, %v1106_v39  ;;  %v10310_v15 = vrot.slane %v16322_v30, 10  ;;  %v16383_v26 = vrot.slane %v2299_v29, 4  ;;  %v10312_v46 = vrot.slane %v16327_v4, 9 }
 0x304   :  { %1099 = vst [vmem:[%s18162_s11 + $0x50] sm:$0x2] %v1098_v61  ;;  %v1910_v45 = vrot.slane %v1908_v8, 6  ;;  %v16389_v36 = vrot.slane %v2216_v13, 4  ;;  %v1982_v11 = vrot.slane %v1957_v22, 6  ;;  %v16399_v29 = vrot.slane %v2377_v35, 4 }
 0x305   :  { %1105 = vst [vmem:[%s18162_s11 + $0x94] sm:$0x22] %v1104_v54  ;;  %v10315_v62 = vrot.slane %v16373_v27, 10  ;;  %v2023_v25 = vld [vmem:[#allocation7 + $0x13c] sm:$0xf]  ;;  %v16405_v9 = vrot.slane %v2522_v52, 4 }
 0x306   :  { %1108 = vst [vmem:[%s18162_s11 + $0x9c] sm:$0x22] %v1107_v21  ;;  %v1911_v34 = vor.u32 %v1910_v45, %v1907_v16  ;;  %v16407_v53 = vrot.slane %v1559_v23, 4  ;;  %v2344_v49 = vld [vmem:[#allocation7 + $0x1fc] sm:$0xff]  ;;  %v1110_v22 = vsel %vm15756_vm3, 0, %v16397_v44  ;;  %v16442_v51 = vsel %vm15607_vm10, %v15902_v20, %v1982_v11 }
 0x307   :  { %v16412_v14 = vld [vmem:[%s18162_s11 + $0x54] sm:$0xff]  ;;  %13813 = vst [vmem:[#allocation6 + $0x30] sm:$0xff] %v13771_v18   ;;  %v2161_v52 = vld [vmem:[#allocation7 + $0x164] sm:$0xf]  ;;  %vm1577_vm2 = vsmask.f32 5392 }
 0x308   :  { %v16417_v55 = vld [vmem:[%s18162_s11 + $0x54] sm:$0xee]  ;;  %2662 = vst [vmem:[#allocation7 + $0x258] sm:$0xff] %v16412_v14  ;;  %v2681_v57 = vshrl.u32 %v16412_v14, 16  ;;  %v2684_v16 = vshll.u32 %v16412_v14, 16  ;;  %v1912_v61 = vsel %vm15629_vm4, %v1903_v56, %v1911_v34  ;;  %vm16604_vm3 = vmor %vm1082_vm14, %vm1577_vm2  ;;  %vm18215_vm9 = vcmask 1044484  }
 0x309   :  { %v2013_v13 = vld [vmem:[%s18162_s11 + $0x30] sm:$0xf]  ;;  %v1943_v45 = vsel %vm15645_vm5, %v1912_v61, %v1942_v2  ;;  %1111 = vst [vmem:[%s18162_s11 + $0xa4] sm:$0x2] %v1110_v22  ;;  %vm18216_vm14 = vcmask 1040384  }
 0x30a   :  { %v2031_v41 = vld [vmem:[%s18162_s11 + $0x30] sm:$0xf]  ;;  %v2024_v10 = vsel %vm15494_vm13, %v2013_v13, %v2023_v25  ;;  %v2115_v39 = vld [vmem:[%s18162_s11 + $0x4c] sm:$0x1]  ;;  %1944 = vst [vmem:[#allocation7 + $0xa0] sm:$0xff] %v1943_v45  ;;  %vm16779_vm12 = vmor %vm18216_vm14, %vm18215_vm9 }
 0x30b   :  { %v2112_v19 = vld [vmem:[%s18162_s11 + $0x30] sm:$0xf]  ;;  %v2070_v35 = vshll.u32 %v2031_v41, 16  ;;  %v2084_v54 = vshrl.u32 %v2031_v41, 16  ;;  %2025 = vst [vmem:[#allocation7 + $0x13c] sm:$0xf] %v2024_v10 }
 0x30c   :  { %v2135_v8 = vrot.slane %v2112_v19, 5  ;;  %v16452_v60 = vld [vmem:[%s18162_s11 + $0x2c] sm:$0xff]  ;;  %v2144_v56 = vrot.slane %v2115_v39, 5 }
 0x30d   :  { %v2169_v20 = vld [vmem:[%s18162_s11 + $0x30] sm:$0xf]  ;;  %v2345_v21 = vsel %vm15645_vm5, %v16452_v60, %v2344_v49  ;;  %v2380_v18 = vshll.u32 %v16452_v60, 16  ;;  %v2072_v44 = vrot.slane %v2070_v35, 5  ;;  %v2086_v11 = vrot.slane %v2084_v54, 4 }
 0x30e   :  { %v2136_v25 = vsel %vm15529_vm6, %v10307_v48, %v2135_v8  ;;  %v2143_v34 = vrot.slane %v2135_v8, 4  ;;  %v2172_v13 = vld [vmem:[%s18162_s11 + $0x4c] sm:$0x1]  ;;  %2346 = vst [vmem:[#allocation7 + $0x1fc] sm:$0xff] %v2345_v21  ;;  %v16473_v49 = vld [vmem:[%s18162_s11 + $0x54] sm:$0xee] }
 0x30f   :  { %v2104_v41 = vld [vmem:[#allocation7 + $0x150] sm:$0xf]  ;;  %2154 = vst [vmem:[#allocation7 + $0x100] sm:$0xf] %v2136_v25  ;;  %v2219_v2 = vshrl.u32 %v2169_v20, 16  ;;  %v2222_v19 = vshll.u32 %v2169_v20, 16  ;;  %v2073_v48 = vsel %vm15572_vm11, %v16368_v5, %v2072_v44  ;;  %v2087_v10 = vor.u32 %v2086_v11, %v2072_v44 }
 0x310   :  { %v2249_v61 = vshrl.u32 %v2172_v13, 16  ;;  %v2252_v12 = vshll.u32 %v2172_v13, 16  ;;  %v2145_v35 = vsel %vm15529_vm6, %v2143_v34, %v2144_v56  ;;  %v16483_v54 = vld [vmem:[%s18162_s11 + $0x30] sm:$0xf]  ;;  %v2382_v39 = vrot.slane %v2380_v18, 5 }
 0x311   :  { %v2438_v8 = vld [vmem:[%s18162_s11 + $0x48] sm:$0x11]  ;;  %2097 = vst [vmem:[#allocation7 + $0xec] sm:$0xf] %v2073_v48  ;;  %v2162_v20 = vsel %vm15494_vm13, %v2145_v35, %v2161_v52  ;;  %v2221_v5 = vrot.slane %v2219_v2, 5  ;;  %v2224_v21 = vrot.slane %v2222_v19, 6 }
 0x312   :  { %v2251_v44 = vrot.slane %v2249_v61, 5  ;;  %v2088_v11 = vrot.slane %v2087_v10, 4  ;;  %2163 = vst [vmem:[#allocation7 + $0x164] sm:$0xf] %v2162_v20  ;;  %v2254_v56 = vrot.slane %v2252_v12, 6  ;;  %v2303_v25 = vrot.slane %v16483_v54, 6 }
 0x313   :  { %v2383_v34 = vsel %vm15572_vm11, %v16399_v29, %v2382_v39  ;;  %v2225_v13 = vor.u32 %v2224_v21, %v2221_v5  ;;  %v2403_v23 = vshrl.u32 %v16452_v60, 16  ;;  %v2455_v45 = vrot.slane %v16452_v60, 5  ;;  %v2495_v52 = vld [vmem:[%s18162_s11 + $0x48] sm:$0x11]  ;;  %v2272_v12 = vld [vmem:[#allocation7 + $0x178] sm:$0xf] }
 0x314   :  { %2420 = vst [vmem:[#allocation7 + $0x1ac] sm:$0xff] %v2383_v34  ;;  %v2822_v2 = vshrl.u32 %v16473_v49, 16  ;;  %v2105_v19 = vsel %vm15494_vm13, %v2088_v11, %v2104_v41  ;;  %v2255_v61 = vor.u32 %v2254_v56, %v2251_v44  ;;  %v2304_v29 = vsel %vm15607_vm10, %v10310_v15, %v2303_v25  ;;  %v2482_v20 = vld [vmem:[#allocation7 + $0x224] sm:$0xff]  ;;  %v2425_v11 = vld [vmem:[#allocation7 + $0x210] sm:$0xff]  ;;  %v1575_v27 = vld [vmem:[#allocation6 + $0x34] sm:$0xf] }
 0x315   :  { %v2465_v48 = vrot.slane %v2438_v8, 5  ;;  %2106 = vst [vmem:[#allocation7 + $0x150] sm:$0xf] %v2105_v19  ;;  %v2226_v10 = vsel %vm15629_vm4, %v16389_v36, %v2225_v13  ;;  %v2247_v41 = vrot.slane %v2225_v13, 4  ;;  %v2405_v35 = vrot.slane %v2403_v23, 4  ;;  %v16521_v34 = vld [vmem:[#allocation7 + $0xb4] sm:$0xff] }
 0x316   :  { %v2456_v30 = vsel %vm15529_vm6, %v10312_v46, %v2455_v45  ;;  %2265 = vst [vmem:[#allocation7 + $0x114] sm:$0xf] %v2226_v10  ;;  %v2464_v15 = vrot.slane %v2455_v45, 4  ;;  %v2527_v8 = vrot.slane %v2403_v23, 5  ;;  %v2530_v5 = vrot.slane %v2380_v18, 6 }
 0x317   :  { %v2563_v21 = vshrl.u32 %v2495_v52, 16  ;;  %v2256_v22 = vsel %vm15629_vm4, %v2247_v41, %v2255_v61  ;;  %2322 = vst [vmem:[#allocation7 + $0x128] sm:$0xf] %v2304_v29  ;;  %v2406_v44 = vor.u32 %v2405_v35, %v2382_v39  ;;  %v2566_v36 = vshll.u32 %v2495_v52, 16  ;;  %v1121_v13 = vld [vmem:[%s18162_s11 + $0x8c] sm:$0x3] }
 0x318   :  { %v2623_v56 = vrot.slane %v16452_v60, 6  ;;  %v2273_v4 = vsel %vm15494_vm13, %v2256_v22, %v2272_v12  ;;  %v2466_v46 = vsel %vm15529_vm6, %v2464_v15, %v2465_v48  ;;  %2477 = vst [vmem:[#allocation7 + $0x1c0] sm:$0xff] %v2456_v30  ;;  %v2531_v23 = vor.u32 %v2530_v5, %v2527_v8  ;;  %v1126_v39 = vld [vmem:[%s18162_s11 + $0x50] sm:$0x3]  ;;  %v1551_v19 = vld [vmem:[#allocation6 + $0x30] sm:$0x7] }
 0x319   :  { %v2565_v18 = vrot.slane %v2563_v21, 5  ;;  %2274 = vst [vmem:[#allocation7 + $0x178] sm:$0xf] %v2273_v4  ;;  %v2407_v60 = vrot.slane %v2406_v44, 4  ;;  %v2483_v45 = vsel %vm15645_vm5, %v2466_v46, %v2482_v20  ;;  %v2568_v52 = vrot.slane %v2566_v36, 6  ;;  %v2593_v29 = vld [vmem:[#allocation7 + $0x238] sm:$0xff] }
 0x31a   :  { %2484 = vst [vmem:[#allocation7 + $0x224] sm:$0xff] %v2483_v45  ;;  %v2532_v61 = vsel %vm15629_vm4, %v16405_v9, %v2531_v23  ;;  %v2561_v12 = vrot.slane %v2531_v23, 4  ;;  %v2624_v48 = vsel %vm15607_vm10, %v10315_v62, %v2623_v56  ;;  %v2683_v10 = vrot.slane %v2681_v57, 4  ;;  %v1574_v41 = vld [vmem:[#allocation6 + $0x30] sm:$0x8]  ;;  %v2002_v23 = vld [vmem:[#allocation7 + $0xbc] sm:$0xff] }
 0x31b   :  { %v2426_v35 = vsel %vm15645_vm5, %v2407_v60, %v2425_v11  ;;  %v2569_v30 = vor.u32 %v2568_v52, %v2565_v18  ;;  %2588 = vst [vmem:[#allocation7 + $0x1d4] sm:$0xff] %v2532_v61  ;;  %v2686_v20 = vrot.slane %v2684_v16, 5  ;;  %v1131_v9 = vld [vmem:[%s18162_s11 + $0xa4] sm:$0x3]  ;;  %v2000_v62 = vsel %vm15645_vm5, %v16442_v51, %v16521_v34  ;;  %v2323_v45 = vld [vmem:[#allocation7 + $0x17c] sm:$0xff] }
 0x31c   :  { %2427 = vst [vmem:[#allocation7 + $0x210] sm:$0xff] %v2426_v35  ;;  %v2824_v57 = vrot.slane %v2822_v2, 5  ;;  %v2825_v15 = vshll.u32 %v16473_v49, 16  ;;  %v1122_v8 = vsel %vm16010_vm8, 0, %v1121_v13  ;;  %v1127_v14 = vsel %vm16010_vm8, 0, %v1126_v39 }
 0x31d   :  { %v1958_v16 = vld [vmem:[%s18162_s11 + $0x40] sm:$0x33]  ;;  %v2570_v5 = vsel %vm15629_vm4, %v2561_v12, %v2569_v30  ;;  %2645 = vst [vmem:[#allocation7 + $0x1e8] sm:$0xff] %v2624_v48  ;;  %v2687_v21 = vor.u32 %v2686_v20, %v2683_v10  ;;  %v1132_v51 = vsel %vm16010_vm8, 0, %v1131_v9  ;;  %v1562_v2 = vrot.slane %v1551_v19, 6 }
 0x31e   :  { %v1959_v49 = vld [vmem:[%s18162_s11 + $0x48] sm:$0x3]  ;;  %v2594_v22 = vsel %vm15645_vm5, %v2570_v5, %v2593_v29  ;;  %v2827_v44 = vrot.slane %v2825_v15, 6  ;;  %1123 = vst [vmem:[%s18162_s11 + $0x8c] sm:$0x3] %v1122_v8  ;;  %v1580_v11 = vshrl.u32 %v1574_v41, 16 }
 0x31f   :  { %v1583_v36 = vshll.u32 %v1574_v41, 16  ;;  %v2311_v34 = vrot.slane %v2303_v25, 4  ;;  %2595 = vst [vmem:[#allocation7 + $0x238] sm:$0xff] %v2594_v22  ;;  %v1563_v3 = vsel %vm15607_vm10, %v16407_v53, %v1562_v2  ;;  %v1564_v4 = vrot.slane %v1562_v2, 4  ;;  %v2005_v18 = vld [vmem:[#allocation7 + $0xc4] sm:$0xf] }
 0x320   :  { %v1589_v46 = vshrl.u32 %v1575_v27, 16  ;;  %v2281_v13 = vld [vmem:[%s18162_s11 + $0x3c] sm:$0x33]  ;;  %v16583_v39 = vrot.slane %v2623_v56, 4  ;;  %1128 = vst [vmem:[%s18162_s11 + $0x50] sm:$0x3] %v1127_v14  ;;  %v2828_v56 = vor.u32 %v2827_v44, %v2824_v57 }
 0x321   :  { %v1582_v54 = vrot.slane %v1580_v11, 6  ;;  %v1585_v25 = vrot.slane %v1583_v36, 7  ;;  %v1592_v60 = vshll.u32 %v1575_v27, 16  ;;  %1133 = vst [vmem:[%s18162_s11 + $0xa4] sm:$0x3] %v1132_v51  ;;  %v1985_v52 = vrot.slane %v1958_v16, 6 }
 0x322   :  { %v1591_v53 = vrot.slane %v1589_v46, 6  ;;  %v1988_v19 = vrot.slane %v1959_v49, 6  ;;  %v2306_v61 = vrot.slane %v2281_v13, 6  ;;  %v16591_v12 = vrot.slane %v2687_v21, 4  ;;  %10280 = vst [vmem:[%s18162_s11 + $0x74] sm:$0xf] %v1563_v3 }
 0x323   :  { %v1586_v29 = vor.u32 %v1585_v25, %v1582_v54  ;;  %v1594_v48 = vrot.slane %v1592_v60, 7  ;;  %v2282_v10 = vld [vmem:[%s18162_s11 + $0x44] sm:$0x33]  ;;  %10281 = vst [vmem:[%s18162_s11 + $0x90] sm:$0x1] %v1564_v4  ;;  %v1986_v35 = vsel %vm15607_vm10, %v1984_v37, %v1985_v52  ;;  %v16638_v2 = vrot.slane %v2828_v56, 4 }
 0x324   :  { %v1989_v30 = vsel %vm15607_vm10, %v16286_v0, %v1988_v19  ;;  %v2283_v20 = vld [vmem:[%s18162_s11 + $0x4c] sm:$0x3]  ;;  %v2307_v9 = vsel %vm15607_vm10, %v15960_v43, %v2306_v61  ;;  %v2309_v27 = vrot.slane %v2282_v10, 6  ;;  %v2326_v57 = vld [vmem:[#allocation7 + $0x184] sm:$0xff]  ;;  %v10282_v14 = vld [vmem:[%s18162_s11 + $0x5c] sm:$0xf]  ;;  %v2003_v0 = vsel %vm15645_vm5, %v1986_v35, %v2002_v23 }
 0x325   :  { %v1587_v15 = vrot.slane %v1586_v29, 4  ;;  %v16621_v8 = vor.u32 %v1594_v48, %v1591_v53  ;;  %2001 = vst [vmem:[#allocation7 + $0xb4] sm:$0xff] %v2000_v62  ;;  %v2006_v16 = vsel %vm15494_vm13, %v1989_v30, %v2005_v18  ;;  %v2312_v5 = vrot.slane %v2283_v20, 6  ;;  %v2329_v51 = vld [vmem:[#allocation7 + $0x18c] sm:$0xf]  ;;  %v2647_v36 = vld [vmem:[#allocation7 + $0x244] sm:$0xff]  ;;  %v16663_v53 = vpop.f32.mrf.mxu0 }
 0x326   :  { %2004 = vst [vmem:[#allocation7 + $0xbc] sm:$0xff] %v2003_v0  ;;  %v2310_v43 = vsel %vm15607_vm10, %v16383_v26, %v2309_v27  ;;  %v2324_v21 = vsel %vm15645_vm5, %v2307_v9, %v2323_v45  ;;  %v2605_v62 = vld [vmem:[%s18162_s11 + $0x40] sm:$0x33]  ;;  %v2485_v26 = vld [vmem:[#allocation7 + $0x22c] sm:$0xf] }
 0x327   :  { %v1596_v49 = vsel %vm16604_vm3, %v1587_v15, %v16621_v8  ;;  %2007 = vst [vmem:[#allocation7 + $0xc4] sm:$0xf] %v2006_v16  ;;  %v2327_v22 = vsel %vm15645_vm5, %v2310_v43, %v2326_v57  ;;  %v2606_v44 = vld [vmem:[%s18162_s11 + $0x48] sm:$0x33]  ;;  %v2630_v11 = vrot.slane %v2605_v62, 6  ;;  %v2313_v46 = vsel %vm15607_vm10, %v2311_v34, %v2312_v5  ;;  %v2665_v45 = vld [vmem:[#allocation7 + $0x2bc] sm:$0xff] }
 0x328   :  { %v2650_v3 = vld [vmem:[#allocation7 + $0x24c] sm:$0xff]  ;;  %v1612_v4 = vsel %vm15547_vm1, %v1596_v49, %v10282_v14  ;;  %2325 = vst [vmem:[#allocation7 + $0x17c] sm:$0xff] %v2324_v21  ;;  %v2633_v13 = vrot.slane %v2606_v44, 6  ;;  %v2330_v54 = vsel %vm15494_vm13, %v2313_v46, %v2329_v51  ;;  %v2653_v56 = vld [vmem:[#allocation7 + $0x254] sm:$0xf]  ;;  %v18211_v62 = vrot.slane %v15619_v24, 4 }
 0x329   :  { %v2439_v23 = vld [vmem:[%s18162_s11 + $0x50] sm:$0x1]  ;;  %10283 = vst [vmem:[%s18162_s11 + $0x5c] sm:$0xf] %v1612_v4  ;;  %v2631_v19 = vsel %vm15607_vm10, %v1984_v37, %v2630_v11  ;;  %v2596_v57 = vld [vmem:[#allocation7 + $0x240] sm:$0xf] }
 0x32a   :  { %v2496_v18 = vld [vmem:[%s18162_s11 + $0x50] sm:$0x1]  ;;  %v2468_v25 = vrot.slane %v2439_v23, 5  ;;  %2328 = vst [vmem:[#allocation7 + $0x184] sm:$0xff] %v2327_v22  ;;  %v2634_v61 = vsel %vm15607_vm10, %v16583_v39, %v2633_v13  ;;  %v2648_v39 = vsel %vm15645_vm5, %v2631_v19, %v2647_v36  ;;  %v10350_v16 = vld [vmem:[%s18162_s11 + $0x54] sm:$0xcc] }
 0x32b   :  { %v2573_v60 = vshrl.u32 %v2496_v18, 16  ;;  %v2576_v34 = vshll.u32 %v2496_v18, 16  ;;  %v2607_v52 = vld [vmem:[%s18162_s11 + $0x50] sm:$0x3]  ;;  %2331 = vst [vmem:[#allocation7 + $0x18c] sm:$0xf] %v2330_v54  ;;  %v2651_v30 = vsel %vm15645_vm5, %v2634_v61, %v2650_v3 }
 0x32c   :  { %v16678_v29 = vld [vmem:[%s18162_s11 + $0x70] sm:$0xff]  ;;  %v2469_v48 = vsel %vm15529_vm6, %v15884_v32, %v2468_v25  ;;  %v2636_v35 = vrot.slane %v2607_v52, 6  ;;  %2649 = vst [vmem:[#allocation7 + $0x244] sm:$0xff] %v2648_v39  ;;  %v18212_v36 = vrot.slane %v16417_v55, 9  ;;  %v2803_v4 = vld [vmem:[#allocation7 + $0x2e4] sm:$0xff]  ;;  %v10359_v52 = vrot.slane %v10350_v16, 10 }
 0x32d   :  { %v2575_v10 = vrot.slane %v2573_v60, 5  ;;  %v2578_v6 = vrot.slane %v2576_v34, 6  ;;  %v2486_v37 = vsel %vm15494_vm13, %v2469_v48, %v2485_v26  ;;  %v2666_v20 = vsel %vm15645_vm5, %v16678_v29, %v2665_v45  ;;  %v10335_v32 = vld [vmem:[%s18162_s11 + $0x8c] sm:$0x11]  ;;  %2652 = vst [vmem:[#allocation7 + $0x24c] sm:$0xff] %v2651_v30  ;;  %v2914_v39 = vld [vmem:[#allocation7 + $0x2f8] sm:$0xff] }
 0x32e   :  { %v10347_v9 = vld [vmem:[%s18162_s11 + $0x8c] sm:$0x11]  ;;  %2487 = vst [vmem:[#allocation7 + $0x22c] sm:$0xf] %v2486_v37  ;;  %v2637_v15 = vsel %vm15607_vm10, %v15889_v59, %v2636_v35  ;;  %v2690_v14 = vshll.u32 %v16678_v29, 16  ;;  %v2722_v0 = vshrl.u32 %v16678_v29, 16 }
 0x32f   :  { %v2579_v27 = vor.u32 %v2578_v6, %v2575_v10  ;;  %v2654_v43 = vsel %vm15494_vm13, %v2637_v15, %v2653_v56  ;;  %v2775_v5 = vrot.slane %v16678_v29, 5  ;;  %v2786_v21 = vrot.slane %v10335_v32, 5  ;;  %v10356_v44 = vld [vmem:[%s18162_s11 + $0x8c] sm:$0x33]  ;;  %2667 = vst [vmem:[#allocation7 + $0x2bc] sm:$0xff] %v2666_v20 }
 0x330   :  { %v2877_v51 = vshrl.u32 %v10347_v9, 16  ;;  %v2692_v49 = vrot.slane %v2690_v14, 5  ;;  %v2724_v22 = vrot.slane %v2722_v0, 4  ;;  %v2833_v26 = vrot.slane %v2722_v0, 5  ;;  %2655 = vst [vmem:[#allocation7 + $0x254] sm:$0xf] %v2654_v43 }
 0x331   :  { %v2580_v59 = vsel %vm15629_vm4, %v18211_v62, %v2579_v27  ;;  %v2776_v24 = vsel %vm15529_vm6, %v18212_v36, %v2775_v5  ;;  %v2785_v3 = vrot.slane %v2775_v5, 4  ;;  %v2836_v46 = vrot.slane %v2690_v14, 6  ;;  %v2746_v25 = vld [vmem:[#allocation7 + $0x2d0] sm:$0xff]  ;;  %v10427_v20 = vld [vmem:[%s18162_s11 + $0xa4] sm:$0x1] }
 0x332   :  { %v2597_v11 = vsel %vm15494_vm13, %v2580_v59, %v2596_v57  ;;  %v2693_v23 = vsel %vm15572_vm11, %v16591_v12, %v2692_v49  ;;  %v2725_v18 = vor.u32 %v2724_v22, %v2692_v49  ;;  %v2879_v13 = vrot.slane %v2877_v51, 5  ;;  %v1309_v12 = vpop.f32.mrf.mxu0  ;;  %2800 = vst [vmem:[#allocation7 + $0x280] sm:$0xff] %v2776_v24  ;;  %v2971_v35 = vld [vmem:[#allocation7 + $0x30c] sm:$0xff]  ;;  %v10439_v27 = vld [vmem:[%s18162_s11 + $0xa4] sm:$0x1] }
 0x333   :  { %2598 = vst [vmem:[#allocation7 + $0x240] sm:$0xf] %v2597_v11  ;;  %v2880_v54 = vshll.u32 %v10347_v9, 16  ;;  %v2787_v60 = vsel %vm15529_vm6, %v2785_v3, %v2786_v21  ;;  %v2837_v55 = vor.u32 %v2836_v46, %v2833_v26  ;;  %v2943_v34 = vrot.slane %v16678_v29, 6  ;;  %v10448_v57 = vld [vmem:[%s18162_s11 + $0xa4] sm:$0x3] }
 0x334   :  { %v2954_v45 = vrot.slane %v10356_v44, 6  ;;  %v2726_v19 = vrot.slane %v2725_v18, 4  ;;  %2743 = vst [vmem:[#allocation7 + $0x26c] sm:$0xff] %v2693_v23  ;;  %v2804_v61 = vsel %vm15645_vm5, %v2787_v60, %v2803_v4  ;;  %v18213_v32 = vrot.slane %v15652_v40, 5  ;;  %v3568_v23 = vld [vmem:[#allocation7 + $0x498] sm:$0xf] }
 0x335   :  { %v2882_v56 = vrot.slane %v2880_v54, 6  ;;  %v2838_v48 = vsel %vm15629_vm4, %v16638_v2, %v2837_v55  ;;  %v2875_v10 = vrot.slane %v2837_v55, 4  ;;  %v2953_v6 = vrot.slane %v2943_v34, 4  ;;  %2805 = vst [vmem:[#allocation7 + $0x2e4] sm:$0xff] %v2804_v61 }
 0x336   :  { %v2747_v29 = vsel %vm15645_vm5, %v2726_v19, %v2746_v25  ;;  %v2944_v30 = vsel %vm15607_vm10, %v10359_v52, %v2943_v34  ;;  %v3439_v9 = vrot.slane %v18213_v32, 4  ;;  %v1308_v15 = vadd.f32 %v16106_v1, %v16663_v53  ;;  %2911 = vst [vmem:[#allocation7 + $0x294] sm:$0xff] %v2838_v48  ;;  %v10362_v53 = vld [vmem:[%s18162_s11 + $0x58] sm:$0xff] }
 0x337   :  { %v2883_v37 = vor.u32 %v2882_v56, %v2879_v13  ;;  %2748 = vst [vmem:[#allocation7 + $0x2d0] sm:$0xff] %v2747_v29  ;;  %v2955_v2 = vsel %vm15607_vm10, %v2953_v6, %v2954_v45  ;;  %v1310_v14 = vadd.f32 %v16106_v1, %v1309_v12  ;;  %v18214_v16 = vrot.slane %v15718_v63, 6  ;;  %v3457_v1 = vld [vmem:[#allocation7 + $0x484] sm:$0xf]  ;;  %v3625_v63 = vld [vmem:[#allocation7 + $0x4ac] sm:$0xf] }
 0x338   :  { %v2972_v0 = vsel %vm15645_vm5, %v2955_v2, %v2971_v35  ;;  %2968 = vst [vmem:[#allocation7 + $0x2a8] sm:$0xff] %v2944_v30  ;;  %v3440_v21 = vrot.slane %v10427_v20, 5  ;;  %v3545_v51 = vshrl.u32 %v10439_v27, 16  ;;  %v3548_v62 = vshll.u32 %v10439_v27, 16  ;;  %v10287_v56 = vld [vmem:[%s18162_s11 + $0x60] sm:$0xf] }
 0x339   :  { %v2884_v40 = vsel %vm15629_vm4, %v2875_v10, %v2883_v37  ;;  %v3607_v43 = vrot.slane %v18214_v16, 4  ;;  %v3608_v59 = vrot.slane %v10448_v57, 6  ;;  %2973 = vst [vmem:[#allocation7 + $0x30c] sm:$0xff] %v2972_v0  ;;  %v1341_v22 = vmax.f32 %v1308_v15, 0.0  ;;  %v10386_v12 = vld [vmem:[%s18162_s11 + $0x58] sm:$0xee] }
 0x33a   :  { %v2915_v5 = vsel %vm15645_vm5, %v2884_v40, %v2914_v39  ;;  %v3441_v49 = vsel %vm15529_vm6, %v3439_v9, %v3440_v21  ;;  %v1342_v26 = vmax.f32 %v1310_v14, 0.0  ;;  %v3543_v44 = vrot.slane %v15742_v31, 4  ;;  %2986 = vst [vmem:[#allocation7 + $0x320] sm:$0xff] %v10362_v53  ;;  %v1312_v54 = vpop.f32.mrf.mxu0  ;;  %v16805_v20 = vld [vmem:[%s18154_s2] ss:$0 sm:$0xff] }
 0x33b   :  { %2916 = vst [vmem:[#allocation7 + $0x2f8] sm:$0xff] %v2915_v5  ;;  %v3458_v11 = vsel %vm15494_vm13, %v3441_v49, %v3457_v1  ;;  %v3547_v36 = vrot.slane %v3545_v51, 5  ;;  %v3550_v24 = vrot.slane %v3548_v62, 6  ;;  %v3609_v3 = vsel %vm15607_vm10, %v3607_v43, %v3608_v59  ;;  %v10374_v21 = vld [vmem:[%s18162_s11 + $0x58] sm:$0xee]  ;;  %v2989_v62 = vld [vmem:[#allocation7 + $0x384] sm:$0xff] }
 0x33c   :  { %3459 = vst [vmem:[#allocation7 + $0x484] sm:$0xf] %v3458_v11  ;;  %v13776_v4 = vpack.c.bf16 %v1342_v26, %v1341_v22  ;;  %v3626_v18 = vsel %vm15494_vm13, %v3609_v3, %v3625_v63  ;;  %v3005_v35 = vshrl.u32 %v10362_v53, 16  ;;  %v3008_v29 = vshll.u32 %v10362_v53, 16  ;;  %v10395_v1 = vld [vmem:[%s18162_s11 + $0x58] sm:$0xcc] }
 0x33d   :  { %v3551_v46 = vor.u32 %v3550_v24, %v3547_v36  ;;  %3627 = vst [vmem:[#allocation7 + $0x4ac] sm:$0xf] %v3626_v18  ;;  %v1597_v39 = vrot.slane %v16621_v8, 4  ;;  %v1313_v32 = vadd.f32 %v16805_v20, %v1312_v54  ;;  %v3146_v9 = vshrl.u32 %v10386_v12, 16 }
 0x33e   :  { %13814 = vst [vmem:[#allocation6 + $0x38] sm:$0xff] %v13776_v4   ;;  %v3149_v2 = vshll.u32 %v10386_v12, 16  ;;  %v3007_v14 = vrot.slane %v3005_v35, 4  ;;  %v3010_v40 = vrot.slane %v3008_v29, 5  ;;  %v10383_v49 = vrot.slane %v10374_v21, 9  ;;  %v3070_v35 = vld [vmem:[#allocation7 + $0x398] sm:$0xff] }
 0x33f   :  { %v3552_v31 = vsel %vm15629_vm4, %v3543_v44, %v3551_v46  ;;  %v1343_v0 = vmax.f32 %v1313_v32, 0.0  ;;  %v3148_v43 = vrot.slane %v3146_v9, 5  ;;  %v10404_v63 = vrot.slane %v10395_v1, 10  ;;  %v3295_v32 = vld [vmem:[#allocation7 + $0x3d4] sm:$0xff] }
 0x340   :  { %v3569_v13 = vsel %vm15494_vm13, %v3552_v31, %v3568_v23  ;;  %v3151_v5 = vrot.slane %v3149_v2, 6  ;;  %v3011_v41 = vor.u32 %v3010_v40, %v3007_v14 }
 0x341   :  { %3570 = vst [vmem:[#allocation7 + $0x498] sm:$0xf] %v3569_v13 }
 0x342   :  { %v1314_v27 = vpop.f32.mrf.mxu0  ;;  %v3152_v59 = vor.u32 %v3151_v5, %v3148_v43  ;;  %v3012_v26 = vrot.slane %v3011_v41, 4  ;;  %v3238_v41 = vld [vmem:[#allocation7 + $0x3c0] sm:$0xff] }
 0x343   :  { %v1315_v8 = vadd.f32 %v16805_v20, %v1314_v27 }
 0x344   :  { %v3153_v18 = vrot.slane %v3152_v59, 4 }
 0x345   :  { %v1576_v60 = vld [vmem:[#allocation6 + $0x38] sm:$0xf]  ;;  %v16783_v34 = vld [vmem:[#allocation6 + $0x3c] sm:$0xf]  ;;  %v1344_v16 = vmax.f32 %v1315_v8, 0.0 }
 0x346   :  { %v1616_v55 = vld [vmem:[#allocation6 + $0x38] sm:$0x8]  ;;  %v1599_v45 = vshrl.u32 %v1576_v60, 16  ;;  %v1602_v52 = vshll.u32 %v1576_v60, 16  ;;  %v1625_v61 = vrot.slane %v16783_v34, 7 }
 0x347   :  { %v10286_v19 = vrot.slane %v1616_v55, 11  ;;  %v13781_v53 = vpack.c.bf16 %v1344_v16, %v1343_v0 }
 0x348   :  { %v1601_v48 = vrot.slane %v1599_v45, 6  ;;  %v1604_v10 = vrot.slane %v1602_v52, 7  ;;  %v3127_v52 = vld [vmem:[#allocation7 + $0x3ac] sm:$0xff]  ;;  %v1627_v5 = vrot.slane %v1625_v61, 4 }
 0x349   :  { %v1626_v6 = vsel %vm16779_vm12, %v10286_v19, %v1625_v61  ;;  %13815 = vst [vmem:[#allocation6 + $0x40] sm:$0xff] %v13781_v53  }
 0x34a   :  { %v1635_v37 = vsel %vm15547_vm1, %v1626_v6, %v10287_v56  ;;  %v1605_v30 = vor.u32 %v1604_v10, %v1601_v48 }
 0x34b   :  { %10288 = vst [vmem:[%s18162_s11 + $0x60] sm:$0xf] %v1635_v37 }
 0x34c   :  { %v1606_v57 = vsel %vm16604_vm3, %v1597_v39, %v1605_v30  ;;  %v1607_v15 = vrot.slane %v1605_v30, 4 }
 0x34d   :  { %10284 = vst [vmem:[%s18162_s11 + $0x78] sm:$0xf] %v1606_v57 }
 0x34e   :  { %10285 = vst [vmem:[%s18162_s11 + $0x94] sm:$0x1] %v1607_v15 }
 0x350   :  { %v1618_v15 = vld [vmem:[#allocation6 + $0x40] sm:$0xf]  ;;  %v1639_v16 = vld [vmem:[#allocation6 + $0x44] sm:$0xf] }
 0x351   :  { %v1628_v1 = vrot.slane %v1618_v15, 7 }
 0x352   :  { %v16826_v51 = vld [vmem:[%s18162_s11 + $0x5c] sm:$0xff] }
 0x353   :  { %2663 = vst [vmem:[#allocation7 + $0x260] sm:$0xff] %v16826_v51  ;;  %v2695_v60 = vshrl.u32 %v16826_v51, 16  ;;  %v2698_v56 = vshll.u32 %v16826_v51, 16  ;;  %v1629_v61 = vsel %vm16779_vm12, %v1627_v5, %v1628_v1 }
 0x354   :  { %3310 = vst [vmem:[#allocation7 + $0x3e8] sm:$0xff] %v16826_v51  ;;  %v10365_v22 = vld [vmem:[%s18162_s11 + $0x74] sm:$0xff] }
 0x355   :  { %v2990_v44 = vsel %vm15645_vm5, %v10365_v22, %v2989_v62  ;;  %v3014_v11 = vshll.u32 %v10365_v22, 16  ;;  %v3046_v36 = vshrl.u32 %v10365_v22, 16  ;;  %v10380_v24 = vld [vmem:[%s18162_s11 + $0x90] sm:$0x11]  ;;  %v3099_v3 = vrot.slane %v10365_v22, 5 }
 0x356   :  { %2991 = vst [vmem:[#allocation7 + $0x384] sm:$0xff] %v2990_v44  ;;  %v3110_v4 = vrot.slane %v10380_v24, 5  ;;  %v10392_v46 = vld [vmem:[%s18162_s11 + $0x90] sm:$0x11]  ;;  %v3267_v23 = vrot.slane %v10365_v22, 6  ;;  %v2697_v51 = vrot.slane %v2695_v60, 4 }
 0x357   :  { %v3016_v31 = vrot.slane %v3014_v11, 5  ;;  %v3048_v13 = vrot.slane %v3046_v36, 4  ;;  %v3157_v54 = vrot.slane %v3046_v36, 5  ;;  %v3100_v55 = vsel %vm15529_vm6, %v10383_v49, %v3099_v3  ;;  %v10401_v6 = vld [vmem:[%s18162_s11 + $0x90] sm:$0x33] }
 0x358   :  { %v3109_v45 = vrot.slane %v3099_v3, 4  ;;  %v3160_v19 = vrot.slane %v3014_v11, 6  ;;  %3124 = vst [vmem:[#allocation7 + $0x348] sm:$0xff] %v3100_v55  ;;  %v3201_v10 = vshrl.u32 %v10392_v46, 16  ;;  %v3204_v39 = vshll.u32 %v10392_v46, 16  ;;  %v3313_v60 = vld [vmem:[#allocation7 + $0x44c] sm:$0xff] }
 0x359   :  { %v3017_v12 = vsel %vm15572_vm11, %v3012_v26, %v3016_v31  ;;  %v3049_v48 = vor.u32 %v3048_v13, %v3016_v31  ;;  %v3268_v30 = vsel %vm15607_vm10, %v10404_v63, %v3267_v23  ;;  %v3277_v57 = vrot.slane %v3267_v23, 4  ;;  %v10342_v62 = vld [vmem:[%s18162_s11 + $0x5c] sm:$0xee]  ;;  %10289 = vst [vmem:[%s18162_s11 + $0x7c] sm:$0xf] %v1629_v61  ;;  %v2668_v13 = vld [vmem:[#allocation7 + $0x2c4] sm:$0xff] }
 0x35a   :  { %3067 = vst [vmem:[#allocation7 + $0x334] sm:$0xff] %v3017_v12  ;;  %v3111_v29 = vsel %vm15529_vm6, %v3109_v45, %v3110_v4  ;;  %v3161_v37 = vor.u32 %v3160_v19, %v3157_v54  ;;  %v3203_v27 = vrot.slane %v3201_v10, 5  ;;  %v3206_v40 = vrot.slane %v3204_v39, 6  ;;  %v10291_v3 = vld [vmem:[%s18162_s11 + $0x64] sm:$0xf]  ;;  %v16895_v54 = vpop.f32.mrf.mxu0 }
 0x35b   :  { %v3050_v9 = vrot.slane %v3049_v48, 4  ;;  %v3128_v2 = vsel %vm15645_vm5, %v3111_v29, %v3127_v52  ;;  %3292 = vst [vmem:[#allocation7 + $0x370] sm:$0xff] %v3268_v30  ;;  %v3278_v0 = vrot.slane %v10401_v6, 6  ;;  %v1643_v49 = vshrl.u32 %v1639_v16, 16  ;;  %v10330_v46 = vld [vmem:[%s18162_s11 + $0x5c] sm:$0xee] }
 0x35c   :  { %3129 = vst [vmem:[#allocation7 + $0x3ac] sm:$0xff] %v3128_v2  ;;  %v3162_v8 = vsel %vm15629_vm4, %v3153_v18, %v3161_v37  ;;  %v3199_v14 = vrot.slane %v3161_v37, 4  ;;  %v3207_v53 = vor.u32 %v3206_v40, %v3203_v27  ;;  %v2700_v63 = vrot.slane %v2698_v56, 5  ;;  %v10351_v19 = vld [vmem:[%s18162_s11 + $0x5c] sm:$0xcc] }
 0x35d   :  { %v3071_v43 = vsel %vm15645_vm5, %v3050_v9, %v3070_v35  ;;  %3235 = vst [vmem:[#allocation7 + $0x35c] sm:$0xff] %v3162_v8  ;;  %v3279_v21 = vsel %vm15607_vm10, %v3277_v57, %v3278_v0  ;;  %v1630_v22 = vrot.slane %v1628_v1, 4  ;;  %v16878_v44 = vrot.slane %v1643_v49, 7  ;;  %v10431_v30 = vld [vmem:[%s18162_s11 + $0x5c] sm:$0xee]  ;;  %v2806_v8 = vld [vmem:[#allocation7 + $0x2ec] sm:$0xff] }
 0x35e   :  { %3072 = vst [vmem:[#allocation7 + $0x398] sm:$0xff] %v3071_v43  ;;  %v3296_v59 = vsel %vm15645_vm5, %v3279_v21, %v3295_v32  ;;  %v3208_v34 = vsel %vm15629_vm4, %v3199_v14, %v3207_v53  ;;  %v1646_v11 = vshll.u32 %v1639_v16, 16  ;;  %v2840_v36 = vshrl.u32 %v10342_v62, 16  ;;  %v10419_v0 = vld [vmem:[%s18162_s11 + $0x5c] sm:$0xee] }
 0x35f   :  { %3297 = vst [vmem:[#allocation7 + $0x3d4] sm:$0xff] %v3296_v59  ;;  %v3239_v26 = vsel %vm15645_vm5, %v3208_v34, %v3238_v41  ;;  %v2843_v24 = vshll.u32 %v10342_v62, 16  ;;  %v2701_v4 = vor.u32 %v2700_v63, %v2697_v51  ;;  %v10339_v45 = vrot.slane %v10330_v46, 9  ;;  %v2749_v1 = vld [vmem:[#allocation7 + $0x2d8] sm:$0xff] }
 0x360   :  { %3240 = vst [vmem:[#allocation7 + $0x3c0] sm:$0xff] %v3239_v26  ;;  %v1648_v25 = vor.u32 %v1646_v11, %v16878_v44  ;;  %v2842_v18 = vrot.slane %v2840_v36, 5  ;;  %v10321_v52 = vld [vmem:[%s18162_s11 + $0x78] sm:$0xff]  ;;  %v10360_v57 = vrot.slane %v10351_v19, 10  ;;  %v3470_v41 = vshrl.u32 %v10431_v30, 16 }
 0x361   :  { %10290 = vst [vmem:[%s18162_s11 + $0x98] sm:$0x1] %v1630_v22  ;;  %v2845_v31 = vrot.slane %v2843_v24, 6  ;;  %v2702_v55 = vrot.slane %v2701_v4, 4  ;;  %v2669_v56 = vsel %vm15645_vm5, %v10321_v52, %v2668_v13  ;;  %v2704_v12 = vshll.u32 %v10321_v52, 16 }
 0x362   :  { %v1667_v23 = vsel %vm15547_vm1, %v1648_v25, %v10291_v3  ;;  %v2727_v48 = vshrl.u32 %v10321_v52, 16  ;;  %v16905_v10 = vrot.slane %v10321_v52, 5  ;;  %2670 = vst [vmem:[#allocation7 + $0x2c4] sm:$0xff] %v2669_v56  ;;  %v16913_v37 = vrot.slane %v10321_v52, 6  ;;  %v1319_v26 = vpop.f32.mrf.mxu0  ;;  %v2917_v56 = vld [vmem:[#allocation7 + $0x300] sm:$0xff] }
 0x363   :  { %10292 = vst [vmem:[%s18162_s11 + $0x64] sm:$0xf] %v1667_v23  ;;  %v2846_v6 = vor.u32 %v2845_v31, %v2842_v18  ;;  %v3314_v39 = vsel %vm15645_vm5, %v10321_v52, %v3313_v60  ;;  %v2706_v32 = vrot.slane %v2704_v12, 5  ;;  %v2854_v40 = vrot.slane %v2704_v12, 6  ;;  %v3394_v52 = vld [vmem:[#allocation7 + $0x460] sm:$0xff] }
 0x364   :  { %v2729_v9 = vrot.slane %v2727_v48, 4  ;;  %v2780_v2 = vsel %vm15529_vm6, %v10339_v45, %v16905_v10  ;;  %v2788_v27 = vrot.slane %v16905_v10, 4  ;;  %3315 = vst [vmem:[#allocation7 + $0x44c] sm:$0xff] %v3314_v39  ;;  %v2851_v14 = vrot.slane %v2727_v48, 5  ;;  %v10440_v45 = vld [vmem:[%s18162_s11 + $0x5c] sm:$0xcc] }
 0x365   :  { %2801 = vst [vmem:[#allocation7 + $0x288] sm:$0xff] %v2780_v2  ;;  %v2707_v43 = vsel %vm15572_vm11, %v2702_v55, %v2706_v32  ;;  %v3473_v21 = vshll.u32 %v10431_v30, 16  ;;  %v2948_v62 = vsel %vm15607_vm10, %v10360_v57, %v16913_v37  ;;  %v2847_v59 = vrot.slane %v2846_v6, 4  ;;  %v2974_v55 = vld [vmem:[#allocation7 + $0x314] sm:$0xff] }
 0x366   :  { %v2730_v5 = vor.u32 %v2729_v9, %v2706_v32  ;;  %2744 = vst [vmem:[#allocation7 + $0x274] sm:$0xff] %v2707_v43  ;;  %v16941_v34 = vor.u32 %v2854_v40, %v2851_v14  ;;  %v10428_v61 = vrot.slane %v10419_v0, 9  ;;  %v3472_v4 = vrot.slane %v3470_v41, 5  ;;  %v3451_v57 = vld [vmem:[#allocation7 + $0x474] sm:$0xff] }
 0x367   :  { %2969 = vst [vmem:[#allocation7 + $0x2b0] sm:$0xff] %v2948_v62  ;;  %v3475_v46 = vrot.slane %v3473_v21, 6  ;;  %v2956_v13 = vrot.slane %v16913_v37, 4  ;;  %v1320_v14 = vadd.f32 %v16805_v20, %v1319_v26 }
 0x368   :  { %v10336_v35 = vld [vmem:[%s18162_s11 + $0x94] sm:$0x11]  ;;  %v2731_v49 = vrot.slane %v2730_v5, 4  ;;  %v2856_v36 = vsel %vm15629_vm4, %v2847_v59, %v16941_v34  ;;  %v3424_v23 = vsel %vm15529_vm6, %v10428_v61, %v16905_v10  ;;  %v2885_v18 = vrot.slane %v16941_v34, 4  ;;  %3391 = vst [vmem:[#allocation7 + $0x3fc] sm:$0xff] %v2707_v43 }
 0x369   :  { %v10348_v29 = vld [vmem:[%s18162_s11 + $0x94] sm:$0x11]  ;;  %v2789_v15 = vrot.slane %v10336_v35, 5  ;;  %2912 = vst [vmem:[#allocation7 + $0x29c] sm:$0xff] %v2856_v36  ;;  %v3476_v48 = vor.u32 %v3475_v46, %v3472_v4  ;;  %v1346_v59 = vmax.f32 %v1320_v14, 0.0 }
 0x36a   :  { %v10319_v16 = vld [vmem:[%s18162_s11 + $0x64] sm:$0xf]  ;;  %v2887_v53 = vshrl.u32 %v10348_v29, 16  ;;  %v10357_v22 = vld [vmem:[%s18162_s11 + $0x94] sm:$0x33]  ;;  %v2750_v11 = vsel %vm15645_vm5, %v2731_v49, %v2749_v1  ;;  %v2890_v3 = vshll.u32 %v10348_v29, 16  ;;  %v3395_v30 = vsel %vm15645_vm5, %v2731_v49, %v3394_v52 }
 0x36b   :  { %2664 = vst [vmem:[#allocation7 + $0x268] sm:$0xf] %v10319_v16  ;;  %v2790_v51 = vsel %vm15529_vm6, %v2788_v27, %v2789_v15  ;;  %v16954_v25 = vld [vmem:[%s18162_s11 + $0x60] sm:$0xff]  ;;  %v2957_v60 = vrot.slane %v10357_v22, 6  ;;  %v10425_v35 = vld [vmem:[%s18162_s11 + $0x94] sm:$0x11] }
 0x36c   :  { %v2807_v63 = vsel %vm15645_vm5, %v2790_v51, %v2806_v8  ;;  %v2889_v24 = vrot.slane %v2887_v53, 5  ;;  %2751 = vst [vmem:[#allocation7 + $0x2d8] sm:$0xff] %v2750_v11  ;;  %v2892_v31 = vrot.slane %v2890_v3, 6  ;;  %v10449_v29 = vrot.slane %v10440_v45, 10  ;;  %v10437_v32 = vld [vmem:[%s18162_s11 + $0x94] sm:$0x11]  ;;  %v1322_v53 = vpop.f32.mrf.mxu0 }
 0x36d   :  { %2808 = vst [vmem:[#allocation7 + $0x2ec] sm:$0xff] %v2807_v63  ;;  %v2958_v12 = vsel %vm15607_vm10, %v2956_v13, %v2957_v60  ;;  %v3434_v2 = vrot.slane %v10425_v35, 5  ;;  %v10446_v15 = vld [vmem:[%s18162_s11 + $0x94] sm:$0x33]  ;;  %v1318_v8 = vadd.f32 %v16805_v20, %v16895_v54  ;;  %v3525_v40 = vshrl.u32 %v10437_v32, 16  ;;  %v3619_v51 = vld [vmem:[#allocation7 + $0x49c] sm:$0xff] }
 0x36e   :  { %2987 = vst [vmem:[#allocation7 + $0x328] sm:$0xff] %v16954_v25  ;;  %v2893_v19 = vor.u32 %v2892_v31, %v2889_v24  ;;  %v2975_v6 = vsel %vm15645_vm5, %v2958_v12, %v2974_v55  ;;  %v3528_v0 = vshll.u32 %v10437_v32, 16  ;;  %v3477_v16 = vrot.slane %v3476_v48, 4  ;;  %v10325_v36 = vld [vmem:[%s18162_s11 + $0x64] sm:$0xf] }
 0x36f   :  { %3448 = vst [vmem:[#allocation7 + $0x410] sm:$0xff] %v3424_v23  ;;  %v3435_v43 = vsel %vm15529_vm6, %v2788_v27, %v3434_v2  ;;  %v3592_v5 = vsel %vm15607_vm10, %v10449_v29, %v16913_v37  ;;  %v3527_v54 = vrot.slane %v3525_v40, 5  ;;  %v3602_v1 = vrot.slane %v10446_v15, 6  ;;  %v3562_v37 = vld [vmem:[#allocation7 + $0x488] sm:$0xff]  ;;  %v10387_v31 = vld [vmem:[%s18162_s11 + $0x60] sm:$0xee] }
 0x370   :  { %v2894_v39 = vsel %vm15629_vm4, %v2885_v18, %v2893_v19  ;;  %2976 = vst [vmem:[#allocation7 + $0x314] sm:$0xff] %v2975_v6  ;;  %v3452_v41 = vsel %vm15645_vm5, %v3435_v43, %v3451_v57  ;;  %v3530_v21 = vrot.slane %v3528_v0, 6  ;;  %v1345_v62 = vmax.f32 %v1318_v8, 0.0  ;;  %v10295_v45 = vld [vmem:[%s18162_s11 + $0x68] sm:$0xf] }
 0x371   :  { %v2918_v9 = vsel %vm15645_vm5, %v2894_v39, %v2917_v56  ;;  %3396 = vst [vmem:[#allocation7 + $0x460] sm:$0xff] %v3395_v30  ;;  %v1323_v10 = vadd.f32 %v16805_v20, %v1322_v53  ;;  %v3486_v27 = vsel %vm15629_vm4, %v3477_v16, %v16941_v34  ;;  %v3603_v63 = vsel %vm15607_vm10, %v2956_v13, %v3602_v1  ;;  %v10343_v34 = vld [vmem:[%s18162_s11 + $0x64] sm:$0xe] }
 0x372   :  { %2919 = vst [vmem:[#allocation7 + $0x300] sm:$0xff] %v2918_v9  ;;  %v3531_v49 = vor.u32 %v3530_v21, %v3527_v54  ;;  %v13786_v61 = vpack.c.bf16 %v1346_v59, %v1345_v62  ;;  %v3620_v11 = vsel %vm15645_vm5, %v3603_v63, %v3619_v51  ;;  %v2709_v4 = vshrl.u32 %v10325_v36, 16  ;;  %v17026_v30 = vld [vmem:[%s18162_s11 + $0x64] sm:$0xe] }
 0x373   :  { %3616 = vst [vmem:[#allocation7 + $0x438] sm:$0xff] %v3592_v5  ;;  %v1347_v22 = vmax.f32 %v1323_v10, 0.0  ;;  %v2712_v46 = vshll.u32 %v10325_v36, 16  ;;  %v2858_v23 = vshrl.u32 %v10343_v34, 16  ;;  %v3019_v56 = vshrl.u32 %v16954_v25, 16 }
 0x374   :  { %3453 = vst [vmem:[#allocation7 + $0x474] sm:$0xff] %v3452_v41  ;;  %v3532_v26 = vsel %vm15629_vm4, %v2885_v18, %v3531_v49  ;;  %v2861_v18 = vshll.u32 %v10343_v34, 16  ;;  %v2711_v13 = vrot.slane %v2709_v4, 4  ;;  %v1324_v52 = vpop.f32.mrf.mxu0  ;;  %v3022_v12 = vshll.u32 %v16954_v25, 16  ;;  %v17039_v42 = vld [vmem:[%s18162_s11 + $0x64] sm:$0xc] }
 0x375   :  { %3559 = vst [vmem:[#allocation7 + $0x424] sm:$0xff] %v3486_v27  ;;  %v3563_v24 = vsel %vm15645_vm5, %v3532_v26, %v3562_v37  ;;  %v1369_v3 = vpack.c.bf16 %v1347_v22, %v1347_v22  ;;  %v2714_v60 = vrot.slane %v2712_v46, 5  ;;  %v2860_v55 = vrot.slane %v2858_v23, 5  ;;  %v17045_v41 = vld [vmem:[%s18162_s11 + $0x60] sm:$0xee] }
 0x376   :  { %3621 = vst [vmem:[#allocation7 + $0x49c] sm:$0xff] %v3620_v11  ;;  %v2863_v19 = vrot.slane %v2861_v18, 6  ;;  %v1325_v48 = vadd.f32 %v16805_v20, %v1324_v52  ;;  %v3164_v6 = vshrl.u32 %v10387_v31, 16  ;;  %v3167_v35 = vshll.u32 %v10387_v31, 16 }
 0x377   :  { %3564 = vst [vmem:[#allocation7 + $0x488] sm:$0xff] %v3563_v24  ;;  %v2715_v57 = vor.u32 %v2714_v60, %v2711_v13  ;;  %v3021_v8 = vrot.slane %v3019_v56, 4  ;;  %v3024_v0 = vrot.slane %v3022_v12, 5  ;;  %v1649_v53 = vrot.slane %v16878_v44, 4  ;;  %v2671_v13 = vld [vmem:[#allocation7 + $0x2cc] sm:$0xf] }
 0x378   :  { %13816 = vst [vmem:[#allocation6 + $0x48] sm:$0xff] %v13786_v61   ;;  %v1348_v20 = vmax.f32 %v1325_v48, 0.0  ;;  %v2864_v25 = vor.u32 %v2863_v19, %v2860_v55  ;;  %v3166_v16 = vrot.slane %v3164_v6, 5  ;;  %v3169_v43 = vrot.slane %v3167_v35, 6  ;;  %v17061_v61 = vld [vmem:[%s18162_s11 + $0x60] sm:$0xcc] }
 0x379   :  { %1391 = vst [vmem:[#allocation6 + $0x50] sm:$0xf] %v1369_v3  ;;  %v10340_v51 = vrot.slane %v17026_v30, 9  ;;  %v17048_v62 = vrot.slane %v2715_v57, 4  ;;  %v10361_v59 = vrot.slane %v17039_v42, 10  ;;  %v3025_v49 = vor.u32 %v3024_v0, %v3021_v8  ;;  %v2992_v19 = vld [vmem:[#allocation7 + $0x38c] sm:$0xff] }
 0x37a   :  { %v1370_v5 = vpack.c.bf16 %v1348_v20, %v1348_v20  ;;  %v17055_v27 = vrot.slane %v2864_v25, 4  ;;  %v10384_v37 = vrot.slane %v17045_v41, 9  ;;  %v3170_v63 = vor.u32 %v3169_v43, %v3166_v16 }
 0x37b   :  { %v10405_v34 = vrot.slane %v17061_v61, 10  ;;  %v17094_v46 = vrot.slane %v3025_v49, 4  ;;  %v3241_v61 = vld [vmem:[#allocation7 + $0x3c8] sm:$0xff] }
 0x37c   :  { %1392 = vst [vmem:[#allocation6 + $0x54] sm:$0x1] %v1370_v5  ;;  %v17096_v23 = vrot.slane %v3170_v63, 4 }
 0x37f   :  { %v1640_v29 = vld [vmem:[#allocation6 + $0x48] sm:$0xf]  ;;  %v1671_v39 = vld [vmem:[#allocation6 + $0x4c] sm:$0xf] }
 0x380   :  { %v1651_v32 = vshrl.u32 %v1640_v29, 16  ;;  %v1675_v9 = vsel %vm15547_vm1, %v1671_v39, %v10295_v45  ;;  %v1672_v2 = vld [vmem:[#allocation6 + $0x50] sm:$0xf]  ;;  %v1641_v15 = vld [vmem:[#allocation6 + $0x4c] sm:$0x1]  ;;  %v1654_v40 = vshll.u32 %v1640_v29, 16 }
 0x381   :  { %10296 = vst [vmem:[%s18162_s11 + $0x68] sm:$0xf] %v1675_v9  ;;  %v1660_v1 = vshll.u32 %v1641_v15, 16  ;;  %v2809_v15 = vld [vmem:[#allocation7 + $0x2f4] sm:$0xf] }
 0x382   :  { %v1653_v14 = vrot.slane %v1651_v32, 7  ;;  %10297 = vst [vmem:[%s18162_s11 + $0x84] sm:$0xf] %v1672_v2 }
 0x384   :  { %v1656_v54 = vor.u32 %v1654_v40, %v1653_v14  ;;  %v1658_v21 = vrot.slane %v1653_v14, 4 }
 0x386   :  { %v1657_v10 = vsel %vm15563_vm0, %v1649_v53, %v1656_v54  ;;  %v1662_v44 = vsel %vm15563_vm0, %v1658_v21, %v1660_v1  ;;  %v2752_v54 = vld [vmem:[#allocation7 + $0x2e0] sm:$0xf] }
 0x387   :  { %10293 = vst [vmem:[%s18162_s11 + $0x80] sm:$0xf] %v1657_v10 }
 0x388   :  { %10294 = vst [vmem:[%s18162_s11 + $0x9c] sm:$0x1] %v1662_v44  ;;  %v10364_v50 = vld [vmem:[%s18162_s11 + $0x68] sm:$0xf] }
 0x389   :  { %v10370_v22 = vld [vmem:[%s18162_s11 + $0x68] sm:$0xf]  ;;  %2988 = vst [vmem:[#allocation7 + $0x330] sm:$0xf] %v10364_v50 }
 0x38a   :  { %v3033_v26 = vshrl.u32 %v10370_v22, 16  ;;  %v3036_v11 = vshll.u32 %v10370_v22, 16  ;;  %v17078_v36 = vld [vmem:[%s18162_s11 + $0x68] sm:$0xe] }
 0x38b   :  { %v10388_v24 = vld [vmem:[%s18162_s11 + $0x68] sm:$0xe]  ;;  %v10385_v45 = vrot.slane %v17078_v36, 9 }
 0x38c   :  { %v17087_v3 = vld [vmem:[%s18162_s11 + $0x68] sm:$0xc]  ;;  %v3182_v18 = vshrl.u32 %v10388_v24, 16  ;;  %v3185_v31 = vshll.u32 %v10388_v24, 16  ;;  %v17099_v60 = vrot.slane %v3033_v26, 4  ;;  %v17101_v55 = vrot.slane %v3036_v11, 5 }
 0x38d   :  { %v17092_v4 = vld [vmem:[%s18162_s11 + $0x64] sm:$0xff]  ;;  %v10406_v52 = vrot.slane %v17087_v3, 10 }
 0x38e   :  { %3311 = vst [vmem:[#allocation7 + $0x3f0] sm:$0xff] %v17092_v4  ;;  %v17105_v56 = vrot.slane %v3182_v18, 5  ;;  %v17107_v12 = vrot.slane %v3185_v31, 6  ;;  %v3343_v48 = vshrl.u32 %v17092_v4, 16  ;;  %v3346_v6 = vshll.u32 %v17092_v4, 16  ;;  %v17128_v20 = vld [vmem:[%s18162_s11 + $0x7c] sm:$0xff] }
 0x38f   :  { %v10322_v35 = vld [vmem:[%s18162_s11 + $0x80] sm:$0xf]  ;;  %v10337_v2 = vld [vmem:[%s18162_s11 + $0x9c] sm:$0x1]  ;;  %v2993_v14 = vsel %vm15645_vm5, %v17128_v20, %v2992_v19  ;;  %v3028_v40 = vshll.u32 %v17128_v20, 16 }
 0x390   :  { %v10328_v29 = vld [vmem:[%s18162_s11 + $0x80] sm:$0xf]  ;;  %v2672_v30 = vsel %vm15494_vm13, %v10322_v35, %v2671_v13  ;;  %v2792_v25 = vrot.slane %v10337_v2, 5  ;;  %v10349_v53 = vld [vmem:[%s18162_s11 + $0x9c] sm:$0x1]  ;;  %2994 = vst [vmem:[#allocation7 + $0x38c] sm:$0xff] %v2993_v14 }
 0x391   :  { %v10334_v39 = vld [vmem:[%s18162_s11 + $0x80] sm:$0xf]  ;;  %v2718_v32 = vshll.u32 %v10328_v29, 16  ;;  %v2732_v9 = vshrl.u32 %v10328_v29, 16  ;;  %2673 = vst [vmem:[#allocation7 + $0x2cc] sm:$0xf] %v2672_v30 }
 0x392   :  { %v2783_v57 = vrot.slane %v10334_v39, 5  ;;  %v10346_v8 = vld [vmem:[%s18162_s11 + $0x80] sm:$0xf]  ;;  %v2897_v10 = vshrl.u32 %v10349_v53, 16  ;;  %v2900_v44 = vshll.u32 %v10349_v53, 16  ;;  %v3030_v26 = vrot.slane %v3028_v40, 5 }
 0x393   :  { %v2720_v0 = vrot.slane %v2718_v32, 5  ;;  %v2734_v16 = vrot.slane %v2732_v9, 4  ;;  %v2867_v21 = vshrl.u32 %v10346_v8, 16  ;;  %v2870_v1 = vshll.u32 %v10346_v8, 16  ;;  %v10355_v50 = vld [vmem:[%s18162_s11 + $0x80] sm:$0xf] }
 0x394   :  { %v2784_v43 = vsel %vm15529_vm6, %v10340_v51, %v2783_v57  ;;  %v2791_v5 = vrot.slane %v2783_v57, 4  ;;  %v10358_v22 = vld [vmem:[%s18162_s11 + $0x9c] sm:$0x3]  ;;  %v2902_v13 = vrot.slane %v2900_v44, 6  ;;  %v2951_v19 = vrot.slane %v10355_v50, 6 }
 0x395   :  { %2802 = vst [vmem:[#allocation7 + $0x290] sm:$0xf] %v2784_v43  ;;  %v2721_v49 = vsel %vm15572_vm11, %v17048_v62, %v2720_v0  ;;  %v2735_v63 = vor.u32 %v2734_v16, %v2720_v0  ;;  %v2869_v24 = vrot.slane %v2867_v21, 5  ;;  %v2872_v18 = vrot.slane %v2870_v1, 6  ;;  %v10381_v32 = vld [vmem:[%s18162_s11 + $0x98] sm:$0x11] }
 0x396   :  { %v2793_v51 = vsel %vm15529_vm6, %v2791_v5, %v2792_v25  ;;  %2745 = vst [vmem:[#allocation7 + $0x27c] sm:$0xf] %v2721_v49  ;;  %v2899_v62 = vrot.slane %v2897_v10, 5  ;;  %v2960_v35 = vrot.slane %v10358_v22, 6  ;;  %v3031_v39 = vsel %vm15572_vm11, %v17094_v46, %v3030_v26  ;;  %v2977_v46 = vld [vmem:[#allocation7 + $0x31c] sm:$0xf] }
 0x397   :  { %v2810_v11 = vsel %vm15494_vm13, %v2793_v51, %v2809_v15  ;;  %v2736_v31 = vrot.slane %v2735_v63, 4  ;;  %v2873_v29 = vor.u32 %v2872_v18, %v2869_v24  ;;  %v3051_v30 = vshrl.u32 %v17128_v20, 16  ;;  %v2920_v15 = vld [vmem:[#allocation7 + $0x308] sm:$0xf]  ;;  %3068 = vst [vmem:[#allocation7 + $0x33c] sm:$0xff] %v3031_v39  ;;  %v3073_v49 = vld [vmem:[#allocation7 + $0x3a0] sm:$0xff] }
 0x398   :  { %2811 = vst [vmem:[#allocation7 + $0x2f4] sm:$0xf] %v2810_v11  ;;  %v3103_v9 = vrot.slane %v17128_v20, 5  ;;  %v2903_v57 = vor.u32 %v2902_v13, %v2899_v62  ;;  %v2952_v25 = vsel %vm15607_vm10, %v10361_v59, %v2951_v19  ;;  %v2959_v8 = vrot.slane %v2951_v19, 4  ;;  %v10393_v42 = vld [vmem:[%s18162_s11 + $0x98] sm:$0x11] }
 0x399   :  { %v2753_v2 = vsel %vm15494_vm13, %v2736_v31, %v2752_v54  ;;  %v2874_v14 = vsel %vm15629_vm4, %v17055_v27, %v2873_v29  ;;  %v2895_v0 = vrot.slane %v2873_v29, 4  ;;  %v3053_v16 = vrot.slane %v3051_v30, 4  ;;  %v3130_v54 = vld [vmem:[#allocation7 + $0x3b4] sm:$0xff]  ;;  %2970 = vst [vmem:[#allocation7 + $0x2b8] sm:$0xf] %v2952_v25 }
 0x39a   :  { %2754 = vst [vmem:[#allocation7 + $0x2e0] sm:$0xf] %v2753_v2  ;;  %v3104_v43 = vsel %vm15529_vm6, %v10384_v37, %v3103_v9  ;;  %v2961_v59 = vsel %vm15607_vm10, %v2959_v8, %v2960_v35  ;;  %v3112_v5 = vrot.slane %v3103_v9, 4  ;;  %v3113_v53 = vrot.slane %v10381_v32, 5  ;;  %v10402_v10 = vld [vmem:[%s18162_s11 + $0x98] sm:$0x33] }
 0x39b   :  { %2913 = vst [vmem:[#allocation7 + $0x2a4] sm:$0xf] %v2874_v14  ;;  %v3175_v21 = vrot.slane %v3051_v30, 5  ;;  %v2904_v27 = vsel %vm15629_vm4, %v2895_v0, %v2903_v57  ;;  %v2978_v41 = vsel %vm15494_vm13, %v2961_v59, %v2977_v46  ;;  %v3054_v37 = vor.u32 %v3053_v16, %v3030_v26  ;;  %v2995_v50 = vld [vmem:[#allocation7 + $0x394] sm:$0xf]  ;;  %v3298_v30 = vld [vmem:[#allocation7 + $0x3dc] sm:$0xff] }
 0x39c   :  { %v3178_v1 = vrot.slane %v3028_v40, 6  ;;  %v2921_v44 = vsel %vm15494_vm13, %v2904_v27, %v2920_v15  ;;  %2979 = vst [vmem:[#allocation7 + $0x31c] sm:$0xf] %v2978_v41  ;;  %v3114_v63 = vsel %vm15529_vm6, %v3112_v5, %v3113_v53  ;;  %v3211_v51 = vshrl.u32 %v10393_v42, 16  ;;  %v10432_v18 = vld [vmem:[%s18162_s11 + $0x64] sm:$0xee] }
 0x39d   :  { %v3039_v22 = vor.u32 %v17101_v55, %v17099_v60  ;;  %2922 = vst [vmem:[#allocation7 + $0x308] sm:$0xf] %v2921_v44  ;;  %v3055_v26 = vrot.slane %v3054_v37, 4  ;;  %v3131_v40 = vsel %vm15645_vm5, %v3114_v63, %v3130_v54  ;;  %v3214_v24 = vshll.u32 %v10393_v42, 16  ;;  %v10367_v60 = vld [vmem:[%s18162_s11 + $0x84] sm:$0xf] }
 0x39e   :  { %v3179_v11 = vor.u32 %v3178_v1, %v3175_v21  ;;  %3125 = vst [vmem:[#allocation7 + $0x350] sm:$0xff] %v3104_v43  ;;  %v3188_v62 = vor.u32 %v17107_v12, %v17105_v56  ;;  %v3213_v31 = vrot.slane %v3211_v51, 5  ;;  %v3271_v13 = vrot.slane %v17128_v20, 6  ;;  %v10373_v56 = vld [vmem:[%s18162_s11 + $0x84] sm:$0xf]  ;;  %v3316_v59 = vld [vmem:[#allocation7 + $0x454] sm:$0xff] }
 0x39f   :  { %v3281_v19 = vrot.slane %v10402_v10, 6  ;;  %v3074_v55 = vsel %vm15645_vm5, %v3055_v26, %v3073_v49  ;;  %3132 = vst [vmem:[#allocation7 + $0x3b4] sm:$0xff] %v3131_v40  ;;  %v3216_v39 = vrot.slane %v3214_v24, 6  ;;  %v3345_v32 = vrot.slane %v3343_v48, 4  ;;  %v10379_v2 = vld [vmem:[%s18162_s11 + $0x84] sm:$0xf] }
 0x3a0   :  { %v3180_v35 = vsel %vm15629_vm4, %v17096_v23, %v3179_v11  ;;  %v3209_v29 = vrot.slane %v3179_v11, 4  ;;  %3075 = vst [vmem:[#allocation7 + $0x3a0] sm:$0xff] %v3074_v55  ;;  %v3272_v12 = vsel %vm15607_vm10, %v10405_v34, %v3271_v13  ;;  %v3280_v20 = vrot.slane %v3271_v13, 4  ;;  %v17222_v23 = vld [vmem:[%s18162_s11 + $0x64] sm:$0xee] }
 0x3a1   :  { %v3488_v9 = vshrl.u32 %v10432_v18, 16  ;;  %v3217_v57 = vor.u32 %v3216_v39, %v3213_v31  ;;  %3236 = vst [vmem:[#allocation7 + $0x364] sm:$0xff] %v3180_v35  ;;  %v3348_v34 = vrot.slane %v3346_v6, 5  ;;  %v3491_v15 = vshll.u32 %v10432_v18, 16  ;;  %v10391_v25 = vld [vmem:[%s18162_s11 + $0x84] sm:$0xf] }
 0x3a2   :  { %v2996_v48 = vsel %vm15494_vm13, %v10367_v60, %v2995_v50  ;;  %v3282_v8 = vsel %vm15607_vm10, %v3280_v20, %v3281_v19  ;;  %3293 = vst [vmem:[#allocation7 + $0x378] sm:$0xff] %v3272_v12  ;;  %v3040_v14 = vrot.slane %v3039_v22, 4  ;;  %v3042_v0 = vshll.u32 %v10373_v56, 16  ;;  %v10400_v4 = vld [vmem:[%s18162_s11 + $0x84] sm:$0xf] }
 0x3a3   :  { %v3490_v46 = vrot.slane %v3488_v9, 5  ;;  %v3218_v6 = vsel %vm15629_vm4, %v3209_v29, %v3217_v57  ;;  %v3299_v16 = vsel %vm15645_vm5, %v3282_v8, %v3298_v30  ;;  %v3493_v43 = vrot.slane %v3491_v15, 6  ;;  %2997 = vst [vmem:[#allocation7 + $0x394] sm:$0xf] %v2996_v48  ;;  %v1673_v5 = vld [vmem:[#allocation6 + $0x54] sm:$0x1] }
 0x3a4   :  { %v3056_v42 = vshrl.u32 %v10373_v56, 16  ;;  %v3242_v53 = vsel %vm15645_vm5, %v3218_v6, %v3241_v61  ;;  %3300 = vst [vmem:[#allocation7 + $0x3dc] sm:$0xff] %v3299_v16  ;;  %v10441_v54 = vld [vmem:[%s18162_s11 + $0x64] sm:$0xcc]  ;;  %v3044_v21 = vrot.slane %v3042_v0, 5  ;;  %v3107_v27 = vrot.slane %v10379_v2, 5 }
 0x3a5   :  { %v3191_v41 = vshrl.u32 %v10391_v25, 16  ;;  %3243 = vst [vmem:[#allocation7 + $0x3c8] sm:$0xff] %v3242_v53  ;;  %v10429_v37 = vrot.slane %v17222_v23, 9  ;;  %v3194_v10 = vshll.u32 %v10391_v25, 16  ;;  %v3275_v44 = vrot.slane %v10400_v4, 6  ;;  %v17252_v49 = vld [vmem:[%s18162_s11 + $0x80] sm:$0xff] }
 0x3a6   :  { %v3058_v1 = vrot.slane %v3056_v42, 4  ;;  %v3189_v63 = vrot.slane %v3188_v62, 4  ;;  %v3045_v51 = vsel %vm15572_vm11, %v3040_v14, %v3044_v21  ;;  %v3108_v50 = vsel %vm15529_vm6, %v10385_v45, %v3107_v27  ;;  %10298 = vst [vmem:[%s18162_s11 + $0xa0] sm:$0x1] %v1673_v5  ;;  %v3076_v62 = vld [vmem:[#allocation7 + $0x3a8] sm:$0xf] }
 0x3a7   :  { %v3193_v22 = vrot.slane %v3191_v41, 5  ;;  %v10450_v26 = vrot.slane %v10441_v54, 10  ;;  %3069 = vst [vmem:[#allocation7 + $0x344] sm:$0xf] %v3045_v51  ;;  %v3196_v11 = vrot.slane %v3194_v10, 6  ;;  %v3276_v24 = vsel %vm15607_vm10, %v10406_v52, %v3275_v44  ;;  %v3397_v23 = vld [vmem:[#allocation7 + $0x468] sm:$0xff] }
 0x3a8   :  { %v3059_v40 = vor.u32 %v3058_v1, %v3044_v21  ;;  %v3494_v18 = vor.u32 %v3493_v43, %v3490_v46  ;;  %3126 = vst [vmem:[#allocation7 + $0x358] sm:$0xf] %v3108_v50  ;;  %v3317_v36 = vsel %vm15645_vm5, %v17252_v49, %v3316_v59  ;;  %v3349_v45 = vor.u32 %v3348_v34, %v3345_v32  ;;  %v3133_v57 = vld [vmem:[#allocation7 + $0x3bc] sm:$0xf]  ;;  %v3301_v4 = vld [vmem:[#allocation7 + $0x3e4] sm:$0xf] }
 0x3a9   :  { %v3352_v31 = vshll.u32 %v17252_v49, 16  ;;  %v17271_v19 = vor.u32 %v3196_v11, %v3193_v22  ;;  %3294 = vst [vmem:[#allocation7 + $0x380] sm:$0xf] %v3276_v24  ;;  %v3375_v60 = vshrl.u32 %v17252_v49, 16  ;;  %v3427_v3 = vrot.slane %v17252_v49, 5  ;;  %v3622_v22 = vld [vmem:[#allocation7 + $0x4a4] sm:$0xff] }
 0x3aa   :  { %v3060_v13 = vrot.slane %v3059_v40, 4  ;;  %3318 = vst [vmem:[#allocation7 + $0x454] sm:$0xff] %v3317_v36  ;;  %v3350_v52 = vrot.slane %v3349_v45, 4  ;;  %v3595_v29 = vrot.slane %v17252_v49, 6  ;;  %v3115_v30 = vrot.slane %v3107_v27, 4 }
 0x3ab   :  { %v3354_v55 = vrot.slane %v3352_v31, 5  ;;  %v3502_v35 = vrot.slane %v3352_v31, 6  ;;  %v3198_v56 = vsel %vm15629_vm4, %v3189_v63, %v17271_v19  ;;  %v3377_v12 = vrot.slane %v3375_v60, 4  ;;  %v3454_v63 = vld [vmem:[#allocation7 + $0x47c] sm:$0xff]  ;;  %v3244_v11 = vld [vmem:[#allocation7 + $0x3d0] sm:$0xf] }
 0x3ac   :  { %v3077_v39 = vsel %vm15494_vm13, %v3060_v13, %v3076_v62  ;;  %v3495_v20 = vrot.slane %v3494_v18, 4  ;;  %v3428_v9 = vsel %vm15529_vm6, %v10429_v37, %v3427_v3  ;;  %v3499_v2 = vrot.slane %v3375_v60, 5  ;;  %3237 = vst [vmem:[#allocation7 + $0x36c] sm:$0xf] %v3198_v56 }
 0x3ad   :  { %3078 = vst [vmem:[#allocation7 + $0x3a8] sm:$0xf] %v3077_v39  ;;  %v3355_v32 = vsel %vm15572_vm11, %v3350_v52, %v3354_v55  ;;  %v3219_v61 = vrot.slane %v17271_v19, 4  ;;  %v3283_v34 = vrot.slane %v3275_v44, 4  ;;  %v3378_v15 = vor.u32 %v3377_v12, %v3354_v55  ;;  %v10382_v25 = vld [vmem:[%s18162_s11 + $0xa0] sm:$0x1] }
 0x3ae   :  { %v3596_v48 = vsel %vm15607_vm10, %v10450_v26, %v3595_v29  ;;  %3392 = vst [vmem:[#allocation7 + $0x404] sm:$0xff] %v3355_v32  ;;  %v3503_v8 = vor.u32 %v3502_v35, %v3499_v2  ;;  %v3116_v46 = vrot.slane %v10382_v25, 5  ;;  %v10394_v14 = vld [vmem:[%s18162_s11 + $0xa0] sm:$0x1]  ;;  %v3436_v59 = vrot.slane %v3427_v3, 4  ;;  %v3565_v55 = vld [vmem:[#allocation7 + $0x490] sm:$0xff] }
 0x3af   :  { %v10403_v0 = vld [vmem:[%s18162_s11 + $0xa0] sm:$0x3]  ;;  %v3379_v6 = vrot.slane %v3378_v15, 4  ;;  %3449 = vst [vmem:[#allocation7 + $0x418] sm:$0xff] %v3428_v9  ;;  %v3221_v16 = vshrl.u32 %v10394_v14, 16  ;;  %v3224_v43 = vshll.u32 %v10394_v14, 16 }
 0x3b0   :  { %v3284_v42 = vrot.slane %v10403_v0, 6  ;;  %v3504_v5 = vsel %vm15629_vm4, %v3495_v20, %v3503_v8  ;;  %3617 = vst [vmem:[#allocation7 + $0x440] sm:$0xff] %v3596_v48  ;;  %v3117_v53 = vsel %vm15529_vm6, %v3115_v30, %v3116_v46  ;;  %v10426_v54 = vld [vmem:[%s18162_s11 + $0x9c] sm:$0x11]  ;;  %v3604_v26 = vrot.slane %v3595_v29, 4 }
 0x3b1   :  { %v10438_v21 = vld [vmem:[%s18162_s11 + $0x9c] sm:$0x11]  ;;  %v3398_v27 = vsel %vm15645_vm5, %v3379_v6, %v3397_v23  ;;  %3560 = vst [vmem:[#allocation7 + $0x42c] sm:$0xff] %v3504_v5  ;;  %v3134_v41 = vsel %vm15494_vm13, %v3117_v53, %v3133_v57  ;;  %v3223_v37 = vrot.slane %v3221_v16, 5  ;;  %v3226_v1 = vrot.slane %v3224_v43, 6 }
 0x3b2   :  { %v10447_v10 = vld [vmem:[%s18162_s11 + $0x9c] sm:$0x33]  ;;  %3399 = vst [vmem:[#allocation7 + $0x468] sm:$0xff] %v3398_v27  ;;  %v3285_v44 = vsel %vm15607_vm10, %v3283_v34, %v3284_v42  ;;  %v3437_v49 = vrot.slane %v10426_v54, 5  ;;  %v3535_v51 = vshrl.u32 %v10438_v21, 16  ;;  %v3538_v50 = vshll.u32 %v10438_v21, 16 }
 0x3b3   :  { %3135 = vst [vmem:[#allocation7 + $0x3bc] sm:$0xf] %v3134_v41  ;;  %v3227_v40 = vor.u32 %v3226_v1, %v3223_v37  ;;  %v3302_v24 = vsel %vm15494_vm13, %v3285_v44, %v3301_v4  ;;  %v3605_v18 = vrot.slane %v10447_v10, 6  ;;  %v3533_v60 = vrot.slane %v3503_v8, 4 }
 0x3b4   :  { %3303 = vst [vmem:[#allocation7 + $0x3e4] sm:$0xf] %v3302_v24  ;;  %v3438_v62 = vsel %vm15529_vm6, %v3436_v59, %v3437_v49  ;;  %v3537_v36 = vrot.slane %v3535_v51, 5  ;;  %v3540_v45 = vrot.slane %v3538_v50, 6 }
 0x3b5   :  { %v3228_v31 = vsel %vm15629_vm4, %v3219_v61, %v3227_v40  ;;  %v3455_v13 = vsel %vm15645_vm5, %v3438_v62, %v3454_v63  ;;  %v3606_v19 = vsel %vm15607_vm10, %v3604_v26, %v3605_v18 }
 0x3b6   :  { %v3245_v3 = vsel %vm15494_vm13, %v3228_v31, %v3244_v11  ;;  %3456 = vst [vmem:[#allocation7 + $0x47c] sm:$0xff] %v3455_v13  ;;  %v3541_v52 = vor.u32 %v3540_v45, %v3537_v36  ;;  %v3623_v35 = vsel %vm15645_vm5, %v3606_v19, %v3622_v22 }
 0x3b7   :  { %3246 = vst [vmem:[#allocation7 + $0x3d0] sm:$0xf] %v3245_v3 }
 0x3b8   :  { %v3542_v29 = vsel %vm15629_vm4, %v3533_v60, %v3541_v52  ;;  %3624 = vst [vmem:[#allocation7 + $0x4a4] sm:$0xff] %v3623_v35 }
 0x3b9   :  { %v3566_v39 = vsel %vm15645_vm5, %v3542_v29, %v3565_v55 }
 0x3ba   :  { %3567 = vst [vmem:[#allocation7 + $0x490] sm:$0xff] %v3566_v39 }
 0x3bb   :  { %13827 = dma.done.wait [#allocation5], 25600 }
 0x3bc   :  { %13828 = vsyncadd [#allocation5], 4294941696  ;;  %v13247_v17 = vld [vmem:[#allocation2 + $0x378] sm:$0xff]  ;;  %v13263_v56 = vld [vmem:[#allocation2 + $0x188] sm:$0xff]  ;;  %vm7179_vm1 = vsmask.f32 6400 }
 0x3bd   :  { %v13255_v30 = vld [vmem:[#allocation2 + $0x2b8] sm:$0xff]  ;;  %6148 = vmatpush.bf16.msra.mxu1 %v13247_v17  ;;  %v13246_v12 = vld [vmem:[#allocation2 + $0x440] sm:$0xff]  ;;  %6226 = vmatpush.bf16.msra.mxu3 %v13263_v56  ;;  %v13262_v32 = vld [vmem:[#allocation2 + $0x8] sm:$0xff]  ;;  %vm18219_vm0 = vsmask.f32 2304  ;;  %vm18220_vm10 = vcmask 1042432  }
 0x3be   :  { %6187 = vmatpush.bf16.msra.mxu2 %v13255_v30  ;;  %v13254_v20 = vld [vmem:[#allocation2 + $0x58] sm:$0xff]  ;;  %v13245_v28 = vld [vmem:[#allocation2 + $0x328] sm:$0xff]  ;;  %v13253_v23 = vld [vmem:[#allocation2 + $0x500] sm:$0xff]  ;;  %vm18223_vm5 = vcmask 1046532  }
 0x3bf   :  { %v13261_v9 = vld [vmem:[#allocation2 + $0x100] sm:$0xff]  ;;  %v13244_v38 = vld [vmem:[#allocation2 + $0x450] sm:$0xff]  ;;  %v13252_v2 = vld [vmem:[#allocation2 + $0x548] sm:$0xff] }
 0x3c0   :  { %v13260_v57 = vld [vmem:[#allocation2 + $0x330] sm:$0xff]  ;;  %v13243_v61 = vld [vmem:[#allocation2 + $0x18] sm:$0xff]  ;;  %v13259_v15 = vld [vmem:[#allocation2 + $0x3c0] sm:$0xff] }
 0x3c1   :  { %6149 = vmatpush.bf16.msra.mxu1 %v13246_v12  ;;  %6227 = vmatpush.bf16.msra.mxu3 %v13262_v32  ;;  %v13251_v34 = vld [vmem:[#allocation2 + $0x318] sm:$0xff]  ;;  %v13250_v25 = vld [vmem:[#allocation2 + $0x490] sm:$0xff]  ;;  %v13258_v8 = vld [vmem:[#allocation2 + $0x540] sm:$0xff] }
 0x3c2   :  { %6188 = vmatpush.bf16.msra.mxu2 %v13254_v20  ;;  %v13242_v48 = vld [vmem:[#allocation2 + $0x4d8] sm:$0xff]  ;;  %v13241_v46 = vld [vmem:[#allocation2 + $0x3b0] sm:$0xff]  ;;  %v13248_v6 = vld [vmem:[#allocation2 + $0x108] sm:$0xff] }
 0x3c3   :  { %v13249_v14 = vld [vmem:[#allocation2 + $0x510] sm:$0xff]  ;;  %v13256_v16 = vld [vmem:[#allocation2 + $0x580] sm:$0xff]  ;;  %v10454_v43 = vld [vmem:[#allocation7] sm:$0xf] }
 0x3c4   :  { %v13257_v0 = vld [vmem:[#allocation2 + $0x590] sm:$0xff]  ;;  %v13102_v42 = vld [vmem:[#allocation7 + $0x60] sm:$0xf0]  ;;  %v10456_v5 = vld [vmem:[#allocation7 + $0x64] sm:$0xf0] }
 0x3c5   :  { %6150 = vmatpush.bf16.msra.mxu1 %v13245_v28  ;;  %6228 = vmatpush.bf16.msra.mxu3 %v13261_v9  ;;  %v13240_v4 = vld [vmem:[#allocation2 + $0x2b0] sm:$0xff]  ;;  %v13090_v59 = vld [vmem:[#allocation7 + $0x4] sm:$0xf]  ;;  %v13279_v53 = vld [vmem:[#allocation2 + $0x5e8] sm:$0xff]  ;;  %v10455_v41 = vor.u32 %v13102_v42, %v10454_v43 }
 0x3c6   :  { %6189 = vmatpush.bf16.msra.mxu2 %v13253_v23  ;;  %v10462_v54 = vld [vmem:[#allocation7 + $0x8] sm:$0xf]  ;;  %v13103_v21 = vld [vmem:[#allocation7 + $0x68] sm:$0xf0]  ;;  %v13271_v27 = vld [vmem:[#allocation2 + $0x4d0] sm:$0xff]  ;;  %v10459_v37 = vor.u32 %v13090_v59, %v10456_v5 }
 0x3c7   :  { %v10463_v1 = vor.u32 %v13103_v21, %v10462_v54  ;;  %v13278_v10 = vld [vmem:[#allocation2 + $0x4c8] sm:$0xff]  ;;  %v13269_v63 = vld [vmem:[#allocation2 + $0x5e0] sm:$0xff]  ;;  %v13276_v51 = vld [vmem:[#allocation2 + $0x598] sm:$0xff] }
 0x3c8   :  { %v13270_v44 = vld [vmem:[#allocation2 + $0x488] sm:$0xff]  ;;  %v10554_v22 = vld [vmem:[#allocation7 + $0xc8] sm:$0xf]  ;;  %v13127_v26 = vld [vmem:[#allocation7 + $0x128] sm:$0xf0] }
 0x3c9   :  { %6151 = vmatpush.bf16.msra.mxu1 %v13244_v38  ;;  %6229 = vmatpush.bf16.msra.mxu3 %v13260_v57  ;;  %v13277_v49 = vld [vmem:[#allocation2 + $0x5a8] sm:$0xff]  ;;  %v13115_v40 = vld [vmem:[#allocation7 + $0xcc] sm:$0xf]  ;;  %v10555_v62 = vor.u32 %v13127_v26, %v10554_v22  ;;  %v13275_v31 = vld [vmem:[#allocation2 + $0x570] sm:$0xff] }
 0x3ca   :  { %6190 = vmatpush.bf16.msra.mxu2 %v13252_v2  ;;  %v13268_v50 = vld [vmem:[#allocation2 + $0x3a8] sm:$0xff]  ;;  %v13267_v13 = vld [vmem:[#allocation2 + $0x520] sm:$0xff]  ;;  %v10656_v55 = vld [vmem:[#allocation7 + $0x1f4] sm:$0xf0] }
 0x3cb   :  { %v10556_v11 = vld [vmem:[#allocation7 + $0x12c] sm:$0xf0]  ;;  %v13128_v18 = vld [vmem:[#allocation7 + $0x130] sm:$0xf0]  ;;  %v13274_v19 = vld [vmem:[#allocation2 + $0x2a0] sm:$0xff] }
 0x3cc   :  { %v10562_v24 = vld [vmem:[#allocation7 + $0xd0] sm:$0xf]  ;;  %v10559_v36 = vor.u32 %v13115_v40, %v10556_v11  ;;  %v13152_v3 = vld [vmem:[#allocation7 + $0x1f0] sm:$0xf0]  ;;  %v10662_v35 = vld [vmem:[#allocation7 + $0x198] sm:$0xf] }
 0x3cd   :  { %6152 = vmatpush.bf16.msra.mxu1 %v13243_v61  ;;  %6230 = vmatpush.bf16.msra.mxu3 %v13259_v15  ;;  %v10563_v45 = vor.u32 %v13128_v18, %v10562_v24  ;;  %v10654_v60 = vld [vmem:[#allocation7 + $0x190] sm:$0xf]  ;;  %v13140_v52 = vld [vmem:[#allocation7 + $0x194] sm:$0xf]  ;;  %v13153_v29 = vld [vmem:[#allocation7 + $0x1f8] sm:$0xf0] }
 0x3ce   :  { %6191 = vmatpush.bf16.msra.mxu2 %v13251_v34  ;;  %v10655_v39 = vor.u32 %v13152_v3, %v10654_v60  ;;  %v10659_v17 = vor.u32 %v13140_v52, %v10656_v55  ;;  %v10663_v30 = vor.u32 %v13153_v29, %v10662_v35  ;;  %v13266_v56 = vld [vmem:[#allocation2 + $0x388] sm:$0xff]  ;;  %v13287_v12 = vld [vmem:[#allocation2 + $0x3e0] sm:$0xff]  ;;  %v13273_v20 = vld [vmem:[#allocation2 + $0xb0] sm:$0xff] }
 0x3cf   :  { %v13295_v32 = vld [vmem:[#allocation2 + $0x618] sm:$0xff]  ;;  %v13265_v28 = vld [vmem:[#allocation2 + $0xc8] sm:$0xff]  ;;  %v13294_v9 = vld [vmem:[#allocation2 + $0x5a0] sm:$0xff] }
 0x3d0   :  { %v13286_v23 = vld [vmem:[#allocation2 + $0x2a8] sm:$0xff]  ;;  %6382 = vmatpush.bf16.msrb.mxu0 %v13295_v32  ;;  %v13285_v38 = vld [vmem:[#allocation2 + $0x480] sm:$0xff]  ;;  %v10754_v2 = vld [vmem:[#allocation7 + $0x258] sm:$0xf] }
 0x3d1   :  { %6153 = vmatpush.bf16.msra.mxu1 %v13242_v48  ;;  %6231 = vmatpush.bf16.msra.mxu3 %v13258_v8  ;;  %v13177_v57 = vld [vmem:[#allocation7 + $0x2b8] sm:$0xf0]  ;;  %v10756_v34 = vld [vmem:[#allocation7 + $0x2bc] sm:$0xf0]  ;;  %v13178_v48 = vld [vmem:[#allocation7 + $0x2c0] sm:$0xf0] }
 0x3d2   :  { %6192 = vmatpush.bf16.msra.mxu2 %v13250_v25  ;;  %v13165_v61 = vld [vmem:[#allocation7 + $0x25c] sm:$0xf]  ;;  %v10762_v15 = vld [vmem:[#allocation7 + $0x260] sm:$0xf]  ;;  %v10755_v8 = vor.u32 %v13177_v57, %v10754_v2  ;;  %v13282_v43 = vld [vmem:[#allocation2 + $0x3c8] sm:$0xff] }
 0x3d3   :  { %v13284_v25 = vld [vmem:[#allocation2 + $0x338] sm:$0xff]  ;;  %v13292_v42 = vld [vmem:[#allocation2 + $0x608] sm:$0xff]  ;;  %v13281_v59 = vld [vmem:[#allocation2 + $0x2f0] sm:$0xff] }
 0x3d4   :  { %6383 = vmatpush.bf16.msrb.mxu0 %v13294_v9  ;;  %v13291_v5 = vld [vmem:[#allocation2 + $0xf8] sm:$0xff]  ;;  %v13303_v22 = vld [vmem:[#allocation2 + $0x70] sm:$0xff]  ;;  %v13310_v26 = vld [vmem:[#allocation2 + $0x2e8] sm:$0xff] }
 0x3d5   :  { %6154 = vmatpush.bf16.msra.mxu1 %v13241_v46  ;;  %6232 = vmatpush.bf16.msra.mxu3 %v13257_v0  ;;  %v10759_v46 = vor.u32 %v13165_v61, %v10756_v34  ;;  %v13283_v0 = vld [vmem:[#allocation2 + $0x5c0] sm:$0xff]  ;;  %v13202_v54 = vld [vmem:[#allocation7 + $0x380] sm:$0xf0]  ;;  %v10478_v11 = vld [vmem:[#allocation7 + $0x18] sm:$0xf] }
 0x3d6   :  { %6193 = vmatpush.bf16.msra.mxu2 %v13249_v14  ;;  %v10763_v14 = vor.u32 %v13178_v48, %v10762_v15  ;;  %v13190_v21 = vld [vmem:[#allocation7 + $0x324] sm:$0xf]  ;;  %v13105_v24 = vld [vmem:[#allocation7 + $0x78] sm:$0xf0]  ;;  %v13309_v35 = vld [vmem:[#allocation2 + $0x148] sm:$0xff] }
 0x3d7   :  { %v13288_v40 = vld [vmem:[#allocation2 + $0x3d8] sm:$0xff]  ;;  %v10479_v18 = vor.u32 %v13105_v24, %v10478_v11  ;;  %v13301_v29 = vld [vmem:[#allocation2 + $0x380] sm:$0xff]  ;;  %v13104_v32 = vld [vmem:[#allocation7 + $0x70] sm:$0xf0] }
 0x3d8   :  { %v13302_v55 = vld [vmem:[#allocation2 + $0x5f8] sm:$0xff]  ;;  %v13308_v57 = vld [vmem:[#allocation2 + $0x588] sm:$0xff]  ;;  %v10678_v34 = vld [vmem:[#allocation7 + $0x1a8] sm:$0xf] }
 0x3d9   :  { %6155 = vmatpush.bf16.msra.mxu1 %v13240_v4  ;;  %6233 = vmatpush.bf16.msra.mxu3 %v13256_v16  ;;  %v13293_v4 = vld [vmem:[#allocation2 + $0x4f0] sm:$0xff]  ;;  %v13264_v16 = vld [vmem:[#allocation2 + $0x248] sm:$0xff]  ;;  %v13300_v61 = vld [vmem:[#allocation2 + $0x2f8] sm:$0xff] }
 0x3da   :  { %6194 = vmatpush.bf16.msra.mxu2 %v13248_v6  ;;  %v13272_v6 = vld [vmem:[#allocation2 + $0x98] sm:$0xff]  ;;  %6384 = vmatpush.bf16.msrb.mxu0 %v13293_v4  ;;  %v13155_v15 = vld [vmem:[#allocation7 + $0x208] sm:$0xf0]  ;;  %vm17694_vm4 = vmand %vm18220_vm10, %vm18219_vm0 }
 0x3db   :  { %v10679_v48 = vor.u32 %v13155_v15, %v10678_v34  ;;  %v10572_v4 = vld [vmem:[#allocation7 + $0x13c] sm:$0xf0]  ;;  %v13319_v11 = vld [vmem:[#allocation2 + $0x340] sm:$0xff]  ;;  %vm7180_vm15 = vmand %vm18223_vm5, %vm7179_vm1 }
 0x3dc   :  { %6156 = vmatmul.bf16.vlgmr.msra.gmra.mxu1 %v10455_v41  ;;  %6234 = vmatmul.bf16.vlgmr.msra.gmra.mxu3 %v10463_v1  ;;  %v10862_v41 = vld [vmem:[#allocation7 + $0x328] sm:$0xf]  ;;  %v13280_v1 = vld [vmem:[#allocation2 + $0x1f8] sm:$0xff]  ;;  %vm17704_vm8 = vmor %vm7180_vm15, %vm17694_vm4 }
 0x3dd   :  { %6265 = vmatpush.bf16.msrb.mxu1 %v13271_v27  ;;  %6195 = vmatmul.bf16.vlgmr.msra.gmra.mxu2 %v10459_v37  ;;  %v10856_v27 = vld [vmem:[#allocation7 + $0x384] sm:$0xf0]  ;;  %v13203_v37 = vld [vmem:[#allocation7 + $0x388] sm:$0xf0]  ;;  %v7281_v7 = vld [vmem:[#allocation8 + $0x74] sm:$0x7] }
 0x3de   :  { %6304 = vmatpush.bf16.msrb.mxu2 %v13279_v53  ;;  %6343 = vmatpush.bf16.msrb.mxu3 %v13287_v12  ;;  %v10854_v53 = vld [vmem:[#allocation7 + $0x320] sm:$0xf]  ;;  %v10464_v12 = vld [vmem:[#allocation7 + $0x6c] sm:$0xf0]  ;;  %v13326_v34 = vld [vmem:[#allocation2 + $0x20] sm:$0xff] }
 0x3df   :  { %6385 = vmatpush.bf16.msrb.mxu0 %v13292_v42  ;;  %v13307_v42 = vld [vmem:[#allocation2 + $0x270] sm:$0xff] }
 0x3e1   :  { %6266 = vmatpush.bf16.msrb.mxu1 %v13270_v44  ;;  %v10855_v44 = vor.u32 %v13202_v54, %v10854_v53  ;;  %v13180_v53 = vld [vmem:[#allocation7 + $0x2d0] sm:$0xf0] }
 0x3e2   :  { %6305 = vmatpush.bf16.msrb.mxu2 %v13278_v10  ;;  %6344 = vmatpush.bf16.msrb.mxu3 %v13286_v23  ;;  %v13290_v10 = vld [vmem:[#allocation2 + $0x28] sm:$0xff]  ;;  %v10472_v23 = vld [vmem:[#allocation7 + $0x74] sm:$0xf0] }
 0x3e3   :  { %6386 = vmatpush.bf16.msrb.mxu0 %v13291_v5  ;;  %v10778_v5 = vld [vmem:[#allocation7 + $0x270] sm:$0xf] }
 0x3e4   :  { %v10779_v54 = vor.u32 %v13180_v53, %v10778_v5  ;;  %v10978_v5 = vld [vmem:[#allocation7 + $0x400] sm:$0xf]  ;;  %v13230_v53 = vld [vmem:[#allocation7 + $0x460] sm:$0xf0] }
 0x3e5   :  { %6267 = vmatpush.bf16.msrb.mxu1 %v13269_v63  ;;  %v10863_v63 = vor.u32 %v13203_v37, %v10862_v41  ;;  %v10670_v41 = vld [vmem:[#allocation7 + $0x1a0] sm:$0xf]  ;;  %v13154_v37 = vld [vmem:[#allocation7 + $0x200] sm:$0xf0] }
 0x3e6   :  { %6306 = vmatpush.bf16.msrb.mxu2 %v13277_v49  ;;  %6345 = vmatpush.bf16.msrb.mxu3 %v13285_v38  ;;  %v10859_v49 = vor.u32 %v13190_v21, %v10856_v27  ;;  %v13141_v21 = vld [vmem:[#allocation7 + $0x19c] sm:$0xf]  ;;  %v10664_v27 = vld [vmem:[#allocation7 + $0x1fc] sm:$0xf0] }
 0x3e7   :  { %6387 = vmatpush.bf16.msrb.mxu0 %v13290_v10  ;;  %v10672_v10 = vld [vmem:[#allocation7 + $0x204] sm:$0xf0] }
 0x3e9   :  { %6268 = vmatpush.bf16.msrb.mxu1 %v13268_v50  ;;  %v13289_v50 = vld [vmem:[#allocation2 + $0x4b0] sm:$0xff] }
 0x3ea   :  { %6307 = vmatpush.bf16.msrb.mxu2 %v13276_v51  ;;  %6346 = vmatpush.bf16.msrb.mxu3 %v13284_v25  ;;  %v13311_v51 = vld [vmem:[#allocation2 + $0x638] sm:$0xff]  ;;  %v13116_v25 = vld [vmem:[#allocation7 + $0xd4] sm:$0xf] }
 0x3eb   :  { %6388 = vmatpush.bf16.msrb.mxu0 %v13289_v50 }
 0x3ec   :  { %6161 = vmatmul.bf16.gmra.mxu1 %v10555_v62  ;;  %6239 = vmatmul.bf16.gmra.mxu3 %v10563_v45  ;;  %v10954_v62 = vld [vmem:[#allocation7 + $0x3e8] sm:$0xf]  ;;  %v13215_v45 = vld [vmem:[#allocation7 + $0x3ec] sm:$0xf] }
 0x3ed   :  { %6200 = vmatmul.bf16.gmra.mxu2 %v10559_v36  ;;  %6269 = vmatpush.bf16.msrb.mxu1 %v13267_v13  ;;  %v13227_v36 = vld [vmem:[#allocation7 + $0x448] sm:$0xf0]  ;;  %v10962_v13 = vld [vmem:[#allocation7 + $0x3f0] sm:$0xf] }
 0x3ee   :  { %6308 = vmatpush.bf16.msrb.mxu2 %v13275_v31  ;;  %6347 = vmatpush.bf16.msrb.mxu3 %v13283_v0  ;;  %v10956_v31 = vld [vmem:[#allocation7 + $0x44c] sm:$0xf0]  ;;  %v10955_v60 = vor.u32 %v13227_v36, %v10954_v62  ;;  %v13117_v0 = vld [vmem:[#allocation7 + $0xdc] sm:$0xf] }
 0x3ef   :  { %6389 = vmatpush.bf16.msrb.mxu0 %v13288_v40  ;;  %v10959_v3 = vor.u32 %v13215_v45, %v10956_v31  ;;  %v13298_v40 = vld [vmem:[#allocation2 + $0x118] sm:$0xff]  ;;  %v13318_v45 = vld [vmem:[#allocation2 + $0x320] sm:$0xff] }
 0x3f1   :  { %6270 = vmatpush.bf16.msrb.mxu1 %v13266_v56  ;;  %v13091_v56 = vld [vmem:[#allocation7 + $0xc] sm:$0xf] }
 0x3f2   :  { %6309 = vmatpush.bf16.msrb.mxu2 %v13274_v19  ;;  %6348 = vmatpush.bf16.msrb.mxu3 %v13282_v43  ;;  %v13228_v19 = vld [vmem:[#allocation7 + $0x450] sm:$0xf0]  ;;  %v10467_v9 = vor.u32 %v13091_v56, %v10464_v12  ;;  %v10575_v43 = vor.u32 %v13117_v0, %v10572_v4  ;;  %v13167_v56 = vld [vmem:[#allocation7 + $0x26c] sm:$0xf]  ;;  %v10772_v12 = vld [vmem:[#allocation7 + $0x2cc] sm:$0xf0] }
 0x3f3   :  { %6390 = vmatmul.bf16.vlgmr.msrb.gmra.mxu0 %v10479_v18  ;;  %v10963_v52 = vor.u32 %v13228_v19, %v10962_v13  ;;  %v13305_v13 = vld [vmem:[#allocation2 + $0x1d0] sm:$0xff]  ;;  %v13304_v4 = vld [vmem:[#allocation2 + $0x538] sm:$0xff] }
 0x3f4   :  { %v10878_v19 = vld [vmem:[#allocation7 + $0x338] sm:$0xf] }
 0x3f5   :  { %6271 = vmatpush.bf16.msrb.mxu1 %v13265_v28  ;;  %v13092_v28 = vld [vmem:[#allocation7 + $0x14] sm:$0xf] }
 0x3f6   :  { %6310 = vmatpush.bf16.msrb.mxu2 %v13273_v20  ;;  %6349 = vmatpush.bf16.msrb.mxu3 %v13281_v59  ;;  %v10470_v20 = vld [vmem:[#allocation7 + $0x10] sm:$0xf]  ;;  %v10475_v2 = vor.u32 %v13092_v28, %v10472_v23 }
 0x3f7   :  { %v10471_v38 = vor.u32 %v13104_v32, %v10470_v20  ;;  %v13299_v59 = vld [vmem:[#allocation2 + $0x508] sm:$0xff] }
 0x3f9   :  { %6272 = vmatpush.bf16.msrb.mxu1 %v13264_v16 }
 0x3fa   :  { %6311 = vmatpush.bf16.msrb.mxu2 %v13272_v6  ;;  %6350 = vmatpush.bf16.msrb.mxu3 %v13280_v1  ;;  %v13142_v1 = vld [vmem:[#allocation7 + $0x1a4] sm:$0xf] }
 0x3fc   :  { %6166 = vmatmul.bf16.gmra.mxu1 %v10655_v39  ;;  %6244 = vmatmul.bf16.gmra.mxu3 %v10663_v30  ;;  %v10578_v39 = vld [vmem:[#allocation7 + $0xe0] sm:$0xf] }
 0x3fd   :  { %6205 = vmatmul.bf16.gmra.mxu2 %v10659_v17  ;;  %6421 = vmatpush.bf16.msra.mxu1 %v13303_v22  ;;  %v13130_v17 = vld [vmem:[#allocation7 + $0x140] sm:$0xf0]  ;;  %v10675_v22 = vor.u32 %v13142_v1, %v10672_v10  ;;  %v13313_v1 = vld [vmem:[#allocation2 + $0x4c0] sm:$0xff]  ;;  %v13323_v10 = vld [vmem:[#allocation2 + $0x48] sm:$0xff] }
 0x3fe   :  { %6460 = vmatpush.bf16.msra.mxu2 %v13311_v51  ;;  %v10579_v30 = vor.u32 %v13130_v17, %v10578_v39  ;;  %v13306_v51 = vld [vmem:[#allocation2 + $0xe8] sm:$0xff]  ;;  %6499 = vmatpush.bf16.msra.mxu3 %v13319_v11  ;;  %v13327_v17 = vld [vmem:[#allocation2 + $0x78] sm:$0xff] }
 0x3ff   :  { %v13317_v39 = vld [vmem:[#allocation2 + $0x128] sm:$0xff]  ;;  %6538 = vmatpush.bf16.msra.mxu0 %v13327_v17 }
 0x401   :  { %6422 = vmatpush.bf16.msra.mxu1 %v13302_v55  ;;  %v10764_v55 = vld [vmem:[#allocation7 + $0x2c4] sm:$0xf0] }
 0x402   :  { %6461 = vmatpush.bf16.msra.mxu2 %v13310_v26  ;;  %6500 = vmatpush.bf16.msra.mxu3 %v13318_v45 }
 0x403   :  { %6395 = vmatmul.bf16.gmra.mxu0 %v10579_v30 }
 0x404   :  { %6539 = vmatpush.bf16.msra.mxu0 %v13326_v34 }
 0x405   :  { %6423 = vmatpush.bf16.msra.mxu1 %v13301_v29  ;;  %v13179_v29 = vld [vmem:[#allocation7 + $0x2c8] sm:$0xf0] }
 0x406   :  { %6462 = vmatpush.bf16.msra.mxu2 %v13309_v35  ;;  %v10770_v35 = vld [vmem:[#allocation7 + $0x268] sm:$0xf]  ;;  %6501 = vmatpush.bf16.msra.mxu3 %v13317_v39  ;;  %v13320_v39 = vld [vmem:[#allocation2 + $0x398] sm:$0xff] }
 0x409   :  { %6424 = vmatpush.bf16.msra.mxu1 %v13300_v61  ;;  %v13316_v61 = vld [vmem:[#allocation2 + $0x3f8] sm:$0xff] }
 0x40a   :  { %6463 = vmatpush.bf16.msra.mxu2 %v13308_v57  ;;  %v10775_v57 = vor.u32 %v13167_v56, %v10772_v12  ;;  %6502 = vmatpush.bf16.msra.mxu3 %v13316_v61  ;;  %v13107_v56 = vld [vmem:[#allocation7 + $0x88] sm:$0xf0] }
 0x40c   :  { %6171 = vmatmul.bf16.gmra.mxu1 %v10755_v8  ;;  %6249 = vmatmul.bf16.gmra.mxu3 %v10763_v14  ;;  %v10564_v8 = vld [vmem:[#allocation7 + $0x134] sm:$0xf0]  ;;  %v13129_v14 = vld [vmem:[#allocation7 + $0x138] sm:$0xf0] }
 0x40d   :  { %6210 = vmatmul.bf16.gmra.mxu2 %v10759_v46  ;;  %v10570_v46 = vld [vmem:[#allocation7 + $0xd8] sm:$0xf]  ;;  %v10567_v6 = vor.u32 %v13116_v25, %v10564_v8  ;;  %6425 = vmatpush.bf16.msra.mxu1 %v13299_v59  ;;  %v13325_v8 = vld [vmem:[#allocation2 + $0x238] sm:$0xff]  ;;  %v13296_v59 = vld [vmem:[#allocation2 + $0x308] sm:$0xff] }
 0x40e   :  { %v10571_v16 = vor.u32 %v13129_v14, %v10570_v46  ;;  %6464 = vmatpush.bf16.msra.mxu2 %v13307_v42  ;;  %v13315_v25 = vld [vmem:[#allocation2 + $0x530] sm:$0xff]  ;;  %6540 = vmatpush.bf16.msra.mxu0 %v13325_v8  ;;  %v13342_v8 = vld [vmem:[#allocation2 + $0x178] sm:$0xff] }
 0x40f   :  { %6503 = vmatpush.bf16.msra.mxu3 %v13315_v25 }
 0x411   :  { %6426 = vmatpush.bf16.msra.mxu1 %v13298_v40 }
 0x412   :  { %6465 = vmatpush.bf16.msra.mxu2 %v13306_v51  ;;  %v10872_v51 = vld [vmem:[#allocation7 + $0x394] sm:$0xf0] }
 0x413   :  { %6400 = vmatmul.bf16.gmra.mxu0 %v10679_v48 }
 0x416   :  { %6466 = vmatpush.bf16.msra.mxu2 %v13305_v13 }
 0x41a   :  { %6467 = vmatpush.bf16.msra.mxu2 %v13304_v4 }
 0x41c   :  { %6176 = vmatmul.bf16.gmra.mxu1 %v10855_v44  ;;  %6254 = vmatmul.bf16.gmra.mxu3 %v10863_v63  ;;  %v17337_v44 = vld [vmem:[%s18155_s3] ss:$0 sm:$0xff]  ;;  %v10671_v63 = vor.u32 %v13154_v37, %v10670_v41  ;;  %v10870_v41 = vld [vmem:[#allocation7 + $0x330] sm:$0xf]  ;;  %v13204_v37 = vld [vmem:[#allocation7 + $0x390] sm:$0xf0] }
 0x41d   :  { %6215 = vmatmul.bf16.gmra.mxu2 %v10859_v49  ;;  %v10667_v49 = vor.u32 %v13141_v21, %v10664_v27  ;;  %v13191_v21 = vld [vmem:[#allocation7 + $0x32c] sm:$0xf]  ;;  %v10864_v27 = vld [vmem:[#allocation7 + $0x38c] sm:$0xf0]  ;;  %v10871_v11 = vor.u32 %v13204_v37, %v10870_v41  ;;  %v13093_v37 = vld [vmem:[#allocation7 + $0x1c] sm:$0xf] }
 0x41e   :  { %v10867_v40 = vor.u32 %v13191_v21, %v10864_v27  ;;  %v10594_v21 = vld [vmem:[#allocation7 + $0xf0] sm:$0xf]  ;;  %v13132_v27 = vld [vmem:[#allocation7 + $0x150] sm:$0xf0] }
 0x41f   :  { %v10595_v41 = vor.u32 %v13132_v27, %v10594_v21  ;;  %v13331_v21 = vld [vmem:[#allocation2 + $0x50] sm:$0xff] }
 0x423   :  { %6405 = vmatmul.bf16.gmra.mxu0 %v10779_v54  ;;  %v10979_v54 = vor.u32 %v13230_v53, %v10978_v5 }
 0x42c   :  { %6181 = vmatmul.bf16.gmra.mxu1 %v10955_v60  ;;  %6259 = vmatmul.bf16.gmra.mxu3 %v10963_v52  ;;  %v13205_v60 = vld [vmem:[#allocation7 + $0x398] sm:$0xf0]  ;;  %v13166_v52 = vld [vmem:[#allocation7 + $0x264] sm:$0xf] }
 0x42d   :  { %6220 = vmatmul.bf16.gmra.mxu2 %v10959_v3  ;;  %v10879_v3 = vor.u32 %v13205_v60, %v10878_v19  ;;  %v10767_v23 = vor.u32 %v13166_v52, %v10764_v55  ;;  %v13343_v19 = vld [vmem:[#allocation2 + $0x200] sm:$0xff]  ;;  %v13321_v60 = vld [vmem:[#allocation2 + $0x138] sm:$0xff] }
 0x433   :  { %6410 = vmatmul.bf16.gmra.mxu0 %v10879_v3 }
 0x43c   :  { %6273 = vmatmul.bf16.vlgmr.msrb.gmra.mxu1 %v10467_v9  ;;  %6351 = vmatmul.bf16.vlgmr.msrb.gmra.mxu3 %v10475_v2  ;;  %v10771_v9 = vor.u32 %v13179_v29, %v10770_v35  ;;  %v13335_v35 = vld [vmem:[#allocation2 + $0x1a0] sm:$0xff] }
 0x43d   :  { %6312 = vmatmul.bf16.vlgmr.msrb.gmra.mxu2 %v10471_v38  ;;  %v13297_v38 = vld [vmem:[#allocation2 + $0x278] sm:$0xff] }
 0x43e   :  { %6427 = vmatpush.bf16.msra.mxu1 %v13297_v38  ;;  %6616 = vmatpush.bf16.msrb.mxu2 %v13343_v19  ;;  %v13217_v38 = vld [vmem:[#allocation7 + $0x3fc] sm:$0xf] }
 0x442   :  { %6428 = vmatpush.bf16.msra.mxu1 %v13296_v59  ;;  %6617 = vmatpush.bf16.msrb.mxu2 %v13342_v8 }
 0x443   :  { %6415 = vmatmul.bf16.gmra.mxu0 %v10979_v54  ;;  %v13341_v54 = vld [vmem:[#allocation2 + $0x160] sm:$0xff] }
 0x446   :  { %6577 = vmatpush.bf16.msrb.mxu1 %v13335_v35  ;;  %6618 = vmatpush.bf16.msrb.mxu2 %v13341_v54 }
 0x44c   :  { %6278 = vmatmul.bf16.gmra.mxu1 %v10567_v6  ;;  %6356 = vmatmul.bf16.gmra.mxu3 %v10575_v43  ;;  %v13324_v43 = vld [vmem:[#allocation2 + $0xd0] sm:$0xff] }
 0x44d   :  { %6317 = vmatmul.bf16.gmra.mxu2 %v10571_v16  ;;  %v13314_v16 = vld [vmem:[#allocation2 + $0xb8] sm:$0xff]  ;;  %6541 = vmatpush.bf16.msra.mxu0 %v13324_v43 }
 0x44e   :  { %6504 = vmatpush.bf16.msra.mxu3 %v13314_v16 }
 0x451   :  { %6542 = vmatpush.bf16.msra.mxu0 %v13323_v10  ;;  %v10486_v10 = vld [vmem:[#allocation7 + $0x20] sm:$0xf] }
 0x452   :  { %6505 = vmatpush.bf16.msra.mxu3 %v13313_v1  ;;  %v10480_v1 = vld [vmem:[#allocation7 + $0x7c] sm:$0xf0] }
 0x459   :  { %v6157_v50 = vpop.f32.mrf.mxu1 }
 0x45a   :  { %v6158_v26 = vadd.f32 %v17337_v44, %v6157_v50 }
 0x45c   :  { %6283 = vmatmul.bf16.gmra.mxu1 %v10667_v49  ;;  %6361 = vmatmul.bf16.gmra.mxu3 %v10675_v22 }
 0x45d   :  { %6322 = vmatmul.bf16.gmra.mxu2 %v10671_v63  ;;  %v13192_v63 = vld [vmem:[#allocation7 + $0x334] sm:$0xf] }
 0x45f   :  { %v6235_v62 = vpop.f32.mrf.mxu3 }
 0x460   :  { %v6196_v24 = vpop.f32.mrf.mxu2 }
 0x461   :  { %v6197_v18 = vadd.f32 %v6196_v24, %v6158_v26  ;;  %v6159_v36 = vpop.f32.mrf.mxu1 }
 0x462   :  { %v6160_v30 = vadd.f32 %v17337_v44, %v6159_v36  ;;  %v13322_v36 = vld [vmem:[#allocation2 + $0x518] sm:$0xff] }
 0x463   :  { %v17340_v31 = vadd.f32 %v6235_v62, %v6197_v18  ;;  %v10875_v18 = vor.u32 %v13192_v63, %v10872_v51  ;;  %v13312_v62 = vld [vmem:[#allocation2 + $0x390] sm:$0xff]  ;;  %6543 = vmatpush.bf16.msra.mxu0 %v13322_v36  ;;  %v13094_v51 = vld [vmem:[#allocation7 + $0x24] sm:$0xf] }
 0x464   :  { %6506 = vmatpush.bf16.msra.mxu3 %v13312_v62 }
 0x467   :  { %v6237_v28 = vpop.f32.mrf.mxu3  ;;  %6544 = vmatpush.bf16.msra.mxu0 %v13321_v60 }
 0x468   :  { %v6198_v20 = vpop.f32.mrf.mxu2 }
 0x469   :  { %v6199_v32 = vadd.f32 %v6198_v20, %v6160_v30  ;;  %v6162_v2 = vpop.f32.mrf.mxu1  ;;  %v10494_v30 = vld [vmem:[#allocation7 + $0x28] sm:$0xf]  ;;  %v13216_v20 = vld [vmem:[#allocation7 + $0x3f4] sm:$0xf] }
 0x46a   :  { %v6163_v48 = vadd.f32 %v17337_v44, %v6162_v2  ;;  %v10495_v12 = vor.u32 %v13107_v56, %v10494_v30  ;;  %v10972_v2 = vld [vmem:[#allocation7 + $0x45c] sm:$0xf0]  ;;  %v10694_v30 = vld [vmem:[#allocation7 + $0x1b8] sm:$0xf]  ;;  %v13157_v56 = vld [vmem:[#allocation7 + $0x218] sm:$0xf0] }
 0x46b   :  { %v17343_v15 = vadd.f32 %v6237_v28, %v6199_v32  ;;  %6545 = vmatpush.bf16.msra.mxu0 %v13320_v39  ;;  %v10964_v32 = vld [vmem:[#allocation7 + $0x454] sm:$0xf0] }
 0x46c   :  { %6288 = vmatmul.bf16.gmra.mxu1 %v10767_v23  ;;  %6366 = vmatmul.bf16.gmra.mxu3 %v10775_v57  ;;  %v10970_v28 = vld [vmem:[#allocation7 + $0x3f8] sm:$0xf]  ;;  %v13229_v23 = vld [vmem:[#allocation7 + $0x458] sm:$0xf0] }
 0x46d   :  { %6327 = vmatmul.bf16.gmra.mxu2 %v10771_v9  ;;  %v10971_v25 = vor.u32 %v13229_v23, %v10970_v28  ;;  %v10580_v28 = vld [vmem:[#allocation7 + $0x144] sm:$0xf0] }
 0x46e   :  { %6546 = vmatmul.bf16.vlgmr.msra.gmra.mxu0 %v10495_v12  ;;  %v13118_v12 = vld [vmem:[#allocation7 + $0xe4] sm:$0xf]  ;;  %v10586_v23 = vld [vmem:[#allocation7 + $0xe8] sm:$0xf] }
 0x46f   :  { %v6240_v0 = vpop.f32.mrf.mxu3 }
 0x470   :  { %v6201_v46 = vpop.f32.mrf.mxu2  ;;  %v17366_v39 = vpop.f32.mrf.mxu0 }
 0x471   :  { %v6202_v14 = vadd.f32 %v6201_v46, %v6163_v48  ;;  %v6164_v6 = vpop.f32.mrf.mxu1  ;;  %v10967_v48 = vor.u32 %v13216_v20, %v10964_v32  ;;  %v13332_v20 = vld [vmem:[#allocation2 + $0x610] sm:$0xff]  ;;  %v10695_v32 = vor.u32 %v13157_v56, %v10694_v30  ;;  %v13351_v56 = vld [vmem:[#allocation2 + $0x628] sm:$0xff] }
 0x472   :  { %v6165_v49 = vadd.f32 %v17337_v44, %v6164_v6  ;;  %v13334_v6 = vld [vmem:[#allocation2 + $0x60] sm:$0xff]  ;;  %6655 = vmatpush.bf16.msrb.mxu3 %v13351_v56  ;;  %v10994_v56 = vld [vmem:[#allocation7 + $0x410] sm:$0xf] }
 0x473   :  { %v17346_v42 = vadd.f32 %v6240_v0, %v6202_v14  ;;  %v10975_v14 = vor.u32 %v13217_v38, %v10972_v2  ;;  %6578 = vmatpush.bf16.msrb.mxu1 %v13334_v6  ;;  %v13119_v2 = vld [vmem:[#allocation7 + $0xec] sm:$0xf] }
 0x477   :  { %v6242_v26 = vpop.f32.mrf.mxu3 }
 0x478   :  { %v6203_v50 = vpop.f32.mrf.mxu2  ;;  %v17371_v6 = vpop.f32.mrf.mxu0 }
 0x479   :  { %v6204_v22 = vadd.f32 %v6203_v50, %v6165_v49  ;;  %v6167_v24 = vpop.f32.mrf.mxu1  ;;  %v13106_v49 = vld [vmem:[#allocation7 + $0x80] sm:$0xf0]  ;;  %v10488_v50 = vld [vmem:[#allocation7 + $0x84] sm:$0xf0] }
 0x47a   :  { %v6168_v13 = vadd.f32 %v17337_v44, %v6167_v24  ;;  %v10487_v24 = vor.u32 %v13106_v49, %v10486_v10  ;;  %v10491_v36 = vor.u32 %v13094_v51, %v10488_v50  ;;  %v13182_v10 = vld [vmem:[#allocation7 + $0x2e0] sm:$0xf0]  ;;  %v13143_v49 = vld [vmem:[#allocation7 + $0x1ac] sm:$0xf]  ;;  %v10680_v51 = vld [vmem:[#allocation7 + $0x20c] sm:$0xf0] }
 0x47b   :  { %v17349_v45 = vadd.f32 %v6242_v26, %v6204_v22  ;;  %v10686_v50 = vld [vmem:[#allocation7 + $0x1b0] sm:$0xf] }
 0x47c   :  { %6293 = vmatmul.bf16.gmra.mxu1 %v10867_v40  ;;  %6371 = vmatmul.bf16.gmra.mxu3 %v10875_v18  ;;  %v13333_v18 = vld [vmem:[#allocation2 + $0x460] sm:$0xff] }
 0x47d   :  { %6332 = vmatmul.bf16.gmra.mxu2 %v10871_v11  ;;  %v10483_v11 = vor.u32 %v13093_v37, %v10480_v1  ;;  %6579 = vmatpush.bf16.msrb.mxu1 %v13333_v18  ;;  %v10794_v1 = vld [vmem:[#allocation7 + $0x280] sm:$0xf] }
 0x47e   :  { %6551 = vmatmul.bf16.gmra.mxu0 %v10595_v41 }
 0x47f   :  { %v6245_v55 = vpop.f32.mrf.mxu3 }
 0x480   :  { %v6206_v3 = vpop.f32.mrf.mxu2  ;;  %v17376_v37 = vpop.f32.mrf.mxu0 }
 0x481   :  { %v6207_v52 = vadd.f32 %v6206_v3, %v6168_v13  ;;  %v6169_v29 = vpop.f32.mrf.mxu1  ;;  %6580 = vmatpush.bf16.msrb.mxu1 %v13332_v20 }
 0x482   :  { %v6170_v9 = vadd.f32 %v17337_v44, %v6169_v29 }
 0x483   :  { %v17352_v17 = vadd.f32 %v6245_v55, %v6207_v52  ;;  %v13340_v55 = vld [vmem:[#allocation2 + $0x210] sm:$0xff] }
 0x484   :  { %6619 = vmatpush.bf16.msrb.mxu2 %v13340_v55 }
 0x485   :  { %6581 = vmatpush.bf16.msrb.mxu1 %v13331_v21 }
 0x487   :  { %v6247_v34 = vpop.f32.mrf.mxu3 }
 0x488   :  { %v6208_v57 = vpop.f32.mrf.mxu2  ;;  %v17382_v30 = vpop.f32.mrf.mxu0 }
 0x489   :  { %v6209_v61 = vadd.f32 %v6208_v57, %v6170_v9  ;;  %v6172_v46 = vpop.f32.mrf.mxu1  ;;  %v13131_v9 = vld [vmem:[#allocation7 + $0x148] sm:$0xf0]  ;;  %v10588_v57 = vld [vmem:[#allocation7 + $0x14c] sm:$0xf0] }
 0x48a   :  { %v6173_v4 = vadd.f32 %v17337_v44, %v6172_v46  ;;  %v10587_v8 = vor.u32 %v13131_v9, %v10586_v23  ;;  %v13350_v23 = vld [vmem:[#allocation2 + $0x630] sm:$0xff] }
 0x48b   :  { %v17355_v0 = vadd.f32 %v6247_v34, %v6209_v61  ;;  %6656 = vmatpush.bf16.msrb.mxu3 %v13350_v23  ;;  %v13328_v23 = vld [vmem:[#allocation2 + $0x2d8] sm:$0xff] }
 0x48c   :  { %6298 = vmatmul.bf16.gmra.mxu1 %v10967_v48  ;;  %6376 = vmatmul.bf16.gmra.mxu3 %v10975_v14  ;;  %v10591_v14 = vor.u32 %v13119_v2, %v10588_v57  ;;  %v13168_v2 = vld [vmem:[#allocation7 + $0x274] sm:$0xf]  ;;  %v10894_v57 = vld [vmem:[#allocation7 + $0x348] sm:$0xf] }
 0x48d   :  { %6337 = vmatmul.bf16.gmra.mxu2 %v10971_v25  ;;  %v10583_v25 = vor.u32 %v13118_v12, %v10580_v28 }
 0x48e   :  { %6556 = vmatmul.bf16.gmra.mxu0 %v10695_v32 }
 0x48f   :  { %v6250_v59 = vpop.f32.mrf.mxu3 }
 0x490   :  { %v6211_v16 = vpop.f32.mrf.mxu2 }
 0x491   :  { %v6212_v43 = vadd.f32 %v6211_v16, %v6173_v4  ;;  %v6174_v5 = vpop.f32.mrf.mxu1 }
 0x492   :  { %v6175_v63 = vadd.f32 %v17337_v44, %v6174_v5 }
 0x493   :  { %v17358_v53 = vadd.f32 %v6250_v59, %v6212_v43  ;;  %v13339_v43 = vld [vmem:[#allocation2 + $0x5d8] sm:$0xff] }
 0x494   :  { %6620 = vmatpush.bf16.msrb.mxu2 %v13339_v43  ;;  %v13359_v43 = vld [vmem:[#allocation2 + $0x358] sm:$0xff] }
 0x495   :  { %6694 = vmatpush.bf16.msrb.mxu0 %v13359_v43  ;;  %v13344_v43 = vld [vmem:[#allocation2 + $0x288] sm:$0xff] }
 0x497   :  { %v6252_v40 = vpop.f32.mrf.mxu3 }
 0x498   :  { %v6213_v22 = vpop.f32.mrf.mxu2 }
 0x499   :  { %v6214_v26 = vadd.f32 %v6213_v22, %v6175_v63  ;;  %v6177_v62 = vpop.f32.mrf.mxu1  ;;  %v10795_v63 = vor.u32 %v13182_v10, %v10794_v1  ;;  %v13156_v22 = vld [vmem:[#allocation7 + $0x210] sm:$0xf0] }
 0x49a   :  { %v6178_v19 = vadd.f32 %v17337_v44, %v6177_v62 }
 0x49b   :  { %v17361_v13 = vadd.f32 %v6252_v40, %v6214_v26  ;;  %v13144_v40 = vld [vmem:[#allocation7 + $0x1b4] sm:$0xf] }
 0x49c   :  { %6429 = vmatmul.bf16.vlgmr.msra.gmra.mxu1 %v10483_v11  ;;  %6507 = vmatmul.bf16.vlgmr.msra.gmra.mxu3 %v10491_v36  ;;  %v10688_v11 = vld [vmem:[#allocation7 + $0x214] sm:$0xf0]  ;;  %v10683_v36 = vor.u32 %v13143_v49, %v10680_v51  ;;  %v13358_v51 = vld [vmem:[#allocation2 + $0xc0] sm:$0xff] }
 0x49d   :  { %6468 = vmatmul.bf16.vlgmr.msra.gmra.mxu2 %v10487_v24  ;;  %6695 = vmatpush.bf16.msrb.mxu0 %v13358_v51  ;;  %v13352_v51 = vld [vmem:[#allocation2 + $0x370] sm:$0xff] }
 0x49e   :  { %6561 = vmatmul.bf16.gmra.mxu0 %v10795_v63  ;;  %v13348_v63 = vld [vmem:[#allocation2 + $0x5b0] sm:$0xff] }
 0x49f   :  { %v6255_v52 = vpop.f32.mrf.mxu3 }
 0x4a0   :  { %v6216_v60 = vpop.f32.mrf.mxu2 }
 0x4a1   :  { %v6217_v3 = vadd.f32 %v6216_v60, %v6178_v19  ;;  %v6179_v35 = vpop.f32.mrf.mxu1  ;;  %v10687_v19 = vor.u32 %v13156_v22, %v10686_v50  ;;  %v13338_v60 = vld [vmem:[#allocation2 + $0x400] sm:$0xff] }
 0x4a2   :  { %v6180_v38 = vadd.f32 %v17337_v44, %v6179_v35  ;;  %6621 = vmatpush.bf16.msrb.mxu2 %v13338_v60  ;;  %v13346_v60 = vld [vmem:[#allocation2 + $0x230] sm:$0xff] }
 0x4a3   :  { %v17364_v29 = vadd.f32 %v6255_v52, %v6217_v3  ;;  %v10691_v52 = vor.u32 %v13144_v40, %v10688_v11  ;;  %v13347_v11 = vld [vmem:[#allocation2 + $0x5d0] sm:$0xff] }
 0x4a7   :  { %v6257_v48 = vpop.f32.mrf.mxu3 }
 0x4a8   :  { %v6218_v61 = vpop.f32.mrf.mxu2 }
 0x4a9   :  { %v6219_v34 = vadd.f32 %v6218_v61, %v6180_v38  ;;  %v6182_v46 = vpop.f32.mrf.mxu1  ;;  %v13207_v61 = vld [vmem:[#allocation7 + $0x3a8] sm:$0xf0] }
 0x4aa   :  { %v6183_v16 = vadd.f32 %v17337_v44, %v6182_v46  ;;  %v10895_v46 = vor.u32 %v13207_v61, %v10894_v57  ;;  %v13355_v57 = vld [vmem:[#allocation2 + $0x300] sm:$0xff] }
 0x4ab   :  { %v17369_v4 = vadd.f32 %v6257_v48, %v6219_v34  ;;  %v10780_v48 = vld [vmem:[#allocation7 + $0x2d4] sm:$0xf0]  ;;  %v10888_v61 = vld [vmem:[#allocation7 + $0x3a4] sm:$0xf0] }
 0x4ac   :  { %6434 = vmatmul.bf16.gmra.mxu1 %v10583_v25  ;;  %6512 = vmatmul.bf16.gmra.mxu3 %v10591_v14  ;;  %v10786_v25 = vld [vmem:[#allocation7 + $0x278] sm:$0xf]  ;;  %v13181_v14 = vld [vmem:[#allocation7 + $0x2d8] sm:$0xf0] }
 0x4ad   :  { %6473 = vmatmul.bf16.gmra.mxu2 %v10587_v8  ;;  %v13337_v8 = vld [vmem:[#allocation2 + $0x498] sm:$0xff]  ;;  %v10787_v1 = vor.u32 %v13181_v14, %v10786_v25 }
 0x4ae   :  { %6622 = vmatpush.bf16.msrb.mxu2 %v13337_v8  ;;  %6566 = vmatmul.bf16.gmra.mxu0 %v10895_v46 }
 0x4af   :  { %v6260_v54 = vpop.f32.mrf.mxu3 }
 0x4b0   :  { %v6221_v59 = vpop.f32.mrf.mxu2 }
 0x4b1   :  { %v6222_v5 = vadd.f32 %v6221_v59, %v6183_v16  ;;  %v6184_v27 = vpop.f32.mrf.mxu1  ;;  %v13349_v16 = vld [vmem:[#allocation2 + $0x310] sm:$0xff] }
 0x4b2   :  { %v6185_v26 = vadd.f32 %v17337_v44, %v6184_v27  ;;  %v13330_v44 = vld [vmem:[#allocation2 + $0x168] sm:$0xff]  ;;  %v13169_v59 = vld [vmem:[#allocation7 + $0x27c] sm:$0xf]  ;;  %6657 = vmatpush.bf16.msrb.mxu3 %v13349_v16  ;;  %v10783_v27 = vor.u32 %v13168_v2, %v10780_v48  ;;  %v13345_v2 = vld [vmem:[#allocation2 + $0x240] sm:$0xff] }
 0x4b3   :  { %v17374_v41 = vadd.f32 %v6260_v54, %v6222_v5  ;;  %6582 = vmatpush.bf16.msrb.mxu1 %v13330_v44  ;;  %v10788_v5 = vld [vmem:[#allocation7 + $0x2dc] sm:$0xf0] }
 0x4b4   :  { %v10791_v49 = vor.u32 %v13169_v59, %v10788_v5  ;;  %v13354_v59 = vld [vmem:[#allocation2 + $0x30] sm:$0xff] }
 0x4b6   :  { %6658 = vmatpush.bf16.msrb.mxu3 %v13348_v63  ;;  %v13367_v63 = vld [vmem:[#allocation2 + $0x120] sm:$0xff] }
 0x4b7   :  { %v6262_v62 = vpop.f32.mrf.mxu3 }
 0x4b8   :  { %v6223_v24 = vpop.f32.mrf.mxu2 }
 0x4b9   :  { %v6224_v18 = vadd.f32 %v6223_v24, %v6185_v26  ;;  %v6274_v3 = vpop.f32.mrf.mxu1  ;;  %v13357_v24 = vld [vmem:[#allocation2 + $0x150] sm:$0xff] }
 0x4ba   :  { %v6275_v35 = vadd.f32 %v6274_v3, %v17340_v31  ;;  %v17385_v31 = vpop.f32.mrf.mxu0  ;;  %6659 = vmatpush.bf16.msrb.mxu3 %v13347_v11  ;;  %6696 = vmatpush.bf16.msrb.mxu0 %v13357_v24  ;;  %v13356_v3 = vld [vmem:[#allocation2 + $0x428] sm:$0xff]  ;;  %v13109_v24 = vld [vmem:[#allocation7 + $0x98] sm:$0xf0] }
 0x4bb   :  { %v17379_v55 = vadd.f32 %v6262_v62, %v6224_v18 }
 0x4bc   :  { %6439 = vmatmul.bf16.gmra.mxu1 %v10683_v36  ;;  %6517 = vmatmul.bf16.gmra.mxu3 %v10691_v52 }
 0x4bd   :  { %6478 = vmatmul.bf16.gmra.mxu2 %v10687_v19 }
 0x4be   :  { %6660 = vmatpush.bf16.msrb.mxu3 %v13346_v60  ;;  %6697 = vmatpush.bf16.msrb.mxu0 %v13356_v3  ;;  %v13231_v60 = vld [vmem:[#allocation7 + $0x468] sm:$0xf0] }
 0x4bf   :  { %v6352_v32 = vpop.f32.mrf.mxu3  ;;  %v13219_v3 = vld [vmem:[#allocation7 + $0x40c] sm:$0xf] }
 0x4c0   :  { %v6313_v12 = vpop.f32.mrf.mxu2 }
 0x4c1   :  { %v6314_v20 = vadd.f32 %v6313_v12, %v6275_v35  ;;  %v6276_v28 = vpop.f32.mrf.mxu1  ;;  %v13232_v12 = vld [vmem:[#allocation7 + $0x470] sm:$0xf0] }
 0x4c2   :  { %v6277_v9 = vadd.f32 %v6276_v28, %v17343_v15  ;;  %v17391_v26 = vpop.f32.mrf.mxu0  ;;  %v10886_v28 = vld [vmem:[#allocation7 + $0x340] sm:$0xf]  ;;  %6661 = vmatpush.bf16.msrb.mxu3 %v13345_v2  ;;  %6698 = vmatpush.bf16.msrb.mxu0 %v13355_v57  ;;  %v13366_v57 = vld [vmem:[#allocation2 + $0x1e0] sm:$0xff] }
 0x4c3   :  { %v6353_v38 = vadd.f32 %v6352_v32, %v6314_v20  ;;  %v10880_v32 = vld [vmem:[#allocation7 + $0x39c] sm:$0xf0] }
 0x4c5   :  { %v17388_v34 = vadd.f32 %v17366_v39, %v6353_v38  ;;  %v13329_v39 = vld [vmem:[#allocation2 + $0x4e0] sm:$0xff]  ;;  %v13206_v38 = vld [vmem:[#allocation7 + $0x3a0] sm:$0xf0] }
 0x4c6   :  { %6583 = vmatpush.bf16.msrb.mxu1 %v13329_v39  ;;  %v10887_v14 = vor.u32 %v13206_v38, %v10886_v28  ;;  %6662 = vmatpush.bf16.msrb.mxu3 %v13344_v43  ;;  %v13373_v43 = vld [vmem:[#allocation2 + $0x368] sm:$0xff] }
 0x4c7   :  { %v6354_v21 = vpop.f32.mrf.mxu3  ;;  %6699 = vmatpush.bf16.msrb.mxu0 %v13354_v59 }
 0x4c8   :  { %v6315_v15 = vpop.f32.mrf.mxu2 }
 0x4c9   :  { %v6316_v54 = vadd.f32 %v6315_v15, %v6277_v9  ;;  %v6279_v10 = vpop.f32.mrf.mxu1  ;;  %v10995_v9 = vor.u32 %v13232_v12, %v10994_v56 }
 0x4ca   :  { %v6280_v50 = vadd.f32 %v6279_v10, %v17346_v42  ;;  %v13336_v42 = vld [vmem:[#allocation2 + $0x458] sm:$0xff]  ;;  %v17397_v44 = vpop.f32.mrf.mxu0  ;;  %6584 = vmatpush.bf16.msrb.mxu1 %v13328_v23 }
 0x4cb   :  { %v6355_v22 = vadd.f32 %v6354_v21, %v6316_v54  ;;  %6623 = vmatpush.bf16.msrb.mxu2 %v13336_v42  ;;  %6571 = vmatmul.bf16.gmra.mxu0 %v10995_v9  ;;  %v10980_v42 = vld [vmem:[#allocation7 + $0x464] sm:$0xf0] }
 0x4cc   :  { %6444 = vmatmul.bf16.gmra.mxu1 %v10783_v27  ;;  %6522 = vmatmul.bf16.gmra.mxu3 %v10791_v49  ;;  %v13375_v27 = vld [vmem:[#allocation2 + $0x38] sm:$0xff] }
 0x4cd   :  { %v17394_v40 = vadd.f32 %v17371_v6, %v6355_v22  ;;  %6483 = vmatmul.bf16.gmra.mxu2 %v10787_v1  ;;  %v13193_v6 = vld [vmem:[#allocation7 + $0x33c] sm:$0xf] }
 0x4ce   :  { %v10883_v46 = vor.u32 %v13193_v6, %v10880_v32  ;;  %v13353_v1 = vld [vmem:[#allocation2 + $0x190] sm:$0xff]  ;;  %6733 = vmatpush.bf16.msra.mxu1 %v13367_v63  ;;  %v13374_v32 = vld [vmem:[#allocation2 + $0x3a0] sm:$0xff] }
 0x4cf   :  { %v6357_v36 = vpop.f32.mrf.mxu3  ;;  %6772 = vmatpush.bf16.msra.mxu2 %v13375_v27  ;;  %6700 = vmatpush.bf16.msrb.mxu0 %v13353_v1  ;;  %v13108_v27 = vld [vmem:[#allocation7 + $0x90] sm:$0xf0] }
 0x4d0   :  { %v6318_v18 = vpop.f32.mrf.mxu2  ;;  %v13096_v1 = vld [vmem:[#allocation7 + $0x34] sm:$0xf] }
 0x4d1   :  { %v6319_v62 = vadd.f32 %v6318_v18, %v6280_v50  ;;  %v6281_v19 = vpop.f32.mrf.mxu1 }
 0x4d2   :  { %v6282_v52 = vadd.f32 %v6281_v19, %v17349_v45  ;;  %v13194_v45 = vld [vmem:[#allocation7 + $0x344] sm:$0xf]  ;;  %v17403_v54 = vpop.f32.mrf.mxu0  ;;  %v10986_v19 = vld [vmem:[#allocation7 + $0x408] sm:$0xf]  ;;  %6734 = vmatpush.bf16.msra.mxu1 %v13366_v57  ;;  %v10604_v57 = vld [vmem:[#allocation7 + $0x15c] sm:$0xf0] }
 0x4d3   :  { %v6358_v35 = vadd.f32 %v6357_v36, %v6319_v62  ;;  %v10891_v16 = vor.u32 %v13194_v45, %v10888_v61  ;;  %6701 = vmatpush.bf16.msrb.mxu0 %v13352_v51  ;;  %v13218_v62 = vld [vmem:[#allocation7 + $0x404] sm:$0xf]  ;;  %v10987_v12 = vor.u32 %v13231_v60, %v10986_v19  ;;  %6773 = vmatpush.bf16.msra.mxu2 %v13374_v32  ;;  %v13365_v51 = vld [vmem:[#allocation2 + $0x2c8] sm:$0xff] }
 0x4d4   :  { %v10983_v56 = vor.u32 %v13218_v62, %v10980_v42  ;;  %v13372_v60 = vld [vmem:[#allocation2 + $0x478] sm:$0xff] }
 0x4d5   :  { %v17400_v20 = vadd.f32 %v17376_v37, %v6358_v35 }
 0x4d6   :  { %6735 = vmatpush.bf16.msra.mxu1 %v13365_v51  ;;  %v10696_v51 = vld [vmem:[#allocation7 + $0x21c] sm:$0xf0] }
 0x4d7   :  { %v6359_v8 = vpop.f32.mrf.mxu3  ;;  %6774 = vmatpush.bf16.msra.mxu2 %v13373_v43  ;;  %v13371_v43 = vld [vmem:[#allocation2 + $0x550] sm:$0xff] }
 0x4d8   :  { %v6320_v48 = vpop.f32.mrf.mxu2 }
 0x4d9   :  { %v6321_v25 = vadd.f32 %v6320_v48, %v6282_v52  ;;  %v6284_v37 = vpop.f32.mrf.mxu1  ;;  %v10988_v52 = vld [vmem:[#allocation7 + $0x46c] sm:$0xf0] }
 0x4da   :  { %v6285_v5 = vadd.f32 %v6284_v37, %v17352_v17  ;;  %v17409_v11 = vpop.f32.mrf.mxu0  ;;  %v10991_v23 = vor.u32 %v13219_v3, %v10988_v52  ;;  %v13134_v37 = vld [vmem:[#allocation7 + $0x160] sm:$0xf0] }
 0x4db   :  { %v6360_v15 = vadd.f32 %v6359_v8, %v6321_v25  ;;  %6775 = vmatpush.bf16.msra.mxu2 %v13372_v60 }
 0x4dc   :  { %6449 = vmatmul.bf16.gmra.mxu1 %v10883_v46  ;;  %6527 = vmatmul.bf16.gmra.mxu3 %v10891_v16 }
 0x4dd   :  { %v17406_v21 = vadd.f32 %v17382_v30, %v6360_v15  ;;  %6488 = vmatmul.bf16.gmra.mxu2 %v10887_v14  ;;  %v10510_v30 = vld [vmem:[#allocation7 + $0x38] sm:$0xf]  ;;  %v10610_v14 = vld [vmem:[#allocation7 + $0x100] sm:$0xf]  ;;  %v10502_v15 = vld [vmem:[#allocation7 + $0x30] sm:$0xf] }
 0x4de   :  { %v10511_v36 = vor.u32 %v13109_v24, %v10510_v30  ;;  %v10611_v59 = vor.u32 %v13134_v37, %v10610_v14 }
 0x4df   :  { %v6362_v49 = vpop.f32.mrf.mxu3  ;;  %6776 = vmatpush.bf16.msra.mxu2 %v13371_v43  ;;  %v13183_v43 = vld [vmem:[#allocation7 + $0x2e8] sm:$0xf0] }
 0x4e0   :  { %v6323_v39 = vpop.f32.mrf.mxu2  ;;  %6702 = vmatmul.bf16.vlgmr.msrb.gmra.mxu0 %v10511_v36 }
 0x4e1   :  { %v6324_v10 = vadd.f32 %v6323_v39, %v6285_v5  ;;  %v6286_v17 = vpop.f32.mrf.mxu1  ;;  %v10496_v5 = vld [vmem:[#allocation7 + $0x8c] sm:$0xf0]  ;;  %v10504_v39 = vld [vmem:[#allocation7 + $0x94] sm:$0xf0] }
 0x4e2   :  { %v6287_v50 = vadd.f32 %v6286_v17, %v17355_v0  ;;  %v17415_v38 = vpop.f32.mrf.mxu0  ;;  %v10503_v17 = vor.u32 %v13108_v27, %v10502_v15  ;;  %v13363_v27 = vld [vmem:[#allocation2 + $0x438] sm:$0xff] }
 0x4e3   :  { %v6363_v22 = vadd.f32 %v6362_v49, %v6324_v10 }
 0x4e5   :  { %v17412_v18 = vadd.f32 %v17385_v31, %v6363_v22  ;;  %v10507_v22 = vor.u32 %v13096_v1, %v10504_v39 }
 0x4e7   :  { %v6364_v6 = vpop.f32.mrf.mxu3 }
 0x4e8   :  { %v6325_v35 = vpop.f32.mrf.mxu2 }
 0x4e9   :  { %v6326_v0 = vadd.f32 %v6325_v35, %v6287_v50  ;;  %v6289_v28 = vpop.f32.mrf.mxu1 }
 0x4ea   :  { %v6290_v9 = vadd.f32 %v6289_v28, %v17358_v53  ;;  %v17421_v53 = vpop.f32.mrf.mxu0  ;;  %v10596_v28 = vld [vmem:[#allocation7 + $0x154] sm:$0xf0] }
 0x4eb   :  { %v6365_v31 = vadd.f32 %v6364_v6, %v6326_v0  ;;  %v10710_v0 = vld [vmem:[#allocation7 + $0x1c8] sm:$0xf]  ;;  %v13159_v6 = vld [vmem:[#allocation7 + $0x228] sm:$0xf0] }
 0x4ec   :  { %6454 = vmatmul.bf16.gmra.mxu1 %v10983_v56  ;;  %6532 = vmatmul.bf16.gmra.mxu3 %v10991_v23  ;;  %v10711_v32 = vor.u32 %v13159_v6, %v10710_v0  ;;  %v10602_v23 = vld [vmem:[#allocation7 + $0xf8] sm:$0xf] }
 0x4ed   :  { %v17418_v2 = vadd.f32 %v17391_v26, %v6365_v31  ;;  %6493 = vmatmul.bf16.gmra.mxu2 %v10987_v12  ;;  %v13095_v26 = vld [vmem:[#allocation7 + $0x2c] sm:$0xf]  ;;  %v13364_v12 = vld [vmem:[#allocation2 + $0x268] sm:$0xff]  ;;  %v13121_v31 = vld [vmem:[#allocation7 + $0xfc] sm:$0xf] }
 0x4ee   :  { %v10499_v63 = vor.u32 %v13095_v26, %v10496_v5  ;;  %6736 = vmatpush.bf16.msra.mxu1 %v13364_v12  ;;  %v13362_v12 = vld [vmem:[#allocation2 + $0x5c8] sm:$0xff] }
 0x4ef   :  { %v6367_v48 = vpop.f32.mrf.mxu3 }
 0x4f0   :  { %v6328_v45 = vpop.f32.mrf.mxu2  ;;  %6707 = vmatmul.bf16.gmra.mxu0 %v10611_v59 }
 0x4f1   :  { %v6329_v61 = vadd.f32 %v6328_v45, %v6290_v9  ;;  %v6291_v25 = vpop.f32.mrf.mxu1  ;;  %v13133_v9 = vld [vmem:[#allocation7 + $0x158] sm:$0xf0] }
 0x4f2   :  { %v6292_v8 = vadd.f32 %v6291_v25, %v17361_v13  ;;  %v17427_v24 = vpop.f32.mrf.mxu0  ;;  %v10603_v25 = vor.u32 %v13133_v9, %v10602_v23  ;;  %6737 = vmatpush.bf16.msra.mxu1 %v13363_v27  ;;  %v10804_v27 = vld [vmem:[#allocation7 + $0x2ec] sm:$0xf0] }
 0x4f3   :  { %v6368_v46 = vadd.f32 %v6367_v48, %v6329_v61 }
 0x4f5   :  { %v17424_v16 = vadd.f32 %v17397_v44, %v6368_v46  ;;  %v10607_v46 = vor.u32 %v13121_v31, %v10604_v57  ;;  %v13382_v57 = vld [vmem:[#allocation2 + $0x3b8] sm:$0xff] }
 0x4f6   :  { %6738 = vmatpush.bf16.msra.mxu1 %v13362_v12 }
 0x4f7   :  { %v6369_v49 = vpop.f32.mrf.mxu3 }
 0x4f8   :  { %v6330_v10 = vpop.f32.mrf.mxu2 }
 0x4f9   :  { %v6331_v13 = vadd.f32 %v6330_v10, %v6292_v8  ;;  %v6294_v50 = vpop.f32.mrf.mxu1 }
 0x4fa   :  { %v6295_v44 = vadd.f32 %v6294_v50, %v17364_v29  ;;  %v17433_v29 = vpop.f32.mrf.mxu0  ;;  %v10702_v50 = vld [vmem:[#allocation7 + $0x1c0] sm:$0xf] }
 0x4fb   :  { %v6370_v30 = vadd.f32 %v6369_v49, %v6331_v13  ;;  %v10810_v13 = vld [vmem:[#allocation7 + $0x290] sm:$0xf]  ;;  %v13184_v49 = vld [vmem:[#allocation7 + $0x2f0] sm:$0xf0] }
 0x4fc   :  { %6585 = vmatmul.bf16.vlgmr.msrb.gmra.mxu1 %v10499_v63  ;;  %6663 = vmatmul.bf16.vlgmr.msrb.gmra.mxu3 %v10507_v22  ;;  %v13145_v63 = vld [vmem:[#allocation7 + $0x1bc] sm:$0xf]  ;;  %v13158_v22 = vld [vmem:[#allocation7 + $0x220] sm:$0xf0] }
 0x4fd   :  { %v17430_v62 = vadd.f32 %v17403_v54, %v6370_v30  ;;  %6624 = vmatmul.bf16.vlgmr.msrb.gmra.mxu2 %v10503_v17  ;;  %v13120_v54 = vld [vmem:[#allocation7 + $0xf4] sm:$0xf]  ;;  %v10811_v17 = vor.u32 %v13184_v49, %v10810_v13  ;;  %v10704_v30 = vld [vmem:[#allocation7 + $0x224] sm:$0xf0]  ;;  %v10703_v60 = vor.u32 %v13158_v22, %v10702_v50 }
 0x4fe   :  { %v10599_v48 = vor.u32 %v13120_v54, %v10596_v28 }
 0x4ff   :  { %v6372_v19 = vpop.f32.mrf.mxu3 }
 0x500   :  { %v6333_v36 = vpop.f32.mrf.mxu2  ;;  %6712 = vmatmul.bf16.gmra.mxu0 %v10711_v32  ;;  %v13383_v32 = vld [vmem:[#allocation2 + $0x430] sm:$0xff] }
 0x501   :  { %v6334_v42 = vadd.f32 %v6333_v36, %v6295_v44  ;;  %v6296_v3 = vpop.f32.mrf.mxu1  ;;  %v13146_v44 = vld [vmem:[#allocation7 + $0x1c4] sm:$0xf]  ;;  %6811 = vmatpush.bf16.msra.mxu3 %v13383_v32  ;;  %v11010_v32 = vld [vmem:[#allocation7 + $0x420] sm:$0xf] }
 0x502   :  { %v6297_v52 = vadd.f32 %v6296_v3, %v17369_v4  ;;  %v17439_v37 = vpop.f32.mrf.mxu0  ;;  %v13370_v3 = vld [vmem:[#allocation2 + $0x180] sm:$0xff] }
 0x503   :  { %v6373_v35 = vadd.f32 %v6372_v19, %v6334_v42  ;;  %v10699_v19 = vor.u32 %v13145_v63, %v10696_v51  ;;  %6777 = vmatpush.bf16.msra.mxu2 %v13370_v3  ;;  %v13390_v51 = vld [vmem:[#allocation2 + $0x1d8] sm:$0xff] }
 0x505   :  { %v17436_v56 = vadd.f32 %v17409_v11, %v6373_v35  ;;  %v10707_v35 = vor.u32 %v13146_v44, %v10704_v30  ;;  %6812 = vmatpush.bf16.msra.mxu3 %v13382_v57  ;;  %v13360_v57 = vld [vmem:[#allocation2 + $0x4a0] sm:$0xff] }
 0x507   :  { %v6374_v61 = vpop.f32.mrf.mxu3 }
 0x508   :  { %v6335_v4 = vpop.f32.mrf.mxu2 }
 0x509   :  { %v6336_v45 = vadd.f32 %v6335_v4, %v6297_v52  ;;  %v6299_v8 = vpop.f32.mrf.mxu1 }
 0x50a   :  { %v6300_v11 = vadd.f32 %v6299_v8, %v17374_v41  ;;  %v17445_v41 = vpop.f32.mrf.mxu0  ;;  %v10796_v8 = vld [vmem:[#allocation7 + $0x2e4] sm:$0xf0] }
 0x50b   :  { %v6375_v14 = vadd.f32 %v6374_v61, %v6336_v45  ;;  %v13170_v45 = vld [vmem:[#allocation7 + $0x284] sm:$0xf] }
 0x50c   :  { %6590 = vmatmul.bf16.gmra.mxu1 %v10599_v48  ;;  %6668 = vmatmul.bf16.gmra.mxu3 %v10607_v46  ;;  %v13209_v48 = vld [vmem:[#allocation7 + $0x3b8] sm:$0xf0]  ;;  %v10802_v46 = vld [vmem:[#allocation7 + $0x288] sm:$0xf] }
 0x50d   :  { %v17442_v26 = vadd.f32 %v17415_v38, %v6375_v14  ;;  %6629 = vmatmul.bf16.gmra.mxu2 %v10603_v25  ;;  %v10803_v13 = vor.u32 %v13183_v43, %v10802_v46 }
 0x50f   :  { %v6377_v15 = vpop.f32.mrf.mxu3 }
 0x510   :  { %v6338_v59 = vpop.f32.mrf.mxu2  ;;  %6717 = vmatmul.bf16.gmra.mxu0 %v10811_v17  ;;  %v13380_v17 = vld [vmem:[#allocation2 + $0x4f8] sm:$0xff] }
 0x511   :  { %v6339_v5 = vadd.f32 %v6338_v59, %v6300_v11  ;;  %v6301_v1 = vpop.f32.mrf.mxu1  ;;  %v13369_v11 = vld [vmem:[#allocation2 + $0x3d0] sm:$0xff]  ;;  %v13381_v59 = vld [vmem:[#allocation2 + $0x408] sm:$0xff] }
 0x512   :  { %v6302_v39 = vadd.f32 %v6301_v1, %v17379_v55  ;;  %v17451_v6 = vpop.f32.mrf.mxu0  ;;  %6778 = vmatpush.bf16.msra.mxu2 %v13369_v11  ;;  %6813 = vmatpush.bf16.msra.mxu3 %v13381_v59 }
 0x513   :  { %v6378_v10 = vadd.f32 %v6377_v15, %v6339_v5  ;;  %v13391_v5 = vld [vmem:[#allocation2 + $0x568] sm:$0xff]  ;;  %v13171_v15 = vld [vmem:[#allocation7 + $0x28c] sm:$0xf] }
 0x514   :  { %6850 = vmatpush.bf16.msra.mxu0 %v13391_v5  ;;  %v10807_v63 = vor.u32 %v13171_v15, %v10804_v27  ;;  %v13376_v5 = vld [vmem:[#allocation2 + $0x280] sm:$0xff] }
 0x515   :  { %v17448_v38 = vadd.f32 %v17421_v53, %v6378_v10  ;;  %v10799_v10 = vor.u32 %v13170_v45, %v10796_v8  ;;  %v13377_v45 = vld [vmem:[#allocation2 + $0x5f0] sm:$0xff]  ;;  %v13386_v15 = vld [vmem:[#allocation2 + $0x360] sm:$0xff] }
 0x516   :  { %6814 = vmatpush.bf16.msra.mxu3 %v13380_v17  ;;  %v13399_v17 = vld [vmem:[#allocation2 + $0x1a8] sm:$0xff] }
 0x517   :  { %v6379_v55 = vpop.f32.mrf.mxu3 }
 0x518   :  { %v6340_v36 = vpop.f32.mrf.mxu2  ;;  %6851 = vmatpush.bf16.msra.mxu0 %v13390_v51  ;;  %v13384_v51 = vld [vmem:[#allocation2 + $0x198] sm:$0xff] }
 0x519   :  { %v6341_v42 = vadd.f32 %v6340_v36, %v6302_v39  ;;  %v6430_v52 = vpop.f32.mrf.mxu1  ;;  %v13379_v36 = vld [vmem:[#allocation2 + $0x40] sm:$0xff] }
 0x51a   :  { %v6431_v53 = vadd.f32 %v6430_v52, %v17388_v34  ;;  %v17457_v61 = vpop.f32.mrf.mxu0  ;;  %6815 = vmatpush.bf16.msra.mxu3 %v13379_v36  ;;  %v13378_v52 = vld [vmem:[#allocation2 + $0x68] sm:$0xff] }
 0x51b   :  { %v6380_v0 = vadd.f32 %v6379_v55, %v6341_v42  ;;  %v13389_v42 = vld [vmem:[#allocation2 + $0x80] sm:$0xff] }
 0x51c   :  { %6595 = vmatmul.bf16.gmra.mxu1 %v10699_v19  ;;  %6673 = vmatmul.bf16.gmra.mxu3 %v10707_v35  ;;  %v13388_v35 = vld [vmem:[#allocation2 + $0xe0] sm:$0xff] }
 0x51d   :  { %v17454_v54 = vadd.f32 %v17427_v24, %v6380_v0  ;;  %6634 = vmatmul.bf16.gmra.mxu2 %v10703_v60  ;;  %v10910_v24 = vld [vmem:[#allocation7 + $0x358] sm:$0xf]  ;;  %6852 = vmatpush.bf16.msra.mxu0 %v13389_v42  ;;  %v13111_v42 = vld [vmem:[#allocation7 + $0xa8] sm:$0xf0] }
 0x51e   :  { %v10911_v14 = vor.u32 %v13209_v48, %v10910_v24  ;;  %6816 = vmatpush.bf16.msra.mxu3 %v13378_v52  ;;  %v13387_v24 = vld [vmem:[#allocation2 + $0x250] sm:$0xff] }
 0x51f   :  { %v6508_v9 = vpop.f32.mrf.mxu3  ;;  %v10904_v48 = vld [vmem:[#allocation7 + $0x3b4] sm:$0xf0]  ;;  %v13233_v52 = vld [vmem:[#allocation7 + $0x478] sm:$0xf0] }
 0x520   :  { %v6469_v28 = vpop.f32.mrf.mxu2  ;;  %6722 = vmatmul.bf16.gmra.mxu0 %v10911_v14 }
 0x521   :  { %v6470_v23 = vadd.f32 %v6469_v28, %v6431_v53  ;;  %v6432_v31 = vpop.f32.mrf.mxu1  ;;  %6853 = vmatpush.bf16.msra.mxu0 %v13388_v35  ;;  %v13234_v28 = vld [vmem:[#allocation7 + $0x480] sm:$0xf0]  ;;  %v13221_v35 = vld [vmem:[#allocation7 + $0x41c] sm:$0xf] }
 0x522   :  { %v6433_v34 = vadd.f32 %v6432_v31, %v17394_v40  ;;  %v17463_v44 = vpop.f32.mrf.mxu0  ;;  %v10902_v31 = vld [vmem:[#allocation7 + $0x350] sm:$0xf]  ;;  %6817 = vmatpush.bf16.msra.mxu3 %v13377_v45 }
 0x523   :  { %v6509_v4 = vadd.f32 %v6508_v9, %v6470_v23  ;;  %v10896_v9 = vld [vmem:[#allocation7 + $0x3ac] sm:$0xf0] }
 0x525   :  { %v17460_v25 = vadd.f32 %v17433_v29, %v6509_v4  ;;  %v13361_v29 = vld [vmem:[#allocation2 + $0x418] sm:$0xff]  ;;  %v13208_v4 = vld [vmem:[#allocation7 + $0x3b0] sm:$0xf0]  ;;  %6854 = vmatpush.bf16.msra.mxu0 %v13387_v24  ;;  %v13398_v24 = vld [vmem:[#allocation2 + $0x110] sm:$0xff] }
 0x526   :  { %6739 = vmatpush.bf16.msra.mxu1 %v13361_v29  ;;  %v10903_v43 = vor.u32 %v13208_v4, %v10902_v31  ;;  %6818 = vmatpush.bf16.msra.mxu3 %v13376_v5  ;;  %v13405_v5 = vld [vmem:[#allocation2 + $0x1b8] sm:$0xff] }
 0x527   :  { %v6510_v39 = vpop.f32.mrf.mxu3 }
 0x528   :  { %v6471_v40 = vpop.f32.mrf.mxu2 }
 0x529   :  { %v6472_v1 = vadd.f32 %v6471_v40, %v6433_v34  ;;  %v6435_v49 = vpop.f32.mrf.mxu1  ;;  %v11011_v34 = vor.u32 %v13234_v28, %v11010_v32  ;;  %6855 = vmatpush.bf16.msra.mxu0 %v13386_v15 }
 0x52a   :  { %v6436_v50 = vadd.f32 %v6435_v49, %v17400_v20  ;;  %v13368_v20 = vld [vmem:[#allocation2 + $0x4a8] sm:$0xff]  ;;  %v17469_v12 = vpop.f32.mrf.mxu0  ;;  %6740 = vmatpush.bf16.msra.mxu1 %v13360_v57 }
 0x52b   :  { %v6511_v22 = vadd.f32 %v6510_v39, %v6472_v1  ;;  %6779 = vmatpush.bf16.msra.mxu2 %v13368_v20  ;;  %v10996_v20 = vld [vmem:[#allocation7 + $0x474] sm:$0xf0] }
 0x52c   :  { %6600 = vmatmul.bf16.gmra.mxu1 %v10799_v10  ;;  %6678 = vmatmul.bf16.gmra.mxu3 %v10807_v63  ;;  %v13407_v10 = vld [vmem:[#allocation2 + $0x208] sm:$0xff] }
 0x52d   :  { %v17466_v30 = vadd.f32 %v17439_v37, %v6511_v22  ;;  %6639 = vmatmul.bf16.gmra.mxu2 %v10803_v13  ;;  %v13195_v37 = vld [vmem:[#allocation7 + $0x34c] sm:$0xf]  ;;  %v13385_v13 = vld [vmem:[#allocation2 + $0x350] sm:$0xff] }
 0x52e   :  { %v10899_v14 = vor.u32 %v13195_v37, %v10896_v9  ;;  %6856 = vmatpush.bf16.msra.mxu0 %v13385_v13  ;;  %6889 = vmatpush.bf16.msrb.mxu1 %v13399_v17  ;;  %v13406_v9 = vld [vmem:[#allocation2 + $0x258] sm:$0xff] }
 0x52f   :  { %v6513_v60 = vpop.f32.mrf.mxu3  ;;  %6928 = vmatpush.bf16.msrb.mxu2 %v13407_v10  ;;  %v13110_v10 = vld [vmem:[#allocation7 + $0xa0] sm:$0xf0] }
 0x530   :  { %v6474_v55 = vpop.f32.mrf.mxu2  ;;  %6727 = vmatmul.bf16.gmra.mxu0 %v11011_v34  ;;  %v13098_v13 = vld [vmem:[#allocation7 + $0x44] sm:$0xf] }
 0x531   :  { %v6475_v19 = vadd.f32 %v6474_v55, %v6436_v50  ;;  %v6437_v3 = vpop.f32.mrf.mxu1 }
 0x532   :  { %v6438_v0 = vadd.f32 %v6437_v3, %v17406_v21  ;;  %v13196_v21 = vld [vmem:[#allocation7 + $0x354] sm:$0xf]  ;;  %v17475_v1 = vpop.f32.mrf.mxu0  ;;  %6857 = vmatpush.bf16.msra.mxu0 %v13384_v51  ;;  %v11002_v3 = vld [vmem:[#allocation7 + $0x418] sm:$0xf]  ;;  %6890 = vmatpush.bf16.msrb.mxu1 %v13398_v24  ;;  %v13397_v51 = vld [vmem:[#allocation2 + $0x420] sm:$0xff] }
 0x533   :  { %v6514_v53 = vadd.f32 %v6513_v60, %v6475_v19  ;;  %v10907_v59 = vor.u32 %v13196_v21, %v10904_v48  ;;  %v13220_v19 = vld [vmem:[#allocation7 + $0x414] sm:$0xf]  ;;  %v11003_v28 = vor.u32 %v13233_v52, %v11002_v3  ;;  %6929 = vmatpush.bf16.msrb.mxu2 %v13406_v9  ;;  %v10620_v24 = vld [vmem:[#allocation7 + $0x16c] sm:$0xf0] }
 0x534   :  { %v10999_v32 = vor.u32 %v13220_v19, %v10996_v20  ;;  %v13404_v52 = vld [vmem:[#allocation2 + $0x1c8] sm:$0xff] }
 0x535   :  { %v17472_v23 = vadd.f32 %v17445_v41, %v6514_v53 }
 0x536   :  { %6891 = vmatpush.bf16.msrb.mxu1 %v13397_v51  ;;  %v10712_v51 = vld [vmem:[#allocation7 + $0x22c] sm:$0xf0] }
 0x537   :  { %v6515_v11 = vpop.f32.mrf.mxu3  ;;  %6930 = vmatpush.bf16.msrb.mxu2 %v13405_v5  ;;  %v13403_v5 = vld [vmem:[#allocation2 + $0x1e8] sm:$0xff] }
 0x538   :  { %v6476_v8 = vpop.f32.mrf.mxu2 }
 0x539   :  { %v6477_v46 = vadd.f32 %v6476_v8, %v6438_v0  ;;  %v6440_v41 = vpop.f32.mrf.mxu1  ;;  %v11004_v0 = vld [vmem:[#allocation7 + $0x47c] sm:$0xf0] }
 0x53a   :  { %v6441_v27 = vadd.f32 %v6440_v41, %v17412_v18  ;;  %v17481_v36 = vpop.f32.mrf.mxu0  ;;  %v11007_v57 = vor.u32 %v13221_v35, %v11004_v0  ;;  %v13136_v41 = vld [vmem:[#allocation7 + $0x170] sm:$0xf0] }
 0x53b   :  { %v6516_v40 = vadd.f32 %v6515_v11, %v6477_v46  ;;  %6931 = vmatpush.bf16.msrb.mxu2 %v13404_v52 }
 0x53c   :  { %6605 = vmatmul.bf16.gmra.mxu1 %v10899_v14  ;;  %6683 = vmatmul.bf16.gmra.mxu3 %v10907_v59 }
 0x53d   :  { %v17478_v39 = vadd.f32 %v17451_v6, %v6516_v40  ;;  %6644 = vmatmul.bf16.gmra.mxu2 %v10903_v43  ;;  %v10526_v6 = vld [vmem:[#allocation7 + $0x48] sm:$0xf]  ;;  %v10626_v43 = vld [vmem:[#allocation7 + $0x110] sm:$0xf]  ;;  %v10518_v40 = vld [vmem:[#allocation7 + $0x40] sm:$0xf] }
 0x53e   :  { %v10527_v60 = vor.u32 %v13111_v42, %v10526_v6  ;;  %v10627_v15 = vor.u32 %v13136_v41, %v10626_v43 }
 0x53f   :  { %v6518_v63 = vpop.f32.mrf.mxu3  ;;  %6932 = vmatpush.bf16.msrb.mxu2 %v13403_v5  ;;  %v13185_v5 = vld [vmem:[#allocation7 + $0x2f8] sm:$0xf0] }
 0x540   :  { %v6479_v29 = vpop.f32.mrf.mxu2  ;;  %6858 = vmatmul.bf16.vlgmr.msra.gmra.mxu0 %v10527_v60 }
 0x541   :  { %v6480_v49 = vadd.f32 %v6479_v29, %v6441_v27  ;;  %v6442_v18 = vpop.f32.mrf.mxu1  ;;  %v10512_v27 = vld [vmem:[#allocation7 + $0x9c] sm:$0xf0]  ;;  %v10520_v29 = vld [vmem:[#allocation7 + $0xa4] sm:$0xf0] }
 0x542   :  { %v6443_v50 = vadd.f32 %v6442_v18, %v17418_v2  ;;  %v17487_v4 = vpop.f32.mrf.mxu0  ;;  %v10519_v18 = vor.u32 %v13110_v10, %v10518_v40  ;;  %v13395_v10 = vld [vmem:[#allocation2 + $0x3e8] sm:$0xff] }
 0x543   :  { %v6519_v22 = vadd.f32 %v6518_v63, %v6480_v49 }
 0x545   :  { %v17484_v55 = vadd.f32 %v17457_v61, %v6519_v22  ;;  %v10523_v22 = vor.u32 %v13098_v13, %v10520_v29 }
 0x547   :  { %v6520_v37 = vpop.f32.mrf.mxu3 }
 0x548   :  { %v6481_v53 = vpop.f32.mrf.mxu2 }
 0x549   :  { %v6482_v2 = vadd.f32 %v6481_v53, %v6443_v50  ;;  %v6445_v31 = vpop.f32.mrf.mxu1 }
 0x54a   :  { %v6446_v34 = vadd.f32 %v6445_v31, %v17424_v16  ;;  %v17493_v16 = vpop.f32.mrf.mxu0  ;;  %v10612_v31 = vld [vmem:[#allocation7 + $0x164] sm:$0xf0] }
 0x54b   :  { %v6521_v61 = vadd.f32 %v6520_v37, %v6482_v2  ;;  %v10726_v2 = vld [vmem:[#allocation7 + $0x1d8] sm:$0xf]  ;;  %v13161_v37 = vld [vmem:[#allocation7 + $0x238] sm:$0xf0] }
 0x54c   :  { %6610 = vmatmul.bf16.gmra.mxu1 %v10999_v32  ;;  %6688 = vmatmul.bf16.gmra.mxu3 %v11007_v57  ;;  %v10727_v9 = vor.u32 %v13161_v37, %v10726_v2  ;;  %v10618_v57 = vld [vmem:[#allocation7 + $0x108] sm:$0xf] }
 0x54d   :  { %v17490_v45 = vadd.f32 %v17463_v44, %v6521_v61  ;;  %6649 = vmatmul.bf16.gmra.mxu2 %v11003_v28  ;;  %v13097_v44 = vld [vmem:[#allocation7 + $0x3c] sm:$0xf]  ;;  %v13396_v28 = vld [vmem:[#allocation2 + $0x140] sm:$0xff] }
 0x54e   :  { %v10515_v17 = vor.u32 %v13097_v44, %v10512_v27  ;;  %v13123_v61 = vld [vmem:[#allocation7 + $0x10c] sm:$0xf]  ;;  %6892 = vmatpush.bf16.msrb.mxu1 %v13396_v28  ;;  %v13394_v28 = vld [vmem:[#allocation2 + $0x218] sm:$0xff] }
 0x54f   :  { %v6523_v8 = vpop.f32.mrf.mxu3 }
 0x550   :  { %v6484_v21 = vpop.f32.mrf.mxu2  ;;  %6863 = vmatmul.bf16.gmra.mxu0 %v10627_v15 }
 0x551   :  { %v6485_v48 = vadd.f32 %v6484_v21, %v6446_v34  ;;  %v6447_v46 = vpop.f32.mrf.mxu1  ;;  %v13135_v34 = vld [vmem:[#allocation7 + $0x168] sm:$0xf0] }
 0x552   :  { %v6448_v11 = vadd.f32 %v6447_v46, %v17430_v62  ;;  %v17499_v42 = vpop.f32.mrf.mxu0  ;;  %v10619_v46 = vor.u32 %v13135_v34, %v10618_v57  ;;  %6893 = vmatpush.bf16.msrb.mxu1 %v13395_v10  ;;  %v10820_v10 = vld [vmem:[#allocation7 + $0x2fc] sm:$0xf0] }
 0x553   :  { %v6524_v14 = vadd.f32 %v6523_v8, %v6485_v48 }
 0x555   :  { %v17496_v59 = vadd.f32 %v17469_v12, %v6524_v14  ;;  %v10623_v14 = vor.u32 %v13123_v61, %v10620_v24  ;;  %v13414_v24 = vld [vmem:[#allocation2 + $0x600] sm:$0xff] }
 0x556   :  { %6894 = vmatpush.bf16.msrb.mxu1 %v13394_v28 }
 0x557   :  { %v6525_v63 = vpop.f32.mrf.mxu3 }
 0x558   :  { %v6486_v49 = vpop.f32.mrf.mxu2 }
 0x559   :  { %v6487_v62 = vadd.f32 %v6486_v49, %v6448_v11  ;;  %v6450_v50 = vpop.f32.mrf.mxu1 }
 0x55a   :  { %v6451_v12 = vadd.f32 %v6450_v50, %v17436_v56  ;;  %v10718_v50 = vld [vmem:[#allocation7 + $0x1d0] sm:$0xf] }
 0x55b   :  { %v6526_v6 = vadd.f32 %v6525_v63, %v6487_v62  ;;  %v10826_v62 = vld [vmem:[#allocation7 + $0x2a0] sm:$0xf]  ;;  %v13186_v63 = vld [vmem:[#allocation7 + $0x300] sm:$0xf0] }
 0x55c   :  { %6741 = vmatmul.bf16.vlgmr.msra.gmra.mxu1 %v10515_v17  ;;  %6819 = vmatmul.bf16.vlgmr.msra.gmra.mxu3 %v10523_v22  ;;  %v13147_v17 = vld [vmem:[#allocation7 + $0x1cc] sm:$0xf]  ;;  %v13160_v22 = vld [vmem:[#allocation7 + $0x230] sm:$0xf0] }
 0x55d   :  { %v17502_v19 = vadd.f32 %v17475_v1, %v6526_v6  ;;  %6780 = vmatmul.bf16.vlgmr.msra.gmra.mxu2 %v10519_v18  ;;  %v17505_v56 = vpop.f32.mrf.mxu0  ;;  %v13122_v1 = vld [vmem:[#allocation7 + $0x104] sm:$0xf]  ;;  %v10827_v18 = vor.u32 %v13186_v63, %v10826_v62  ;;  %v10720_v6 = vld [vmem:[#allocation7 + $0x234] sm:$0xf0]  ;;  %v10719_v52 = vor.u32 %v13160_v22, %v10718_v50 }
 0x55e   :  { %v10615_v8 = vor.u32 %v13122_v1, %v10612_v31 }
 0x55f   :  { %v6528_v3 = vpop.f32.mrf.mxu3 }
 0x560   :  { %v6489_v60 = vpop.f32.mrf.mxu2  ;;  %6868 = vmatmul.bf16.gmra.mxu0 %v10727_v9  ;;  %v13415_v9 = vld [vmem:[#allocation2 + $0xa8] sm:$0xff] }
 0x561   :  { %v6490_v20 = vadd.f32 %v6489_v60, %v6451_v12  ;;  %v6452_v35 = vpop.f32.mrf.mxu1  ;;  %v13148_v12 = vld [vmem:[#allocation7 + $0x1d4] sm:$0xf]  ;;  %6967 = vmatpush.bf16.msrb.mxu3 %v13415_v9  ;;  %v11026_v9 = vld [vmem:[#allocation7 + $0x430] sm:$0xf] }
 0x562   :  { %v6453_v0 = vadd.f32 %v6452_v35, %v17442_v26  ;;  %v13402_v35 = vld [vmem:[#allocation2 + $0x298] sm:$0xff] }
 0x563   :  { %v6529_v53 = vadd.f32 %v6528_v3, %v6490_v20  ;;  %v10715_v3 = vor.u32 %v13147_v17, %v10712_v51  ;;  %6933 = vmatpush.bf16.msrb.mxu2 %v13402_v35  ;;  %v13422_v51 = vld [vmem:[#allocation2 + $0x2e0] sm:$0xff] }
 0x565   :  { %v17508_v32 = vadd.f32 %v17481_v36, %v6529_v53  ;;  %v17511_v41 = vpop.f32.mrf.mxu0  ;;  %v10723_v53 = vor.u32 %v13148_v12, %v10720_v6  ;;  %6968 = vmatpush.bf16.msrb.mxu3 %v13414_v24  ;;  %v13392_v24 = vld [vmem:[#allocation2 + $0x170] sm:$0xff] }
 0x567   :  { %v6530_v48 = vpop.f32.mrf.mxu3 }
 0x568   :  { %v6491_v26 = vpop.f32.mrf.mxu2 }
 0x569   :  { %v6492_v21 = vadd.f32 %v6491_v26, %v6453_v0  ;;  %v6455_v11 = vpop.f32.mrf.mxu1 }
 0x56a   :  { %v6456_v36 = vadd.f32 %v6455_v11, %v17448_v38  ;;  %v10812_v11 = vld [vmem:[#allocation7 + $0x2f4] sm:$0xf0] }
 0x56b   :  { %v6531_v43 = vadd.f32 %v6530_v48, %v6492_v21  ;;  %v13172_v21 = vld [vmem:[#allocation7 + $0x294] sm:$0xf] }
 0x56c   :  { %6746 = vmatmul.bf16.gmra.mxu1 %v10615_v8  ;;  %6824 = vmatmul.bf16.gmra.mxu3 %v10623_v14  ;;  %v13211_v8 = vld [vmem:[#allocation7 + $0x3c8] sm:$0xf0]  ;;  %v10818_v14 = vld [vmem:[#allocation7 + $0x298] sm:$0xf] }
 0x56d   :  { %v17514_v44 = vadd.f32 %v17487_v4, %v6531_v43  ;;  %6785 = vmatmul.bf16.gmra.mxu2 %v10619_v46  ;;  %v17517_v38 = vpop.f32.mrf.mxu0  ;;  %v10819_v62 = vor.u32 %v13185_v5, %v10818_v14 }
 0x56f   :  { %v6533_v40 = vpop.f32.mrf.mxu3 }
 0x570   :  { %v6494_v15 = vpop.f32.mrf.mxu2  ;;  %6873 = vmatmul.bf16.gmra.mxu0 %v10827_v18  ;;  %v13412_v18 = vld [vmem:[#allocation2] sm:$0xff] }
 0x571   :  { %v6495_v27 = vadd.f32 %v6494_v15, %v6456_v36  ;;  %v6457_v13 = vpop.f32.mrf.mxu1  ;;  %v13401_v36 = vld [vmem:[#allocation2 + $0x4b8] sm:$0xff] }
 0x572   :  { %v6458_v29 = vadd.f32 %v6457_v13, %v17454_v54  ;;  %v13413_v15 = vld [vmem:[#allocation2 + $0x5b8] sm:$0xff]  ;;  %6934 = vmatpush.bf16.msrb.mxu2 %v13401_v36 }
 0x573   :  { %v6534_v49 = vadd.f32 %v6533_v40, %v6495_v27  ;;  %v13423_v27 = vld [vmem:[#allocation2 + $0x528] sm:$0xff]  ;;  %v13173_v40 = vld [vmem:[#allocation7 + $0x29c] sm:$0xf]  ;;  %6969 = vmatpush.bf16.msrb.mxu3 %v13413_v15 }
 0x574   :  { %7006 = vmatpush.bf16.msrb.mxu0 %v13423_v27  ;;  %v10823_v17 = vor.u32 %v13173_v40, %v10820_v10  ;;  %v13408_v27 = vld [vmem:[#allocation2 + $0x348] sm:$0xff]  ;;  %v13418_v40 = vld [vmem:[#allocation2 + $0x620] sm:$0xff] }
 0x575   :  { %v17520_v4 = vadd.f32 %v17493_v16, %v6534_v49  ;;  %v17523_v37 = vpop.f32.mrf.mxu0  ;;  %v10815_v49 = vor.u32 %v13172_v21, %v10812_v11  ;;  %v13409_v21 = vld [vmem:[#allocation2 + $0x88] sm:$0xff] }
 0x577   :  { %v6535_v54 = vpop.f32.mrf.mxu3  ;;  %6970 = vmatpush.bf16.msrb.mxu3 %v13412_v18  ;;  %v13431_v18 = vld [vmem:[#allocation2 + $0x1c0] sm:$0xff] }
 0x578   :  { %v6496_v60 = vpop.f32.mrf.mxu2  ;;  %7007 = vmatpush.bf16.msrb.mxu0 %v13422_v51  ;;  %v13416_v51 = vld [vmem:[#allocation2 + $0x260] sm:$0xff] }
 0x579   :  { %v6497_v20 = vadd.f32 %v6496_v60, %v6458_v29  ;;  %v6586_v0 = vpop.f32.mrf.mxu1  ;;  %v13411_v60 = vld [vmem:[#allocation2 + $0x1f0] sm:$0xff] }
 0x57a   :  { %v6587_v16 = vadd.f32 %v6586_v0, %v17460_v25  ;;  %v13410_v0 = vld [vmem:[#allocation2 + $0x90] sm:$0xff] }
 0x57b   :  { %v6536_v2 = vadd.f32 %v6535_v54, %v6497_v20  ;;  %v13421_v20 = vld [vmem:[#allocation2 + $0x2d0] sm:$0xff]  ;;  %6971 = vmatpush.bf16.msrb.mxu3 %v13411_v60 }
 0x57c   :  { %6751 = vmatmul.bf16.gmra.mxu1 %v10715_v3  ;;  %6829 = vmatmul.bf16.gmra.mxu3 %v10723_v53  ;;  %v13420_v53 = vld [vmem:[#allocation2 + $0x1b0] sm:$0xff] }
 0x57d   :  { %v17526_v1 = vadd.f32 %v17499_v42, %v6536_v2  ;;  %6790 = vmatmul.bf16.gmra.mxu2 %v10719_v52  ;;  %v17529_v48 = vpop.f32.mrf.mxu0  ;;  %v10926_v42 = vld [vmem:[#allocation7 + $0x368] sm:$0xf]  ;;  %7008 = vmatpush.bf16.msrb.mxu0 %v13421_v20  ;;  %v13113_v20 = vld [vmem:[#allocation7 + $0xb8] sm:$0xf0] }
 0x57e   :  { %v10927_v43 = vor.u32 %v13211_v8, %v10926_v42  ;;  %v13419_v42 = vld [vmem:[#allocation2 + $0x410] sm:$0xff]  ;;  %v10920_v8 = vld [vmem:[#allocation7 + $0x3c4] sm:$0xf0] }
 0x57f   :  { %v6664_v34 = vpop.f32.mrf.mxu3  ;;  %6972 = vmatpush.bf16.msrb.mxu3 %v13410_v0  ;;  %v13235_v0 = vld [vmem:[#allocation7 + $0x488] sm:$0xf0] }
 0x580   :  { %v6625_v31 = vpop.f32.mrf.mxu2  ;;  %6878 = vmatmul.bf16.gmra.mxu0 %v10927_v43 }
 0x581   :  { %v6626_v57 = vadd.f32 %v6625_v31, %v6587_v16  ;;  %v6588_v61 = vpop.f32.mrf.mxu1  ;;  %7009 = vmatpush.bf16.msrb.mxu0 %v13420_v53  ;;  %v13236_v31 = vld [vmem:[#allocation7 + $0x490] sm:$0xf0]  ;;  %v13223_v53 = vld [vmem:[#allocation7 + $0x42c] sm:$0xf] }
 0x582   :  { %v6589_v25 = vadd.f32 %v6588_v61, %v17466_v30  ;;  %v10918_v61 = vld [vmem:[#allocation7 + $0x360] sm:$0xf] }
 0x583   :  { %v6665_v26 = vadd.f32 %v6664_v34, %v6626_v57  ;;  %v10912_v34 = vld [vmem:[#allocation7 + $0x3bc] sm:$0xf0]  ;;  %6973 = vmatpush.bf16.msrb.mxu3 %v13409_v21 }
 0x584   :  { %v13430_v21 = vld [vmem:[#allocation2 + $0x558] sm:$0xff] }
 0x585   :  { %v17532_v46 = vadd.f32 %v17505_v56, %v6665_v26  ;;  %v13393_v56 = vld [vmem:[#allocation2 + $0x3f0] sm:$0xff]  ;;  %v17535_v12 = vpop.f32.mrf.mxu0  ;;  %v13210_v26 = vld [vmem:[#allocation7 + $0x3c0] sm:$0xf0]  ;;  %7010 = vmatpush.bf16.msrb.mxu0 %v13419_v42 }
 0x586   :  { %6895 = vmatpush.bf16.msrb.mxu1 %v13393_v56  ;;  %v10919_v5 = vor.u32 %v13210_v26, %v10918_v61 }
 0x587   :  { %v6666_v29 = vpop.f32.mrf.mxu3  ;;  %6974 = vmatpush.bf16.msrb.mxu3 %v13408_v27 }
 0x588   :  { %v6627_v30 = vpop.f32.mrf.mxu2 }
 0x589   :  { %v6628_v13 = vadd.f32 %v6627_v30, %v6589_v25  ;;  %v6591_v63 = vpop.f32.mrf.mxu1  ;;  %v11027_v25 = vor.u32 %v13236_v31, %v11026_v9  ;;  %7011 = vmatpush.bf16.msrb.mxu0 %v13418_v40  ;;  %v10528_v40 = vld [vmem:[#allocation7 + $0xac] sm:$0xf0] }
 0x58a   :  { %v6592_v50 = vadd.f32 %v6591_v63, %v17472_v23  ;;  %v13400_v23 = vld [vmem:[#allocation2 + $0x470] sm:$0xff]  ;;  %6896 = vmatpush.bf16.msrb.mxu1 %v13392_v24 }
 0x58b   :  { %v6667_v22 = vadd.f32 %v6666_v29, %v6628_v13  ;;  %6935 = vmatpush.bf16.msrb.mxu2 %v13400_v23  ;;  %v11012_v23 = vld [vmem:[#allocation7 + $0x484] sm:$0xf0] }
 0x58c   :  { %6756 = vmatmul.bf16.gmra.mxu1 %v10815_v49  ;;  %6834 = vmatmul.bf16.gmra.mxu3 %v10823_v17  ;;  %v13439_v49 = vld [vmem:[#allocation2 + $0x290] sm:$0xff] }
 0x58d   :  { %v17538_v6 = vadd.f32 %v17511_v41, %v6667_v22  ;;  %6795 = vmatmul.bf16.gmra.mxu2 %v10819_v62  ;;  %v13197_v41 = vld [vmem:[#allocation7 + $0x35c] sm:$0xf]  ;;  %v17541_v28 = vpop.f32.mrf.mxu0  ;;  %v13417_v62 = vld [vmem:[#allocation2 + $0x220] sm:$0xff] }
 0x58e   :  { %v10915_v43 = vor.u32 %v13197_v41, %v10912_v34  ;;  %7012 = vmatpush.bf16.msrb.mxu0 %v13417_v62  ;;  %7045 = vmatpush.bf16.msra.mxu1 %v13431_v18  ;;  %v13438_v34 = vld [vmem:[#allocation2 + $0x4e8] sm:$0xff]  ;;  %v10536_v62 = vld [vmem:[#allocation7 + $0xb4] sm:$0xf0] }
 0x58f   :  { %v6669_v52 = vpop.f32.mrf.mxu3  ;;  %7084 = vmatpush.bf16.msra.mxu2 %v13439_v49  ;;  %v13100_v49 = vld [vmem:[#allocation7 + $0x54] sm:$0xf] }
 0x590   :  { %v6630_v54 = vpop.f32.mrf.mxu2  ;;  %6883 = vmatmul.bf16.gmra.mxu0 %v11027_v25 }
 0x591   :  { %v6631_v3 = vadd.f32 %v6630_v54, %v6592_v50  ;;  %v6593_v35 = vpop.f32.mrf.mxu1 }
 0x592   :  { %v6594_v2 = vadd.f32 %v6593_v35, %v17478_v39  ;;  %v13198_v39 = vld [vmem:[#allocation7 + $0x364] sm:$0xf]  ;;  %7013 = vmatpush.bf16.msrb.mxu0 %v13416_v51  ;;  %v11018_v35 = vld [vmem:[#allocation7 + $0x428] sm:$0xf]  ;;  %7046 = vmatpush.bf16.msra.mxu1 %v13430_v21  ;;  %v13429_v51 = vld [vmem:[#allocation2 + $0x228] sm:$0xff] }
 0x593   :  { %v6670_v16 = vadd.f32 %v6669_v52, %v6631_v3  ;;  %v10923_v15 = vor.u32 %v13198_v39, %v10920_v8  ;;  %v13222_v3 = vld [vmem:[#allocation7 + $0x424] sm:$0xf]  ;;  %v11019_v31 = vor.u32 %v13235_v0, %v11018_v35  ;;  %7085 = vmatpush.bf16.msra.mxu2 %v13438_v34  ;;  %v13436_v35 = vld [vmem:[#allocation2 + $0x560] sm:$0xff]  ;;  %v10628_v34 = vld [vmem:[#allocation7 + $0x174] sm:$0xf0] }
 0x594   :  { %v11015_v9 = vor.u32 %v13222_v3, %v11012_v23 }
 0x595   :  { %v17544_v57 = vadd.f32 %v17517_v38, %v6670_v16  ;;  %v17547_v13 = vpop.f32.mrf.mxu0 }
 0x596   :  { %7047 = vmatpush.bf16.msra.mxu1 %v13429_v51  ;;  %v13162_v51 = vld [vmem:[#allocation7 + $0x240] sm:$0xf0] }
 0x597   :  { %v6671_v36 = vpop.f32.mrf.mxu3 }
 0x598   :  { %v6632_v11 = vpop.f32.mrf.mxu2 }
 0x599   :  { %v6633_v14 = vadd.f32 %v6632_v11, %v6594_v2  ;;  %v6596_v38 = vpop.f32.mrf.mxu1  ;;  %v11020_v2 = vld [vmem:[#allocation7 + $0x48c] sm:$0xf0] }
 0x59a   :  { %v6597_v10 = vadd.f32 %v6596_v38, %v17484_v55  ;;  %v11023_v24 = vor.u32 %v13223_v53, %v11020_v2 }
 0x59b   :  { %v6672_v30 = vadd.f32 %v6671_v36, %v6633_v14 }
 0x59c   :  { %6761 = vmatmul.bf16.gmra.mxu1 %v10915_v43  ;;  %6839 = vmatmul.bf16.gmra.mxu3 %v10923_v15  ;;  %v13437_v15 = vld [vmem:[#allocation2 + $0xa0] sm:$0xff] }
 0x59d   :  { %v17550_v29 = vadd.f32 %v17523_v37, %v6672_v30  ;;  %6800 = vmatmul.bf16.gmra.mxu2 %v10919_v5  ;;  %v17553_v60 = vpop.f32.mrf.mxu0  ;;  %v10542_v37 = vld [vmem:[#allocation7 + $0x58] sm:$0xf]  ;;  %v13138_v5 = vld [vmem:[#allocation7 + $0x180] sm:$0xf0]  ;;  %v13112_v30 = vld [vmem:[#allocation7 + $0xb0] sm:$0xf0] }
 0x59e   :  { %v10543_v52 = vor.u32 %v13113_v20, %v10542_v37  ;;  %7086 = vmatpush.bf16.msra.mxu2 %v13437_v15 }
 0x59f   :  { %v6674_v17 = vpop.f32.mrf.mxu3 }
 0x5a0   :  { %v6635_v56 = vpop.f32.mrf.mxu2  ;;  %7014 = vmatmul.bf16.vlgmr.msrb.gmra.mxu0 %v10543_v52 }
 0x5a1   :  { %v6636_v63 = vadd.f32 %v6635_v56, %v6597_v10  ;;  %v6598_v55 = vpop.f32.mrf.mxu1  ;;  %v10534_v10 = vld [vmem:[#allocation7 + $0x50] sm:$0xf] }
 0x5a2   :  { %v6599_v50 = vadd.f32 %v6598_v55, %v17490_v45  ;;  %v10535_v55 = vor.u32 %v13112_v30, %v10534_v10  ;;  %7087 = vmatpush.bf16.msra.mxu2 %v13436_v35  ;;  %v13427_v10 = vld [vmem:[#allocation2 + $0x578] sm:$0xff]  ;;  %v13434_v35 = vld [vmem:[#allocation2 + $0x448] sm:$0xff] }
 0x5a3   :  { %v6675_v22 = vadd.f32 %v6674_v17, %v6636_v63 }
 0x5a5   :  { %v17556_v54 = vadd.f32 %v17529_v48, %v6675_v22  ;;  %v17562_v42 = vpop.f32.mrf.mxu0 }
 0x5a7   :  { %v6676_v41 = vpop.f32.mrf.mxu3 }
 0x5a8   :  { %v6637_v16 = vpop.f32.mrf.mxu2 }
 0x5a9   :  { %v6638_v45 = vadd.f32 %v6637_v16, %v6599_v50  ;;  %v6601_v61 = vpop.f32.mrf.mxu1  ;;  %v10539_v50 = vor.u32 %v13100_v49, %v10536_v62 }
 0x5aa   :  { %v6602_v25 = vadd.f32 %v6601_v61, %v17496_v59  ;;  %v10642_v59 = vld [vmem:[#allocation7 + $0x120] sm:$0xf]  ;;  %v10634_v61 = vld [vmem:[#allocation7 + $0x118] sm:$0xf] }
 0x5ab   :  { %v6677_v48 = vadd.f32 %v6676_v41, %v6638_v45  ;;  %v10643_v27 = vor.u32 %v13138_v5, %v10642_v59  ;;  %v13163_v45 = vld [vmem:[#allocation7 + $0x248] sm:$0xf0] }
 0x5ac   :  { %6766 = vmatmul.bf16.gmra.mxu1 %v11015_v9  ;;  %6844 = vmatmul.bf16.gmra.mxu3 %v11023_v24  ;;  %v13428_v9 = vld [vmem:[#allocation2 + $0x468] sm:$0xff]  ;;  %v13137_v24 = vld [vmem:[#allocation7 + $0x178] sm:$0xf0] }
 0x5ad   :  { %v17560_v26 = vadd.f32 %v17535_v12, %v6677_v48  ;;  %6805 = vmatmul.bf16.gmra.mxu2 %v11019_v31  ;;  %v13099_v12 = vld [vmem:[#allocation7 + $0x4c] sm:$0xf]  ;;  %v17568_v63 = vpop.f32.mrf.mxu0  ;;  %v10636_v48 = vld [vmem:[#allocation7 + $0x17c] sm:$0xf0]  ;;  %7048 = vmatpush.bf16.msra.mxu1 %v13428_v9 }
 0x5ae   :  { %v10531_v18 = vor.u32 %v13099_v12, %v10528_v40  ;;  %v13435_v12 = vld [vmem:[#allocation2 + $0xf0] sm:$0xff] }
 0x5af   :  { %v6679_v11 = vpop.f32.mrf.mxu3  ;;  %7088 = vmatpush.bf16.msra.mxu2 %v13435_v12 }
 0x5b0   :  { %v6640_v39 = vpop.f32.mrf.mxu2  ;;  %7019 = vmatmul.bf16.gmra.mxu0 %v10643_v27 }
 0x5b1   :  { %v6641_v8 = vadd.f32 %v6640_v39, %v6602_v25  ;;  %v6603_v14 = vpop.f32.mrf.mxu1  ;;  %v13125_v25 = vld [vmem:[#allocation7 + $0x11c] sm:$0xf]  ;;  %7049 = vmatpush.bf16.msra.mxu1 %v13427_v10 }
 0x5b2   :  { %v6604_v36 = vadd.f32 %v6603_v14, %v17502_v19 }
 0x5b3   :  { %v6680_v43 = vadd.f32 %v6679_v11, %v6641_v8  ;;  %v10635_v11 = vor.u32 %v13137_v24, %v10634_v61  ;;  %7089 = vmatpush.bf16.msra.mxu2 %v13434_v35  ;;  %v10934_v35 = vld [vmem:[#allocation7 + $0x370] sm:$0xf] }
 0x5b5   :  { %v17566_v38 = vadd.f32 %v17541_v28, %v6680_v43  ;;  %v17574_v53 = vpop.f32.mrf.mxu0 }
 0x5b7   :  { %v6681_v17 = vpop.f32.mrf.mxu3 }
 0x5b8   :  { %v6642_v56 = vpop.f32.mrf.mxu2 }
 0x5b9   :  { %v6643_v19 = vadd.f32 %v6642_v56, %v6604_v36  ;;  %v6606_v28 = vpop.f32.mrf.mxu1  ;;  %v10639_v36 = vor.u32 %v13125_v25, %v10636_v48  ;;  %v13188_v56 = vld [vmem:[#allocation7 + $0x310] sm:$0xf0]  ;;  %v10942_v48 = vld [vmem:[#allocation7 + $0x378] sm:$0xf] }
 0x5ba   :  { %v6607_v22 = vadd.f32 %v6606_v28, %v17508_v32  ;;  %v10742_v32 = vld [vmem:[#allocation7 + $0x1e8] sm:$0xf] }
 0x5bb   :  { %v6682_v37 = vadd.f32 %v6681_v17, %v6643_v19  ;;  %v10743_v31 = vor.u32 %v13163_v45, %v10742_v32  ;;  %v13426_v45 = vld [vmem:[#allocation2 + $0x158] sm:$0xff] }
 0x5bc   :  { %6897 = vmatmul.bf16.vlgmr.msrb.gmra.mxu1 %v10531_v18  ;;  %6975 = vmatmul.bf16.vlgmr.msrb.gmra.mxu3 %v10539_v50  ;;  %v10728_v18 = vld [vmem:[#allocation7 + $0x23c] sm:$0xf0]  ;;  %v13150_v50 = vld [vmem:[#allocation7 + $0x1e4] sm:$0xf] }
 0x5bd   :  { %v17572_v20 = vadd.f32 %v17547_v13, %v6682_v37  ;;  %6936 = vmatmul.bf16.vlgmr.msrb.gmra.mxu2 %v10535_v55  ;;  %v13124_v13 = vld [vmem:[#allocation7 + $0x114] sm:$0xf]  ;;  %v6859_v59 = vpop.f32.mrf.mxu0  ;;  %v10734_v55 = vld [vmem:[#allocation7 + $0x1e0] sm:$0xf]  ;;  %7050 = vmatpush.bf16.msra.mxu1 %v13426_v45 }
 0x5be   :  { %v10631_v8 = vor.u32 %v13124_v13, %v10628_v34 }
 0x5bf   :  { %v6684_v23 = vpop.f32.mrf.mxu3 }
 0x5c0   :  { %v6645_v3 = vpop.f32.mrf.mxu2  ;;  %7024 = vmatmul.bf16.gmra.mxu0 %v10743_v31 }
 0x5c1   :  { %v6646_v52 = vadd.f32 %v6645_v3, %v6607_v22  ;;  %v6608_v0 = vpop.f32.mrf.mxu1  ;;  %v10736_v22 = vld [vmem:[#allocation7 + $0x244] sm:$0xf0] }
 0x5c2   :  { %v6609_v2 = vadd.f32 %v6608_v0, %v17514_v44 }
 0x5c3   :  { %v6685_v16 = vadd.f32 %v6684_v23, %v6646_v52  ;;  %v10735_v23 = vor.u32 %v13162_v51, %v10734_v55 }
 0x5c5   :  { %v17578_v41 = vadd.f32 %v17553_v60, %v6685_v16  ;;  %v6861_v28 = vpop.f32.mrf.mxu0 }
 0x5c7   :  { %v6686_v44 = vpop.f32.mrf.mxu3 }
 0x5c8   :  { %v6647_v21 = vpop.f32.mrf.mxu2 }
 0x5c9   :  { %v6648_v39 = vadd.f32 %v6647_v21, %v6609_v2  ;;  %v6611_v14 = vpop.f32.mrf.mxu1  ;;  %v10739_v2 = vor.u32 %v13150_v50, %v10736_v22  ;;  %v13213_v21 = vld [vmem:[#allocation7 + $0x3d8] sm:$0xf0] }
 0x5ca   :  { %v6612_v60 = vadd.f32 %v6611_v14, %v17520_v4  ;;  %v10842_v4 = vld [vmem:[#allocation7 + $0x2b0] sm:$0xf]  ;;  %v13187_v14 = vld [vmem:[#allocation7 + $0x308] sm:$0xf0] }
 0x5cb   :  { %v6687_v43 = vadd.f32 %v6686_v44, %v6648_v39  ;;  %v10843_v17 = vor.u32 %v13188_v56, %v10842_v4  ;;  %v13174_v39 = vld [vmem:[#allocation7 + $0x2a4] sm:$0xf]  ;;  %v10943_v44 = vor.u32 %v13213_v21, %v10942_v48 }
 0x5cc   :  { %6902 = vmatmul.bf16.gmra.mxu1 %v10631_v8  ;;  %6980 = vmatmul.bf16.gmra.mxu3 %v10639_v36  ;;  %v10828_v8 = vld [vmem:[#allocation7 + $0x304] sm:$0xf0]  ;;  %v13175_v36 = vld [vmem:[#allocation7 + $0x2ac] sm:$0xf] }
 0x5cd   :  { %v17582_v5 = vadd.f32 %v17562_v42, %v6687_v43  ;;  %6941 = vmatmul.bf16.gmra.mxu2 %v10635_v11  ;;  %v13149_v42 = vld [vmem:[#allocation7 + $0x1dc] sm:$0xf]  ;;  %v6864_v9 = vpop.f32.mrf.mxu0  ;;  %v10834_v11 = vld [vmem:[#allocation7 + $0x2a8] sm:$0xf] }
 0x5cf   :  { %v6689_v40 = vpop.f32.mrf.mxu3 }
 0x5d0   :  { %v6650_v15 = vpop.f32.mrf.mxu2  ;;  %7029 = vmatmul.bf16.gmra.mxu0 %v10843_v17 }
 0x5d1   :  { %v6651_v27 = vadd.f32 %v6650_v15, %v6612_v60  ;;  %v6613_v30 = vpop.f32.mrf.mxu1  ;;  %v10836_v60 = vld [vmem:[#allocation7 + $0x30c] sm:$0xf0] }
 0x5d2   :  { %v6614_v49 = vadd.f32 %v6613_v30, %v17526_v1  ;;  %v10731_v1 = vor.u32 %v13149_v42, %v10728_v18  ;;  %v10839_v30 = vor.u32 %v13175_v36, %v10836_v60  ;;  %v13432_v18 = vld [vmem:[#allocation2 + $0xd8] sm:$0xff]  ;;  %v13224_v36 = vld [vmem:[#allocation7 + $0x434] sm:$0xf]  ;;  %v11028_v60 = vld [vmem:[#allocation7 + $0x494] sm:$0xf0] }
 0x5d3   :  { %v6690_v62 = vadd.f32 %v6689_v40, %v6651_v27  ;;  %v10831_v27 = vor.u32 %v13174_v39, %v10828_v8  ;;  %v13425_v40 = vld [vmem:[#allocation2 + $0x2c0] sm:$0xff] }
 0x5d4   :  { %7051 = vmatpush.bf16.msra.mxu1 %v13425_v40 }
 0x5d5   :  { %v17586_v19 = vadd.f32 %v17568_v63, %v6690_v62 }
 0x5d7   :  { %v6691_v52 = vpop.f32.mrf.mxu3 }
 0x5d8   :  { %v6652_v37 = vpop.f32.mrf.mxu2 }
 0x5d9   :  { %v6653_v3 = vadd.f32 %v6652_v37, %v6614_v49  ;;  %v6742_v0 = vpop.f32.mrf.mxu1  ;;  %v11042_v37 = vld [vmem:[#allocation7 + $0x440] sm:$0xf] }
 0x5da   :  { %v6743_v63 = vadd.f32 %v6742_v0, %v17532_v46  ;;  %v13212_v0 = vld [vmem:[#allocation7 + $0x3d0] sm:$0xf0] }
 0x5db   :  { %v6692_v16 = vadd.f32 %v6691_v52, %v6653_v3  ;;  %v13238_v3 = vld [vmem:[#allocation7 + $0x4a0] sm:$0xf0]  ;;  %v13199_v52 = vld [vmem:[#allocation7 + $0x36c] sm:$0xf] }
 0x5dc   :  { %6907 = vmatmul.bf16.gmra.mxu1 %v10731_v1  ;;  %6985 = vmatmul.bf16.gmra.mxu3 %v10739_v2  ;;  %v11043_v1 = vor.u32 %v13238_v3, %v11042_v37  ;;  %v13200_v2 = vld [vmem:[#allocation7 + $0x374] sm:$0xf] }
 0x5dd   :  { %v17590_v32 = vadd.f32 %v17574_v53, %v6692_v16  ;;  %6946 = vmatmul.bf16.gmra.mxu2 %v10735_v23  ;;  %v13433_v53 = vld [vmem:[#allocation2 + $0x10] sm:$0xff]  ;;  %v10928_v23 = vld [vmem:[#allocation7 + $0x3cc] sm:$0xf0] }
 0x5de   :  { %7090 = vmatpush.bf16.msra.mxu2 %v13433_v53  ;;  %v10936_v16 = vld [vmem:[#allocation7 + $0x3d4] sm:$0xf0] }
 0x5df   :  { %v6820_v34 = vpop.f32.mrf.mxu3 }
 0x5e0   :  { %v6781_v13 = vpop.f32.mrf.mxu2  ;;  %7034 = vmatmul.bf16.gmra.mxu0 %v10943_v44 }
 0x5e1   :  { %v6782_v31 = vadd.f32 %v6781_v13, %v6743_v63  ;;  %v6744_v61 = vpop.f32.mrf.mxu1  ;;  %v10931_v13 = vor.u32 %v13199_v52, %v10928_v23  ;;  %v13101_v52 = vld [vmem:[#allocation7 + $0x5c] sm:$0xf] }
 0x5e2   :  { %v6745_v24 = vadd.f32 %v6744_v61, %v17538_v6  ;;  %v10835_v6 = vor.u32 %v13187_v14, %v10834_v11  ;;  %7091 = vmatpush.bf16.msra.mxu2 %v13432_v18  ;;  %v10939_v61 = vor.u32 %v13200_v2, %v10936_v16 }
 0x5e3   :  { %v6821_v25 = vadd.f32 %v6820_v34, %v6782_v31  ;;  %v10935_v31 = vor.u32 %v13212_v0, %v10934_v35 }
 0x5e5   :  { %v17593_v46 = vadd.f32 %v6859_v59, %v6821_v25  ;;  %v6866_v59 = vpop.f32.mrf.mxu0 }
 0x5e7   :  { %v6822_v15 = vpop.f32.mrf.mxu3 }
 0x5e8   :  { %v6783_v43 = vpop.f32.mrf.mxu2 }
 0x5e9   :  { %v6784_v12 = vadd.f32 %v6783_v43, %v6745_v24  ;;  %v6747_v10 = vpop.f32.mrf.mxu1  ;;  %v11034_v43 = vld [vmem:[#allocation7 + $0x438] sm:$0xf] }
 0x5ea   :  { %v6748_v49 = vadd.f32 %v6747_v10, %v17544_v57 }
 0x5eb   :  { %v6823_v62 = vadd.f32 %v6822_v15, %v6784_v12  ;;  %v13225_v12 = vld [vmem:[#allocation7 + $0x43c] sm:$0xf]  ;;  %v11036_v15 = vld [vmem:[#allocation7 + $0x49c] sm:$0xf0] }
 0x5ec   :  { %6912 = vmatmul.bf16.gmra.mxu1 %v10831_v27  ;;  %6990 = vmatmul.bf16.gmra.mxu3 %v10839_v30  ;;  %v11031_v30 = vor.u32 %v13224_v36, %v11028_v60 }
 0x5ed   :  { %v17596_v4 = vadd.f32 %v6861_v28, %v6823_v62  ;;  %6951 = vmatmul.bf16.gmra.mxu2 %v10835_v6  ;;  %v6869_v22 = vpop.f32.mrf.mxu0  ;;  %v13424_v28 = vld [vmem:[#allocation2 + $0x130] sm:$0xff]  ;;  %v11039_v62 = vor.u32 %v13225_v12, %v11036_v15 }
 0x5ee   :  { %7052 = vmatpush.bf16.msra.mxu1 %v13424_v28  ;;  %v10544_v28 = vld [vmem:[#allocation7 + $0xbc] sm:$0xf0] }
 0x5ef   :  { %v6825_v17 = vpop.f32.mrf.mxu3  ;;  %v10547_v2 = vor.u32 %v13101_v52, %v10544_v28 }
 0x5f0   :  { %v6786_v56 = vpop.f32.mrf.mxu2  ;;  %7039 = vmatmul.bf16.gmra.mxu0 %v11043_v1  ;;  %v10550_v1 = vld [vmem:[#allocation7 + $0x60] sm:$0xf] }
 0x5f1   :  { %v6787_v42 = vadd.f32 %v6786_v56, %v6748_v49  ;;  %v6749_v55 = vpop.f32.mrf.mxu1 }
 0x5f2   :  { %v6750_v51 = vadd.f32 %v6749_v55, %v17550_v29 }
 0x5f3   :  { %v6826_v50 = vadd.f32 %v6825_v17, %v6787_v42 }
 0x5f5   :  { %v17599_v57 = vadd.f32 %v6864_v9, %v6826_v50  ;;  %v6871_v48 = vpop.f32.mrf.mxu0 }
 0x5f7   :  { %v6827_v29 = vpop.f32.mrf.mxu3 }
 0x5f8   :  { %v6788_v63 = vpop.f32.mrf.mxu2 }
 0x5f9   :  { %v6789_v45 = vadd.f32 %v6788_v63, %v6750_v51  ;;  %v6752_v34 = vpop.f32.mrf.mxu1 }
 0x5fa   :  { %v6753_v9 = vadd.f32 %v6752_v34, %v17556_v54  ;;  %v13237_v54 = vld [vmem:[#allocation7 + $0x498] sm:$0xf0] }
 0x5fb   :  { %v6828_v24 = vadd.f32 %v6827_v29, %v6789_v45 }
 0x5fc   :  { %6917 = vmatmul.bf16.gmra.mxu1 %v10931_v13  ;;  %6995 = vmatmul.bf16.gmra.mxu3 %v10939_v61 }
 0x5fd   :  { %v17602_v25 = vadd.f32 %v6866_v59, %v6828_v24  ;;  %6956 = vmatmul.bf16.gmra.mxu2 %v10935_v31  ;;  %v6874_v6 = vpop.f32.mrf.mxu0  ;;  %v11035_v59 = vor.u32 %v13237_v54, %v11034_v43 }
 0x5ff   :  { %v6830_v53 = vpop.f32.mrf.mxu3 }
 0x600   :  { %v6791_v21 = vpop.f32.mrf.mxu2 }
 0x601   :  { %v6792_v39 = vadd.f32 %v6791_v21, %v6753_v9  ;;  %v6754_v44 = vpop.f32.mrf.mxu1 }
 0x602   :  { %v6755_v8 = vadd.f32 %v6754_v44, %v17560_v26  ;;  %v10644_v44 = vld [vmem:[#allocation7 + $0x184] sm:$0xf0] }
 0x603   :  { %v6831_v11 = vadd.f32 %v6830_v53, %v6792_v39  ;;  %v13126_v39 = vld [vmem:[#allocation7 + $0x124] sm:$0xf] }
 0x604   :  { %v10647_v43 = vor.u32 %v13126_v39, %v10644_v44  ;;  %v10944_v44 = vld [vmem:[#allocation7 + $0x3dc] sm:$0xf0] }
 0x605   :  { %v17605_v14 = vadd.f32 %v6869_v22, %v6831_v11  ;;  %v6876_v50 = vpop.f32.mrf.mxu0 }
 0x607   :  { %v6832_v10 = vpop.f32.mrf.mxu3 }
 0x608   :  { %v6793_v27 = vpop.f32.mrf.mxu2 }
 0x609   :  { %v6794_v40 = vadd.f32 %v6793_v27, %v6755_v8  ;;  %v6757_v49 = vpop.f32.mrf.mxu1  ;;  %v10650_v8 = vld [vmem:[#allocation7 + $0x128] sm:$0xf] }
 0x60a   :  { %v6758_v56 = vadd.f32 %v6757_v49, %v17566_v38  ;;  %v13114_v38 = vld [vmem:[#allocation7 + $0xc0] sm:$0xf0] }
 0x60b   :  { %v6833_v26 = vadd.f32 %v6832_v10, %v6794_v40  ;;  %v10551_v16 = vor.u32 %v13114_v38, %v10550_v1 }
 0x60c   :  { %6922 = vmatmul.bf16.gmra.mxu1 %v11031_v30  ;;  %7000 = vmatmul.bf16.gmra.mxu3 %v11039_v62 }
 0x60d   :  { %v17608_v42 = vadd.f32 %v6871_v48, %v6833_v26  ;;  %6961 = vmatmul.bf16.gmra.mxu2 %v11035_v59  ;;  %v6879_v13 = vpop.f32.mrf.mxu0  ;;  %v13151_v26 = vld [vmem:[#allocation7 + $0x1ec] sm:$0xf] }
 0x60f   :  { %v6835_v55 = vpop.f32.mrf.mxu3 }
 0x610   :  { %v6796_v17 = vpop.f32.mrf.mxu2 }
 0x611   :  { %v6797_v18 = vadd.f32 %v6796_v17, %v6758_v56  ;;  %v6759_v51 = vpop.f32.mrf.mxu1  ;;  %v10744_v17 = vld [vmem:[#allocation7 + $0x24c] sm:$0xf0] }
 0x612   :  { %v6760_v22 = vadd.f32 %v6759_v51, %v17572_v20 }
 0x613   :  { %v6836_v37 = vadd.f32 %v6835_v55, %v6797_v18  ;;  %v10750_v18 = vld [vmem:[#allocation7 + $0x1f0] sm:$0xf]  ;;  %v13164_v55 = vld [vmem:[#allocation7 + $0x250] sm:$0xf0] }
 0x615   :  { %v17611_v3 = vadd.f32 %v6874_v6, %v6836_v37  ;;  %v6881_v53 = vpop.f32.mrf.mxu0  ;;  %v10751_v37 = vor.u32 %v13164_v55, %v10750_v18 }
 0x617   :  { %v6837_v0 = vpop.f32.mrf.mxu3 }
 0x618   :  { %v6798_v23 = vpop.f32.mrf.mxu2 }
 0x619   :  { %v6799_v35 = vadd.f32 %v6798_v23, %v6760_v22  ;;  %v6762_v63 = vpop.f32.mrf.mxu1  ;;  %v10747_v22 = vor.u32 %v13151_v26, %v10744_v17 }
 0x61a   :  { %v6763_v45 = vadd.f32 %v6762_v63, %v17578_v41  ;;  %v13139_v41 = vld [vmem:[#allocation7 + $0x188] sm:$0xf0]  ;;  %v10844_v63 = vld [vmem:[#allocation7 + $0x314] sm:$0xf0] }
 0x61b   :  { %v6838_v29 = vadd.f32 %v6837_v0, %v6799_v35  ;;  %v10651_v54 = vor.u32 %v13139_v41, %v10650_v8  ;;  %v10950_v8 = vld [vmem:[#allocation7 + $0x380] sm:$0xf]  ;;  %v13214_v41 = vld [vmem:[#allocation7 + $0x3e0] sm:$0xf0] }
 0x61c   :  { %7053 = vmatmul.bf16.vlgmr.msra.gmra.mxu1 %v10547_v2 }
 0x61d   :  { %v17614_v31 = vadd.f32 %v6876_v50, %v6838_v29  ;;  %7092 = vmatmul.bf16.vlgmr.msra.gmra.mxu2 %v10551_v16  ;;  %v6884_v40 = vpop.f32.mrf.mxu0  ;;  %v13176_v16 = vld [vmem:[#allocation7 + $0x2b4] sm:$0xf]  ;;  %v13189_v29 = vld [vmem:[#allocation7 + $0x318] sm:$0xf0] }
 0x61f   :  { %v6840_v61 = vpop.f32.mrf.mxu3 }
 0x620   :  { %v6801_v20 = vpop.f32.mrf.mxu2 }
 0x621   :  { %v6802_v34 = vadd.f32 %v6801_v20, %v6763_v45  ;;  %v6764_v9 = vpop.f32.mrf.mxu1  ;;  %v10850_v45 = vld [vmem:[#allocation7 + $0x2b8] sm:$0xf] }
 0x622   :  { %v6765_v24 = vadd.f32 %v6764_v9, %v17582_v5 }
 0x623   :  { %v6841_v48 = vadd.f32 %v6840_v61, %v6802_v34  ;;  %v10847_v34 = vor.u32 %v13176_v16, %v10844_v63  ;;  %v10851_v61 = vor.u32 %v13189_v29, %v10850_v45 }
 0x625   :  { %v17617_v21 = vadd.f32 %v6879_v13, %v6841_v48  ;;  %v6886_v28 = vpop.f32.mrf.mxu0 }
 0x627   :  { %v6842_v60 = vpop.f32.mrf.mxu3 }
 0x628   :  { %v6803_v11 = vpop.f32.mrf.mxu2 }
 0x629   :  { %v6804_v36 = vadd.f32 %v6803_v11, %v6765_v24  ;;  %v6767_v12 = vpop.f32.mrf.mxu1 }
 0x62a   :  { %v6768_v15 = vadd.f32 %v6767_v12, %v17586_v19 }
 0x62b   :  { %v6843_v27 = vadd.f32 %v6842_v60, %v6804_v36 }
 0x62c   :  { %7058 = vmatmul.bf16.gmra.mxu1 %v10647_v43  ;;  %v10951_v43 = vor.u32 %v13214_v41, %v10950_v8 }
 0x62d   :  { %v17620_v6 = vadd.f32 %v6881_v53, %v6843_v27  ;;  %7097 = vmatmul.bf16.gmra.mxu2 %v10651_v54  ;;  %v13201_v53 = vld [vmem:[#allocation7 + $0x37c] sm:$0xf] }
 0x62e   :  { %v10947_v60 = vor.u32 %v13201_v53, %v10944_v44 }
 0x62f   :  { %v6845_v30 = vpop.f32.mrf.mxu3 }
 0x630   :  { %v6806_v5 = vpop.f32.mrf.mxu2 }
 0x631   :  { %v6807_v10 = vadd.f32 %v6806_v5, %v6768_v15  ;;  %v6769_v59 = vpop.f32.mrf.mxu1  ;;  %v13226_v5 = vld [vmem:[#allocation7 + $0x444] sm:$0xf] }
 0x632   :  { %v6770_v49 = vadd.f32 %v6769_v59, %v17590_v32 }
 0x633   :  { %v6846_v62 = vadd.f32 %v6845_v30, %v6807_v10  ;;  %v11050_v10 = vld [vmem:[#allocation7 + $0x448] sm:$0xf]  ;;  %v13239_v30 = vld [vmem:[#allocation7 + $0x4a8] sm:$0xf0] }
 0x634   :  { %v11051_v26 = vor.u32 %v13239_v30, %v11050_v10 }
 0x635   :  { %v17623_v56 = vadd.f32 %v6884_v40, %v6846_v62  ;;  %v11044_v40 = vld [vmem:[#allocation7 + $0x4a4] sm:$0xf0] }
 0x636   :  { %v11047_v62 = vor.u32 %v13226_v5, %v11044_v40  ;;  %v7148_v5 = vld [vmem:[%s18163_s12 + $0xc] sm:$0xf] }
 0x637   :  { %v6847_v50 = vpop.f32.mrf.mxu3 }
 0x638   :  { %v6808_v19 = vpop.f32.mrf.mxu2 }
 0x639   :  { %v6809_v51 = vadd.f32 %v6808_v19, %v6770_v49  ;;  %v6898_v52 = vpop.f32.mrf.mxu1 }
 0x63a   :  { %v6899_v38 = vadd.f32 %v6898_v52, %v17593_v46 }
 0x63b   :  { %v6848_v1 = vadd.f32 %v6847_v50, %v6809_v51 }
 0x63c   :  { %7063 = vmatmul.bf16.gmra.mxu1 %v10747_v22 }
 0x63d   :  { %v17626_v23 = vadd.f32 %v6886_v28, %v6848_v1  ;;  %7102 = vmatmul.bf16.gmra.mxu2 %v10751_v37 }
 0x63f   :  { %v6976_v52 = vpop.f32.mrf.mxu3 }
 0x640   :  { %v6937_v32 = vpop.f32.mrf.mxu2 }
 0x641   :  { %v17628_v35 = vadd.f32 %v6937_v32, %v6899_v38  ;;  %v6900_v0 = vpop.f32.mrf.mxu1  ;;  %v7015_v32 = vpop.f32.mrf.mxu0 }
 0x642   :  { %v6901_v2 = vadd.f32 %v6900_v0, %v17596_v4 }
 0x643   :  { %v6977_v41 = vadd.f32 %v6976_v52, %v17628_v35 }
 0x647   :  { %v6978_v16 = vpop.f32.mrf.mxu3 }
 0x648   :  { %v6939_v13 = vpop.f32.mrf.mxu2 }
 0x649   :  { %v17631_v20 = vadd.f32 %v6939_v13, %v6901_v2  ;;  %v6903_v46 = vpop.f32.mrf.mxu1  ;;  %v7017_v45 = vpop.f32.mrf.mxu0 }
 0x64a   :  { %v6904_v9 = vadd.f32 %v6903_v46, %v17599_v57 }
 0x64b   :  { %v6979_v53 = vadd.f32 %v6978_v16, %v17631_v20 }
 0x64c   :  { %7068 = vmatmul.bf16.gmra.mxu1 %v10847_v34 }
 0x64d   :  { %7107 = vmatmul.bf16.gmra.mxu2 %v10851_v61 }
 0x64f   :  { %v6981_v61 = vpop.f32.mrf.mxu3 }
 0x650   :  { %v6942_v24 = vpop.f32.mrf.mxu2 }
 0x651   :  { %v17634_v48 = vadd.f32 %v6942_v24, %v6904_v9  ;;  %v6905_v39 = vpop.f32.mrf.mxu1  ;;  %v7020_v46 = vpop.f32.mrf.mxu0 }
 0x652   :  { %v6906_v4 = vadd.f32 %v6905_v39, %v17602_v25 }
 0x657   :  { %v6983_v39 = vpop.f32.mrf.mxu3 }
 0x658   :  { %v6944_v11 = vpop.f32.mrf.mxu2 }
 0x659   :  { %v17637_v36 = vadd.f32 %v6944_v11, %v6906_v4  ;;  %v6908_v54 = vpop.f32.mrf.mxu1  ;;  %v7022_v44 = vpop.f32.mrf.mxu0 }
 0x65a   :  { %v6909_v57 = vadd.f32 %v6908_v54, %v17605_v14 }
 0x65c   :  { %7073 = vmatmul.bf16.gmra.mxu1 %v10947_v60 }
 0x65d   :  { %7112 = vmatmul.bf16.gmra.mxu2 %v10951_v43 }
 0x65f   :  { %v6986_v60 = vpop.f32.mrf.mxu3 }
 0x660   :  { %v6947_v12 = vpop.f32.mrf.mxu2 }
 0x661   :  { %v17640_v15 = vadd.f32 %v6947_v12, %v6909_v57  ;;  %v6910_v27 = vpop.f32.mrf.mxu1  ;;  %v7016_v12 = vadd.f32 %v7015_v32, %v6977_v41  ;;  %v7182_v41 = vld [vmem:[#allocation8 + $0x24] sm:$0x77] }
 0x662   :  { %v6911_v25 = vadd.f32 %v6910_v27, %v17608_v42 }
 0x668   :  { %v6949_v59 = vpop.f32.mrf.mxu2 }
 0x669   :  { %v17643_v49 = vadd.f32 %v6949_v59, %v6911_v25  ;;  %v6913_v17 = vpop.f32.mrf.mxu1  ;;  %v7025_v25 = vpop.f32.mrf.mxu0 }
 0x66a   :  { %v6914_v14 = vadd.f32 %v6913_v17, %v17611_v3  ;;  %v6988_v17 = vpop.f32.mrf.mxu3 }
 0x66c   :  { %7078 = vmatmul.bf16.gmra.mxu1 %v11047_v62  ;;  %v6984_v62 = vadd.f32 %v6983_v39, %v17637_v36 }
 0x66d   :  { %7117 = vmatmul.bf16.gmra.mxu2 %v11051_v26 }
 0x670   :  { %v6952_v18 = vpop.f32.mrf.mxu2 }
 0x671   :  { %v17646_v55 = vadd.f32 %v6952_v18, %v6914_v14  ;;  %v6915_v19 = vpop.f32.mrf.mxu1 }
 0x672   :  { %v6916_v42 = vadd.f32 %v6915_v19, %v17614_v31  ;;  %v17679_v32 = vpop.f32.mrf.mxu3 }
 0x678   :  { %v6954_v51 = vpop.f32.mrf.mxu2 }
 0x679   :  { %v17649_v50 = vadd.f32 %v6954_v51, %v6916_v42  ;;  %v6918_v22 = vpop.f32.mrf.mxu1  ;;  %v7023_v42 = vadd.f32 %v7022_v44, %v6984_v62 }
 0x67a   :  { %v6919_v37 = vadd.f32 %v6918_v22, %v17617_v21  ;;  %v7027_v22 = vpop.f32.mrf.mxu0 }
 0x680   :  { %v6957_v28 = vpop.f32.mrf.mxu2 }
 0x681   :  { %v17652_v1 = vadd.f32 %v6957_v28, %v6919_v37  ;;  %v6920_v38 = vpop.f32.mrf.mxu1  ;;  %v6987_v28 = vadd.f32 %v6986_v60, %v17640_v15  ;;  %v6993_v60 = vpop.f32.mrf.mxu3 }
 0x682   :  { %v6921_v3 = vadd.f32 %v6920_v38, %v17620_v6 }
 0x683   :  { %v7026_v16 = vadd.f32 %v7025_v25, %v6987_v28 }
 0x688   :  { %v6959_v0 = vpop.f32.mrf.mxu2 }
 0x689   :  { %v17655_v2 = vadd.f32 %v6959_v0, %v6921_v3  ;;  %v6923_v63 = vpop.f32.mrf.mxu1  ;;  %v7152_v0 = vld [vmem:[%s18163_s12 + $0x10] sm:$0xf] }
 0x68a   :  { %v6924_v31 = vadd.f32 %v6923_v63, %v17623_v56  ;;  %v7018_v56 = vadd.f32 %v7017_v45, %v6979_v53 }
 0x690   :  { %v6962_v29 = vpop.f32.mrf.mxu2 }
 0x691   :  { %v17658_v13 = vadd.f32 %v6962_v29, %v6924_v31  ;;  %v6925_v21 = vpop.f32.mrf.mxu1 }
 0x692   :  { %v6926_v34 = vadd.f32 %v6925_v21, %v17626_v23  ;;  %v6982_v23 = vadd.f32 %v6981_v61, %v17634_v48  ;;  %v6989_v61 = vadd.f32 %v6988_v17, %v17643_v49 }
 0x694   :  { %v7021_v20 = vadd.f32 %v7020_v46, %v6982_v23 }
 0x698   :  { %v6964_v9 = vpop.f32.mrf.mxu2 }
 0x699   :  { %v17661_v24 = vadd.f32 %v6964_v9, %v6926_v34  ;;  %v7054_v6 = vpop.f32.mrf.mxu1  ;;  %v17686_v34 = vpop.f32.mrf.mxu0 }
 0x69a   :  { %v7055_v40 = vadd.f32 %v7054_v6, %v7016_v12 }
 0x6a0   :  { %v7093_v4 = vpop.f32.mrf.mxu2 }
 0x6a1   :  { %v7056_v8 = vpop.f32.mrf.mxu1  ;;  %v7094_v30 = vadd.f32 %v7093_v4, %v7055_v40 }
 0x6a2   :  { %v7057_v11 = vadd.f32 %v7056_v8, %v7018_v56  ;;  %v7028_v8 = vadd.f32 %v7027_v22, %v6989_v61  ;;  %v7156_v22 = vld [vmem:[%s18163_s12 + $0x14] sm:$0xf] }
 0x6a3   :  { %v7123_v18 = vmax.f32 %v7094_v30, 0.0  ;;  %v7266_v30 = vld [vmem:[#allocation8 + $0x3c] sm:$0x77] }
 0x6a8   :  { %v7095_v43 = vpop.f32.mrf.mxu2 }
 0x6a9   :  { %v7096_v54 = vadd.f32 %v7095_v43, %v7057_v11  ;;  %v7059_v57 = vpop.f32.mrf.mxu1 }
 0x6aa   :  { %v7060_v59 = vadd.f32 %v7059_v57, %v7021_v20 }
 0x6ab   :  { %v7124_v27 = vmax.f32 %v7096_v54, 0.0 }
 0x6ad   :  { %v7136_v10 = vpack.c.bf16 %v7124_v27, %v7124_v27 }
 0x6af   :  { %v7149_v35 = vsel %vm15494_vm13, %v7136_v10, %v7148_v5 }
 0x6b0   :  { %7150 = vst [vmem:[%s18163_s12 + $0xc] sm:$0xf] %v7149_v35  ;;  %v7098_v48 = vpop.f32.mrf.mxu2 }
 0x6b1   :  { %v7099_v26 = vadd.f32 %v7098_v48, %v7060_v59  ;;  %v7061_v14 = vpop.f32.mrf.mxu1  ;;  %v7032_v59 = vpop.f32.mrf.mxu0 }
 0x6b2   :  { %v7062_v37 = vadd.f32 %v7061_v14, %v7023_v42 }
 0x6b3   :  { %v7125_v19 = vmax.f32 %v7099_v26, 0.0 }
 0x6b5   :  { %v13791_v51 = vpack.c.bf16 %v7125_v19, %v7123_v18 }
 0x6b7   :  { %13792 = vst [vmem:[%s18163_s12] sm:$0xff] %v13791_v51   ;;  %v7193_v63 = vshrl.u32 %v13791_v51, 16  ;;  %v7196_v31 = vshll.u32 %v13791_v51, 16 }
 0x6b8   :  { %7176 = vst [vmem:[#allocation8] sm:$0xff] %v13791_v51  ;;  %v7100_v52 = vpop.f32.mrf.mxu2 }
 0x6b9   :  { %v7101_v38 = vadd.f32 %v7100_v52, %v7062_v37  ;;  %v7064_v3 = vpop.f32.mrf.mxu1  ;;  %v7195_v46 = vrot.slane %v7193_v63, 4  ;;  %v7198_v9 = vrot.slane %v7196_v31, 5  ;;  %v7236_v37 = vld [vmem:[#allocation8 + $0x30] sm:$0x77] }
 0x6ba   :  { %v7065_v21 = vadd.f32 %v7064_v3, %v7026_v16 }
 0x6bb   :  { %v7126_v36 = vmax.f32 %v7101_v38, 0.0  ;;  %v7199_v56 = vor.u32 %v7198_v9, %v7195_v46  ;;  %v7035_v46 = vpop.f32.mrf.mxu0 }
 0x6bd   :  { %v7138_v45 = vpack.c.bf16 %v7126_v36, %v7126_v36  ;;  %v7200_v10 = vrot.slane %v7199_v56, 4 }
 0x6be   :  { %v7242_v44 = vld [vmem:[%s18163_s12] sm:$0xee] }
 0x6bf   :  { %v7153_v29 = vsel %vm15494_vm13, %v7138_v45, %v7152_v0  ;;  %v11861_v43 = vrot.slane %v7242_v44, 9  ;;  %v6996_v0 = vpop.f32.mrf.mxu3  ;;  %v7185_v44 = vld [vmem:[#allocation8 + $0x2c] sm:$0x7] }
 0x6c0   :  { %7154 = vst [vmem:[%s18163_s12 + $0x10] sm:$0xf] %v7153_v29  ;;  %v7103_v15 = vpop.f32.mrf.mxu2  ;;  %v6994_v29 = vadd.f32 %v6993_v60, %v17649_v50 }
 0x6c1   :  { %v7104_v39 = vadd.f32 %v7103_v15, %v7065_v21  ;;  %v7066_v4 = vpop.f32.mrf.mxu1 }
 0x6c2   :  { %v7067_v12 = vadd.f32 %v7066_v4, %v7028_v8  ;;  %v7033_v9 = vadd.f32 %v7032_v59, %v6994_v29  ;;  %v6992_v4 = vadd.f32 %v17679_v32, %v17646_v55  ;;  %v11853_v59 = vld [vmem:[%s18163_s12 + $0x24] sm:$0xf] }
 0x6c3   :  { %v7127_v53 = vmax.f32 %v7104_v39, 0.0 }
 0x6c5   :  { %v7139_v11 = vpack.c.bf16 %v7127_v53, %v7127_v53 }
 0x6c7   :  { %v7174_v23 = vld [vmem:[%s18163_s12 + $0xc] sm:$0x77]  ;;  %7155 = vst [vmem:[%s18163_s12 + $0x8] sm:$0xf] %v7139_v11  ;;  %v6998_v32 = vpop.f32.mrf.mxu3 }
 0x6c8   :  { %v7190_v54 = vld [vmem:[%s18163_s12 + $0xc] sm:$0x77]  ;;  %v7183_v27 = vsel %vm17704_vm8, %v7174_v23, %v7182_v41  ;;  %v7105_v40 = vpop.f32.mrf.mxu2  ;;  %v6997_v41 = vadd.f32 %v6996_v0, %v17652_v1 }
 0x6c9   :  { %v7244_v57 = vld [vmem:[%s18163_s12 + $0xc] sm:$0xff]  ;;  %v7202_v25 = vshll.u32 %v7190_v54, 16  ;;  %v7220_v5 = vshrl.u32 %v7190_v54, 16  ;;  %7184 = vst [vmem:[#allocation8 + $0x24] sm:$0x77] %v7183_v27  ;;  %v7106_v35 = vadd.f32 %v7105_v40, %v7067_v12  ;;  %v7069_v14 = vpop.f32.mrf.mxu1  ;;  %v7031_v27 = vadd.f32 %v17686_v34, %v6992_v4 }
 0x6ca   :  { %v7252_v20 = vrot.slane %v7244_v57, 5 }
 0x6cb   :  { %v7204_v48 = vrot.slane %v7202_v25, 5  ;;  %v7222_v62 = vrot.slane %v7220_v5, 4  ;;  %v7128_v18 = vmax.f32 %v7106_v35, 0.0  ;;  %v7269_v5 = vld [vmem:[#allocation8 + $0x44] sm:$0x7] }
 0x6cc   :  { %v7253_v26 = vsel %vm15529_vm6, %v11861_v43, %v7252_v20  ;;  %v7258_v17 = vrot.slane %v7252_v20, 4 }
 0x6cd   :  { %7264 = vst [vmem:[#allocation8 + $0x18] sm:$0xff] %v7253_v26  ;;  %v7205_v19 = vsel %vm15572_vm11, %v7200_v10, %v7204_v48  ;;  %v7223_v42 = vor.u32 %v7222_v62, %v7204_v48  ;;  %v7140_v52 = vpack.c.bf16 %v7128_v18, %v7128_v18  ;;  %v7036_v48 = vadd.f32 %v7035_v46, %v6997_v41 }
 0x6ce   :  { %v7267_v51 = vsel %vm17704_vm8, %v7258_v17, %v7266_v30  ;;  %7234 = vst [vmem:[#allocation8 + $0xc] sm:$0xff] %v7205_v19  ;;  %v7173_v38 = vld [vmem:[%s18163_s12 + $0x8] sm:$0xf]  ;;  %v7070_v62 = vadd.f32 %v7069_v14, %v7031_v27  ;;  %v7037_v17 = vpop.f32.mrf.mxu0  ;;  %v6999_v14 = vadd.f32 %v6998_v32, %v17655_v2  ;;  %v7278_v27 = vld [vmem:[#allocation8 + $0x6c] sm:$0x77] }
 0x6cf   :  { %v7224_v28 = vrot.slane %v7223_v42, 4  ;;  %7268 = vst [vmem:[#allocation8 + $0x3c] sm:$0x77] %v7267_v51  ;;  %v7189_v3 = vld [vmem:[%s18163_s12 + $0x8] sm:$0xf]  ;;  %v7157_v36 = vsel %vm15494_vm13, %v7140_v52, %v7156_v22 }
 0x6d0   :  { %7177 = vst [vmem:[#allocation8 + $0x8] sm:$0xf] %v7173_v38  ;;  %v7207_v63 = vshrl.u32 %v7189_v3, 16  ;;  %v7210_v31 = vshll.u32 %v7189_v3, 16  ;;  %v7108_v45 = vpop.f32.mrf.mxu2  ;;  %v7243_v39 = vld [vmem:[%s18163_s12 + $0x8] sm:$0xe] }
 0x6d1   :  { %v7237_v16 = vsel %vm17704_vm8, %v7224_v28, %v7236_v37  ;;  %7158 = vst [vmem:[%s18163_s12 + $0x14] sm:$0xf] %v7157_v36  ;;  %v7071_v21 = vpop.f32.mrf.mxu1  ;;  %v11862_v8 = vrot.slane %v7243_v39, 9  ;;  %v7239_v42 = vld [vmem:[#allocation8 + $0x38] sm:$0x7]  ;;  %v7109_v51 = vadd.f32 %v7108_v45, %v7070_v62 }
 0x6d2   :  { %7238 = vst [vmem:[#allocation8 + $0x30] sm:$0x77] %v7237_v16  ;;  %v7209_v15 = vrot.slane %v7207_v63, 4  ;;  %v7212_v61 = vrot.slane %v7210_v31, 5  ;;  %v7072_v50 = vadd.f32 %v7071_v21, %v7033_v9  ;;  %v7001_v63 = vpop.f32.mrf.mxu3  ;;  %v7038_v31 = vadd.f32 %v7037_v17, %v6999_v14  ;;  %v11856_v39 = vld [vmem:[%s18163_s12 + $0x28] sm:$0xf] }
 0x6d3   :  { %v7129_v0 = vmax.f32 %v7109_v51, 0.0  ;;  %v7362_v17 = vld [vmem:[#allocation8 + $0x84] sm:$0x77]  ;;  %v11859_v14 = vld [vmem:[%s18163_s12 + $0x2c] sm:$0xf] }
 0x6d4   :  { %v7213_v53 = vor.u32 %v7212_v61, %v7209_v15  ;;  %v7002_v15 = vadd.f32 %v7001_v63, %v17658_v13 }
 0x6d6   :  { %v7214_v25 = vrot.slane %v7213_v53, 4  ;;  %v7040_v29 = vpop.f32.mrf.mxu0 }
 0x6d7   :  { %v7041_v4 = vadd.f32 %v7040_v29, %v7002_v15 }
 0x6d8   :  { %v7110_v56 = vpop.f32.mrf.mxu2  ;;  %v7175_v11 = vld [vmem:[%s18163_s12 + $0x14] sm:$0x7] }
 0x6d9   :  { %v7191_v60 = vld [vmem:[%s18163_s12 + $0x14] sm:$0x7]  ;;  %v7111_v55 = vadd.f32 %v7110_v56, %v7072_v50  ;;  %v7186_v23 = vsel %vm17694_vm4, %v7175_v11, %v7185_v44  ;;  %v7074_v12 = vpop.f32.mrf.mxu1 }
 0x6da   :  { %v7245_v43 = vld [vmem:[%s18163_s12 + $0x14] sm:$0xf]  ;;  %v7216_v54 = vshll.u32 %v7191_v60, 16  ;;  %v7225_v57 = vshrl.u32 %v7191_v60, 16  ;;  %7187 = vst [vmem:[#allocation8 + $0x2c] sm:$0x7] %v7186_v23  ;;  %v7075_v37 = vadd.f32 %v7074_v12, %v7036_v48 }
 0x6db   :  { %v7256_v1 = vrot.slane %v7245_v43, 5  ;;  %v7130_v20 = vmax.f32 %v7111_v55, 0.0 }
 0x6dc   :  { %v7218_v40 = vrot.slane %v7216_v54, 5  ;;  %v7227_v10 = vrot.slane %v7225_v57, 4 }
 0x6dd   :  { %v7257_v30 = vsel %vm15529_vm6, %v11862_v8, %v7256_v1  ;;  %v7259_v35 = vrot.slane %v7256_v1, 4  ;;  %v7142_v26 = vpack.c.bf16 %v7130_v20, %v7130_v20  ;;  %v7003_v8 = vpop.f32.mrf.mxu3 }
 0x6de   :  { %7265 = vst [vmem:[#allocation8 + $0x20] sm:$0xf] %v7257_v30  ;;  %v7219_v34 = vsel %vm15572_vm11, %v7214_v25, %v7218_v40  ;;  %v7228_v18 = vor.u32 %v7227_v10, %v7218_v40  ;;  %v7004_v11 = vadd.f32 %v7003_v8, %v17661_v24  ;;  %v7042_v32 = vpop.f32.mrf.mxu0 }
 0x6df   :  { %v7270_v19 = vsel %vm17694_vm4, %v7259_v35, %v7269_v5  ;;  %7235 = vst [vmem:[#allocation8 + $0x14] sm:$0xf] %v7219_v34  ;;  %v7162_v22 = vsel %vm15494_vm13, %v7142_v26, %v11853_v59 }
 0x6e0   :  { %v7229_v52 = vrot.slane %v7228_v18, 4  ;;  %7271 = vst [vmem:[#allocation8 + $0x44] sm:$0x7] %v7270_v19  ;;  %v7113_v28 = vpop.f32.mrf.mxu2  ;;  %v7043_v1 = vadd.f32 %v7042_v32, %v7004_v11 }
 0x6e1   :  { %11854 = vst [vmem:[%s18163_s12 + $0x24] sm:$0xf] %v7162_v22  ;;  %v7114_v38 = vadd.f32 %v7113_v28, %v7075_v37  ;;  %v7076_v36 = vpop.f32.mrf.mxu1 }
 0x6e2   :  { %v7240_v3 = vsel %vm17694_vm4, %v7229_v52, %v7239_v42  ;;  %v7077_v2 = vadd.f32 %v7076_v36, %v7038_v31 }
 0x6e3   :  { %7241 = vst [vmem:[#allocation8 + $0x38] sm:$0x7] %v7240_v3  ;;  %v7131_v16 = vmax.f32 %v7114_v38, 0.0  ;;  %v7332_v38 = vld [vmem:[#allocation8 + $0x78] sm:$0x77] }
 0x6e5   :  { %v13796_v45 = vpack.c.bf16 %v7131_v16, %v7129_v0 }
 0x6e7   :  { %13817 = vst [vmem:[%s18163_s12 + $0x18] sm:$0xff] %v13796_v45   ;;  %v7289_v53 = vshrl.u32 %v13796_v45, 16  ;;  %v7292_v44 = vshll.u32 %v13796_v45, 16 }
 0x6e8   :  { %7276 = vst [vmem:[#allocation8 + $0x48] sm:$0xff] %v13796_v45  ;;  %v7115_v21 = vpop.f32.mrf.mxu2 }
 0x6e9   :  { %v7116_v61 = vadd.f32 %v7115_v21, %v7077_v2  ;;  %v7079_v46 = vpop.f32.mrf.mxu1  ;;  %v7291_v60 = vrot.slane %v7289_v53, 4  ;;  %v7294_v43 = vrot.slane %v7292_v44, 5 }
 0x6ea   :  { %v7080_v41 = vadd.f32 %v7079_v46, %v7041_v4 }
 0x6eb   :  { %v7132_v9 = vmax.f32 %v7116_v61, 0.0  ;;  %v7295_v12 = vor.u32 %v7294_v43, %v7291_v60 }
 0x6ed   :  { %v7144_v50 = vpack.c.bf16 %v7132_v9, %v7132_v9  ;;  %v7296_v26 = vrot.slane %v7295_v12, 4 }
 0x6ee   :  { %v11871_v54 = vld [vmem:[%s18163_s12 + $0x18] sm:$0xee] }
 0x6ef   :  { %v7166_v56 = vsel %vm15494_vm13, %v7144_v50, %v11856_v39  ;;  %v11875_v5 = vrot.slane %v11871_v54, 9 }
 0x6f0   :  { %11857 = vst [vmem:[%s18163_s12 + $0x28] sm:$0xf] %v7166_v56  ;;  %v7118_v13 = vpop.f32.mrf.mxu2  ;;  %v7365_v56 = vld [vmem:[#allocation8 + $0x8c] sm:$0x7] }
 0x6f1   :  { %v7119_v55 = vadd.f32 %v7118_v13, %v7080_v41  ;;  %v7081_v57 = vpop.f32.mrf.mxu1 }
 0x6f2   :  { %v7082_v10 = vadd.f32 %v7081_v57, %v7043_v1 }
 0x6f3   :  { %v7133_v23 = vmax.f32 %v7119_v55, 0.0 }
 0x6f5   :  { %v7145_v25 = vpack.c.bf16 %v7133_v23, %v7133_v23  ;;  %v7335_v23 = vld [vmem:[#allocation8 + $0x80] sm:$0x7] }
 0x6f7   :  { %v11865_v20 = vld [vmem:[%s18163_s12 + $0x24] sm:$0x77]  ;;  %11858 = vst [vmem:[%s18163_s12 + $0x20] sm:$0xf] %v7145_v25 }
 0x6f8   :  { %v11869_v24 = vld [vmem:[%s18163_s12 + $0x24] sm:$0x77]  ;;  %v7279_v30 = vsel %vm17704_vm8, %v11865_v20, %v7278_v27  ;;  %v7120_v62 = vpop.f32.mrf.mxu2 }
 0x6f9   :  { %v11873_v40 = vld [vmem:[%s18163_s12 + $0x24] sm:$0xff]  ;;  %v7298_v35 = vshll.u32 %v11869_v24, 16  ;;  %v7316_v59 = vshrl.u32 %v11869_v24, 16  ;;  %7280 = vst [vmem:[#allocation8 + $0x6c] sm:$0x77] %v7279_v30  ;;  %v7121_v34 = vadd.f32 %v7120_v62, %v7082_v10 }
 0x6fa   :  { %v7348_v48 = vrot.slane %v11873_v40, 5 }
 0x6fb   :  { %v7300_v18 = vrot.slane %v7298_v35, 5  ;;  %v7318_v19 = vrot.slane %v7316_v59, 4  ;;  %v7134_v22 = vmax.f32 %v7121_v34, 0.0 }
 0x6fc   :  { %v7349_v42 = vsel %vm15529_vm6, %v11875_v5, %v7348_v48  ;;  %v7354_v51 = vrot.slane %v7348_v48, 4 }
 0x6fd   :  { %7360 = vst [vmem:[#allocation8 + $0x60] sm:$0xff] %v7349_v42  ;;  %v7301_v37 = vsel %vm15572_vm11, %v7296_v26, %v7300_v18  ;;  %v7319_v52 = vor.u32 %v7318_v19, %v7300_v18  ;;  %v7146_v3 = vpack.c.bf16 %v7134_v22, %v7134_v22 }
 0x6fe   :  { %v7363_v28 = vsel %vm17704_vm8, %v7354_v51, %v7362_v17  ;;  %7330 = vst [vmem:[#allocation8 + $0x54] sm:$0xff] %v7301_v37  ;;  %v11864_v0 = vld [vmem:[%s18163_s12 + $0x20] sm:$0xf] }
 0x6ff   :  { %v7320_v36 = vrot.slane %v7319_v52, 4  ;;  %7364 = vst [vmem:[#allocation8 + $0x84] sm:$0x77] %v7363_v28  ;;  %v11868_v16 = vld [vmem:[%s18163_s12 + $0x20] sm:$0xf]  ;;  %v7170_v63 = vsel %vm15494_vm13, %v7146_v3, %v11859_v14 }
 0x700   :  { %7277 = vst [vmem:[#allocation8 + $0x50] sm:$0xf] %v11864_v0  ;;  %v7303_v45 = vshrl.u32 %v11868_v16, 16  ;;  %v7306_v2 = vshll.u32 %v11868_v16, 16  ;;  %v11872_v15 = vld [vmem:[%s18163_s12 + $0x20] sm:$0xe] }
 0x701   :  { %v7333_v31 = vsel %vm17704_vm8, %v7320_v36, %v7332_v38  ;;  %11860 = vst [vmem:[%s18163_s12 + $0x2c] sm:$0xf] %v7170_v63  ;;  %v11876_v46 = vrot.slane %v11872_v15, 9 }
 0x702   :  { %7334 = vst [vmem:[#allocation8 + $0x78] sm:$0x77] %v7333_v31  ;;  %v7305_v29 = vrot.slane %v7303_v45, 4  ;;  %v7308_v21 = vrot.slane %v7306_v2, 5 }
 0x704   :  { %v7309_v61 = vor.u32 %v7308_v21, %v7305_v29 }
 0x706   :  { %v7310_v8 = vrot.slane %v7309_v61, 4 }
 0x708   :  { %v11866_v49 = vld [vmem:[%s18163_s12 + $0x2c] sm:$0x7] }
 0x709   :  { %v11870_v9 = vld [vmem:[%s18163_s12 + $0x2c] sm:$0x7]  ;;  %v7282_v4 = vsel %vm17694_vm4, %v11866_v49, %v7281_v7 }
 0x70a   :  { %v11874_v39 = vld [vmem:[%s18163_s12 + $0x2c] sm:$0xf]  ;;  %v7312_v53 = vshll.u32 %v11870_v9, 16  ;;  %v7321_v44 = vshrl.u32 %v11870_v9, 16  ;;  %7283 = vst [vmem:[#allocation8 + $0x74] sm:$0x7] %v7282_v4 }
 0x70b   :  { %v7352_v50 = vrot.slane %v11874_v39, 5 }
 0x70c   :  { %v7314_v41 = vrot.slane %v7312_v53, 5  ;;  %v7323_v13 = vrot.slane %v7321_v44, 4 }
 0x70d   :  { %v7353_v11 = vsel %vm15529_vm6, %v11876_v46, %v7352_v50  ;;  %v7355_v60 = vrot.slane %v7352_v50, 4 }
 0x70e   :  { %7361 = vst [vmem:[#allocation8 + $0x68] sm:$0xf] %v7353_v11  ;;  %v7315_v43 = vsel %vm15572_vm11, %v7310_v8, %v7314_v41  ;;  %v7324_v55 = vor.u32 %v7323_v13, %v7314_v41 }
 0x70f   :  { %v7366_v32 = vsel %vm17694_vm4, %v7355_v60, %v7365_v56  ;;  %7331 = vst [vmem:[#allocation8 + $0x5c] sm:$0xf] %v7315_v43 }
 0x710   :  { %v7325_v54 = vrot.slane %v7324_v55, 4  ;;  %7367 = vst [vmem:[#allocation8 + $0x8c] sm:$0x7] %v7366_v32 }
 0x712   :  { %v7336_v57 = vsel %vm17694_vm4, %v7325_v54, %v7335_v23 }
 0x713   :  { %7337 = vst [vmem:[#allocation8 + $0x80] sm:$0x7] %v7336_v57 }
 0x714   :  { %13829 = dma.done.wait [#allocation5 + $0x1], 9216 }
 0x715   :  { %13830 = vsyncadd [#allocation5 + $0x1], 4294958080  ;;  %v13465_v33 = vld [vmem:[#allocation3 + $0x1b0] sm:$0xff]  ;;  %v13464_v1 = vld [vmem:[#allocation3 + $0x38] sm:$0xff]  ;;  %vm18228_vm6 = vsmask.f32 7938 }
 0x716   :  { %8064 = vmatpush.bf16.msra.mxu3 %v13465_v33  ;;  %v13481_v12 = vld [vmem:[#allocation3 + $0x108] sm:$0xff]  ;;  %v13480_v58 = vld [vmem:[#allocation3 + $0x50] sm:$0xff]  ;;  %v13463_v27 = vld [vmem:[#allocation3 + $0x178] sm:$0xff] }
 0x717   :  { %8102 = vmatpush.bf16.msra.mxu0 %v13481_v12  ;;  %v13479_v25 = vld [vmem:[#allocation3 + $0xf8] sm:$0xff]  ;;  %v13462_v5 = vld [vmem:[#allocation3 + $0x130] sm:$0xff]  ;;  %v13461_v6 = vld [vmem:[#allocation3 + $0x1e0] sm:$0xff] }
 0x718   :  { %v13478_v20 = vld [vmem:[#allocation3 + $0x30] sm:$0xff]  ;;  %v13460_v40 = vld [vmem:[#allocation3 + $0x1c0] sm:$0xff]  ;;  %v13476_v10 = vld [vmem:[#allocation3 + $0x138] sm:$0xff] }
 0x719   :  { %v13477_v24 = vld [vmem:[#allocation3 + $0x150] sm:$0xff]  ;;  %v13459_v30 = vld [vmem:[#allocation3 + $0x188] sm:$0xff]  ;;  %v13474_v34 = vld [vmem:[#allocation3 + $0x60] sm:$0xff] }
 0x71a   :  { %8065 = vmatpush.bf16.msra.mxu3 %v13464_v1  ;;  %v13475_v35 = vld [vmem:[#allocation3 + $0xa8] sm:$0xff]  ;;  %v13473_v26 = vld [vmem:[#allocation3 + $0x190] sm:$0xff]  ;;  %v13472_v42 = vld [vmem:[#allocation3 + $0x198] sm:$0xff] }
 0x71b   :  { %8103 = vmatpush.bf16.msra.mxu0 %v13480_v58  ;;  %v13458_v59 = vld [vmem:[#allocation3 + $0x68] sm:$0xff]  ;;  %v11887_v18 = vld [vmem:[#allocation8 + $0x8] sm:$0xf]  ;;  %v13445_v19 = vld [vmem:[#allocation8 + $0x28] sm:$0xf0] }
 0x71c   :  { %v11879_v48 = vld [vmem:[#allocation8] sm:$0xf]  ;;  %v13444_v62 = vld [vmem:[#allocation8 + $0x20] sm:$0xf0]  ;;  %v11888_v51 = vor.u32 %v13445_v19, %v11887_v18  ;;  %v13497_v22 = vld [vmem:[#allocation3 + $0xd0] sm:$0xff] }
 0x71d   :  { %v11880_v17 = vor.u32 %v13444_v62, %v11879_v48  ;;  %v13513_v37 = vld [vmem:[#allocation3 + $0xb8] sm:$0xff]  ;;  %v13496_v52 = vld [vmem:[#allocation3 + $0xb0] sm:$0xff]  ;;  %v13505_v14 = vld [vmem:[#allocation3 + $0x168] sm:$0xff] }
 0x71e   :  { %8066 = vmatpush.bf16.msra.mxu3 %v13463_v27  ;;  %v13471_v28 = vld [vmem:[#allocation3 + $0x98] sm:$0xff]  ;;  %8178 = vmatpush.bf16.msrb.mxu2 %v13513_v37  ;;  %v13512_v38 = vld [vmem:[#allocation3] sm:$0xff]  ;;  %v13495_v3 = vld [vmem:[#allocation3 + $0x90] sm:$0xff] }
 0x71f   :  { %8104 = vmatpush.bf16.msra.mxu0 %v13479_v25  ;;  %8159 = vmatpush.bf16.msrb.mxu1 %v13505_v14  ;;  %v13470_v36 = vld [vmem:[#allocation3 + $0x58] sm:$0xff]  ;;  %v13504_v0 = vld [vmem:[#allocation3 + $0x20] sm:$0xff]  ;;  %v11915_v63 = vld [vmem:[#allocation8 + $0x48] sm:$0xf] }
 0x720   :  { %v13511_v16 = vld [vmem:[#allocation3 + $0x78] sm:$0xff]  ;;  %v13453_v31 = vld [vmem:[#allocation8 + $0x68] sm:$0xf0]  ;;  %v13494_v45 = vld [vmem:[#allocation3 + $0x8] sm:$0xff] }
 0x721   :  { %v13469_v2 = vld [vmem:[#allocation3 + $0x40] sm:$0xff]  ;;  %v11916_v29 = vor.u32 %v13453_v31, %v11915_v63  ;;  %v11923_v21 = vld [vmem:[#allocation8 + $0x50] sm:$0xf]  ;;  %v13454_v15 = vld [vmem:[#allocation8 + $0x70] sm:$0xf0] }
 0x722   :  { %8067 = vmatpush.bf16.msra.mxu3 %v13462_v5  ;;  %8179 = vmatpush.bf16.msrb.mxu2 %v13512_v38  ;;  %v13468_v61 = vld [vmem:[#allocation3 + $0x1a0] sm:$0xff]  ;;  %v11924_v7 = vor.u32 %v13454_v15, %v11923_v21  ;;  %v13510_v9 = vld [vmem:[#allocation3 + $0x28] sm:$0xff]  ;;  %v13467_v4 = vld [vmem:[#allocation3 + $0x210] sm:$0xff] }
 0x723   :  { %8105 = vmatpush.bf16.msra.mxu0 %v13478_v20  ;;  %8160 = vmatpush.bf16.msrb.mxu1 %v13504_v0  ;;  %v13493_v46 = vld [vmem:[#allocation3 + $0x220] sm:$0xff]  ;;  %v13492_v39 = vld [vmem:[#allocation3 + $0xe8] sm:$0xff]  ;;  %v13509_v44 = vld [vmem:[#allocation3 + $0x118] sm:$0xff] }
 0x724   :  { %v13503_v49 = vld [vmem:[#allocation3 + $0x100] sm:$0xff]  ;;  %v13491_v50 = vld [vmem:[#allocation3 + $0x18] sm:$0xff]  ;;  %v13466_v8 = vld [vmem:[#allocation3 + $0x110] sm:$0xff] }
 0x725   :  { %v13502_v53 = vld [vmem:[#allocation3 + $0x180] sm:$0xff]  ;;  %v13501_v56 = vld [vmem:[#allocation3 + $0x1b8] sm:$0xff]  ;;  %v13508_v13 = vld [vmem:[#allocation3 + $0x230] sm:$0xff] }
 0x726   :  { %8068 = vmatpush.bf16.msra.mxu3 %v13461_v6  ;;  %8180 = vmatpush.bf16.msrb.mxu2 %v13511_v16  ;;  %v13489_v41 = vld [vmem:[#allocation3 + $0xc0] sm:$0xff]  ;;  %v13440_v11 = vld [vmem:[#allocation8 + $0x4] sm:$0xf]  ;;  %v11881_v60 = vld [vmem:[#allocation8 + $0x24] sm:$0xf0] }
 0x727   :  { %8106 = vmatpush.bf16.msra.mxu0 %v13477_v24  ;;  %8161 = vmatpush.bf16.msrb.mxu1 %v13503_v49  ;;  %v13490_v43 = vld [vmem:[#allocation3 + $0x148] sm:$0xff]  ;;  %v13507_v23 = vld [vmem:[#allocation3 + $0xa0] sm:$0xff]  ;;  %v11884_v54 = vor.u32 %v13440_v11, %v11881_v60  ;;  %v11895_v57 = vld [vmem:[#allocation8 + $0x10] sm:$0xf] }
 0x728   :  { %v13500_v55 = vld [vmem:[#allocation3 + $0x228] sm:$0xff]  ;;  %v13446_v33 = vld [vmem:[#allocation8 + $0x30] sm:$0xf0]  ;;  %v13529_v58 = vld [vmem:[#allocation3 + $0x10] sm:$0xff] }
 0x729   :  { %v13488_v32 = vld [vmem:[#allocation3 + $0x48] sm:$0xff]  ;;  %v13487_v1 = vld [vmem:[#allocation3 + $0x1f8] sm:$0xff]  ;;  %v11896_v12 = vor.u32 %v13446_v33, %v11895_v57  ;;  %v13506_v25 = vld [vmem:[#allocation3 + $0x200] sm:$0xff] }
 0x72a   :  { %8069 = vmatpush.bf16.msra.mxu3 %v13460_v40  ;;  %8181 = vmatpush.bf16.msrb.mxu2 %v13510_v9  ;;  %v13499_v27 = vld [vmem:[#allocation3 + $0xd8] sm:$0xff]  ;;  %v13528_v5 = vld [vmem:[#allocation3 + $0x128] sm:$0xff]  ;;  %v11903_v20 = vld [vmem:[#allocation8 + $0x18] sm:$0xf] }
 0x72b   :  { %8107 = vmatpush.bf16.msra.mxu0 %v13476_v10  ;;  %8162 = vmatpush.bf16.msrb.mxu1 %v13502_v53  ;;  %v13447_v6 = vld [vmem:[#allocation8 + $0x38] sm:$0xf0]  ;;  %v13498_v24 = vld [vmem:[#allocation3 + $0x1c8] sm:$0xff]  ;;  %v13485_v62 = vld [vmem:[#allocation3 + $0x1d0] sm:$0xff] }
 0x72c   :  { %v13486_v40 = vld [vmem:[#allocation3 + $0x120] sm:$0xff]  ;;  %v11904_v10 = vor.u32 %v13447_v6, %v11903_v20  ;;  %v13484_v18 = vld [vmem:[#allocation3 + $0x88] sm:$0xff]  ;;  %v13523_v31 = vld [vmem:[#allocation3 + $0x1d8] sm:$0xff] }
 0x72d   :  { %v13524_v14 = vld [vmem:[#allocation3 + $0x80] sm:$0xff]  ;;  %v13456_v38 = vld [vmem:[#allocation8 + $0x80] sm:$0xf0]  ;;  %v11889_v21 = vld [vmem:[#allocation8 + $0x2c] sm:$0xf0] }
 0x72e   :  { %8070 = vmatpush.bf16.msra.mxu3 %v13459_v30  ;;  %8182 = vmatpush.bf16.msrb.mxu2 %v13509_v44  ;;  %v13442_v30 = vld [vmem:[#allocation8 + $0x14] sm:$0xf]  ;;  %v13482_v0 = vld [vmem:[#allocation3 + $0x1e8] sm:$0xff]  ;;  %v13521_v63 = vld [vmem:[#allocation3 + $0x140] sm:$0xff] }
 0x72f   :  { %8108 = vmatpush.bf16.msra.mxu0 %v13475_v35  ;;  %8163 = vmatpush.bf16.msrb.mxu1 %v13501_v56  ;;  %v11897_v35 = vld [vmem:[#allocation8 + $0x34] sm:$0xf0]  ;;  %v13522_v15 = vld [vmem:[#allocation3 + $0xc8] sm:$0xff]  ;;  %v13450_v53 = vld [vmem:[#allocation8 + $0x54] sm:$0xf] }
 0x730   :  { %v11900_v48 = vor.u32 %v13442_v30, %v11897_v35  ;;  %v13448_v49 = vld [vmem:[#allocation8 + $0x40] sm:$0xf0]  ;;  %v11925_v44 = vld [vmem:[#allocation8 + $0x74] sm:$0xf0]  ;;  %v13515_v56 = vld [vmem:[#allocation3 + $0x238] sm:$0xff] }
 0x731   :  { %v13514_v11 = vld [vmem:[#allocation3 + $0x1f0] sm:$0xff]  ;;  %vm18226_vm11 = vmmov %vm18216_vm14 }
 0x732   :  { %8071 = vmatpush.bf16.msra.mxu3 %v13458_v59  ;;  %8183 = vmatpush.bf16.msrb.mxu2 %v13508_v13  ;;  %v13527_v59 = vld [vmem:[#allocation3 + $0x1a8] sm:$0xff]  ;;  %v13457_v13 = vld [vmem:[#allocation8 + $0x88] sm:$0xf0]  ;;  %vm18227_vm13 = vmmov %vm18226_vm11 }
 0x733   :  { %8109 = vmatpush.bf16.msra.mxu0 %v13474_v34  ;;  %8164 = vmatpush.bf16.msrb.mxu1 %v13500_v55  ;;  %v13526_v34 = vld [vmem:[#allocation3 + $0xf0] sm:$0xff]  ;;  %v11905_v55 = vld [vmem:[#allocation8 + $0x3c] sm:$0xf0]  ;;  %vm18229_vm2 = vmmov %vm18226_vm11 }
 0x734   :  { %vm17901_vm3 = vmand %vm18229_vm2, %vm18228_vm6 }
 0x735   :  { %8072 = vmatmul.bf16.vlgmr.msra.gmra.mxu3 %v11880_v17  ;;  %v11917_v17 = vld [vmem:[#allocation8 + $0x6c] sm:$0xf0]  ;;  %vm18232_vm9 = vmmov %vm18229_vm2 }
 0x736   :  { %8083 = vmatpush.bf16.msrb.mxu3 %v13473_v26  ;;  %8110 = vmatmul.bf16.vlgmr.msra.gmra.mxu0 %v11888_v51  ;;  %v13449_v26 = vld [vmem:[#allocation8 + $0x4c] sm:$0xf]  ;;  %v13455_v51 = vld [vmem:[#allocation8 + $0x78] sm:$0xf0]  ;;  %vm18233_vm14 = vmmov %vm18229_vm2 }
 0x737   :  { %8140 = vmatpush.bf16.msrb.mxu0 %v13497_v22  ;;  %8184 = vmatpush.bf16.msrb.mxu2 %v13507_v23  ;;  %v11920_v19 = vor.u32 %v13449_v26, %v11917_v17  ;;  %v13483_v22 = vld [vmem:[#allocation3 + $0x160] sm:$0xff]  ;;  %v13452_v23 = vld [vmem:[#allocation8 + $0x64] sm:$0xf]  ;;  %v13825_v26 = vld [vmem:[%s18156_s4] ss:$0 sm:$0xff] }
 0x738   :  { %8165 = vmatpush.bf16.msrb.mxu1 %v13499_v27 }
 0x73a   :  { %8084 = vmatpush.bf16.msrb.mxu3 %v13472_v42  ;;  %v11931_v42 = vld [vmem:[#allocation8 + $0x58] sm:$0xf] }
 0x73b   :  { %8141 = vmatpush.bf16.msrb.mxu0 %v13496_v52  ;;  %8185 = vmatpush.bf16.msrb.mxu2 %v13506_v25  ;;  %v11932_v37 = vor.u32 %v13455_v51, %v11931_v42  ;;  %v13525_v52 = vld [vmem:[#allocation3 + $0x170] sm:$0xff] }
 0x73c   :  { %8166 = vmatpush.bf16.msrb.mxu1 %v13498_v24 }
 0x73e   :  { %8085 = vmatpush.bf16.msrb.mxu3 %v13471_v28  ;;  %8186 = vmatmul.bf16.vlgmr.msrb.gmra.mxu2 %v11904_v10  ;;  %v11939_v28 = vld [vmem:[#allocation8 + $0x60] sm:$0xf] }
 0x73f   :  { %8142 = vmatpush.bf16.msrb.mxu0 %v13495_v3  ;;  %8167 = vmatmul.bf16.vlgmr.msrb.gmra.mxu1 %v11900_v48  ;;  %v13451_v3 = vld [vmem:[#allocation8 + $0x5c] sm:$0xf]  ;;  %v11940_v16 = vor.u32 %v13456_v38, %v11939_v28 }
 0x742   :  { %8086 = vmatpush.bf16.msrb.mxu3 %v13470_v36  ;;  %v11933_v36 = vld [vmem:[#allocation8 + $0x7c] sm:$0xf0] }
 0x743   :  { %8143 = vmatpush.bf16.msrb.mxu0 %v13494_v45  ;;  %v11936_v45 = vor.u32 %v13451_v3, %v11933_v36 }
 0x745   :  { %8077 = vmatmul.bf16.gmra.mxu3 %v11916_v29  ;;  %v13441_v29 = vld [vmem:[#allocation8 + $0xc] sm:$0xf] }
 0x746   :  { %8087 = vmatpush.bf16.msrb.mxu3 %v13469_v2  ;;  %8115 = vmatmul.bf16.gmra.mxu0 %v11924_v7  ;;  %v13520_v2 = vld [vmem:[#allocation3 + $0x208] sm:$0xff]  ;;  %v13519_v7 = vld [vmem:[#allocation3 + $0x158] sm:$0xff] }
 0x747   :  { %8144 = vmatpush.bf16.msrb.mxu0 %v13493_v46  ;;  %v11911_v46 = vld [vmem:[#allocation8 + $0x20] sm:$0xf] }
 0x748   :  { %v11912_v9 = vor.u32 %v13448_v49, %v11911_v46 }
 0x74a   :  { %8088 = vmatpush.bf16.msrb.mxu3 %v13468_v61  ;;  %v11892_v61 = vor.u32 %v13441_v29, %v11889_v21 }
 0x74b   :  { %8145 = vmatpush.bf16.msrb.mxu0 %v13492_v39  ;;  %v13518_v39 = vld [vmem:[#allocation3 + $0x70] sm:$0xff] }
 0x74e   :  { %8089 = vmatpush.bf16.msrb.mxu3 %v13467_v4  ;;  %8191 = vmatmul.bf16.gmra.mxu2 %v11940_v16  ;;  %v13517_v4 = vld [vmem:[#allocation3 + $0x218] sm:$0xff] }
 0x74f   :  { %8146 = vmatpush.bf16.msrb.mxu0 %v13491_v50  ;;  %8172 = vmatmul.bf16.gmra.mxu1 %v11936_v45  ;;  %v13516_v50 = vld [vmem:[#allocation3 + $0xe0] sm:$0xff] }
 0x752   :  { %8090 = vmatpush.bf16.msrb.mxu3 %v13466_v8  ;;  %v11928_v8 = vor.u32 %v13450_v53, %v11925_v44 }
 0x753   :  { %8147 = vmatpush.bf16.msrb.mxu0 %v13490_v43  ;;  %v13443_v43 = vld [vmem:[#allocation8 + $0x1c] sm:$0xf] }
 0x755   :  { %8091 = vmatmul.bf16.vlgmr.msrb.gmra.mxu3 %v11884_v54  ;;  %v11941_v54 = vld [vmem:[#allocation8 + $0x84] sm:$0xf0] }
 0x756   :  { %8121 = vmatpush.bf16.msra.mxu3 %v13489_v41  ;;  %8148 = vmatmul.bf16.vlgmr.msrb.gmra.mxu0 %v11896_v12  ;;  %v11947_v41 = vld [vmem:[#allocation8 + $0x68] sm:$0xf]  ;;  %v11944_v57 = vor.u32 %v13452_v23, %v11941_v54 }
 0x757   :  { %8216 = vmatpush.bf16.msra.mxu0 %v13529_v58  ;;  %v11948_v60 = vor.u32 %v13457_v13, %v11947_v41 }
 0x75a   :  { %8122 = vmatpush.bf16.msra.mxu3 %v13488_v32  ;;  %v11908_v32 = vor.u32 %v13443_v43, %v11905_v55 }
 0x75b   :  { %8217 = vmatpush.bf16.msra.mxu0 %v13528_v5 }
 0x75e   :  { %8123 = vmatpush.bf16.msra.mxu3 %v13487_v1 }
 0x75f   :  { %8218 = vmatpush.bf16.msra.mxu0 %v13527_v59 }
 0x762   :  { %8124 = vmatpush.bf16.msra.mxu3 %v13486_v40 }
 0x763   :  { %8219 = vmatpush.bf16.msra.mxu0 %v13526_v34 }
 0x765   :  { %8096 = vmatmul.bf16.gmra.mxu3 %v11920_v19 }
 0x766   :  { %8125 = vmatpush.bf16.msra.mxu3 %v13485_v62  ;;  %8153 = vmatmul.bf16.gmra.mxu0 %v11932_v37 }
 0x767   :  { %8220 = vmatpush.bf16.msra.mxu0 %v13525_v52 }
 0x76a   :  { %8126 = vmatpush.bf16.msra.mxu3 %v13484_v18 }
 0x76b   :  { %8221 = vmatpush.bf16.msra.mxu0 %v13524_v14 }
 0x76e   :  { %8127 = vmatpush.bf16.msra.mxu3 %v13483_v22 }
 0x76f   :  { %8222 = vmatpush.bf16.msra.mxu0 %v13523_v31 }
 0x772   :  { %8128 = vmatpush.bf16.msra.mxu3 %v13482_v0 }
 0x773   :  { %8223 = vmatpush.bf16.msra.mxu0 %v13522_v15 }
 0x775   :  { %8129 = vmatmul.bf16.vlgmr.msra.gmra.mxu3 %v11892_v61 }
 0x776   :  { %8197 = vmatpush.bf16.msrb.mxu3 %v13521_v63  ;;  %8224 = vmatmul.bf16.vlgmr.msra.gmra.mxu0 %v11912_v9 }
 0x77a   :  { %8198 = vmatpush.bf16.msrb.mxu3 %v13520_v2 }
 0x77e   :  { %8199 = vmatpush.bf16.msrb.mxu3 %v13519_v7 }
 0x782   :  { %8200 = vmatpush.bf16.msrb.mxu3 %v13518_v39 }
 0x785   :  { %8134 = vmatmul.bf16.gmra.mxu3 %v11928_v8 }
 0x786   :  { %8201 = vmatpush.bf16.msrb.mxu3 %v13517_v4  ;;  %8229 = vmatmul.bf16.gmra.mxu0 %v11948_v60 }
 0x78a   :  { %8202 = vmatpush.bf16.msrb.mxu3 %v13516_v50 }
 0x78e   :  { %8203 = vmatpush.bf16.msrb.mxu3 %v13515_v56 }
 0x792   :  { %8204 = vmatpush.bf16.msrb.mxu3 %v13514_v11 }
 0x795   :  { %8205 = vmatmul.bf16.vlgmr.msrb.gmra.mxu3 %v11908_v32 }
 0x7a5   :  { %8210 = vmatmul.bf16.gmra.mxu3 %v11944_v57 }
 0x7b3   :  { %v8111_v12 = vpop.f32.mrf.mxu0 }
 0x7b8   :  { %v8073_v33 = vpop.f32.mrf.mxu3 }
 0x7b9   :  { %v8074_v17 = vadd.f32 %v13825_v26, %v8073_v33 }
 0x7bb   :  { %v8113_v27 = vpop.f32.mrf.mxu0 }
 0x7bc   :  { %v8168_v19 = vpop.f32.mrf.mxu1 }
 0x7c0   :  { %v8075_v1 = vpop.f32.mrf.mxu3 }
 0x7c1   :  { %v8076_v51 = vadd.f32 %v13825_v26, %v8075_v1  ;;  %v8187_v52 = vpop.f32.mrf.mxu2 }
 0x7c3   :  { %v8116_v20 = vpop.f32.mrf.mxu0 }
 0x7c4   :  { %v8170_v0 = vpop.f32.mrf.mxu1 }
 0x7c8   :  { %v8078_v58 = vpop.f32.mrf.mxu3 }
 0x7c9   :  { %v8079_v63 = vadd.f32 %v13825_v26, %v8078_v58  ;;  %v8189_v2 = vpop.f32.mrf.mxu2 }
 0x7cb   :  { %v8118_v24 = vpop.f32.mrf.mxu0 }
 0x7cc   :  { %v8173_v39 = vpop.f32.mrf.mxu1 }
 0x7d0   :  { %v8080_v25 = vpop.f32.mrf.mxu3 }
 0x7d1   :  { %v8081_v15 = vadd.f32 %v13825_v26, %v8080_v25  ;;  %v8192_v13 = vpop.f32.mrf.mxu2 }
 0x7d3   :  { %v8149_v10 = vpop.f32.mrf.mxu0 }
 0x7d4   :  { %v8175_v1 = vpop.f32.mrf.mxu1 }
 0x7d8   :  { %v8092_v5 = vpop.f32.mrf.mxu3 }
 0x7d9   :  { %v8093_v18 = vadd.f32 %v8092_v5, %v8074_v17  ;;  %v8194_v25 = vpop.f32.mrf.mxu2 }
 0x7db   :  { %v8151_v35 = vpop.f32.mrf.mxu0  ;;  %v8112_v37 = vadd.f32 %v8111_v12, %v8093_v18  ;;  %v8263_v18 = vld [vmem:[%s18164_s13 + $0x1] sm:$0x1] }
 0x7e0   :  { %v8094_v6 = vpop.f32.mrf.mxu3 }
 0x7e1   :  { %v8095_v22 = vadd.f32 %v8094_v6, %v8076_v51 }
 0x7e3   :  { %v8154_v62 = vpop.f32.mrf.mxu0  ;;  %v8114_v38 = vadd.f32 %v8113_v27, %v8095_v22 }
 0x7e8   :  { %v8097_v40 = vpop.f32.mrf.mxu3 }
 0x7e9   :  { %v8098_v21 = vadd.f32 %v8097_v40, %v8079_v63 }
 0x7eb   :  { %v8156_v42 = vpop.f32.mrf.mxu0  ;;  %v8117_v49 = vadd.f32 %v8116_v20, %v8098_v21  ;;  %v8248_v20 = vld [vmem:[%s18164_s13] sm:$0x1] }
 0x7f0   :  { %v8099_v30 = vpop.f32.mrf.mxu3 }
 0x7f1   :  { %v8100_v46 = vadd.f32 %v8099_v30, %v8081_v15 }
 0x7f3   :  { %v8225_v16 = vpop.f32.mrf.mxu0  ;;  %v8119_v8 = vadd.f32 %v8118_v24, %v8100_v46 }
 0x7f8   :  { %v8130_v59 = vpop.f32.mrf.mxu3 }
 0x7f9   :  { %v8131_v28 = vadd.f32 %v8130_v59, %v8112_v37 }
 0x7fb   :  { %v8150_v3 = vadd.f32 %v8149_v10, %v8131_v28  ;;  %v8227_v4 = vpop.f32.mrf.mxu0 }
 0x7fd   :  { %v8169_v31 = vadd.f32 %v8168_v19, %v8150_v3 }
 0x7ff   :  { %v8188_v61 = vadd.f32 %v8187_v52, %v8169_v31 }
 0x800   :  { %v8132_v48 = vpop.f32.mrf.mxu3 }
 0x801   :  { %v8133_v36 = vadd.f32 %v8132_v48, %v8114_v38 }
 0x803   :  { %v8152_v45 = vadd.f32 %v8151_v35, %v8133_v36  ;;  %v8230_v23 = vpop.f32.mrf.mxu0  ;;  %v8347_v36 = vld [vmem:[%s18164_s13 + $0x9] sm:$0x1] }
 0x805   :  { %v8171_v7 = vadd.f32 %v8170_v0, %v8152_v45  ;;  %v8272_v0 = vld [vmem:[%s18164_s13 + $0x2] sm:$0x1] }
 0x807   :  { %v8190_v53 = vadd.f32 %v8189_v2, %v8171_v7  ;;  %v8285_v7 = vld [vmem:[%s18164_s13 + $0x3] sm:$0x1] }
 0x808   :  { %v8135_v34 = vpop.f32.mrf.mxu3 }
 0x809   :  { %v8136_v44 = vadd.f32 %v8135_v34, %v8117_v49 }
 0x80b   :  { %v8155_v11 = vadd.f32 %v8154_v62, %v8136_v44  ;;  %v8232_v35 = vpop.f32.mrf.mxu0  ;;  %v8333_v62 = vld [vmem:[%s18164_s13 + $0x8] sm:$0x1] }
 0x80d   :  { %v8174_v54 = vadd.f32 %v8173_v39, %v8155_v11 }
 0x80f   :  { %v8193_v58 = vadd.f32 %v8192_v13, %v8174_v54 }
 0x810   :  { %v8137_v14 = vpop.f32.mrf.mxu3 }
 0x811   :  { %v8138_v60 = vadd.f32 %v8137_v14, %v8119_v8 }
 0x813   :  { %v8157_v57 = vadd.f32 %v8156_v42, %v8138_v60 }
 0x815   :  { %v8176_v27 = vadd.f32 %v8175_v1, %v8157_v57 }
 0x817   :  { %v8195_v6 = vadd.f32 %v8194_v25, %v8176_v27 }
 0x818   :  { %v8206_v29 = vpop.f32.mrf.mxu3 }
 0x819   :  { %v8207_v9 = vadd.f32 %v8206_v29, %v8188_v61 }
 0x81b   :  { %v8226_v56 = vadd.f32 %v8225_v16, %v8207_v9 }
 0x81d   :  { %v8235_v55 = vmax.f32 %v8226_v56, 0.0 }
 0x820   :  { %v8208_v50 = vpop.f32.mrf.mxu3 }
 0x821   :  { %v8209_v41 = vadd.f32 %v8208_v50, %v8190_v53  ;;  %v8294_v50 = vld [vmem:[%s18164_s13 + $0x4] sm:$0x1] }
 0x823   :  { %v8228_v43 = vadd.f32 %v8227_v4, %v8209_v41 }
 0x825   :  { %v8236_v32 = vmax.f32 %v8228_v43, 0.0 }
 0x827   :  { %v13801_v33 = vpack.c.bf16 %v8236_v32, %v8235_v55 }
 0x828   :  { %v8211_v12 = vpop.f32.mrf.mxu3 }
 0x829   :  { %13802 = vst [vmem:[#allocation9] sm:$0xff] %v13801_v33   ;;  %v8212_v5 = vadd.f32 %v8211_v12, %v8193_v58 }
 0x82b   :  { %v8231_v26 = vadd.f32 %v8230_v23, %v8212_v5  ;;  %v8307_v5 = vld [vmem:[%s18164_s13 + $0x5] sm:$0x1] }
 0x82d   :  { %v8237_v28 = vmax.f32 %v8231_v26, 0.0 }
 0x830   :  { %v8247_v24 = vld [vmem:[#allocation9] sm:$0x1]  ;;  %v8266_v10 = vld [vmem:[#allocation9] sm:$0x2]  ;;  %v8213_v30 = vpop.f32.mrf.mxu3  ;;  %v8332_v19 = vld [vmem:[#allocation9 + $0x4] sm:$0x1] }
 0x831   :  { %v8251_v40 = vld [vmem:[#allocation9] sm:$0x1]  ;;  %v8249_v59 = vsel %vm15395_vm7, %v8247_v24, %v8248_v20  ;;  %8268 = vst [vmem:[#allocation1] sm:$0xff] %v8266_v10  ;;  %v8214_v17 = vadd.f32 %v8213_v30, %v8195_v6  ;;  %v8336_v42 = vld [vmem:[#allocation9 + $0x4] sm:$0x1]  ;;  %v8334_v37 = vsel %vm15395_vm7, %v8332_v19, %v8333_v62 }
 0x832   :  { %v8253_v48 = vrot.slane %v8251_v40, 3  ;;  %8250 = vst [vmem:[%s18164_s13] sm:$0x1] %v8249_v59  ;;  %v8338_v52 = vrot.slane %v8336_v42, 3  ;;  %v8275_v45 = vld [vmem:[#allocation9] sm:$0x2] }
 0x833   :  { %v8233_v51 = vadd.f32 %v8232_v35, %v8214_v17  ;;  %8335 = vst [vmem:[%s18164_s13 + $0x8] sm:$0x1] %v8334_v37  ;;  %v8288_v61 = vld [vmem:[#allocation9] sm:$0x4]  ;;  %v8310_v25 = vld [vmem:[#allocation9] sm:$0x8] }
 0x834   :  { %v8257_v34 = vsel %vm18226_vm11, %v8251_v40, %v8253_v48  ;;  %v8341_v3 = vsel %vm18227_vm13, %v8336_v42, %v8338_v52  ;;  %v8297_v23 = vld [vmem:[#allocation9] sm:$0x4]  ;;  %v8316_v24 = vld [vmem:[%s18164_s13 + $0x6] sm:$0x1]  ;;  %v8319_v10 = vld [vmem:[#allocation9] sm:$0x8] }
 0x835   :  { %v8258_v22 = vshrl.u32 %v8257_v34, 16  ;;  %v8238_v14 = vmax.f32 %v8233_v51, 0.0  ;;  %v8342_v16 = vshrl.u32 %v8341_v3, 16  ;;  %v8329_v59 = vld [vmem:[%s18164_s13 + $0x7] sm:$0x1] }
 0x836   :  { %v8350_v48 = vld [vmem:[#allocation9 + $0x4] sm:$0x2]  ;;  %v8356_v17 = vld [vmem:[%s18164_s13 + $0xa] sm:$0x1]  ;;  %v8369_v51 = vld [vmem:[%s18164_s13 + $0xb] sm:$0x1] }
 0x837   :  { %v8264_v38 = vsel %vm15395_vm7, %v8258_v22, %v8263_v18  ;;  %v13806_v63 = vpack.c.bf16 %v8238_v14, %v8237_v28  ;;  %v8348_v2 = vsel %vm15395_vm7, %v8342_v16, %v8347_v36  ;;  %v8359_v18 = vld [vmem:[#allocation9 + $0x4] sm:$0x2]  ;;  %v8372_v22 = vld [vmem:[#allocation9 + $0x4] sm:$0x4]  ;;  %v8378_v28 = vld [vmem:[%s18164_s13 + $0xc] sm:$0x1] }
 0x838   :  { %8265 = vst [vmem:[%s18164_s13 + $0x1] sm:$0x1] %v8264_v38  ;;  %v8270_v31 = vld [vmem:[#allocation1 + $0x1] ss:$4 sm:$0xff] }
 0x839   :  { %8277 = vst [vmem:[#allocation1] sm:$0xff] %v8275_v45  ;;  %v8273_v29 = vsel %vm15395_vm7, %v8270_v31, %v8272_v0  ;;  %v8391_v60 = vld [vmem:[%s18164_s13] sm:$0x1] }
 0x83a   :  { %8349 = vst [vmem:[%s18164_s13 + $0x9] sm:$0x1] %v8348_v2  ;;  %v8467_v12 = vld [vmem:[%s18164_s13 + $0x8] sm:$0x1] }
 0x83b   :  { %13818 = vst [vmem:[#allocation9 + $0x8] sm:$0xff] %v13806_v63  }
 0x83c   :  { %8274 = vst [vmem:[%s18164_s13 + $0x2] sm:$0x1] %v8273_v29 }
 0x83f   :  { %v8395_v39 = vld [vmem:[%s18164_s13 + $0x1] sm:$0x1] }
 0x840   :  { %v8279_v15 = vld [vmem:[#allocation1 + $0x1] ss:$4 sm:$0xff] }
 0x841   :  { %8290 = vst [vmem:[#allocation1] sm:$0xff] %v8288_v61  ;;  %v8280_v46 = vshrl.u32 %v8279_v15, 16  ;;  %v8471_v56 = vld [vmem:[%s18164_s13 + $0x9] sm:$0x1] }
 0x842   :  { %v8381_v49 = vld [vmem:[#allocation9 + $0x8] sm:$0x1]  ;;  %v8458_v13 = vld [vmem:[#allocation9 + $0xc] sm:$0x1]  ;;  %v8398_v38 = vld [vmem:[#allocation9 + $0x8] sm:$0x2] }
 0x843   :  { %v8394_v9 = vld [vmem:[#allocation9 + $0x8] sm:$0x1]  ;;  %v8286_v4 = vsel %vm15395_vm7, %v8280_v46, %v8285_v7  ;;  %v8383_v53 = vrot.slane %v8381_v49, 3  ;;  %v8470_v11 = vld [vmem:[#allocation9 + $0xc] sm:$0x1]  ;;  %v8460_v43 = vrot.slane %v8458_v13, 3 }
 0x844   :  { %v8396_v44 = vsel %vm17901_vm3, %v8394_v9, %v8395_v39  ;;  %8287 = vst [vmem:[%s18164_s13 + $0x3] sm:$0x1] %v8286_v4  ;;  %v8472_v55 = vsel %vm17901_vm3, %v8470_v11, %v8471_v56  ;;  %v8409_v0 = vld [vmem:[#allocation9 + $0x8] sm:$0x2]  ;;  %v8406_v63 = vld [vmem:[%s18164_s13 + $0x2] sm:$0x1] }
 0x845   :  { %v8386_v8 = vsel %vm18232_vm9, %v8381_v49, %v8383_v53  ;;  %8397 = vst [vmem:[%s18164_s13 + $0x1] sm:$0x1] %v8396_v44  ;;  %v8463_v33 = vsel %vm18233_vm14, %v8458_v13, %v8460_v43  ;;  %v8418_v2 = vld [vmem:[#allocation9 + $0x8] sm:$0x4]  ;;  %v8438_v4 = vld [vmem:[#allocation9 + $0x8] sm:$0x8] }
 0x846   :  { %v8387_v41 = vshll.u32 %v8386_v8, 16  ;;  %8473 = vst [vmem:[%s18164_s13 + $0x9] sm:$0x1] %v8472_v55  ;;  %v8464_v1 = vshll.u32 %v8463_v33, 16  ;;  %v8429_v61 = vld [vmem:[#allocation9 + $0x8] sm:$0x4] }
 0x848   :  { %v8292_v32 = vld [vmem:[#allocation1 + $0x2] ss:$4 sm:$0xff]  ;;  %v8392_v54 = vsel %vm17901_vm3, %v8387_v41, %v8391_v60  ;;  %v8468_v58 = vsel %vm17901_vm3, %v8464_v1, %v8467_v12  ;;  %v8474_v60 = vld [vmem:[#allocation9 + $0xc] sm:$0x2] }
 0x849   :  { %8299 = vst [vmem:[#allocation1] sm:$0xff] %v8297_v23  ;;  %v8295_v57 = vsel %vm15395_vm7, %v8292_v32, %v8294_v50  ;;  %v8449_v50 = vld [vmem:[#allocation9 + $0x8] sm:$0x8]  ;;  %v8485_v32 = vld [vmem:[#allocation9 + $0xc] sm:$0x2] }
 0x84a   :  { %8296 = vst [vmem:[%s18164_s13 + $0x4] sm:$0x1] %v8295_v57  ;;  %v8494_v12 = vld [vmem:[#allocation9 + $0xc] sm:$0x4] }
 0x84b   :  { %8393 = vst [vmem:[%s18164_s13] sm:$0x1] %v8392_v54  ;;  %v8415_v45 = vld [vmem:[%s18164_s13 + $0x3] sm:$0x1] }
 0x84c   :  { %8469 = vst [vmem:[%s18164_s13 + $0x8] sm:$0x1] %v8468_v58 }
 0x850   :  { %v8301_v27 = vld [vmem:[#allocation1 + $0x2] ss:$4 sm:$0xff] }
 0x851   :  { %v8302_v20 = vshrl.u32 %v8301_v27, 16  ;;  %8312 = vst [vmem:[#allocation1] sm:$0xff] %v8310_v25  ;;  %v8426_v46 = vld [vmem:[%s18164_s13 + $0x4] sm:$0x1] }
 0x853   :  { %v8308_v6 = vsel %vm15395_vm7, %v8302_v20, %v8307_v5 }
 0x854   :  { %8309 = vst [vmem:[%s18164_s13 + $0x5] sm:$0x1] %v8308_v6 }
 0x858   :  { %v8314_v40 = vld [vmem:[#allocation1 + $0x3] ss:$4 sm:$0xff] }
 0x859   :  { %v8317_v30 = vsel %vm15395_vm7, %v8314_v40, %v8316_v24  ;;  %8321 = vst [vmem:[#allocation1] sm:$0xff] %v8319_v10 }
 0x85a   :  { %8318 = vst [vmem:[%s18164_s13 + $0x6] sm:$0x1] %v8317_v30 }
 0x85b   :  { %v8435_v39 = vld [vmem:[%s18164_s13 + $0x5] sm:$0x1] }
 0x860   :  { %v8323_v35 = vld [vmem:[#allocation1 + $0x3] ss:$4 sm:$0xff] }
 0x861   :  { %v8324_v62 = vshrl.u32 %v8323_v35, 16  ;;  %8352 = vst [vmem:[#allocation1] sm:$0xff] %v8350_v48  ;;  %v8446_v56 = vld [vmem:[%s18164_s13 + $0x6] sm:$0x1] }
 0x863   :  { %v8330_v26 = vsel %vm15395_vm7, %v8324_v62, %v8329_v59 }
 0x864   :  { %8331 = vst [vmem:[%s18164_s13 + $0x7] sm:$0x1] %v8330_v26 }
 0x868   :  { %v8354_v34 = vld [vmem:[#allocation1 + $0x1] ss:$4 sm:$0xff] }
 0x869   :  { %v8357_v19 = vsel %vm15395_vm7, %v8354_v34, %v8356_v17  ;;  %8361 = vst [vmem:[#allocation1] sm:$0xff] %v8359_v18 }
 0x86a   :  { %8358 = vst [vmem:[%s18164_s13 + $0xa] sm:$0x1] %v8357_v19 }
 0x86b   :  { %v8455_v11 = vld [vmem:[%s18164_s13 + $0x7] sm:$0x1] }
 0x870   :  { %v8363_v42 = vld [vmem:[#allocation1 + $0x1] ss:$4 sm:$0xff] }
 0x871   :  { %v8364_v37 = vshrl.u32 %v8363_v42, 16  ;;  %8374 = vst [vmem:[#allocation1] sm:$0xff] %v8372_v22  ;;  %v8482_v54 = vld [vmem:[%s18164_s13 + $0xa] sm:$0x1] }
 0x873   :  { %v8370_v52 = vsel %vm15395_vm7, %v8364_v37, %v8369_v51 }
 0x874   :  { %8371 = vst [vmem:[%s18164_s13 + $0xb] sm:$0x1] %v8370_v52 }
 0x878   :  { %v8376_v14 = vld [vmem:[#allocation1 + $0x2] ss:$4 sm:$0xff] }
 0x879   :  { %v8379_v3 = vsel %vm15395_vm7, %v8376_v14, %v8378_v28  ;;  %8400 = vst [vmem:[#allocation1] sm:$0xff] %v8398_v38 }
 0x87a   :  { %8380 = vst [vmem:[%s18164_s13 + $0xc] sm:$0x1] %v8379_v3 }
 0x87b   :  { %v8491_v1 = vld [vmem:[%s18164_s13 + $0xb] sm:$0x1] }
 0x880   :  { %v8402_v36 = vld [vmem:[#allocation1 + $0x1] ss:$4 sm:$0xff] }
 0x881   :  { %v8403_v16 = vshll.u32 %v8402_v36, 16  ;;  %8411 = vst [vmem:[#allocation1] sm:$0xff] %v8409_v0  ;;  %v8502_v5 = vld [vmem:[%s18164_s13 + $0xc] sm:$0x1] }
 0x883   :  { %v8407_v31 = vsel %vm17901_vm3, %v8403_v16, %v8406_v63 }
 0x884   :  { %8408 = vst [vmem:[%s18164_s13 + $0x2] sm:$0x1] %v8407_v31 }
 0x888   :  { %v8413_v47 = vld [vmem:[#allocation1 + $0x1] ss:$4 sm:$0xff] }
 0x889   :  { %v8416_v29 = vsel %vm17901_vm3, %v8413_v47, %v8415_v45  ;;  %8420 = vst [vmem:[#allocation1] sm:$0xff] %v8418_v2 }
 0x88a   :  { %8417 = vst [vmem:[%s18164_s13 + $0x3] sm:$0x1] %v8416_v29 }
 0x890   :  { %v8422_v15 = vld [vmem:[#allocation1 + $0x2] ss:$4 sm:$0xff] }
 0x891   :  { %v8423_v7 = vshll.u32 %v8422_v15, 16  ;;  %8431 = vst [vmem:[#allocation1] sm:$0xff] %v8429_v61 }
 0x893   :  { %v8427_v49 = vsel %vm17901_vm3, %v8423_v7, %v8426_v46 }
 0x894   :  { %8428 = vst [vmem:[%s18164_s13 + $0x4] sm:$0x1] %v8427_v49 }
 0x898   :  { %v8433_v9 = vld [vmem:[#allocation1 + $0x2] ss:$4 sm:$0xff] }
 0x899   :  { %v8436_v53 = vsel %vm17901_vm3, %v8433_v9, %v8435_v39  ;;  %8440 = vst [vmem:[#allocation1] sm:$0xff] %v8438_v4 }
 0x89a   :  { %8437 = vst [vmem:[%s18164_s13 + $0x5] sm:$0x1] %v8436_v53 }
 0x8a0   :  { %v8442_v44 = vld [vmem:[#allocation1 + $0x3] ss:$4 sm:$0xff] }
 0x8a1   :  { %v8443_v8 = vshll.u32 %v8442_v44, 16  ;;  %8451 = vst [vmem:[#allocation1] sm:$0xff] %v8449_v50 }
 0x8a3   :  { %v8447_v41 = vsel %vm17901_vm3, %v8443_v8, %v8446_v56 }
 0x8a4   :  { %8448 = vst [vmem:[%s18164_s13 + $0x6] sm:$0x1] %v8447_v41 }
 0x8a8   :  { %v8453_v13 = vld [vmem:[#allocation1 + $0x3] ss:$4 sm:$0xff] }
 0x8a9   :  { %v8456_v43 = vsel %vm17901_vm3, %v8453_v13, %v8455_v11  ;;  %8476 = vst [vmem:[#allocation1] sm:$0xff] %v8474_v60 }
 0x8aa   :  { %8457 = vst [vmem:[%s18164_s13 + $0x7] sm:$0x1] %v8456_v43 }
 0x8b0   :  { %v8478_v55 = vld [vmem:[#allocation1 + $0x1] ss:$4 sm:$0xff] }
 0x8b1   :  { %v8479_v23 = vshll.u32 %v8478_v55, 16  ;;  %8487 = vst [vmem:[#allocation1] sm:$0xff] %v8485_v32 }
 0x8b3   :  { %v8483_v57 = vsel %vm17901_vm3, %v8479_v23, %v8482_v54 }
 0x8b4   :  { %8484 = vst [vmem:[%s18164_s13 + $0xa] sm:$0x1] %v8483_v57 }
 0x8b8   :  { %v8489_v33 = vld [vmem:[#allocation1 + $0x1] ss:$4 sm:$0xff] }
 0x8b9   :  { %v8492_v58 = vsel %vm17901_vm3, %v8489_v33, %v8491_v1  ;;  %8496 = vst [vmem:[#allocation1] sm:$0xff] %v8494_v12 }
 0x8ba   :  { %8493 = vst [vmem:[%s18164_s13 + $0xb] sm:$0x1] %v8492_v58 }
 0x8c0   :  { %v8498_v27 = vld [vmem:[#allocation1 + $0x2] ss:$4 sm:$0xff] }
 0x8c1   :  { %v8499_v25 = vshll.u32 %v8498_v27, 16 }
 0x8c3   :  { %v8503_v20 = vsel %vm17901_vm3, %v8499_v25, %v8502_v5 }
 0x8c4   :  { %8504 = vst [vmem:[%s18164_s13 + $0xc] sm:$0x1] %v8503_v20 }
 0x8c5   :  { %13831 = dma.done.wait [#allocation5 + $0x2], 26624 }
 0x8c6   :  { %13832 = vsyncadd [#allocation5 + $0x2], 4294940672  ;;  %v12301_v6 = vld [vmem:[#allocation4 + $0x70] sm:$0xf]  ;;  %v13545_v24 = vld [vmem:[#allocation4 + $0x74] sm:$0xf0] }
 0x8c7   :  { %v12365_v40 = vld [vmem:[#allocation4 + $0xf0] sm:$0xf]  ;;  %v12302_v10 = vor.u32 %v13545_v24, %v12301_v6  ;;  %v13561_v30 = vld [vmem:[#allocation4 + $0xf4] sm:$0xf0]  ;;  %v12293_v26 = vld [vmem:[#allocation4 + $0x60] sm:$0xf] }
 0x8c8   :  { %v12429_v35 = vld [vmem:[#allocation4 + $0x170] sm:$0xf]  ;;  %v13577_v59 = vld [vmem:[#allocation4 + $0x174] sm:$0xf0]  ;;  %v12366_v48 = vor.u32 %v13561_v30, %v12365_v40  ;;  %v13543_v17 = vld [vmem:[#allocation4 + $0x64] sm:$0xf0] }
 0x8c9   :  { %v12430_v62 = vor.u32 %v13577_v59, %v12429_v35  ;;  %v12357_v34 = vld [vmem:[#allocation4 + $0xe0] sm:$0xf]  ;;  %9795 = vmatpush.bf16.msra.mxu1 %v12302_v10  ;;  %v12294_v21 = vor.u32 %v13543_v17, %v12293_v26  ;;  %v13559_v18 = vld [vmem:[#allocation4 + $0xe4] sm:$0xf0]  ;;  %v12285_v37 = vld [vmem:[#allocation4 + $0x50] sm:$0xf] }
 0x8ca   :  { %v12421_v19 = vld [vmem:[#allocation4 + $0x160] sm:$0xf]  ;;  %v13575_v42 = vld [vmem:[#allocation4 + $0x164] sm:$0xf0]  ;;  %9808 = vmatpush.bf16.msra.mxu2 %v12366_v48  ;;  %v12358_v51 = vor.u32 %v13559_v18, %v12357_v34  ;;  %v13541_v52 = vld [vmem:[#allocation4 + $0x54] sm:$0xf0] }
 0x8cb   :  { %9821 = vmatpush.bf16.msra.mxu3 %v12430_v62  ;;  %v12422_v22 = vor.u32 %v13575_v42, %v12421_v19  ;;  %v12349_v28 = vld [vmem:[#allocation4 + $0xd0] sm:$0xf]  ;;  %v13557_v14 = vld [vmem:[#allocation4 + $0xd4] sm:$0xf0]  ;;  %v12286_v16 = vor.u32 %v13541_v52, %v12285_v37  ;;  %v12277_v31 = vld [vmem:[#allocation4 + $0x40] sm:$0xf] }
 0x8cc   :  { %v12413_v38 = vld [vmem:[#allocation4 + $0x150] sm:$0xf]  ;;  %v13573_v3 = vld [vmem:[#allocation4 + $0x154] sm:$0xf0]  ;;  %v13539_v47 = vld [vmem:[#allocation4 + $0x44] sm:$0xf0]  ;;  %v12350_v45 = vor.u32 %v13557_v14, %v12349_v28 }
 0x8cd   :  { %v12493_v36 = vld [vmem:[#allocation4 + $0x1f0] sm:$0xf]  ;;  %v13593_v0 = vld [vmem:[#allocation4 + $0x1f4] sm:$0xf0]  ;;  %9796 = vmatpush.bf16.msra.mxu1 %v12294_v21  ;;  %v12414_v2 = vor.u32 %v13573_v3, %v12413_v38  ;;  %v12341_v29 = vld [vmem:[#allocation4 + $0xc0] sm:$0xf]  ;;  %v12278_v39 = vor.u32 %v13539_v47, %v12277_v31 }
 0x8ce   :  { %v12494_v63 = vor.u32 %v13593_v0, %v12493_v36  ;;  %9809 = vmatpush.bf16.msra.mxu2 %v12358_v51  ;;  %v13555_v15 = vld [vmem:[#allocation4 + $0xc4] sm:$0xf0]  ;;  %v12485_v61 = vld [vmem:[#allocation4 + $0x1e0] sm:$0xf]  ;;  %v12477_v4 = vld [vmem:[#allocation4 + $0x1d0] sm:$0xf] }
 0x8cf   :  { %9822 = vmatpush.bf16.msra.mxu3 %v12422_v22  ;;  %v12405_v7 = vld [vmem:[#allocation4 + $0x140] sm:$0xf]  ;;  %v13571_v46 = vld [vmem:[#allocation4 + $0x144] sm:$0xf0]  ;;  %v13589_v53 = vld [vmem:[#allocation4 + $0x1d4] sm:$0xf0]  ;;  %v12342_v44 = vor.u32 %v13555_v15, %v12341_v29 }
 0x8d0   :  { %9834 = vmatpush.bf16.msrb.mxu0 %v12494_v63  ;;  %v13591_v49 = vld [vmem:[#allocation4 + $0x1e4] sm:$0xf0]  ;;  %v12406_v50 = vor.u32 %v13571_v46, %v12405_v7  ;;  %v12269_v8 = vld [vmem:[#allocation4 + $0x30] sm:$0xf]  ;;  %v13537_v56 = vld [vmem:[#allocation4 + $0x34] sm:$0xf0]  ;;  %v12478_v43 = vor.u32 %v13589_v53, %v12477_v4 }
 0x8d1   :  { %v12486_v9 = vor.u32 %v13591_v49, %v12485_v61  ;;  %9797 = vmatpush.bf16.msra.mxu1 %v12286_v16  ;;  %v12333_v41 = vld [vmem:[#allocation4 + $0xb0] sm:$0xf]  ;;  %v13553_v13 = vld [vmem:[#allocation4 + $0xb4] sm:$0xf0]  ;;  %v12469_v55 = vld [vmem:[#allocation4 + $0x1c0] sm:$0xf]  ;;  %v12270_v23 = vor.u32 %v13537_v56, %v12269_v8 }
 0x8d2   :  { %9810 = vmatpush.bf16.msra.mxu2 %v12350_v45  ;;  %v12397_v11 = vld [vmem:[#allocation4 + $0x130] sm:$0xf]  ;;  %v13569_v60 = vld [vmem:[#allocation4 + $0x134] sm:$0xf0]  ;;  %v13587_v32 = vld [vmem:[#allocation4 + $0x1c4] sm:$0xf0]  ;;  %v12334_v54 = vor.u32 %v13553_v13, %v12333_v41 }
 0x8d3   :  { %9823 = vmatpush.bf16.msra.mxu3 %v12414_v2  ;;  %v12398_v57 = vor.u32 %v13569_v60, %v12397_v11  ;;  %v12261_v33 = vld [vmem:[#allocation4 + $0x20] sm:$0xf]  ;;  %v13535_v1 = vld [vmem:[#allocation4 + $0x24] sm:$0xf0]  ;;  %v12470_v5 = vor.u32 %v13587_v32, %v12469_v55  ;;  %v12461_v20 = vld [vmem:[#allocation4 + $0x1b0] sm:$0xf] }
 0x8d4   :  { %9835 = vmatpush.bf16.msrb.mxu0 %v12486_v9  ;;  %v12325_v12 = vld [vmem:[#allocation4 + $0xa0] sm:$0xf]  ;;  %v13551_v58 = vld [vmem:[#allocation4 + $0xa4] sm:$0xf0]  ;;  %v13585_v6 = vld [vmem:[#allocation4 + $0x1b4] sm:$0xf0]  ;;  %v12262_v24 = vor.u32 %v13535_v1, %v12261_v33 }
 0x8d5   :  { %9798 = vmatpush.bf16.msra.mxu1 %v12278_v39  ;;  %v12389_v27 = vld [vmem:[#allocation4 + $0x120] sm:$0xf]  ;;  %v13567_v25 = vld [vmem:[#allocation4 + $0x124] sm:$0xf0]  ;;  %v12326_v40 = vor.u32 %v13551_v58, %v12325_v12  ;;  %v12253_v30 = vld [vmem:[#allocation4 + $0x10] sm:$0xf]  ;;  %v12462_v17 = vor.u32 %v13585_v6, %v12461_v20 }
 0x8d6   :  { %9811 = vmatpush.bf16.msra.mxu2 %v12342_v44  ;;  %v12390_v10 = vor.u32 %v13567_v25, %v12389_v27  ;;  %v13533_v35 = vld [vmem:[#allocation4 + $0x14] sm:$0xf0]  ;;  %v12317_v59 = vld [vmem:[#allocation4 + $0x90] sm:$0xf]  ;;  %v12453_v34 = vld [vmem:[#allocation4 + $0x1a0] sm:$0xf] }
 0x8d7   :  { %9824 = vmatpush.bf16.msra.mxu3 %v12406_v50  ;;  %v13549_v48 = vld [vmem:[#allocation4 + $0x94] sm:$0xf0]  ;;  %v12381_v62 = vld [vmem:[#allocation4 + $0x110] sm:$0xf]  ;;  %v13583_v21 = vld [vmem:[#allocation4 + $0x1a4] sm:$0xf0]  ;;  %v12254_v18 = vor.u32 %v13533_v35, %v12253_v30 }
 0x8d8   :  { %9836 = vmatpush.bf16.msrb.mxu0 %v12478_v43  ;;  %v13565_v26 = vld [vmem:[#allocation4 + $0x114] sm:$0xf0]  ;;  %v12245_v19 = vld [vmem:[#allocation4] sm:$0xf]  ;;  %v13531_v42 = vld [vmem:[#allocation4 + $0x4] sm:$0xf0]  ;;  %v12318_v51 = vor.u32 %v13549_v48, %v12317_v59  ;;  %v12454_v36 = vor.u32 %v13583_v21, %v12453_v34 }
 0x8d9   :  { %9799 = vmatpush.bf16.msra.mxu1 %v12270_v23  ;;  %v12382_v22 = vor.u32 %v13565_v26, %v12381_v62  ;;  %v12309_v37 = vld [vmem:[#allocation4 + $0x80] sm:$0xf]  ;;  %v13547_v52 = vld [vmem:[#allocation4 + $0x84] sm:$0xf0]  ;;  %v12557_v28 = vld [vmem:[#allocation4 + $0x270] sm:$0xf]  ;;  %v12246_v31 = vor.u32 %v13531_v42, %v12245_v19 }
 0x8da   :  { %9812 = vmatpush.bf16.msra.mxu2 %v12334_v54  ;;  %v13609_v14 = vld [vmem:[#allocation4 + $0x274] sm:$0xf0]  ;;  %v12621_v38 = vld [vmem:[#allocation4 + $0x2f0] sm:$0xf]  ;;  %v12373_v0 = vld [vmem:[#allocation4 + $0x100] sm:$0xf]  ;;  %v12310_v29 = vor.u32 %v13547_v52, %v12309_v37 }
 0x8db   :  { %9825 = vmatpush.bf16.msra.mxu3 %v12398_v57  ;;  %v13625_v3 = vld [vmem:[#allocation4 + $0x2f4] sm:$0xf0]  ;;  %v13563_v16 = vld [vmem:[#allocation4 + $0x104] sm:$0xf0]  ;;  %v12685_v63 = vld [vmem:[#allocation4 + $0x370] sm:$0xf]  ;;  %v12558_v15 = vor.u32 %v13609_v14, %v12557_v28 }
 0x8dc   :  { %9837 = vmatpush.bf16.msrb.mxu0 %v12470_v5  ;;  %v13641_v47 = vld [vmem:[#allocation4 + $0x374] sm:$0xf0]  ;;  %v12445_v45 = vld [vmem:[#allocation4 + $0x190] sm:$0xf]  ;;  %v12622_v61 = vor.u32 %v13625_v3, %v12621_v38  ;;  %v12374_v7 = vor.u32 %v13563_v16, %v12373_v0  ;;  %v12549_v46 = vld [vmem:[#allocation4 + $0x260] sm:$0xf] }
 0x8dd   :  { %9800 = vmatpush.bf16.msra.mxu1 %v12262_v24  ;;  %v13581_v2 = vld [vmem:[#allocation4 + $0x194] sm:$0xf0]  ;;  %v13607_v49 = vld [vmem:[#allocation4 + $0x264] sm:$0xf0]  ;;  %v12686_v9 = vor.u32 %v13641_v47, %v12685_v63  ;;  %v12613_v39 = vld [vmem:[#allocation4 + $0x2e0] sm:$0xf] }
 0x8de   :  { %9813 = vmatpush.bf16.msra.mxu2 %v12326_v40  ;;  %v13623_v4 = vld [vmem:[#allocation4 + $0x2e4] sm:$0xf0]  ;;  %v12446_v53 = vor.u32 %v13581_v2, %v12445_v45  ;;  %v12677_v44 = vld [vmem:[#allocation4 + $0x360] sm:$0xf]  ;;  %v12550_v41 = vor.u32 %v13607_v49, %v12549_v46  ;;  %v12749_v13 = vld [vmem:[#allocation4 + $0x3f0] sm:$0xf] }
 0x8df   :  { %9826 = vmatpush.bf16.msra.mxu3 %v12390_v10  ;;  %v13639_v50 = vld [vmem:[#allocation4 + $0x364] sm:$0xf0]  ;;  %v12437_v8 = vld [vmem:[#allocation4 + $0x180] sm:$0xf]  ;;  %v13657_v11 = vld [vmem:[#allocation4 + $0x3f4] sm:$0xf0]  ;;  %v12614_v60 = vor.u32 %v13623_v4, %v12613_v39 }
 0x8e0   :  { %9838 = vmatpush.bf16.msrb.mxu0 %v12462_v17  ;;  %v13579_v56 = vld [vmem:[#allocation4 + $0x184] sm:$0xf0]  ;;  %v12541_v43 = vld [vmem:[#allocation4 + $0x250] sm:$0xf]  ;;  %v13605_v55 = vld [vmem:[#allocation4 + $0x254] sm:$0xf0]  ;;  %v12678_v32 = vor.u32 %v13639_v50, %v12677_v44  ;;  %v12750_v58 = vor.u32 %v13657_v11, %v12749_v13 }
 0x8e1   :  { %9801 = vmatpush.bf16.msra.mxu1 %v12254_v18  ;;  %v12605_v23 = vld [vmem:[#allocation4 + $0x2d0] sm:$0xf]  ;;  %v13621_v54 = vld [vmem:[#allocation4 + $0x2d4] sm:$0xf0]  ;;  %v12438_v57 = vor.u32 %v13579_v56, %v12437_v8  ;;  %v12542_v27 = vor.u32 %v13605_v55, %v12541_v43  ;;  %v12741_v25 = vld [vmem:[#allocation4 + $0x3e0] sm:$0xf] }
 0x8e2   :  { %9814 = vmatpush.bf16.msra.mxu2 %v12318_v51  ;;  %v8509_v33 = vld [vmem:[%s18164_s13] sm:$0xff]  ;;  %v12669_v1 = vld [vmem:[#allocation4 + $0x350] sm:$0xf]  ;;  %v13655_v5 = vld [vmem:[#allocation4 + $0x3e4] sm:$0xf0]  ;;  %v12606_v20 = vor.u32 %v13621_v54, %v12605_v23  ;;  %vm10141_vm7 = vcmask 519170  }
 0x8e3   :  { %9827 = vmatpush.bf16.msra.mxu3 %v12382_v22  ;;  %v13637_v12 = vld [vmem:[#allocation4 + $0x354] sm:$0xf0]  ;;  %8726 = vst [vmem:[#allocation1] ss:$9 sm:$0xff] %v8509_v33  ;;  %v12533_v6 = vld [vmem:[#allocation4 + $0x240] sm:$0xf]  ;;  %v12742_v48 = vor.u32 %v13655_v5, %v12741_v25 }
 0x8e4   :  { %9839 = vmatpush.bf16.msrb.mxu0 %v12454_v36  ;;  %v13603_v24 = vld [vmem:[#allocation4 + $0x244] sm:$0xf0]  ;;  %v12670_v40 = vor.u32 %v13637_v12, %v12669_v1  ;;  %v12597_v10 = vld [vmem:[#allocation4 + $0x2c0] sm:$0xf]  ;;  %v12525_v26 = vld [vmem:[#allocation4 + $0x230] sm:$0xf] }
 0x8e5   :  { %9802 = vmatpush.bf16.msra.mxu1 %v12246_v31  ;;  %v13619_v30 = vld [vmem:[#allocation4 + $0x2c4] sm:$0xf0]  ;;  %v12661_v35 = vld [vmem:[#allocation4 + $0x340] sm:$0xf]  ;;  %v12534_v62 = vor.u32 %v13603_v24, %v12533_v6  ;;  %v12733_v17 = vld [vmem:[#allocation4 + $0x3d0] sm:$0xf] }
 0x8e6   :  { %9815 = vmatpush.bf16.msra.mxu2 %v12310_v29  ;;  %v13635_v59 = vld [vmem:[#allocation4 + $0x344] sm:$0xf0]  ;;  %v13653_v34 = vld [vmem:[#allocation4 + $0x3d4] sm:$0xf0]  ;;  %v12598_v21 = vor.u32 %v13619_v30, %v12597_v10  ;;  %v12589_v19 = vld [vmem:[#allocation4 + $0x2b0] sm:$0xf] }
 0x8e7   :  { %9828 = vmatpush.bf16.msra.mxu3 %v12374_v7  ;;  %v13601_v18 = vld [vmem:[#allocation4 + $0x234] sm:$0xf0]  ;;  %v12662_v51 = vor.u32 %v13635_v59, %v12661_v35  ;;  %v12653_v28 = vld [vmem:[#allocation4 + $0x330] sm:$0xf]  ;;  %v12734_v38 = vor.u32 %v13653_v34, %v12733_v17  ;;  %v12725_v36 = vld [vmem:[#allocation4 + $0x3c0] sm:$0xf] }
 0x8e8   :  { %9840 = vmatpush.bf16.msrb.mxu0 %v12446_v53  ;;  %v13617_v42 = vld [vmem:[#allocation4 + $0x2b4] sm:$0xf0]  ;;  %v12526_v3 = vor.u32 %v13601_v18, %v12525_v26  ;;  %v13651_v0 = vld [vmem:[#allocation4 + $0x3c4] sm:$0xf0]  ;;  %v12517_v31 = vld [vmem:[#allocation4 + $0x220] sm:$0xf] }
 0x8e9   :  { %9847 = vmatpush.bf16.msrb.mxu1 %v12558_v15  ;;  %v13633_v14 = vld [vmem:[#allocation4 + $0x334] sm:$0xf0]  ;;  %v12590_v63 = vor.u32 %v13617_v42, %v12589_v19  ;;  %v13599_v47 = vld [vmem:[#allocation4 + $0x224] sm:$0xf0]  ;;  %v12581_v2 = vld [vmem:[#allocation4 + $0x2a0] sm:$0xf]  ;;  %v12726_v7 = vor.u32 %v13651_v0, %v12725_v36 }
 0x8ea   :  { %9860 = vmatpush.bf16.msrb.mxu2 %v12622_v61  ;;  %v18078_v22 = vld [vmem:[#allocation1 + $0x9] sm:$0xff]  ;;  %v18080_v37 = vld [vmem:[#allocation1 + $0x12] sm:$0xff]  ;;  %v18082_v52 = vld [vmem:[#allocation1] sm:$0xff]  ;;  %v12654_v45 = vor.u32 %v13633_v14, %v12653_v28  ;;  %v12518_v46 = vor.u32 %v13599_v47, %v12517_v31  ;;  %vm10153_vm12 = vcmask 517120   ;;  %vm18234_vm1 = vcmask 1041408  }
 0x8eb   :  { %9873 = vmatpush.bf16.msrb.mxu3 %v12686_v9  ;;  %9816 = vmatmul.bf16.vlgmr.msra.gmra.mxu2 %v18078_v22  ;;  %v18086_v16 = vld [vmem:[#allocation1 + $0x1b] sm:$0xff]  ;;  %v13615_v29 = vld [vmem:[#allocation4 + $0x2a4] sm:$0xf0]  ;;  %v12645_v15 = vld [vmem:[#allocation4 + $0x320] sm:$0xf]  ;;  %vm10163_vm5 = vcmask 1024  }
 0x8ec   :  { %9841 = vmatpush.bf16.msrb.mxu0 %v12438_v57  ;;  %9829 = vmatmul.bf16.vlgmr.msra.gmra.mxu3 %v18080_v37  ;;  %v13631_v61 = vld [vmem:[#allocation4 + $0x324] sm:$0xf0]  ;;  %v12717_v49 = vld [vmem:[#allocation4 + $0x3b0] sm:$0xf]  ;;  %v13649_v9 = vld [vmem:[#allocation4 + $0x3b4] sm:$0xf0]  ;;  %v12582_v39 = vor.u32 %v13615_v29, %v12581_v2 }
 0x8ed   :  { %9848 = vmatpush.bf16.msrb.mxu1 %v12550_v41  ;;  %v12509_v4 = vld [vmem:[#allocation4 + $0x210] sm:$0xf]  ;;  %v13597_v53 = vld [vmem:[#allocation4 + $0x214] sm:$0xf0]  ;;  %v12646_v44 = vor.u32 %v13631_v61, %v12645_v15  ;;  %v12718_v13 = vor.u32 %v13649_v9, %v12717_v49  ;;  %v12501_v11 = vld [vmem:[#allocation4 + $0x200] sm:$0xf] }
 0x8ee   :  { %9861 = vmatpush.bf16.msrb.mxu2 %v12614_v60  ;;  %9803 = vmatmul.bf16.vlgmr.msra.gmra.mxu1 %v18082_v52  ;;  %v12573_v50 = vld [vmem:[#allocation4 + $0x290] sm:$0xf]  ;;  %v13613_v8 = vld [vmem:[#allocation4 + $0x294] sm:$0xf0]  ;;  %v13595_v60 = vld [vmem:[#allocation4 + $0x204] sm:$0xf0]  ;;  %v12510_v43 = vor.u32 %v13597_v53, %v12509_v4 }
 0x8ef   :  { %9874 = vmatpush.bf16.msrb.mxu3 %v12678_v32  ;;  %9842 = vmatmul.bf16.vlgmr.msrb.gmra.mxu0 %v18086_v16  ;;  %v12637_v56 = vld [vmem:[#allocation4 + $0x310] sm:$0xf]  ;;  %v13629_v41 = vld [vmem:[#allocation4 + $0x314] sm:$0xf0]  ;;  %v12565_v55 = vld [vmem:[#allocation4 + $0x280] sm:$0xf]  ;;  %v12574_v1 = vor.u32 %v13613_v8, %v12573_v50  ;;  %v12502_v59 = vor.u32 %v13595_v60, %v12501_v11 }
 0x8f0   :  { %9886 = vmatpush.bf16.msra.mxu0 %v12750_v58  ;;  %v13611_v32 = vld [vmem:[#allocation4 + $0x284] sm:$0xf0]  ;;  %v12813_v23 = vld [vmem:[#allocation4 + $0x470] sm:$0xf]  ;;  %v13673_v54 = vld [vmem:[#allocation4 + $0x474] sm:$0xf0]  ;;  %v12638_v5 = vor.u32 %v13629_v41, %v12637_v56 }
 0x8f1   :  { %9849 = vmatpush.bf16.msrb.mxu1 %v12542_v27  ;;  %v12709_v57 = vld [vmem:[#allocation4 + $0x3a0] sm:$0xf]  ;;  %v13647_v33 = vld [vmem:[#allocation4 + $0x3a4] sm:$0xf0]  ;;  %v12877_v12 = vld [vmem:[#allocation4 + $0x4f0] sm:$0xf]  ;;  %v12566_v17 = vor.u32 %v13611_v32, %v12565_v55  ;;  %v12814_v34 = vor.u32 %v13673_v54, %v12813_v23 }
 0x8f2   :  { %9862 = vmatpush.bf16.msrb.mxu2 %v12606_v20  ;;  %v13689_v58 = vld [vmem:[#allocation4 + $0x4f4] sm:$0xf0]  ;;  %v12629_v27 = vld [vmem:[#allocation4 + $0x300] sm:$0xf]  ;;  %v13627_v25 = vld [vmem:[#allocation4 + $0x304] sm:$0xf0] }
 0x8f3   :  { %9875 = vmatpush.bf16.msrb.mxu3 %v12670_v40  ;;  %v12941_v20 = vld [vmem:[#allocation4 + $0x570] sm:$0xf]  ;;  %v13705_v6 = vld [vmem:[#allocation4 + $0x574] sm:$0xf0]  ;;  %v12710_v40 = vor.u32 %v13647_v33, %v12709_v57  ;;  %v18090_v30 = vld [vmem:[#allocation1 + $0x2d] sm:$0xff]  ;;  %v12630_v18 = vor.u32 %v13627_v25, %v12629_v27 }
 0x8f4   :  { %9887 = vmatpush.bf16.msra.mxu0 %v12742_v48  ;;  %v12701_v24 = vld [vmem:[#allocation4 + $0x390] sm:$0xf]  ;;  %v13645_v10 = vld [vmem:[#allocation4 + $0x394] sm:$0xf0]  ;;  %v18094_v48 = vld [vmem:[#allocation1 + $0x24] sm:$0xff] }
 0x8f5   :  { %9850 = vmatpush.bf16.msrb.mxu1 %v12534_v62  ;;  %v18092_v35 = vld [vmem:[#allocation1 + $0x36] sm:$0xff]  ;;  %v8510_v62 = vld [vmem:[%s18164_s13 + $0x8] sm:$0x1f]  ;;  %v18099_v26 = vld [vmem:[#allocation1 + $0x3f] sm:$0xff] }
 0x8f6   :  { %9863 = vmatpush.bf16.msrb.mxu2 %v12598_v21  ;;  %8736 = vst [vmem:[#allocation1] ss:$9 sm:$0xff] %v8510_v62  ;;  %v12878_v21 = vor.u32 %v13689_v58, %v12877_v12  ;;  %v12805_v19 = vld [vmem:[#allocation4 + $0x460] sm:$0xf]  ;;  %v13671_v42 = vld [vmem:[#allocation4 + $0x464] sm:$0xf0]  ;;  %vm10142_vm0 = vmor %vm10141_vm7, %vm18234_vm1 }
 0x8f7   :  { %9876 = vmatpush.bf16.msrb.mxu3 %v12662_v51  ;;  %v12942_v51 = vor.u32 %v13705_v6, %v12941_v20  ;;  %v12869_v28 = vld [vmem:[#allocation4 + $0x4e0] sm:$0xf]  ;;  %v13687_v14 = vld [vmem:[#allocation4 + $0x4e4] sm:$0xf0]  ;;  %v12806_v31 = vor.u32 %v13671_v42, %v12805_v19  ;;  %v13005_v47 = vld [vmem:[#allocation4 + $0x5f0] sm:$0xf] }
 0x8f8   :  { %9888 = vmatpush.bf16.msra.mxu0 %v12734_v38  ;;  %v12702_v38 = vor.u32 %v13645_v10, %v12701_v24  ;;  %v13703_v36 = vld [vmem:[#allocation4 + $0x564] sm:$0xf0]  ;;  %v12693_v0 = vld [vmem:[#allocation4 + $0x380] sm:$0xf]  ;;  %v12870_v2 = vor.u32 %v13687_v14, %v12869_v28  ;;  %v12797_v29 = vld [vmem:[#allocation4 + $0x450] sm:$0xf] }
 0x8f9   :  { %9851 = vmatpush.bf16.msrb.mxu1 %v12526_v3  ;;  %v12933_v3 = vld [vmem:[#allocation4 + $0x560] sm:$0xf]  ;;  %v13669_v15 = vld [vmem:[#allocation4 + $0x454] sm:$0xf0]  ;;  %v12925_v9 = vld [vmem:[#allocation4 + $0x550] sm:$0xf] }
 0x8fa   :  { %9864 = vmatpush.bf16.msrb.mxu2 %v12590_v63  ;;  %v13643_v63 = vld [vmem:[#allocation4 + $0x384] sm:$0xf0]  ;;  %v12934_v61 = vor.u32 %v13703_v36, %v12933_v3  ;;  %v12798_v53 = vor.u32 %v13669_v15, %v12797_v29  ;;  %v12789_v56 = vld [vmem:[#allocation4 + $0x440] sm:$0xf]  ;;  %v12989_v54 = vld [vmem:[#allocation4 + $0x5d0] sm:$0xf] }
 0x8fb   :  { %9877 = vmatpush.bf16.msrb.mxu3 %v12654_v45  ;;  %v13721_v45 = vld [vmem:[#allocation4 + $0x5f4] sm:$0xf0]  ;;  %v12694_v49 = vor.u32 %v13643_v63, %v12693_v0  ;;  %v13719_v50 = vld [vmem:[#allocation4 + $0x5e4] sm:$0xf0]  ;;  %v12853_v11 = vld [vmem:[#allocation4 + $0x4c0] sm:$0xf] }
 0x8fc   :  { %9889 = vmatpush.bf16.msra.mxu0 %v12726_v7  ;;  %v12861_v7 = vld [vmem:[#allocation4 + $0x4d0] sm:$0xf]  ;;  %v13006_v4 = vor.u32 %v13721_v45, %v13005_v47  ;;  %v13667_v41 = vld [vmem:[#allocation4 + $0x444] sm:$0xf0]  ;;  %v13717_v57 = vld [vmem:[#allocation4 + $0x5d4] sm:$0xf0] }
 0x8fd   :  { %9852 = vmatpush.bf16.msrb.mxu1 %v12518_v46  ;;  %v13685_v46 = vld [vmem:[#allocation4 + $0x4d4] sm:$0xf0]  ;;  %v13683_v60 = vld [vmem:[#allocation4 + $0x4c4] sm:$0xf0]  ;;  %v12790_v23 = vor.u32 %v13667_v41, %v12789_v56  ;;  %v12845_v27 = vld [vmem:[#allocation4 + $0x4b0] sm:$0xf]  ;;  %v12990_v6 = vor.u32 %v13717_v57, %v12989_v54 }
 0x8fe   :  { %9865 = vmatpush.bf16.msrb.mxu2 %v12582_v39  ;;  %v13701_v39 = vld [vmem:[#allocation4 + $0x554] sm:$0xf0]  ;;  %v12862_v8 = vor.u32 %v13685_v46, %v12861_v7  ;;  %v13699_v55 = vld [vmem:[#allocation4 + $0x544] sm:$0xf0]  ;;  %v12854_v33 = vor.u32 %v13683_v60, %v12853_v11  ;;  %v12773_v62 = vld [vmem:[#allocation4 + $0x420] sm:$0xf] }
 0x8ff   :  { %9878 = vmatpush.bf16.msrb.mxu3 %v12646_v44  ;;  %v12997_v44 = vld [vmem:[#allocation4 + $0x5e0] sm:$0xf]  ;;  %v13665_v12 = vld [vmem:[#allocation4 + $0x434] sm:$0xf0]  ;;  %v13715_v10 = vld [vmem:[#allocation4 + $0x5c4] sm:$0xf0] }
 0x900   :  { %9890 = vmatpush.bf16.msra.mxu0 %v12718_v13  ;;  %v12926_v13 = vor.u32 %v13701_v39, %v12925_v9  ;;  %v12998_v32 = vor.u32 %v13719_v50, %v12997_v44  ;;  %v13681_v25 = vld [vmem:[#allocation4 + $0x4b4] sm:$0xf0]  ;;  %v12901_v19 = vld [vmem:[#allocation4 + $0x520] sm:$0xf]  ;;  %v13695_v42 = vld [vmem:[#allocation4 + $0x524] sm:$0xf0] }
 0x901   :  { %9853 = vmatpush.bf16.msrb.mxu1 %v12510_v43  ;;  %v12917_v43 = vld [vmem:[#allocation4 + $0x540] sm:$0xf]  ;;  %v13697_v20 = vld [vmem:[#allocation4 + $0x534] sm:$0xf0]  ;;  %v12973_v14 = vld [vmem:[#allocation4 + $0x5b0] sm:$0xf]  ;;  %v12902_v63 = vor.u32 %v13695_v42, %v12901_v19 }
 0x902   :  { %9866 = vmatpush.bf16.msrb.mxu2 %v12574_v1  ;;  %v12781_v1 = vld [vmem:[#allocation4 + $0x430] sm:$0xf]  ;;  %v12918_v58 = vor.u32 %v13699_v55, %v12917_v43  ;;  %v13661_v0 = vld [vmem:[#allocation4 + $0x414] sm:$0xf0]  ;;  %v12965_v7 = vld [vmem:[#allocation4 + $0x5a0] sm:$0xf] }
 0x903   :  { %9879 = vmatpush.bf16.msrb.mxu3 %v12638_v5  ;;  %v12909_v5 = vld [vmem:[#allocation4 + $0x530] sm:$0xf]  ;;  %v12782_v24 = vor.u32 %v13665_v12, %v12781_v1  ;;  %v13677_v47 = vld [vmem:[#allocation4 + $0x494] sm:$0xf0]  ;;  %v13711_v46 = vld [vmem:[#allocation4 + $0x5a4] sm:$0xf0] }
 0x904   :  { %9891 = vmatpush.bf16.msra.mxu0 %v12710_v40  ;;  %v12981_v40 = vld [vmem:[#allocation4 + $0x5c0] sm:$0xf]  ;;  %v12765_v36 = vld [vmem:[#allocation4 + $0x410] sm:$0xf]  ;;  %v13659_v9 = vld [vmem:[#allocation4 + $0x404] sm:$0xf0]  ;;  %v12966_v11 = vor.u32 %v13711_v46, %v12965_v7 }
 0x905   :  { %9854 = vmatpush.bf16.msrb.mxu1 %v12502_v59  ;;  %v12846_v59 = vor.u32 %v13681_v25, %v12845_v27  ;;  %v12893_v45 = vld [vmem:[#allocation4 + $0x510] sm:$0xf]  ;;  %v12766_v15 = vor.u32 %v13661_v0, %v12765_v36  ;;  %v12821_v39 = vld [vmem:[#allocation4 + $0x480] sm:$0xf]  ;;  %v13737_v50 = vld [vmem:[#allocation4 + $0x674] sm:$0xf0] }
 0x906   :  { %9867 = vmatpush.bf16.msrb.mxu2 %v12566_v17  ;;  %v13663_v17 = vld [vmem:[#allocation4 + $0x424] sm:$0xf0]  ;;  %v13069_v44 = vld [vmem:[#allocation4 + $0x670] sm:$0xf]  ;;  %v12303_v56 = vld [vmem:[#allocation4 + $0x78] sm:$0xf0] }
 0x907   :  { %9880 = vmatpush.bf16.msrb.mxu3 %v12630_v18  ;;  %v13679_v18 = vld [vmem:[#allocation4 + $0x4a4] sm:$0xf0]  ;;  %v12774_v28 = vor.u32 %v13663_v17, %v12773_v62  ;;  %v12885_v41 = vld [vmem:[#allocation4 + $0x500] sm:$0xf]  ;;  %v13560_v43 = vld [vmem:[#allocation4 + $0xf4] sm:$0xf] }
 0x908   :  { %9892 = vmatpush.bf16.msra.mxu0 %v12702_v38  ;;  %9855 = vmatmul.bf16.vlgmr.msrb.gmra.mxu1 %v18094_v48  ;;  %v13713_v38 = vld [vmem:[#allocation4 + $0x5b4] sm:$0xf0]  ;;  %v12367_v55 = vld [vmem:[#allocation4 + $0xf8] sm:$0xf0]  ;;  %v12957_v54 = vld [vmem:[#allocation4 + $0x590] sm:$0xf] }
 0x909   :  { %9899 = vmatpush.bf16.msra.mxu1 %v12814_v34  ;;  %9868 = vmatmul.bf16.vlgmr.msrb.gmra.mxu2 %v18090_v30  ;;  %v12910_v34 = vor.u32 %v13697_v20, %v12909_v5  ;;  %v12974_v29 = vor.u32 %v13713_v38, %v12973_v14  ;;  %v13709_v57 = vld [vmem:[#allocation4 + $0x594] sm:$0xf0]  ;;  %v13735_v27 = vld [vmem:[#allocation4 + $0x664] sm:$0xf0]  ;;  %v12370_v5 = vor.u32 %v13560_v43, %v12367_v55  ;;  %v13542_v20 = vld [vmem:[#allocation4 + $0x64] sm:$0xf] }
 0x90a   :  { %9912 = vmatpush.bf16.msra.mxu2 %v12878_v21  ;;  %9881 = vmatmul.bf16.vlgmr.msrb.gmra.mxu3 %v18092_v35  ;;  %v12837_v21 = vld [vmem:[#allocation4 + $0x4a0] sm:$0xf]  ;;  %v18105_v12 = vld [vmem:[#allocation1] sm:$0xff]  ;;  %v13053_v17 = vld [vmem:[#allocation4 + $0x650] sm:$0xf] }
 0x90b   :  { %9925 = vmatpush.bf16.msra.mxu3 %v12942_v51  ;;  %v12982_v51 = vor.u32 %v13715_v10, %v12981_v40  ;;  %v12838_v3 = vor.u32 %v13679_v18, %v12837_v21  ;;  %v18107_v25 = vld [vmem:[#allocation1 + $0x9] sm:$0xff]  ;;  %v12958_v40 = vor.u32 %v13709_v57, %v12957_v54  ;;  %v13733_v19 = vld [vmem:[#allocation4 + $0x654] sm:$0xf0]  ;;  %v13576_v42 = vld [vmem:[#allocation4 + $0x174] sm:$0xf] }
 0x90c   :  { %9893 = vmatpush.bf16.msra.mxu0 %v12694_v49  ;;  %v13558_v10 = vld [vmem:[#allocation4 + $0xe4] sm:$0xf]  ;;  %v13707_v21 = vld [vmem:[#allocation4 + $0x584] sm:$0xf0]  ;;  %v13540_v14 = vld [vmem:[#allocation4 + $0x54] sm:$0xf] }
 0x90d   :  { %9900 = vmatpush.bf16.msra.mxu1 %v12806_v31  ;;  %v12829_v31 = vld [vmem:[#allocation4 + $0x490] sm:$0xf]  ;;  %v12287_v38 = vld [vmem:[#allocation4 + $0x58] sm:$0xf0]  ;;  %v13556_v36 = vld [vmem:[#allocation4 + $0xd4] sm:$0xf] }
 0x90e   :  { %9913 = vmatpush.bf16.msra.mxu2 %v12870_v2  ;;  %v13693_v2 = vld [vmem:[#allocation4 + $0x514] sm:$0xf0]  ;;  %v12830_v49 = vor.u32 %v13677_v47, %v12829_v31  ;;  %v12351_v0 = vld [vmem:[#allocation4 + $0xd8] sm:$0xf0]  ;;  %v13045_v47 = vld [vmem:[#allocation4 + $0x640] sm:$0xf] }
 0x90f   :  { %9926 = vmatpush.bf16.msra.mxu3 %v12934_v61  ;;  %9894 = vmatmul.bf16.vlgmr.msra.gmra.mxu0 %v18099_v26  ;;  %v12757_v61 = vld [vmem:[#allocation4 + $0x400] sm:$0xf]  ;;  %v13538_v7 = vld [vmem:[#allocation4 + $0x44] sm:$0xf]  ;;  %v12279_v46 = vld [vmem:[#allocation4 + $0x48] sm:$0xf0] }
 0x910   :  { %9938 = vmatpush.bf16.msrb.mxu0 %v13006_v4  ;;  %v13675_v4 = vld [vmem:[#allocation4 + $0x484] sm:$0xf0]  ;;  %v12758_v60 = vor.u32 %v13659_v9, %v12757_v61  ;;  %v12354_v61 = vor.u32 %v13556_v36, %v12351_v0  ;;  %v13554_v9 = vld [vmem:[#allocation4 + $0xc4] sm:$0xf]  ;;  %v13552_v43 = vld [vmem:[#allocation4 + $0xb4] sm:$0xf] }
 0x911   :  { %9901 = vmatpush.bf16.msra.mxu1 %v12798_v53  ;;  %v12894_v53 = vor.u32 %v13693_v2, %v12893_v45  ;;  %v12290_v45 = vor.u32 %v13540_v14, %v12287_v38  ;;  %v13731_v2 = vld [vmem:[#allocation4 + $0x644] sm:$0xf0]  ;;  %v12335_v55 = vld [vmem:[#allocation4 + $0xb8] sm:$0xf0]  ;;  %v13029_v54 = vld [vmem:[#allocation4 + $0x620] sm:$0xf] }
 0x912   :  { %9914 = vmatpush.bf16.msra.mxu2 %v12862_v8  ;;  %v13544_v8 = vld [vmem:[#allocation4 + $0x74] sm:$0xf]  ;;  %v12319_v14 = vld [vmem:[#allocation4 + $0x98] sm:$0xf0]  ;;  %v13013_v36 = vld [vmem:[#allocation4 + $0x600] sm:$0xf] }
 0x913   :  { %9927 = vmatpush.bf16.msra.mxu3 %v12926_v13  ;;  %v13691_v13 = vld [vmem:[#allocation4 + $0x504] sm:$0xf0]  ;;  %vm18235_vm10 = vmmov %vm18234_vm1 }
 0x914   :  { %9939 = vmatpush.bf16.msrb.mxu0 %v12998_v32  ;;  %v12822_v32 = vor.u32 %v13675_v4, %v12821_v39  ;;  %v12886_v1 = vor.u32 %v13691_v13, %v12885_v41  ;;  %v12343_v39 = vld [vmem:[#allocation4 + $0xc8] sm:$0xf0]  ;;  %v13046_v4 = vor.u32 %v13731_v2, %v13045_v47  ;;  %v12415_v41 = vld [vmem:[#allocation4 + $0x158] sm:$0xf0]  ;;  %v13723_v0 = vld [vmem:[#allocation4 + $0x604] sm:$0xf0] }
 0x915   :  { %9902 = vmatpush.bf16.msra.mxu1 %v12790_v23  ;;  %v13070_v23 = vor.u32 %v13737_v50, %v13069_v44  ;;  %v13037_v44 = vld [vmem:[#allocation4 + $0x630] sm:$0xf]  ;;  %v12282_v50 = vor.u32 %v13538_v7, %v12279_v46  ;;  %v12346_v13 = vor.u32 %v13554_v9, %v12343_v39  ;;  %v12247_v47 = vld [vmem:[#allocation4 + $0x8] sm:$0xf0]  ;;  %v13608_v7 = vld [vmem:[#allocation4 + $0x274] sm:$0xf] }
 0x916   :  { %9915 = vmatpush.bf16.msra.mxu2 %v12854_v33  ;;  %v12306_v33 = vor.u32 %v13544_v8, %v12303_v56  ;;  %v13729_v8 = vld [vmem:[#allocation4 + $0x634] sm:$0xf0]  ;;  %v13572_v56 = vld [vmem:[#allocation4 + $0x154] sm:$0xf]  ;;  %v12391_v2 = vld [vmem:[#allocation4 + $0x128] sm:$0xf0] }
 0x917   :  { %9928 = vmatpush.bf16.msra.mxu3 %v12918_v58  ;;  %v13061_v58 = vld [vmem:[#allocation4 + $0x660] sm:$0xf]  ;;  %v12559_v46 = vld [vmem:[#allocation4 + $0x278] sm:$0xf0]  ;;  %v13546_v9 = vld [vmem:[#allocation4 + $0x84] sm:$0xf] }
 0x918   :  { %9940 = vmatpush.bf16.msrb.mxu0 %v12990_v6  ;;  %v12295_v6 = vld [vmem:[#allocation4 + $0x68] sm:$0xf0]  ;;  %v13062_v62 = vor.u32 %v13735_v27, %v13061_v58  ;;  %v12338_v27 = vor.u32 %v13552_v43, %v12335_v55  ;;  %v13590_v43 = vld [vmem:[#allocation4 + $0x1e4] sm:$0xf]  ;;  %vm18236_vm4 = vmmov %vm18234_vm1 }
 0x919   :  { %9903 = vmatpush.bf16.msra.mxu1 %v12782_v24  ;;  %v18109_v24 = vld [vmem:[#allocation1 + $0x12] sm:$0xff]  ;;  %v12298_v18 = vor.u32 %v13542_v20, %v12295_v6  ;;  %v13550_v6 = vld [vmem:[#allocation4 + $0xa4] sm:$0xf] }
 0x91a   :  { %9916 = vmatpush.bf16.msra.mxu2 %v12846_v59  ;;  %v12359_v59 = vld [vmem:[#allocation4 + $0xe8] sm:$0xf0] }
 0x91b   :  { %9929 = vmatpush.bf16.msra.mxu3 %v12910_v34  ;;  %v12949_v34 = vld [vmem:[#allocation4 + $0x580] sm:$0xf]  ;;  %v12407_v58 = vld [vmem:[#allocation4 + $0x148] sm:$0xf0] }
 0x91c   :  { %9941 = vmatpush.bf16.msrb.mxu0 %v12982_v51  ;;  %v12431_v51 = vld [vmem:[#allocation4 + $0x178] sm:$0xf0]  ;;  %v12263_v20 = vld [vmem:[#allocation4 + $0x28] sm:$0xf0] }
 0x91d   :  { %9904 = vmatpush.bf16.msra.mxu1 %v12774_v28  ;;  %v12362_v28 = vor.u32 %v13558_v10, %v12359_v59  ;;  %v12434_v31 = vor.u32 %v13576_v42, %v12431_v51  ;;  %v13532_v42 = vld [vmem:[#allocation4 + $0x14] sm:$0xf]  ;;  %v12255_v51 = vld [vmem:[#allocation4 + $0x18] sm:$0xf0]  ;;  %v12311_v39 = vld [vmem:[#allocation4 + $0x88] sm:$0xf0] }
 0x91e   :  { %9917 = vmatpush.bf16.msra.mxu2 %v12838_v3  ;;  %v12950_v3 = vor.u32 %v13707_v21, %v12949_v34  ;;  %v13725_v34 = vld [vmem:[#allocation4 + $0x614] sm:$0xf0]  ;;  %v13568_v21 = vld [vmem:[#allocation4 + $0x134] sm:$0xf]  ;;  %v12487_v55 = vld [vmem:[#allocation4 + $0x1e8] sm:$0xf0] }
 0x91f   :  { %9930 = vmatpush.bf16.msra.mxu3 %v12902_v63  ;;  %v13054_v63 = vor.u32 %v13733_v19, %v13053_v17 }
 0x920   :  { %9942 = vmatpush.bf16.msrb.mxu0 %v12974_v29  ;;  %v13574_v29 = vld [vmem:[#allocation4 + $0x164] sm:$0xf] }
 0x921   :  { %9905 = vmatpush.bf16.msra.mxu1 %v12766_v15  ;;  %v12423_v15 = vld [vmem:[#allocation4 + $0x168] sm:$0xf0] }
 0x922   :  { %9918 = vmatpush.bf16.msra.mxu2 %v12830_v49  ;;  %v18114_v49 = vld [vmem:[#allocation1 + $0x1b] sm:$0xff] }
 0x923   :  { %9931 = vmatpush.bf16.msra.mxu3 %v12894_v53  ;;  %v12426_v53 = vor.u32 %v13574_v29, %v12423_v15  ;;  %v13592_v15 = vld [vmem:[#allocation4 + $0x1f4] sm:$0xf] }
 0x924   :  { %9943 = vmatpush.bf16.msrb.mxu0 %v12966_v11  ;;  %v13536_v11 = vld [vmem:[#allocation4 + $0x34] sm:$0xf] }
 0x925   :  { %9906 = vmatpush.bf16.msra.mxu1 %v12758_v60  ;;  %v12271_v60 = vld [vmem:[#allocation4 + $0x38] sm:$0xf0] }
 0x926   :  { %9919 = vmatpush.bf16.msra.mxu2 %v12822_v32  ;;  %v13038_v32 = vor.u32 %v13729_v8, %v13037_v44  ;;  %v12274_v57 = vor.u32 %v13536_v11, %v12271_v60  ;;  %v13624_v44 = vld [vmem:[#allocation4 + $0x2f4] sm:$0xf]  ;;  %v12562_v11 = vor.u32 %v13608_v7, %v12559_v46  ;;  %v12314_v60 = vor.u32 %v13546_v9, %v12311_v39  ;;  %v12671_v46 = vld [vmem:[#allocation4 + $0x358] sm:$0xf0] }
 0x927   :  { %9932 = vmatpush.bf16.msra.mxu3 %v12886_v1  ;;  %v13570_v1 = vld [vmem:[#allocation4 + $0x144] sm:$0xf]  ;;  %v13636_v7 = vld [vmem:[#allocation4 + $0x354] sm:$0xf] }
 0x928   :  { %9907 = vmatmul.bf16.vlgmr.msra.gmra.mxu1 %v18105_v12  ;;  %9944 = vmatpush.bf16.msrb.mxu0 %v12958_v40  ;;  %v12327_v40 = vld [vmem:[#allocation4 + $0xa8] sm:$0xf0]  ;;  %v12410_v59 = vor.u32 %v13570_v1, %v12407_v58  ;;  %v13622_v1 = vld [vmem:[#allocation4 + $0x2e4] sm:$0xf]  ;;  %v13600_v39 = vld [vmem:[#allocation4 + $0x234] sm:$0xf] }
 0x929   :  { %9951 = vmatpush.bf16.msrb.mxu1 %v13070_v23  ;;  %9920 = vmatmul.bf16.vlgmr.msra.gmra.mxu2 %v18107_v25  ;;  %v12418_v23 = vor.u32 %v13572_v56, %v12415_v41  ;;  %v12330_v19 = vor.u32 %v13550_v6, %v12327_v40  ;;  %v13564_v41 = vld [vmem:[#allocation4 + $0x114] sm:$0xf]  ;;  %v12615_v58 = vld [vmem:[#allocation4 + $0x2e8] sm:$0xf0] }
 0x92a   :  { %9964 = vmatpush.bf16.msrb.mxu2 %v12306_v33  ;;  %9933 = vmatmul.bf16.vlgmr.msra.gmra.mxu3 %v18109_v24  ;;  %v13727_v33 = vld [vmem:[#allocation4 + $0x624] sm:$0xf0]  ;;  %v12375_v6 = vld [vmem:[#allocation4 + $0x108] sm:$0xf0] }
 0x92b   :  { %9977 = vmatpush.bf16.msrb.mxu3 %v12370_v5  ;;  %v13534_v5 = vld [vmem:[#allocation4 + $0x24] sm:$0xf]  ;;  %v13030_v10 = vor.u32 %v13727_v33, %v13029_v54  ;;  %v12551_v54 = vld [vmem:[#allocation4 + $0x268] sm:$0xf0] }
 0x92c   :  { %9945 = vmatpush.bf16.msrb.mxu0 %v12950_v3  ;;  %v12266_v17 = vor.u32 %v13534_v5, %v12263_v20  ;;  %v13588_v5 = vld [vmem:[#allocation4 + $0x1d4] sm:$0xf]  ;;  %v13562_v20 = vld [vmem:[#allocation4 + $0x104] sm:$0xf] }
 0x92d   :  { %9952 = vmatpush.bf16.msrb.mxu1 %v13062_v62  ;;  %v13021_v62 = vld [vmem:[#allocation4 + $0x610] sm:$0xf] }
 0x92e   :  { %9965 = vmatpush.bf16.msrb.mxu2 %v12298_v18  ;;  %v12399_v18 = vld [vmem:[#allocation4 + $0x138] sm:$0xf0]  ;;  %v13022_v38 = vor.u32 %v13725_v34, %v13021_v62  ;;  %v13604_v34 = vld [vmem:[#allocation4 + $0x254] sm:$0xf] }
 0x92f   :  { %9978 = vmatpush.bf16.msrb.mxu3 %v12362_v28  ;;  %9946 = vmatmul.bf16.vlgmr.msrb.gmra.mxu0 %v18114_v49  ;;  %v13548_v28 = vld [vmem:[#allocation4 + $0x94] sm:$0xf]  ;;  %v12402_v3 = vor.u32 %v13568_v21, %v12399_v18  ;;  %v12687_v62 = vld [vmem:[#allocation4 + $0x378] sm:$0xf0]  ;;  %v12378_v18 = vor.u32 %v13562_v20, %v12375_v6 }
 0x930   :  { %9990 = vmatpush.bf16.msra.mxu0 %v12434_v31  ;;  %v12258_v31 = vor.u32 %v13532_v42, %v12255_v51  ;;  %v12322_v29 = vor.u32 %v13548_v28, %v12319_v14  ;;  %v12543_v21 = vld [vmem:[#allocation4 + $0x258] sm:$0xf0]  ;;  %v13586_v14 = vld [vmem:[#allocation4 + $0x1c4] sm:$0xf] }
 0x931   :  { %9953 = vmatpush.bf16.msrb.mxu1 %v13054_v63  ;;  %v13530_v63 = vld [vmem:[#allocation4 + $0x4] sm:$0xf]  ;;  %v12607_v42 = vld [vmem:[#allocation4 + $0x2d8] sm:$0xf0] }
 0x932   :  { %9966 = vmatpush.bf16.msrb.mxu2 %v12290_v45  ;;  %v13566_v45 = vld [vmem:[#allocation4 + $0x124] sm:$0xf]  ;;  %v12250_v8 = vor.u32 %v13530_v63, %v12247_v47  ;;  %v12535_v47 = vld [vmem:[#allocation4 + $0x248] sm:$0xf0]  ;;  %v12655_v20 = vld [vmem:[#allocation4 + $0x338] sm:$0xf0] }
 0x933   :  { %9979 = vmatpush.bf16.msrb.mxu3 %v12354_v61  ;;  %v12495_v61 = vld [vmem:[#allocation4 + $0x1f8] sm:$0xf0] }
 0x934   :  { %9991 = vmatpush.bf16.msra.mxu0 %v12426_v53  ;;  %v12394_v53 = vor.u32 %v13566_v45, %v12391_v2  ;;  %v12498_v56 = vor.u32 %v13592_v15, %v12495_v61  ;;  %v13618_v45 = vld [vmem:[#allocation4 + $0x2c4] sm:$0xf]  ;;  %v12599_v2 = vld [vmem:[#allocation4 + $0x2c8] sm:$0xf0]  ;;  %v13584_v15 = vld [vmem:[#allocation4 + $0x1b4] sm:$0xf] }
 0x935   :  { %9954 = vmatpush.bf16.msrb.mxu1 %v13046_v4  ;;  %v13014_v4 = vor.u32 %v13723_v0, %v13013_v36  ;;  %v13638_v36 = vld [vmem:[#allocation4 + $0x364] sm:$0xf]  ;;  %v12679_v0 = vld [vmem:[#allocation4 + $0x368] sm:$0xf0]  ;;  %v12602_v9 = vor.u32 %v13618_v45, %v12599_v2 }
 0x936   :  { %9967 = vmatpush.bf16.msrb.mxu2 %v12282_v50  ;;  %v12623_v50 = vld [vmem:[#allocation4 + $0x2f8] sm:$0xf0] }
 0x937   :  { %9980 = vmatpush.bf16.msrb.mxu3 %v12346_v13  ;;  %v12383_v13 = vld [vmem:[#allocation4 + $0x118] sm:$0xf0] }
 0x938   :  { %9992 = vmatpush.bf16.msra.mxu0 %v12418_v23  ;;  %v13606_v23 = vld [vmem:[#allocation4 + $0x264] sm:$0xf]  ;;  %v12386_v33 = vor.u32 %v13564_v41, %v12383_v13  ;;  %v12455_v13 = vld [vmem:[#allocation4 + $0x1a8] sm:$0xf0] }
 0x939   :  { %9955 = vmatpush.bf16.msrb.mxu1 %v13038_v32  ;;  %v12626_v32 = vor.u32 %v13624_v44, %v12623_v50  ;;  %v12554_v40 = vor.u32 %v13606_v23, %v12551_v54  ;;  %v12591_v44 = vld [vmem:[#allocation4 + $0x2b8] sm:$0xf0]  ;;  %v13614_v23 = vld [vmem:[#allocation4 + $0x2a4] sm:$0xf]  ;;  %v12583_v54 = vld [vmem:[#allocation4 + $0x2a8] sm:$0xf0] }
 0x93a   :  { %9968 = vmatpush.bf16.msrb.mxu2 %v12274_v57  ;;  %v18117_v57 = vld [vmem:[#allocation1 + $0x24] sm:$0xff]  ;;  %v12586_v6 = vor.u32 %v13614_v23, %v12583_v54  ;;  %v13704_v23 = vld [vmem:[#allocation4 + $0x574] sm:$0xf] }
 0x93b   :  { %9981 = vmatpush.bf16.msrb.mxu3 %v12338_v27  ;;  %v12490_v27 = vor.u32 %v13590_v43, %v12487_v55  ;;  %v13598_v55 = vld [vmem:[#allocation4 + $0x224] sm:$0xf]  ;;  %v12943_v54 = vld [vmem:[#allocation4 + $0x578] sm:$0xf0] }
 0x93c   :  { %9993 = vmatpush.bf16.msra.mxu0 %v12410_v59  ;;  %v13640_v59 = vld [vmem:[#allocation4 + $0x374] sm:$0xf] }
 0x93d   :  { %9956 = vmatpush.bf16.msrb.mxu1 %v13030_v10  ;;  %v12479_v10 = vld [vmem:[#allocation4 + $0x1d8] sm:$0xf0]  ;;  %v12690_v28 = vor.u32 %v13640_v59, %v12687_v62  ;;  %v13612_v59 = vld [vmem:[#allocation4 + $0x294] sm:$0xf] }
 0x93e   :  { %9969 = vmatpush.bf16.msrb.mxu2 %v12266_v17  ;;  %v12618_v17 = vor.u32 %v13622_v1, %v12615_v58  ;;  %v12482_v51 = vor.u32 %v13588_v5, %v12479_v10  ;;  %v13580_v1 = vld [vmem:[#allocation4 + $0x194] sm:$0xf]  ;;  %v12511_v10 = vld [vmem:[#allocation4 + $0x218] sm:$0xf0] }
 0x93f   :  { %9982 = vmatpush.bf16.msrb.mxu3 %v12330_v19  ;;  %v13620_v19 = vld [vmem:[#allocation4 + $0x2d4] sm:$0xf]  ;;  %v12575_v62 = vld [vmem:[#allocation4 + $0x298] sm:$0xf0] }
 0x940   :  { %9994 = vmatpush.bf16.msra.mxu0 %v12402_v3  ;;  %v12471_v3 = vld [vmem:[#allocation4 + $0x1c8] sm:$0xf0]  ;;  %v12610_v63 = vor.u32 %v13620_v19, %v12607_v42  ;;  %v13632_v5 = vld [vmem:[#allocation4 + $0x334] sm:$0xf]  ;;  %v13594_v19 = vld [vmem:[#allocation4 + $0x204] sm:$0xf] }
 0x941   :  { %9957 = vmatpush.bf16.msrb.mxu1 %v13022_v38  ;;  %v12546_v38 = vor.u32 %v13604_v34, %v12543_v21  ;;  %v12658_v34 = vor.u32 %v13632_v5, %v12655_v20  ;;  %v13578_v21 = vld [vmem:[#allocation4 + $0x184] sm:$0xf]  ;;  %v12863_v5 = vld [vmem:[#allocation4 + $0x4d8] sm:$0xf0] }
 0x942   :  { %9970 = vmatpush.bf16.msrb.mxu2 %v12258_v31  ;;  %v13602_v31 = vld [vmem:[#allocation4 + $0x244] sm:$0xf] }
 0x943   :  { %9983 = vmatpush.bf16.msrb.mxu3 %v12322_v29  ;;  %v12682_v29 = vor.u32 %v13638_v36, %v12679_v0  ;;  %v12538_v61 = vor.u32 %v13602_v31, %v12535_v47  ;;  %v12751_v36 = vld [vmem:[#allocation4 + $0x3f8] sm:$0xf0]  ;;  %v13672_v0 = vld [vmem:[#allocation4 + $0x474] sm:$0xf]  ;;  %v13610_v31 = vld [vmem:[#allocation4 + $0x284] sm:$0xf] }
 0x944   :  { %9995 = vmatpush.bf16.msra.mxu0 %v12394_v53  ;;  %v13616_v53 = vld [vmem:[#allocation4 + $0x2b4] sm:$0xf]  ;;  %v12567_v47 = vld [vmem:[#allocation4 + $0x288] sm:$0xf0] }
 0x945   :  { %9958 = vmatpush.bf16.msrb.mxu1 %v13014_v4  ;;  %v12527_v4 = vld [vmem:[#allocation4 + $0x238] sm:$0xf0]  ;;  %v12594_v43 = vor.u32 %v13616_v53, %v12591_v44  ;;  %v13670_v44 = vld [vmem:[#allocation4 + $0x464] sm:$0xf] }
 0x946   :  { %9971 = vmatpush.bf16.msrb.mxu2 %v12250_v8  ;;  %v12674_v8 = vor.u32 %v13636_v7, %v12671_v46  ;;  %v12530_v41 = vor.u32 %v13600_v39, %v12527_v4  ;;  %v12639_v7 = vld [vmem:[#allocation4 + $0x318] sm:$0xf0]  ;;  %v13654_v39 = vld [vmem:[#allocation4 + $0x3e4] sm:$0xf]  ;;  %v12743_v4 = vld [vmem:[#allocation4 + $0x3e8] sm:$0xf0] }
 0x947   :  { %9984 = vmatpush.bf16.msrb.mxu3 %v12314_v60  ;;  %v12663_v60 = vld [vmem:[#allocation4 + $0x348] sm:$0xf0] }
 0x948   :  { %9959 = vmatmul.bf16.vlgmr.msrb.gmra.mxu1 %v18117_v57  ;;  %9996 = vmatpush.bf16.msra.mxu0 %v12386_v33 }
 0x949   :  { %10003 = vmatpush.bf16.msra.mxu1 %v12498_v56  ;;  %9972 = vmatmul.bf16.vlgmr.msrb.gmra.mxu2 %v18082_v52  ;;  %v12474_v52 = vor.u32 %v13586_v14, %v12471_v3  ;;  %v13582_v56 = vld [vmem:[#allocation4 + $0x1a4] sm:$0xf]  ;;  %v12647_v14 = vld [vmem:[#allocation4 + $0x328] sm:$0xf0]  ;;  %v13656_v3 = vld [vmem:[#allocation4 + $0x3f4] sm:$0xf] }
 0x94a   :  { %10016 = vmatpush.bf16.msra.mxu2 %v12562_v11  ;;  %9985 = vmatmul.bf16.vlgmr.msrb.gmra.mxu3 %v18078_v22  ;;  %v12463_v22 = vld [vmem:[#allocation4 + $0x1b8] sm:$0xf0]  ;;  %v13634_v11 = vld [vmem:[#allocation4 + $0x344] sm:$0xf] }
 0x94b   :  { %10029 = vmatpush.bf16.msra.mxu3 %v12626_v32  ;;  %v12466_v50 = vor.u32 %v13584_v15, %v12463_v22  ;;  %v12519_v32 = vld [vmem:[#allocation4 + $0x228] sm:$0xf0]  ;;  %v12666_v33 = vor.u32 %v13634_v11, %v12663_v60  ;;  %v13628_v22 = vld [vmem:[#allocation4 + $0x314] sm:$0xf]  ;;  %v13626_v60 = vld [vmem:[#allocation4 + $0x304] sm:$0xf] }
 0x94c   :  { %9997 = vmatpush.bf16.msra.mxu0 %v12378_v18  ;;  %v12522_v58 = vor.u32 %v13598_v55, %v12519_v32  ;;  %v12439_v18 = vld [vmem:[#allocation4 + $0x188] sm:$0xf0]  ;;  %v13652_v11 = vld [vmem:[#allocation4 + $0x3d4] sm:$0xf]  ;;  %v12735_v32 = vld [vmem:[#allocation4 + $0x3d8] sm:$0xf0] }
 0x94d   :  { %10004 = vmatpush.bf16.msra.mxu1 %v12490_v27  ;;  %v12447_v27 = vld [vmem:[#allocation4 + $0x198] sm:$0xf0]  ;;  %v12442_v45 = vor.u32 %v13578_v21, %v12439_v18  ;;  %v12738_v20 = vor.u32 %v13652_v11, %v12735_v32  ;;  %v12791_v21 = vld [vmem:[#allocation4 + $0x448] sm:$0xf0]  ;;  %v13660_v11 = vld [vmem:[#allocation4 + $0x414] sm:$0xf] }
 0x94e   :  { %10017 = vmatpush.bf16.msra.mxu2 %v12554_v40  ;;  %v13596_v40 = vld [vmem:[#allocation4 + $0x214] sm:$0xf]  ;;  %v12855_v18 = vld [vmem:[#allocation4 + $0x4c8] sm:$0xf0] }
 0x94f   :  { %10030 = vmatpush.bf16.msra.mxu3 %v12618_v17  ;;  %9998 = vmatmul.bf16.vlgmr.msra.gmra.mxu0 %v18080_v37  ;;  %v12458_v37 = vor.u32 %v13582_v56, %v12455_v13  ;;  %v12450_v17 = vor.u32 %v13580_v1, %v12447_v27  ;;  %v12514_v42 = vor.u32 %v13596_v40, %v12511_v10  ;;  %v13686_v56 = vld [vmem:[#allocation4 + $0x4e4] sm:$0xf]  ;;  %v12799_v1 = vld [vmem:[#allocation4 + $0x458] sm:$0xf0]  ;;  %v13684_v27 = vld [vmem:[#allocation4 + $0x4d4] sm:$0xf] }
 0x950   :  { %10042 = vmatpush.bf16.msrb.mxu0 %v12690_v28  ;;  %v13630_v28 = vld [vmem:[#allocation4 + $0x324] sm:$0xf]  ;;  %v12746_v13 = vor.u32 %v13654_v39, %v12743_v4  ;;  %v12839_v39 = vld [vmem:[#allocation4 + $0x4a8] sm:$0xf0] }
 0x951   :  { %10005 = vmatpush.bf16.msra.mxu1 %v12482_v51  ;;  %v12503_v51 = vld [vmem:[#allocation4 + $0x208] sm:$0xf0]  ;;  %v12650_v2 = vor.u32 %v13630_v28, %v12647_v14  ;;  %v13650_v40 = vld [vmem:[#allocation4 + $0x3c4] sm:$0xf]  ;;  %v12719_v28 = vld [vmem:[#allocation4 + $0x3b8] sm:$0xf0] }
 0x952   :  { %10018 = vmatpush.bf16.msra.mxu2 %v12546_v38  ;;  %v12578_v38 = vor.u32 %v13612_v59, %v12575_v62  ;;  %v12506_v15 = vor.u32 %v13594_v19, %v12503_v51  ;;  %v12727_v59 = vld [vmem:[#allocation4 + $0x3c8] sm:$0xf0]  ;;  %v13702_v62 = vld [vmem:[#allocation4 + $0x564] sm:$0xf]  ;;  %v13648_v51 = vld [vmem:[#allocation4 + $0x3b4] sm:$0xf] }
 0x953   :  { %10031 = vmatpush.bf16.msra.mxu3 %v12610_v63  ;;  %v12815_v63 = vld [vmem:[#allocation4 + $0x478] sm:$0xf0]  ;;  %v12730_v19 = vor.u32 %v13650_v40, %v12727_v59  ;;  %v13700_v14 = vld [vmem:[#allocation4 + $0x554] sm:$0xf] }
 0x954   :  { %10043 = vmatpush.bf16.msrb.mxu0 %v12682_v29  ;;  %v12879_v29 = vld [vmem:[#allocation4 + $0x4f8] sm:$0xf0]  ;;  %v12818_v46 = vor.u32 %v13672_v0, %v12815_v63  ;;  %v13680_v63 = vld [vmem:[#allocation4 + $0x4b4] sm:$0xf] }
 0x955   :  { %10006 = vmatpush.bf16.msra.mxu1 %v12474_v52  ;;  %v13688_v52 = vld [vmem:[#allocation4 + $0x4f4] sm:$0xf]  ;;  %v12783_v0 = vld [vmem:[#allocation4 + $0x438] sm:$0xf0] }
 0x956   :  { %10019 = vmatpush.bf16.msra.mxu2 %v12538_v61  ;;  %v12754_v61 = vor.u32 %v13656_v3, %v12751_v36  ;;  %v12882_v53 = vor.u32 %v13688_v52, %v12879_v29  ;;  %v13664_v36 = vld [vmem:[#allocation4 + $0x434] sm:$0xf]  ;;  %v12711_v29 = vld [vmem:[#allocation4 + $0x3a8] sm:$0xf0] }
 0x957   :  { %10032 = vmatpush.bf16.msra.mxu3 %v12602_v9  ;;  %v12570_v9 = vor.u32 %v13610_v31, %v12567_v47  ;;  %v12847_v31 = vld [vmem:[#allocation4 + $0x4b8] sm:$0xf0]  ;;  %v12722_v47 = vor.u32 %v13648_v51, %v12719_v28  ;;  %v12786_v52 = vor.u32 %v13664_v36, %v12783_v0  ;;  %v13720_v40 = vld [vmem:[#allocation4 + $0x5f4] sm:$0xf]  ;;  %v12999_v36 = vld [vmem:[#allocation4 + $0x5e8] sm:$0xf0] }
 0x958   :  { %10044 = vmatpush.bf16.msrb.mxu0 %v12674_v8  ;;  %v12642_v8 = vor.u32 %v13628_v22, %v12639_v7  ;;  %v12850_v22 = vor.u32 %v13680_v63, %v12847_v31  ;;  %v13662_v7 = vld [vmem:[#allocation4 + $0x424] sm:$0xf]  ;;  %v13736_v59 = vld [vmem:[#allocation4 + $0x674] sm:$0xf]  ;;  %v12895_v28 = vld [vmem:[#allocation4 + $0x518] sm:$0xf0] }
 0x959   :  { %10007 = vmatpush.bf16.msra.mxu1 %v12466_v50  ;;  %v12807_v50 = vld [vmem:[#allocation4 + $0x468] sm:$0xf0]  ;;  %v13734_v63 = vld [vmem:[#allocation4 + $0x664] sm:$0xf] }
 0x95a   :  { %10020 = vmatpush.bf16.msra.mxu2 %v12530_v41  ;;  %v12871_v41 = vld [vmem:[#allocation4 + $0x4e8] sm:$0xf0]  ;;  %v12810_v55 = vor.u32 %v13670_v44, %v12807_v50  ;;  %v18130_v44 = vld [vmem:[%s18157_s5] sm:$0x3] }
 0x95b   :  { %10033 = vmatpush.bf16.msra.mxu3 %v12594_v43  ;;  %v12631_v43 = vld [vmem:[#allocation4 + $0x308] sm:$0xf0]  ;;  %v8721_v32 = vperm.slane %v18130_v44, 0 }
 0x95c   :  { %10045 = vmatpush.bf16.msrb.mxu0 %v12666_v33  ;;  %v13668_v33 = vld [vmem:[#allocation4 + $0x454] sm:$0xf]  ;;  %v13063_v31 = vld [vmem:[#allocation4 + $0x668] sm:$0xf0] }
 0x95d   :  { %10008 = vmatpush.bf16.msra.mxu1 %v12458_v37  ;;  %v12874_v37 = vor.u32 %v13686_v56, %v12871_v41  ;;  %v12802_v10 = vor.u32 %v13668_v33, %v12799_v1  ;;  %v13696_v56 = vld [vmem:[#allocation4 + $0x534] sm:$0xf]  ;;  %v12911_v41 = vld [vmem:[#allocation4 + $0x538] sm:$0xf0]  ;;  %v12695_v33 = vld [vmem:[#allocation4 + $0x388] sm:$0xf0] }
 0x95e   :  { %10021 = vmatpush.bf16.msra.mxu2 %v12522_v58  ;;  %v12634_v58 = vor.u32 %v13626_v60, %v12631_v43  ;;  %v12767_v60 = vld [vmem:[#allocation4 + $0x418] sm:$0xf0]  ;;  %v13676_v43 = vld [vmem:[#allocation4 + $0x494] sm:$0xf]  ;;  %v13658_v1 = vld [vmem:[#allocation4 + $0x404] sm:$0xf] }
 0x95f   :  { %10034 = vmatpush.bf16.msra.mxu3 %v12586_v6  ;;  %v12946_v6 = vor.u32 %v13704_v23, %v12943_v54  ;;  %v12914_v54 = vor.u32 %v13696_v56, %v12911_v41  ;;  %v13714_v41 = vld [vmem:[#allocation4 + $0x5c4] sm:$0xf] }
 0x960   :  { %10046 = vmatpush.bf16.msrb.mxu0 %v12658_v34  ;;  %v12866_v34 = vor.u32 %v13684_v27, %v12863_v5  ;;  %v12759_v27 = vld [vmem:[#allocation4 + $0x408] sm:$0xf0]  ;;  %v13694_v5 = vld [vmem:[#allocation4 + $0x524] sm:$0xf] }
 0x961   :  { %10009 = vmatpush.bf16.msra.mxu1 %v12450_v17  ;;  %v12935_v17 = vld [vmem:[#allocation4 + $0x568] sm:$0xf0] }
 0x962   :  { %10022 = vmatpush.bf16.msra.mxu2 %v12514_v42  ;;  %v12938_v42 = vor.u32 %v13702_v62, %v12935_v17  ;;  %v13071_v17 = vld [vmem:[#allocation4 + $0x678] sm:$0xf0] }
 0x963   :  { %10035 = vmatpush.bf16.msra.mxu3 %v12578_v38  ;;  %v12927_v38 = vld [vmem:[#allocation4 + $0x558] sm:$0xf0] }
 0x964   :  { %10047 = vmatpush.bf16.msrb.mxu0 %v12650_v2  ;;  %v13646_v2 = vld [vmem:[#allocation4 + $0x3a4] sm:$0xf] }
 0x965   :  { %10010 = vmatpush.bf16.msra.mxu1 %v12442_v45  ;;  %v12930_v45 = vor.u32 %v13700_v14, %v12927_v38  ;;  %v13074_v14 = vor.u32 %v13736_v59, %v13071_v17  ;;  %v13708_v59 = vld [vmem:[#allocation4 + $0x594] sm:$0xf] }
 0x966   :  { %10023 = vmatpush.bf16.msra.mxu2 %v12506_v15  ;;  %v13698_v15 = vld [vmem:[#allocation4 + $0x544] sm:$0xf] }
 0x967   :  { %10036 = vmatpush.bf16.msra.mxu3 %v12570_v9  ;;  %v13678_v9 = vld [vmem:[#allocation4 + $0x4a4] sm:$0xf] }
 0x968   :  { %10011 = vmatmul.bf16.vlgmr.msra.gmra.mxu1 %v18086_v16  ;;  %10048 = vmatpush.bf16.msrb.mxu0 %v12642_v8  ;;  %v13666_v16 = vld [vmem:[#allocation4 + $0x444] sm:$0xf]  ;;  %v12703_v8 = vld [vmem:[#allocation4 + $0x398] sm:$0xf0] }
 0x969   :  { %10055 = vmatpush.bf16.msrb.mxu1 %v12754_v61  ;;  %10024 = vmatmul.bf16.vlgmr.msra.gmra.mxu2 %v18094_v48  ;;  %v13682_v48 = vld [vmem:[#allocation4 + $0x4c4] sm:$0xf]  ;;  %v12919_v61 = vld [vmem:[#allocation4 + $0x548] sm:$0xf0] }
 0x96a   :  { %10068 = vmatpush.bf16.msrb.mxu2 %v12818_v46  ;;  %10037 = vmatmul.bf16.vlgmr.msra.gmra.mxu3 %v18090_v30  ;;  %v12794_v30 = vor.u32 %v13666_v16, %v12791_v21  ;;  %v12858_v3 = vor.u32 %v13682_v48, %v12855_v18  ;;  %v12775_v46 = vld [vmem:[#allocation4 + $0x428] sm:$0xf0]  ;;  %v12922_v4 = vor.u32 %v13698_v15, %v12919_v61  ;;  %v13690_v15 = vld [vmem:[#allocation4 + $0x504] sm:$0xf] }
 0x96b   :  { %10081 = vmatpush.bf16.msrb.mxu3 %v12882_v53  ;;  %v13644_v53 = vld [vmem:[#allocation4 + $0x394] sm:$0xf]  ;;  %v12778_v50 = vor.u32 %v13662_v7, %v12775_v46  ;;  %v9804_v62 = vpop.f32.mrf.mxu1  ;;  %v12823_v16 = vld [vmem:[#allocation4 + $0x488] sm:$0xf0]  ;;  %v12991_v46 = vld [vmem:[#allocation4 + $0x5d8] sm:$0xf0] }
 0x96c   :  { %10049 = vmatpush.bf16.msrb.mxu0 %v12634_v58  ;;  %v12706_v23 = vor.u32 %v13644_v53, %v12703_v8  ;;  %v12770_v58 = vor.u32 %v13660_v11, %v12767_v60  ;;  %v9805_v21 = vadd.f32 %v9804_v62, %v8721_v32  ;;  %v9843_v48 = vpop.f32.mrf.mxu0  ;;  %v12887_v61 = vld [vmem:[#allocation4 + $0x508] sm:$0xf0]  ;;  %v13716_v7 = vld [vmem:[#allocation4 + $0x5d4] sm:$0xf]  ;;  %v13730_v60 = vld [vmem:[#allocation4 + $0x644] sm:$0xf] }
 0x96d   :  { %10056 = vmatpush.bf16.msrb.mxu1 %v12746_v13  ;;  %v12842_v13 = vor.u32 %v13678_v9, %v12839_v39  ;;  %v13732_v39 = vld [vmem:[#allocation4 + $0x654] sm:$0xf]  ;;  %v12994_v8 = vor.u32 %v13716_v7, %v12991_v46  ;;  %v12959_v62 = vld [vmem:[#allocation4 + $0x598] sm:$0xf0] }
 0x96e   :  { %10069 = vmatpush.bf16.msrb.mxu2 %v12810_v55  ;;  %v12831_v55 = vld [vmem:[#allocation4 + $0x498] sm:$0xf0]  ;;  %v9817_v0 = vpop.f32.mrf.mxu2 }
 0x96f   :  { %10082 = vmatpush.bf16.msrb.mxu3 %v12874_v37  ;;  %10050 = vmatmul.bf16.vlgmr.msrb.gmra.mxu0 %v18092_v35  ;;  %v12714_v35 = vor.u32 %v13646_v2, %v12711_v29  ;;  %v13642_v37 = vld [vmem:[#allocation4 + $0x384] sm:$0xf] }
 0x970   :  { %10094 = vmatpush.bf16.msra.mxu0 %v12946_v6  ;;  %v12834_v6 = vor.u32 %v13676_v43, %v12831_v55  ;;  %v12698_v18 = vor.u32 %v13642_v37, %v12695_v33  ;;  %v13047_v43 = vld [vmem:[#allocation4 + $0x648] sm:$0xf0] }
 0x971   :  { %10057 = vmatpush.bf16.msrb.mxu1 %v12738_v20  ;;  %v12903_v20 = vld [vmem:[#allocation4 + $0x528] sm:$0xf0]  ;;  %v13050_v32 = vor.u32 %v13730_v60, %v13047_v43 }
 0x972   :  { %10070 = vmatpush.bf16.msrb.mxu2 %v12802_v10  ;;  %v13007_v10 = vld [vmem:[#allocation4 + $0x5f8] sm:$0xf0] }
 0x973   :  { %10083 = vmatpush.bf16.msrb.mxu3 %v12866_v34  ;;  %v13674_v34 = vld [vmem:[#allocation4 + $0x484] sm:$0xf]  ;;  %v13010_v51 = vor.u32 %v13720_v40, %v13007_v10  ;;  %v9806_v9 = vpop.f32.mrf.mxu1 }
 0x974   :  { %10095 = vmatpush.bf16.msra.mxu0 %v12938_v42  ;;  %v12762_v42 = vor.u32 %v13658_v1, %v12759_v27  ;;  %v12826_v38 = vor.u32 %v13674_v34, %v12823_v16  ;;  %v9845_v53 = vpop.f32.mrf.mxu0  ;;  %v12967_v27 = vld [vmem:[#allocation4 + $0x5a8] sm:$0xf0]  ;;  %v13023_v34 = vld [vmem:[#allocation4 + $0x618] sm:$0xf0] }
 0x975   :  { %10058 = vmatpush.bf16.msrb.mxu1 %v12730_v19  ;;  %v12906_v19 = vor.u32 %v13694_v5, %v12903_v20  ;;  %v13726_v20 = vld [vmem:[#allocation4 + $0x624] sm:$0xf] }
 0x976   :  { %10071 = vmatpush.bf16.msrb.mxu2 %v12794_v30  ;;  %v13692_v30 = vld [vmem:[#allocation4 + $0x514] sm:$0xf]  ;;  %v9819_v11 = vpop.f32.mrf.mxu2 }
 0x977   :  { %10084 = vmatpush.bf16.msrb.mxu3 %v12858_v3  ;;  %v13718_v3 = vld [vmem:[#allocation4 + $0x5e4] sm:$0xf]  ;;  %v12898_v2 = vor.u32 %v13692_v30, %v12895_v28  ;;  %v12951_v28 = vld [vmem:[#allocation4 + $0x588] sm:$0xf0] }
 0x978   :  { %10096 = vmatpush.bf16.msra.mxu0 %v12930_v45  ;;  %v9830_v45 = vpop.f32.mrf.mxu3  ;;  %v13706_v30 = vld [vmem:[#allocation4 + $0x584] sm:$0xf] }
 0x979   :  { %10059 = vmatpush.bf16.msrb.mxu1 %v12722_v47  ;;  %v9818_v47 = vadd.f32 %v9817_v0, %v9805_v21 }
 0x97a   :  { %10072 = vmatpush.bf16.msrb.mxu2 %v12786_v52  ;;  %v13002_v52 = vor.u32 %v13718_v3, %v12999_v36  ;;  %v12954_v36 = vor.u32 %v13706_v30, %v12951_v28 }
 0x97b   :  { %10085 = vmatpush.bf16.msrb.mxu3 %v12850_v22  ;;  %v9831_v29 = vadd.f32 %v9830_v45, %v9818_v47  ;;  %v13066_v22 = vor.u32 %v13734_v63, %v13063_v31 }
 0x97c   :  { %10097 = vmatpush.bf16.msra.mxu0 %v12922_v4 }
 0x97d   :  { %10060 = vmatpush.bf16.msrb.mxu1 %v12714_v35  ;;  %v13055_v35 = vld [vmem:[#allocation4 + $0x658] sm:$0xf0]  ;;  %v9844_v4 = vadd.f32 %v9843_v48, %v9831_v29 }
 0x97e   :  { %10073 = vmatpush.bf16.msrb.mxu2 %v12778_v50  ;;  %v12890_v50 = vor.u32 %v13690_v15, %v12887_v61  ;;  %v13058_v56 = vor.u32 %v13732_v39, %v13055_v35 }
 0x97f   :  { %10086 = vmatpush.bf16.msrb.mxu3 %v12842_v13  ;;  %v12983_v13 = vld [vmem:[#allocation4 + $0x5c8] sm:$0xf0] }
 0x980   :  { %10098 = vmatpush.bf16.msra.mxu0 %v12914_v54  ;;  %v12986_v55 = vor.u32 %v13714_v41, %v12983_v13  ;;  %v13039_v54 = vld [vmem:[#allocation4 + $0x638] sm:$0xf0] }
 0x981   :  { %10061 = vmatpush.bf16.msrb.mxu1 %v12706_v23  ;;  %v12975_v23 = vld [vmem:[#allocation4 + $0x5b8] sm:$0xf0] }
 0x982   :  { %10074 = vmatpush.bf16.msrb.mxu2 %v12770_v58  ;;  %v13710_v58 = vld [vmem:[#allocation4 + $0x5a4] sm:$0xf] }
 0x983   :  { %10087 = vmatpush.bf16.msrb.mxu3 %v12834_v6  ;;  %v13031_v6 = vld [vmem:[#allocation4 + $0x628] sm:$0xf0]  ;;  %v12970_v40 = vor.u32 %v13710_v58, %v12967_v27 }
 0x984   :  { %10099 = vmatpush.bf16.msra.mxu0 %v12906_v19  ;;  %v13034_v10 = vor.u32 %v13726_v20, %v13031_v6 }
 0x985   :  { %10062 = vmatpush.bf16.msrb.mxu1 %v12698_v18  ;;  %v9856_v33 = vpop.f32.mrf.mxu1  ;;  %v12962_v18 = vor.u32 %v13708_v59, %v12959_v62 }
 0x986   :  { %10075 = vmatpush.bf16.msrb.mxu2 %v12762_v42  ;;  %v9857_v5 = vadd.f32 %v9856_v33, %v9844_v4 }
 0x987   :  { %10088 = vmatpush.bf16.msrb.mxu3 %v12826_v38  ;;  %v13015_v38 = vld [vmem:[#allocation4 + $0x608] sm:$0xf0] }
 0x988   :  { %10063 = vmatmul.bf16.vlgmr.msrb.gmra.mxu1 %v18099_v26  ;;  %10100 = vmatpush.bf16.msra.mxu0 %v12898_v2  ;;  %v9832_v26 = vpop.f32.mrf.mxu3 }
 0x989   :  { %10107 = vmatpush.bf16.msra.mxu1 %v13010_v51  ;;  %10076 = vmatmul.bf16.vlgmr.msrb.gmra.mxu2 %v18105_v12  ;;  %v13712_v12 = vld [vmem:[#allocation4 + $0x5b4] sm:$0xf] }
 0x98a   :  { %10120 = vmatpush.bf16.msra.mxu2 %v13074_v14  ;;  %10089 = vmatmul.bf16.vlgmr.msrb.gmra.mxu3 %v18107_v25  ;;  %v13728_v25 = vld [vmem:[#allocation4 + $0x634] sm:$0xf]  ;;  %v12978_v37 = vor.u32 %v13712_v12, %v12975_v23  ;;  %v13722_v14 = vld [vmem:[#allocation4 + $0x604] sm:$0xf] }
 0x98b   :  { %v13042_v1 = vor.u32 %v13728_v25, %v13039_v54  ;;  %v13018_v0 = vor.u32 %v13722_v14, %v13015_v38 }
 0x98c   :  { %10101 = vmatpush.bf16.msra.mxu0 %v12890_v50  ;;  %v9869_v17 = vpop.f32.mrf.mxu2  ;;  %v9895_v16 = vpop.f32.mrf.mxu0  ;;  %v8722_v50 = vperm.slane %v18130_v44, 1 }
 0x98d   :  { %10108 = vmatpush.bf16.msra.mxu1 %v13002_v52  ;;  %v9870_v21 = vadd.f32 %v9869_v17, %v9857_v5  ;;  %v9858_v19 = vpop.f32.mrf.mxu1 }
 0x98e   :  { %10121 = vmatpush.bf16.msra.mxu2 %v13066_v22 }
 0x98f   :  { %10102 = vmatmul.bf16.vlgmr.msra.gmra.mxu0 %v18109_v24  ;;  %v13724_v24 = vld [vmem:[#allocation4 + $0x614] sm:$0xf] }
 0x990   :  { %v9882_v48 = vpop.f32.mrf.mxu3  ;;  %v13026_v42 = vor.u32 %v13724_v24, %v13023_v34 }
 0x991   :  { %10109 = vmatpush.bf16.msra.mxu1 %v12994_v8  ;;  %v9883_v51 = vadd.f32 %v9882_v48, %v9870_v21  ;;  %v10144_v48 = vld [vmem:[%s18158_s6] sm:$0x3] }
 0x992   :  { %10122 = vmatpush.bf16.msra.mxu2 %v13058_v56  ;;  %v10147_v38 = vperm.slane %v10144_v48, 1 }
 0x993   :  { %v9896_v3 = vadd.f32 %v9895_v16, %v9883_v51  ;;  %v10146_v51 = vperm.slane %v10144_v48, 0 }
 0x994   :  { %v9871_v63 = vpop.f32.mrf.mxu2  ;;  %v9897_v31 = vpop.f32.mrf.mxu0 }
 0x995   :  { %10110 = vmatpush.bf16.msra.mxu1 %v12986_v55 }
 0x996   :  { %10123 = vmatpush.bf16.msra.mxu2 %v13050_v32 }
 0x998   :  { %v9884_v47 = vpop.f32.mrf.mxu3 }
 0x999   :  { %10111 = vmatpush.bf16.msra.mxu1 %v12978_v37 }
 0x99a   :  { %10124 = vmatpush.bf16.msra.mxu2 %v13042_v1 }
 0x99d   :  { %10112 = vmatpush.bf16.msra.mxu1 %v12970_v40 }
 0x99e   :  { %10125 = vmatpush.bf16.msra.mxu2 %v13034_v10 }
 0x9a1   :  { %10113 = vmatpush.bf16.msra.mxu1 %v12962_v18 }
 0x9a2   :  { %10126 = vmatpush.bf16.msra.mxu2 %v13026_v42 }
 0x9a5   :  { %10114 = vmatpush.bf16.msra.mxu1 %v12954_v36  ;;  %v9908_v45 = vpop.f32.mrf.mxu1 }
 0x9a6   :  { %10127 = vmatpush.bf16.msra.mxu2 %v13018_v0  ;;  %v9909_v2 = vadd.f32 %v9908_v45, %v9896_v3 }
 0x9a8   :  { %10115 = vmatmul.bf16.vlgmr.msra.gmra.mxu1 %v18114_v49 }
 0x9a9   :  { %10128 = vmatmul.bf16.vlgmr.msra.gmra.mxu2 %v18117_v57 }
 0x9ac   :  { %v9921_v52 = vpop.f32.mrf.mxu2  ;;  %v9947_v61 = vpop.f32.mrf.mxu0 }
 0x9ad   :  { %v9922_v29 = vadd.f32 %v9921_v52, %v9909_v2  ;;  %v9934_v15 = vpop.f32.mrf.mxu3  ;;  %v9910_v22 = vpop.f32.mrf.mxu1 }
 0x9af   :  { %v9935_v7 = vadd.f32 %v9934_v15, %v9922_v29  ;;  %v13826_v29 = vld [vmem:[#allocation10] ss:$0 sm:$0xff] }
 0x9b1   :  { %v9948_v46 = vadd.f32 %v9947_v61, %v9935_v7 }
 0x9b4   :  { %v9923_v9 = vpop.f32.mrf.mxu2  ;;  %v9949_v35 = vpop.f32.mrf.mxu0 }
 0x9b5   :  { %v9936_v39 = vpop.f32.mrf.mxu3 }
 0x9c5   :  { %v9960_v4 = vpop.f32.mrf.mxu1 }
 0x9c6   :  { %v9961_v53 = vadd.f32 %v9960_v4, %v9948_v46 }
 0x9c8   :  { %v10133_v19 = vmax.f32 %v9961_v53, 0.0 }
 0x9ca   :  { %v10150_v36 = vmul.f32 %v10146_v51, %v10133_v19 }
 0x9cc   :  { %v9973_v8 = vpop.f32.mrf.mxu2  ;;  %v9999_v57 = vpop.f32.mrf.mxu0  ;;  %v10152_v47 = vsel %vm18236_vm4, %v10150_v36, 0.0 }
 0x9cd   :  { %v9974_v49 = vadd.f32 %v9973_v8, %v8722_v50  ;;  %v9986_v56 = vpop.f32.mrf.mxu3  ;;  %v9962_v41 = vpop.f32.mrf.mxu1 }
 0x9cf   :  { %v9987_v13 = vadd.f32 %v9986_v56, %v9974_v49 }
 0x9d1   :  { %v10000_v11 = vadd.f32 %v9999_v57, %v9987_v13 }
 0x9d4   :  { %v9975_v60 = vpop.f32.mrf.mxu2  ;;  %v10001_v26 = vpop.f32.mrf.mxu0 }
 0x9d5   :  { %v9988_v43 = vpop.f32.mrf.mxu3 }
 0x9e5   :  { %v10012_v55 = vpop.f32.mrf.mxu1 }
 0x9e6   :  { %v10013_v5 = vadd.f32 %v10012_v55, %v10000_v11 }
 0x9ec   :  { %v10025_v32 = vpop.f32.mrf.mxu2  ;;  %v10051_v23 = vpop.f32.mrf.mxu0 }
 0x9ed   :  { %v10038_v12 = vpop.f32.mrf.mxu3  ;;  %v10014_v25 = vpop.f32.mrf.mxu1  ;;  %v10026_v6 = vadd.f32 %v10025_v32, %v10013_v5 }
 0x9ef   :  { %v10039_v62 = vadd.f32 %v10038_v12, %v10026_v6 }
 0x9f1   :  { %v10052_v17 = vadd.f32 %v10051_v23, %v10039_v62 }
 0x9f4   :  { %v10027_v54 = vpop.f32.mrf.mxu2  ;;  %v10053_v33 = vpop.f32.mrf.mxu0 }
 0x9f5   :  { %v10040_v37 = vpop.f32.mrf.mxu3 }
 0xa05   :  { %v10064_v1 = vpop.f32.mrf.mxu1 }
 0xa06   :  { %v10065_v24 = vadd.f32 %v10064_v1, %v10052_v17 }
 0xa0c   :  { %v10077_v44 = vpop.f32.mrf.mxu2  ;;  %v10103_v27 = vpop.f32.mrf.mxu0 }
 0xa0d   :  { %v10090_v58 = vpop.f32.mrf.mxu3  ;;  %v10066_v20 = vpop.f32.mrf.mxu1  ;;  %v10078_v34 = vadd.f32 %v10077_v44, %v10065_v24 }
 0xa0f   :  { %v10091_v16 = vadd.f32 %v10090_v58, %v10078_v34 }
 0xa11   :  { %v10104_v18 = vadd.f32 %v10103_v27, %v10091_v16 }
 0xa14   :  { %v10079_v40 = vpop.f32.mrf.mxu2  ;;  %v10105_v59 = vpop.f32.mrf.mxu0 }
 0xa15   :  { %v10092_v10 = vpop.f32.mrf.mxu3 }
 0xa25   :  { %v10116_v21 = vpop.f32.mrf.mxu1 }
 0xa26   :  { %v10117_v42 = vadd.f32 %v10116_v21, %v10104_v18 }
 0xa2c   :  { %v10129_v30 = vpop.f32.mrf.mxu2 }
 0xa2d   :  { %v10130_v28 = vadd.f32 %v10129_v30, %v10117_v42  ;;  %v10118_v14 = vpop.f32.mrf.mxu1 }
 0xa2f   :  { %v10134_v3 = vmax.f32 %v10130_v28, 0.0 }
 0xa31   :  { %v10137_v0 = vrot.slane %v10134_v3, 6  ;;  %v10151_v63 = vmul.f32 %v10147_v38, %v10134_v3 }
 0xa33   :  { %v10139_v31 = vsel %vm18235_vm10, %v10133_v19, %v10137_v0  ;;  %v10154_v45 = vsel %vm10153_vm12, %v10151_v63, 0.0 }
 0xa34   :  { %10143 = vst.msk [vmem:[%s18165_s14] sm:$0xf] %vm10142_vm0, %v10139_v31  ;;  %v10131_v2 = vpop.f32.mrf.mxu2  ;;  %v10155_v52 = vadd.f32 %v10154_v45, %v10152_v47 }
 0xa36   :  { %10156 = vadd.xlane.f32.xlu0 %v10155_v52 }
 0xaa9   :  { %v10157_v15 = vpop.xlane.xlu0 %10156 }
 0xaaa   :  { %v10162_v61 = vadd.f32 %v13826_v29, %v10157_v15 }
 0xaac   :  { %10164 = vst.msk [vmem:[%s18166_s15] sm:$0x3] %vm10163_vm5, %v10162_v61 }
 0xaad   :  { %10185 = vsyncmov [#allocation5] }
 0xab0   :  { %s10186_s2 = vpop.sfrf %10185 }
 0xab1   :  { %p13075_p0 = scmp.ne.s32.totalorder %s10186_s2, 0 }
 0xab3   :  { %10190 = shalt.err (%p13075_p0)  }
 0xab4   :  { %10192 = vsyncmov [#allocation5 + $0x1] }
 0xab7   :  { %s10193_s21 = vpop.sfrf %10192 }
 0xab8   :  { %p13076_p1 = scmp.ne.s32.totalorder %s10193_s21, 0 }
 0xaba   :  { %10197 = shalt.err (%p13076_p1)  }
 0xabb   :  { %10199 = vsyncmov [#allocation5 + $0x2] }
 0xabe   :  { %s10200_s14 = vpop.sfrf %10199 }
 0xabf   :  { %p13077_p2 = scmp.ne.s32.totalorder %s10200_s14, 0 }
 0xac1   :  { %10204 = shalt.err (%p13077_p2)  }

</bundles_post_ra>
